<compile_context>
chip_gen: v7x
topology: tpu7x:2x2x1
jax: 0.10.0
libtpu: 0.0.40
codegen_flags: <defaults>
</compile_context>

<pallas_src>
import functools

import numpy as np
import jax
import jax.numpy as jnp
from jax.experimental import pallas as pl
from jax.experimental.pallas import tpu as pltpu

_NEG_SLOPE = 0.01  # torch leaky_relu default


def _round_up(n, m):
    return -(-n // m) * m


def _conv_out(n, k=3, stride=2, pad=1):
    return (n + 2 * pad - k) // stride + 1


# ----------------------------------------------------------------------------
# Fused kernel: conv1 -> conv2 -> conv3 -> fc1(relu) -> fc2(relu) -> fc3(sigmoid)
# One grid step == one block of BB images; every matmul has M = BB.
# ----------------------------------------------------------------------------
def _policy_kernel(x_ref,
                   cw1_ref, cb1_ref, cw2_ref, cb2_ref, cw3_ref, cb3_ref,
                   w1_ref, b1_ref, w2_ref, b2_ref, w3_ref, b3_ref,
                   o_ref):
    def mm(a_f32, w_ref, b_ref):
        # bf16 MXU operands, f32 accumulation, f32 bias add (broadcast over rows).
        return jnp.dot(a_f32.astype(jnp.bfloat16), w_ref[...],
                       preferred_element_type=jnp.float32) + b_ref[...]

    def leaky(a):
        return jnp.where(a >= 0.0, a, _NEG_SLOPE * a)

    x = x_ref[...]                                   # (BB, Hin*Win*Cin) bf16, lane-dense
    y = leaky(jnp.dot(x, cw1_ref[...],
                      preferred_element_type=jnp.float32) + cb1_ref[...])
    y = leaky(mm(y, cw2_ref, cb2_ref))               # (BB, OH2*OW2*32)
    y = leaky(mm(y, cw3_ref, cb3_ref))               # (BB, OH3*OW3*64) == flattened conv3
    h = jnp.maximum(mm(y, w1_ref, b1_ref), 0.0)      # fc1: single (BB,256)x(256,512) dot
    h = jnp.maximum(mm(h, w2_ref, b2_ref), 0.0)      # fc2
    h = mm(h, w3_ref, b3_ref)                        # fc3 (padded to 128 lanes)
    o_ref[...] = jax.nn.sigmoid(h).astype(o_ref.dtype)


# ----------------------------------------------------------------------------
# Host-side (one-time) weight preparation: fold im2col / stride / zero-pad /
# flatten-order / lane-padding into the matrices the kernel multiplies with.
# ----------------------------------------------------------------------------
def _im2col_weight(w, h_in, w_in, oh, ow, k=3, stride=2, pad=1):
    """Fold a conv (kh/kw taps, stride, zero padding) into one matrix.

    Rows follow the input (h, w, c_in) flatten order; columns follow the
    output (oh, ow, c_out) flatten order.
    """
    w = np.asarray(w, np.float32)                    # (C_out, C_in, k, k) PyTorch OIHW
    c_out, c_in = w.shape[0], w.shape[1]
    wf = np.zeros((h_in * w_in * c_in, oh * ow * c_out), np.float32)
    for o_h in range(oh):
        for o_w in range(ow):
            col = (o_h * ow + o_w) * c_out
            for kh in range(k):
                hi = stride * o_h - pad + kh
                if not 0 <= hi < h_in:
                    continue                         # zero padding -> no contribution
                for kw in range(k):
                    wi = stride * o_w - pad + kw
                    if not 0 <= wi < w_in:
                        continue
                    row = (hi * w_in + wi) * c_in
                    wf[row:row + c_in, col:col + c_out] = w[:, :, kh, kw].T
    return wf


def _permuted_fc1(w1, c, oh, ow):
    # w1 rows are in PyTorch NCHW flatten order (c, h, w); the kernel's conv3
    # output columns are in (h, w, c) order -> permute the rows once on host.
    w1 = np.asarray(w1, np.float32)                  # (c*oh*ow, N)
    n = w1.shape[1]
    return w1.reshape(c, oh, ow, n).transpose(1, 2, 0, 3).reshape(oh * ow * c, n)


def prepare_ops(raw, c_in, H, W):
    oh1, ow1 = _conv_out(H), _conv_out(W)
    oh2, ow2 = _conv_out(oh1), _conv_out(ow1)
    oh3, ow3 = _conv_out(oh2), _conv_out(ow2)

    in_flat = H * W * c_in
    in_flat_pad = _round_up(in_flat, 128)            # lane-dense input

    cw1 = _im2col_weight(raw["cw1"], H, W, oh1, ow1)
    cw1 = np.pad(cw1, ((0, in_flat_pad - in_flat), (0, 0)))
    cw2 = _im2col_weight(raw["cw2"], oh1, ow1, oh2, ow2)
    cw3 = _im2col_weight(raw["cw3"], oh2, ow2, oh3, ow3)

    w1 = _permuted_fc1(raw["w1"], 64, oh3, ow3)

    n_out = np.asarray(raw["w3"]).shape[1]
    n_out_pad = _round_up(n_out, 128)                # lane-dense head (host slices :22)
    w3 = np.pad(np.asarray(raw["w3"], np.float32), ((0, 0), (0, n_out_pad - n_out)))
    b3 = np.pad(np.asarray(raw["b3"], np.float32), (0, n_out_pad - n_out))

    bf16 = lambda a: jnp.asarray(a, jnp.bfloat16)
    frow = lambda a: jnp.asarray(np.asarray(a, np.float32)[None, :], jnp.float32)

    return {
        "cw1": bf16(cw1),
        "cb1": frow(np.tile(np.asarray(raw["cb1"], np.float32), oh1 * ow1)),
        "cw2": bf16(cw2),
        "cb2": frow(np.tile(np.asarray(raw["cb2"], np.float32), oh2 * ow2)),
        "cw3": bf16(cw3),
        "cb3": frow(np.tile(np.asarray(raw["cb3"], np.float32), oh3 * ow3)),
        "w1": bf16(w1),        "b1": frow(raw["b1"]),
        "w2": bf16(raw["w2"]), "b2": frow(raw["b2"]),
        "w3": bf16(w3),        "b3": frow(b3),
    }


# ----------------------------------------------------------------------------
# Forward wrapper
# ----------------------------------------------------------------------------
def policy_forward(img, ops, *, n_out, block_b=64, single_buffer_weights=True):
    B, C, H, W = img.shape
    in_flat_pad = ops["cw1"].shape[0]
    n_out_pad = ops["w3"].shape[1]

    # Lane-dense bf16 input: rows = image, cols = (h, w, c) flatten (padded to 128).
    x = jnp.transpose(img, (0, 2, 3, 1)).reshape(B, H * W * C).astype(jnp.bfloat16)
    if in_flat_pad != H * W * C:
        x = jnp.pad(x, ((0, 0), (0, in_flat_pad - H * W * C)))

    bb = min(block_b, _round_up(B, 8))               # images per grid step (mult. of 8)
    b_pad = _round_up(B, bb)
    if b_pad != B:
        x = jnp.pad(x, ((0, b_pad - B), (0, 0)))

    order = ("cw1", "cb1", "cw2", "cb2", "cw3", "cb3",
             "w1", "b1", "w2", "b2", "w3", "b3")
    weights = [ops[n] for n in order]

    def const_spec(a):
        idx = lambda i, _nd=a.ndim: (0,) * _nd
        if single_buffer_weights and hasattr(pl, "Buffered"):
            try:
                # Constant index map across the grid -> no need for a 2nd buffer.
                return pl.BlockSpec(a.shape, idx, pipeline_mode=pl.Buffered(1))
            except TypeError:
                pass
        return pl.BlockSpec(a.shape, idx)

    out = pl.pallas_call(
        _policy_kernel,
        out_shape=jax.ShapeDtypeStruct((b_pad, n_out_pad), jnp.float32),
        grid=(b_pad // bb,),
        in_specs=[pl.BlockSpec((bb, in_flat_pad), lambda i: (i, 0))]
                 + [const_spec(a) for a in weights],
        out_specs=pl.BlockSpec((bb, n_out_pad), lambda i: (i, 0)),
        compiler_params=pltpu.CompilerParams(
            dimension_semantics=("parallel",)),      # v7x: shard image blocks across TCs
    )(x, *weights)
    return out[:B, :n_out]


# ----------------------------------------------------------------------------
# Deterministic synthetic parameters + pure-JAX reference
# ----------------------------------------------------------------------------
def init_raw_params(key, in_ch, conv_hw):
    conv_h, conv_w = conv_hw
    flat = 64 * conv_h * conv_w
    ks = jax.random.split(key, 12)
    s = 0.05

    def w(k, shape):
        return (s * jax.random.normal(k, shape)).astype(jnp.float32)

    return {
        "cw1": w(ks[0], (16, in_ch, 3, 3)), "cb1": w(ks[1], (16,)),
        "cw2": w(ks[2], (32, 16, 3, 3)),    "cb2": w(ks[3], (32,)),
        "cw3": w(ks[4], (64, 32, 3, 3)),    "cb3": w(ks[5], (64,)),
        "w1": w(ks[6], (flat, 512)),        "b1": w(ks[7], (512,)),
        "w2": w(ks[8], (512, 128)),         "b2": w(ks[9], (128,)),
        "w3": w(ks[10], (128, 22)),         "b3": w(ks[11], (22,)),
    }


def reference_forward(img, raw):
    y = img
    for cw, cb in (("cw1", "cb1"), ("cw2", "cb2"), ("cw3", "cb3")):
        y = jax.lax.conv_general_dilated(
            y, raw[cw], window_strides=(2, 2), padding=((1, 1), (1, 1)),
            dimension_numbers=("NCHW", "OIHW", "NCHW"))
        y = y + raw[cb][None, :, None, None]
        y = jnp.where(y >= 0.0, y, _NEG_SLOPE * y)
    flat = y.reshape(y.shape[0], -1)
    h1 = jnp.maximum(flat @ raw["w1"] + raw["b1"], 0.0)
    h2 = jnp.maximum(h1 @ raw["w2"] + raw["b2"], 0.0)
    return jax.nn.sigmoid(h2 @ raw["w3"] + raw["b3"])


if __name__ == "__main__":
    key = jax.random.PRNGKey(0)
    k_img, k_par = jax.random.split(key)

    # 3-channel 16x16 images; three stride-2 pad-1 convs: 16x16 -> 8x8 -> 4x4 -> 2x2.
    # B=128 with block_b=64 -> 2 parallel grid steps, every matmul has M=64.
    B, C_in, H, W = 128, 3, 16, 16
    img = jax.random.normal(k_img, (B, C_in, H, W), dtype=jnp.float32)

    conv_hw = (_conv_out(_conv_out(_conv_out(H))),
               _conv_out(_conv_out(_conv_out(W))))
    raw = init_raw_params(k_par, C_in, conv_hw)
    ops = prepare_ops(raw, C_in, H, W)

    # TODO(synk): in a steady-state inference loop the ~0.6 MiB weight DMA should be
    # amortized across calls (cross-call prefetch / resident weights, pattern P10).
    fwd = jax.jit(functools.partial(policy_forward, n_out=22, block_b=64))
    try:
        out = jax.block_until_ready(fwd(img, ops))
    except Exception:
        # Fallback for JAX versions where pipeline_mode=pl.Buffered(1) doesn't lower.
        fwd = jax.jit(functools.partial(policy_forward, n_out=22, block_b=64,
                                        single_buffer_weights=False))
        out = jax.block_until_ready(fwd(img, ops))

    assert out.shape == (B, 22), out.shape
    assert bool(jnp.all(out >= 0.0)) and bool(jnp.all(out <= 1.0))

    # sanity check against a pure-JAX f32 reference (bf16 MXU operands -> loose tol)
    ref = reference_forward(img, raw)
    err = float(jnp.max(jnp.abs(out - ref)))
    assert err < 3e-2, err

    print("KERNEL_OK")
</pallas_src>

<mosaic_0001>
module attributes {stable_mosaic.version = 11 : i64} {
  func.func @_policy_kernel(%arg0: i32, %arg1: memref<64x768xbf16, #tpu.memory_space<vmem>>, %arg2: memref<768x1024xbf16, #tpu.memory_space<vmem>>, %arg3: memref<1x1024xf32, #tpu.memory_space<vmem>>, %arg4: memref<1024x512xbf16, #tpu.memory_space<vmem>>, %arg5: memref<1x512xf32, #tpu.memory_space<vmem>>, %arg6: memref<512x256xbf16, #tpu.memory_space<vmem>>, %arg7: memref<1x256xf32, #tpu.memory_space<vmem>>, %arg8: memref<256x512xbf16, #tpu.memory_space<vmem>>, %arg9: memref<1x512xf32, #tpu.memory_space<vmem>>, %arg10: memref<512x128xbf16, #tpu.memory_space<vmem>>, %arg11: memref<1x128xf32, #tpu.memory_space<vmem>>, %arg12: memref<128x128xbf16, #tpu.memory_space<vmem>>, %arg13: memref<1x128xf32, #tpu.memory_space<vmem>>, %arg14: memref<64x128xf32, #tpu.memory_space<vmem>>) attributes {dimension_semantics = [#tpu.dimension_semantics<parallel>], iteration_bounds = array<i64: 2>, scalar_prefetch = 0 : i64, scratch_operands = 0 : i64, tpu.core_type = #tpu.core_type<tc>, window_params = [{transform_indices = @transform_0, window_bounds = array<i64: 64, 768>}, {pipeline_mode = #tpu.pipeline_mode<synchronous>, transform_indices = @transform_1, window_bounds = array<i64: 768, 1024>}, {pipeline_mode = #tpu.pipeline_mode<synchronous>, transform_indices = @transform_2, window_bounds = array<i64: 1, 1024>}, {pipeline_mode = #tpu.pipeline_mode<synchronous>, transform_indices = @transform_3, window_bounds = array<i64: 1024, 512>}, {pipeline_mode = #tpu.pipeline_mode<synchronous>, transform_indices = @transform_4, window_bounds = array<i64: 1, 512>}, {pipeline_mode = #tpu.pipeline_mode<synchronous>, transform_indices = @transform_5, window_bounds = array<i64: 512, 256>}, {pipeline_mode = #tpu.pipeline_mode<synchronous>, transform_indices = @transform_6, window_bounds = array<i64: 1, 256>}, {pipeline_mode = #tpu.pipeline_mode<synchronous>, transform_indices = @transform_7, window_bounds = array<i64: 256, 512>}, {pipeline_mode = #tpu.pipeline_mode<synchronous>, transform_indices = @transform_8, window_bounds = array<i64: 1, 512>}, {pipeline_mode = #tpu.pipeline_mode<synchronous>, transform_indices = @transform_9, window_bounds = array<i64: 512, 128>}, {pipeline_mode = #tpu.pipeline_mode<synchronous>, transform_indices = @transform_10, window_bounds = array<i64: 1, 128>}, {pipeline_mode = #tpu.pipeline_mode<synchronous>, transform_indices = @transform_11, window_bounds = array<i64: 128, 128>}, {pipeline_mode = #tpu.pipeline_mode<synchronous>, transform_indices = @transform_12, window_bounds = array<i64: 1, 128>}, {transform_indices = @transform_13, window_bounds = array<i64: 64, 128>}]} {
    %c0 = arith.constant 0 : index
    %c0_0 = arith.constant 0 : index
    %0 = vector.load %arg1[%c0, %c0_0] : memref<64x768xbf16, #tpu.memory_space<vmem>>, vector<64x768xbf16>
    %c0_1 = arith.constant 0 : index
    %c0_2 = arith.constant 0 : index
    %1 = vector.load %arg2[%c0_1, %c0_2] : memref<768x1024xbf16, #tpu.memory_space<vmem>>, vector<768x1024xbf16>
    %cst = arith.constant dense<0.000000e+00> : vector<64x1024xf32>
    %2 = tpu.matmul %0, %1, %cst {dimension_numbers = #tpu.dot_dimension_numbers<[1], [0], [0], [1], [0, 0, 1, 1], [], []>} : vector<64x768xbf16>, vector<768x1024xbf16>, vector<64x1024xf32> -> vector<64x1024xf32>
    %c0_3 = arith.constant 0 : index
    %c0_4 = arith.constant 0 : index
    %3 = vector.load %arg3[%c0_3, %c0_4] : memref<1x1024xf32, #tpu.memory_space<vmem>>, vector<1x1024xf32>
    %4 = vector.broadcast %3 : vector<1x1024xf32> to vector<64x1024xf32>
    %5 = arith.addf %2, %4 : vector<64x1024xf32>
    %cst_5 = arith.constant 0.000000e+00 : f32
    %6 = vector.broadcast %cst_5 : f32 to vector<64x1024xf32>
    %7 = arith.cmpf oge, %5, %6 : vector<64x1024xf32>
    %cst_6 = arith.constant 0.00999999977 : f32
    %8 = vector.broadcast %cst_6 : f32 to vector<64x1024xf32>
    %9 = arith.mulf %8, %5 : vector<64x1024xf32>
    %10 = arith.select %7, %5, %9 : vector<64x1024xi1>, vector<64x1024xf32>
    %11 = arith.truncf %10 : vector<64x1024xf32> to vector<64x1024xbf16>
    %c0_7 = arith.constant 0 : index
    %c0_8 = arith.constant 0 : index
    %12 = vector.load %arg4[%c0_7, %c0_8] : memref<1024x512xbf16, #tpu.memory_space<vmem>>, vector<1024x512xbf16>
    %cst_9 = arith.constant dense<0.000000e+00> : vector<64x512xf32>
    %13 = tpu.matmul %11, %12, %cst_9 {dimension_numbers = #tpu.dot_dimension_numbers<[1], [0], [0], [1], [0, 0, 1, 1], [], []>} : vector<64x1024xbf16>, vector<1024x512xbf16>, vector<64x512xf32> -> vector<64x512xf32>
    %c0_10 = arith.constant 0 : index
    %c0_11 = arith.constant 0 : index
    %14 = vector.load %arg5[%c0_10, %c0_11] : memref<1x512xf32, #tpu.memory_space<vmem>>, vector<1x512xf32>
    %15 = vector.broadcast %14 : vector<1x512xf32> to vector<64x512xf32>
    %16 = arith.addf %13, %15 : vector<64x512xf32>
    %cst_12 = arith.constant 0.000000e+00 : f32
    %17 = vector.broadcast %cst_12 : f32 to vector<64x512xf32>
    %18 = arith.cmpf oge, %16, %17 : vector<64x512xf32>
    %cst_13 = arith.constant 0.00999999977 : f32
    %19 = vector.broadcast %cst_13 : f32 to vector<64x512xf32>
    %20 = arith.mulf %19, %16 : vector<64x512xf32>
    %21 = arith.select %18, %16, %20 : vector<64x512xi1>, vector<64x512xf32>
    %22 = arith.truncf %21 : vector<64x512xf32> to vector<64x512xbf16>
    %c0_14 = arith.constant 0 : index
    %c0_15 = arith.constant 0 : index
    %23 = vector.load %arg6[%c0_14, %c0_15] : memref<512x256xbf16, #tpu.memory_space<vmem>>, vector<512x256xbf16>
    %cst_16 = arith.constant dense<0.000000e+00> : vector<64x256xf32>
    %24 = tpu.matmul %22, %23, %cst_16 {dimension_numbers = #tpu.dot_dimension_numbers<[1], [0], [0], [1], [0, 0, 1, 1], [], []>} : vector<64x512xbf16>, vector<512x256xbf16>, vector<64x256xf32> -> vector<64x256xf32>
    %c0_17 = arith.constant 0 : index
    %c0_18 = arith.constant 0 : index
    %25 = vector.load %arg7[%c0_17, %c0_18] : memref<1x256xf32, #tpu.memory_space<vmem>>, vector<1x256xf32>
    %26 = vector.broadcast %25 : vector<1x256xf32> to vector<64x256xf32>
    %27 = arith.addf %24, %26 : vector<64x256xf32>
    %cst_19 = arith.constant 0.000000e+00 : f32
    %28 = vector.broadcast %cst_19 : f32 to vector<64x256xf32>
    %29 = arith.cmpf oge, %27, %28 : vector<64x256xf32>
    %cst_20 = arith.constant 0.00999999977 : f32
    %30 = vector.broadcast %cst_20 : f32 to vector<64x256xf32>
    %31 = arith.mulf %30, %27 : vector<64x256xf32>
    %32 = arith.select %29, %27, %31 : vector<64x256xi1>, vector<64x256xf32>
    %33 = arith.truncf %32 : vector<64x256xf32> to vector<64x256xbf16>
    %c0_21 = arith.constant 0 : index
    %c0_22 = arith.constant 0 : index
    %34 = vector.load %arg8[%c0_21, %c0_22] : memref<256x512xbf16, #tpu.memory_space<vmem>>, vector<256x512xbf16>
    %cst_23 = arith.constant dense<0.000000e+00> : vector<64x512xf32>
    %35 = tpu.matmul %33, %34, %cst_23 {dimension_numbers = #tpu.dot_dimension_numbers<[1], [0], [0], [1], [0, 0, 1, 1], [], []>} : vector<64x256xbf16>, vector<256x512xbf16>, vector<64x512xf32> -> vector<64x512xf32>
    %c0_24 = arith.constant 0 : index
    %c0_25 = arith.constant 0 : index
    %36 = vector.load %arg9[%c0_24, %c0_25] : memref<1x512xf32, #tpu.memory_space<vmem>>, vector<1x512xf32>
    %37 = vector.broadcast %36 : vector<1x512xf32> to vector<64x512xf32>
    %38 = arith.addf %35, %37 : vector<64x512xf32>
    %cst_26 = arith.constant 0.000000e+00 : f32
    %39 = vector.broadcast %cst_26 : f32 to vector<64x512xf32>
    %40 = arith.maximumf %38, %39 : vector<64x512xf32>
    %41 = arith.truncf %40 : vector<64x512xf32> to vector<64x512xbf16>
    %c0_27 = arith.constant 0 : index
    %c0_28 = arith.constant 0 : index
    %42 = vector.load %arg10[%c0_27, %c0_28] : memref<512x128xbf16, #tpu.memory_space<vmem>>, vector<512x128xbf16>
    %cst_29 = arith.constant dense<0.000000e+00> : vector<64x128xf32>
    %43 = tpu.matmul %41, %42, %cst_29 {dimension_numbers = #tpu.dot_dimension_numbers<[1], [0], [0], [1], [0, 0, 1, 1], [], []>} : vector<64x512xbf16>, vector<512x128xbf16>, vector<64x128xf32> -> vector<64x128xf32>
    %c0_30 = arith.constant 0 : index
    %c0_31 = arith.constant 0 : index
    %44 = vector.load %arg11[%c0_30, %c0_31] : memref<1x128xf32, #tpu.memory_space<vmem>>, vector<1x128xf32>
    %45 = vector.broadcast %44 : vector<1x128xf32> to vector<64x128xf32>
    %46 = arith.addf %43, %45 : vector<64x128xf32>
    %cst_32 = arith.constant 0.000000e+00 : f32
    %47 = vector.broadcast %cst_32 : f32 to vector<64x128xf32>
    %48 = arith.maximumf %46, %47 : vector<64x128xf32>
    %49 = arith.truncf %48 : vector<64x128xf32> to vector<64x128xbf16>
    %c0_33 = arith.constant 0 : index
    %c0_34 = arith.constant 0 : index
    %50 = vector.load %arg12[%c0_33, %c0_34] : memref<128x128xbf16, #tpu.memory_space<vmem>>, vector<128x128xbf16>
    %cst_35 = arith.constant dense<0.000000e+00> : vector<64x128xf32>
    %51 = tpu.matmul %49, %50, %cst_35 {dimension_numbers = #tpu.dot_dimension_numbers<[1], [0], [0], [1], [0, 0, 1, 1], [], []>} : vector<64x128xbf16>, vector<128x128xbf16>, vector<64x128xf32> -> vector<64x128xf32>
    %c0_36 = arith.constant 0 : index
    %c0_37 = arith.constant 0 : index
    %52 = vector.load %arg13[%c0_36, %c0_37] : memref<1x128xf32, #tpu.memory_space<vmem>>, vector<1x128xf32>
    %53 = vector.broadcast %52 : vector<1x128xf32> to vector<64x128xf32>
    %54 = arith.addf %51, %53 : vector<64x128xf32>
    %55 = arith.negf %54 : vector<64x128xf32>
    %56 = math.exp %55 : vector<64x128xf32>
    %cst_38 = arith.constant 1.000000e+00 : f32
    %57 = vector.broadcast %cst_38 : f32 to vector<64x128xf32>
    %58 = arith.addf %57, %56 : vector<64x128xf32>
    %59 = arith.divf %57, %58 : vector<64x128xf32>
    %c0_39 = arith.constant 0 : index
    %c0_40 = arith.constant 0 : index
    %60 = vector.load %arg14[%c0_39, %c0_40] : memref<64x128xf32, #tpu.memory_space<vmem>>, vector<64x128xf32>
    tpu.vector_store %arg14[%c0_39, %c0_40], %59 {strides = array<i32>} : memref<64x128xf32, #tpu.memory_space<vmem>>, vector<64x128xf32>,
    return
  }
  func.func @transform_0(%arg0: i32) -> (i32, i32) {
    %c0_i32 = arith.constant 0 : i32
    %c0_i32_0 = arith.constant 0 : i32
    return %arg0, %c0_i32 : i32, i32
  }
  func.func @transform_1(%arg0: i32) -> (i32, i32) {
    %c0_i32 = arith.constant 0 : i32
    %c0_i32_0 = arith.constant 0 : i32
    %c0_i32_1 = arith.constant 0 : i32
    return %c0_i32, %c0_i32_0 : i32, i32
  }
  func.func @transform_2(%arg0: i32) -> (i32, i32) {
    %c0_i32 = arith.constant 0 : i32
    %c0_i32_0 = arith.constant 0 : i32
    %c0_i32_1 = arith.constant 0 : i32
    return %c0_i32, %c0_i32_0 : i32, i32
  }
  func.func @transform_3(%arg0: i32) -> (i32, i32) {
    %c0_i32 = arith.constant 0 : i32
    %c0_i32_0 = arith.constant 0 : i32
    %c0_i32_1 = arith.constant 0 : i32
    return %c0_i32, %c0_i32_0 : i32, i32
  }
  func.func @transform_4(%arg0: i32) -> (i32, i32) {
    %c0_i32 = arith.constant 0 : i32
    %c0_i32_0 = arith.constant 0 : i32
    %c0_i32_1 = arith.constant 0 : i32
    return %c0_i32, %c0_i32_0 : i32, i32
  }
  func.func @transform_5(%arg0: i32) -> (i32, i32) {
    %c0_i32 = arith.constant 0 : i32
    %c0_i32_0 = arith.constant 0 : i32
    %c0_i32_1 = arith.constant 0 : i32
    return %c0_i32, %c0_i32_0 : i32, i32
  }
  func.func @transform_6(%arg0: i32) -> (i32, i32) {
    %c0_i32 = arith.constant 0 : i32
    %c0_i32_0 = arith.constant 0 : i32
    %c0_i32_1 = arith.constant 0 : i32
    return %c0_i32, %c0_i32_0 : i32, i32
  }
  func.func @transform_7(%arg0: i32) -> (i32, i32) {
    %c0_i32 = arith.constant 0 : i32
    %c0_i32_0 = arith.constant 0 : i32
    %c0_i32_1 = arith.constant 0 : i32
    return %c0_i32, %c0_i32_0 : i32, i32
  }
  func.func @transform_8(%arg0: i32) -> (i32, i32) {
    %c0_i32 = arith.constant 0 : i32
    %c0_i32_0 = arith.constant 0 : i32
    %c0_i32_1 = arith.constant 0 : i32
    return %c0_i32, %c0_i32_0 : i32, i32
  }
  func.func @transform_9(%arg0: i32) -> (i32, i32) {
    %c0_i32 = arith.constant 0 : i32
    %c0_i32_0 = arith.constant 0 : i32
    %c0_i32_1 = arith.constant 0 : i32
    return %c0_i32, %c0_i32_0 : i32, i32
  }
  func.func @transform_10(%arg0: i32) -> (i32, i32) {
    %c0_i32 = arith.constant 0 : i32
    %c0_i32_0 = arith.constant 0 : i32
    %c0_i32_1 = arith.constant 0 : i32
    return %c0_i32, %c0_i32_0 : i32, i32
  }
  func.func @transform_11(%arg0: i32) -> (i32, i32) {
    %c0_i32 = arith.constant 0 : i32
    %c0_i32_0 = arith.constant 0 : i32
    %c0_i32_1 = arith.constant 0 : i32
    return %c0_i32, %c0_i32_0 : i32, i32
  }
  func.func @transform_12(%arg0: i32) -> (i32, i32) {
    %c0_i32 = arith.constant 0 : i32
    %c0_i32_0 = arith.constant 0 : i32
    %c0_i32_1 = arith.constant 0 : i32
    return %c0_i32, %c0_i32_0 : i32, i32
  }
  func.func @transform_13(%arg0: i32) -> (i32, i32) {
    %c0_i32 = arith.constant 0 : i32
    %c0_i32_0 = arith.constant 0 : i32
    return %arg0, %c0_i32 : i32, i32
  }
}

module attributes {stable_mosaic.version = 11 : i64} {
  func.func @_policy_kernel(%arg0: i32, %arg1: memref<64x768xbf16, #tpu.memory_space<vmem>>, %arg2: memref<768x1024xbf16, #tpu.memory_space<vmem>>, %arg3: memref<1x1024xf32, #tpu.memory_space<vmem>>, %arg4: memref<1024x512xbf16, #tpu.memory_space<vmem>>, %arg5: memref<1x512xf32, #tpu.memory_space<vmem>>, %arg6: memref<512x256xbf16, #tpu.memory_space<vmem>>, %arg7: memref<1x256xf32, #tpu.memory_space<vmem>>, %arg8: memref<256x512xbf16, #tpu.memory_space<vmem>>, %arg9: memref<1x512xf32, #tpu.memory_space<vmem>>, %arg10: memref<512x128xbf16, #tpu.memory_space<vmem>>, %arg11: memref<1x128xf32, #tpu.memory_space<vmem>>, %arg12: memref<128x128xbf16, #tpu.memory_space<vmem>>, %arg13: memref<1x128xf32, #tpu.memory_space<vmem>>, %arg14: memref<64x128xf32, #tpu.memory_space<vmem>>) attributes {dimension_semantics = [#tpu.dimension_semantics<parallel>], iteration_bounds = array<i64: 2>, scalar_prefetch = 0 : i64, scratch_operands = 0 : i64, tpu.core_type = #tpu.core_type<tc>, window_params = [{transform_indices = @transform_0, window_bounds = array<i64: 64, 768>}, {pipeline_mode = #tpu.pipeline_mode<synchronous>, transform_indices = @transform_1, window_bounds = array<i64: 768, 1024>}, {pipeline_mode = #tpu.pipeline_mode<synchronous>, transform_indices = @transform_2, window_bounds = array<i64: 1, 1024>}, {pipeline_mode = #tpu.pipeline_mode<synchronous>, transform_indices = @transform_3, window_bounds = array<i64: 1024, 512>}, {pipeline_mode = #tpu.pipeline_mode<synchronous>, transform_indices = @transform_4, window_bounds = array<i64: 1, 512>}, {pipeline_mode = #tpu.pipeline_mode<synchronous>, transform_indices = @transform_5, window_bounds = array<i64: 512, 256>}, {pipeline_mode = #tpu.pipeline_mode<synchronous>, transform_indices = @transform_6, window_bounds = array<i64: 1, 256>}, {pipeline_mode = #tpu.pipeline_mode<synchronous>, transform_indices = @transform_7, window_bounds = array<i64: 256, 512>}, {pipeline_mode = #tpu.pipeline_mode<synchronous>, transform_indices = @transform_8, window_bounds = array<i64: 1, 512>}, {pipeline_mode = #tpu.pipeline_mode<synchronous>, transform_indices = @transform_9, window_bounds = array<i64: 512, 128>}, {pipeline_mode = #tpu.pipeline_mode<synchronous>, transform_indices = @transform_10, window_bounds = array<i64: 1, 128>}, {pipeline_mode = #tpu.pipeline_mode<synchronous>, transform_indices = @transform_11, window_bounds = array<i64: 128, 128>}, {pipeline_mode = #tpu.pipeline_mode<synchronous>, transform_indices = @transform_12, window_bounds = array<i64: 1, 128>}, {transform_indices = @transform_13, window_bounds = array<i64: 64, 128>}]} {
    %c0 = arith.constant 0 : index
    %c0_0 = arith.constant 0 : index
    %0 = vector.load %arg1[%c0, %c0_0] : memref<64x768xbf16, #tpu.memory_space<vmem>>, vector<64x768xbf16>
    %c0_1 = arith.constant 0 : index
    %c0_2 = arith.constant 0 : index
    %1 = vector.load %arg2[%c0_1, %c0_2] : memref<768x1024xbf16, #tpu.memory_space<vmem>>, vector<768x1024xbf16>
    %cst = arith.constant dense<0.000000e+00> : vector<64x1024xf32>
    %2 = tpu.matmul %0, %1, %cst {dimension_numbers = #tpu.dot_dimension_numbers<[1], [0], [0], [1], [0, 0, 1, 1], [], []>} : vector<64x768xbf16>, vector<768x1024xbf16>, vector<64x1024xf32> -> vector<64x1024xf32>
    %c0_3 = arith.constant 0 : index
    %c0_4 = arith.constant 0 : index
    %3 = vector.load %arg3[%c0_3, %c0_4] : memref<1x1024xf32, #tpu.memory_space<vmem>>, vector<1x1024xf32>
    %4 = vector.broadcast %3 : vector<1x1024xf32> to vector<64x1024xf32>
    %5 = arith.addf %2, %4 : vector<64x1024xf32>
    %cst_5 = arith.constant 0.000000e+00 : f32
    %6 = vector.broadcast %cst_5 : f32 to vector<64x1024xf32>
    %7 = arith.cmpf oge, %5, %6 : vector<64x1024xf32>
    %cst_6 = arith.constant 0.00999999977 : f32
    %8 = vector.broadcast %cst_6 : f32 to vector<64x1024xf32>
    %9 = arith.mulf %8, %5 : vector<64x1024xf32>
    %10 = arith.select %7, %5, %9 : vector<64x1024xi1>, vector<64x1024xf32>
    %11 = arith.truncf %10 : vector<64x1024xf32> to vector<64x1024xbf16>
    %c0_7 = arith.constant 0 : index
    %c0_8 = arith.constant 0 : index
    %12 = vector.load %arg4[%c0_7, %c0_8] : memref<1024x512xbf16, #tpu.memory_space<vmem>>, vector<1024x512xbf16>
    %cst_9 = arith.constant dense<0.000000e+00> : vector<64x512xf32>
    %13 = tpu.matmul %11, %12, %cst_9 {dimension_numbers = #tpu.dot_dimension_numbers<[1], [0], [0], [1], [0, 0, 1, 1], [], []>} : vector<64x1024xbf16>, vector<1024x512xbf16>, vector<64x512xf32> -> vector<64x512xf32>
    %c0_10 = arith.constant 0 : index
    %c0_11 = arith.constant 0 : index
    %14 = vector.load %arg5[%c0_10, %c0_11] : memref<1x512xf32, #tpu.memory_space<vmem>>, vector<1x512xf32>
    %15 = vector.broadcast %14 : vector<1x512xf32> to vector<64x512xf32>
    %16 = arith.addf %13, %15 : vector<64x512xf32>
    %cst_12 = arith.constant 0.000000e+00 : f32
    %17 = vector.broadcast %cst_12 : f32 to vector<64x512xf32>
    %18 = arith.cmpf oge, %16, %17 : vector<64x512xf32>
    %cst_13 = arith.constant 0.00999999977 : f32
    %19 = vector.broadcast %cst_13 : f32 to vector<64x512xf32>
    %20 = arith.mulf %19, %16 : vector<64x512xf32>
    %21 = arith.select %18, %16, %20 : vector<64x512xi1>, vector<64x512xf32>
    %22 = arith.truncf %21 : vector<64x512xf32> to vector<64x512xbf16>
    %c0_14 = arith.constant 0 : index
    %c0_15 = arith.constant 0 : index
    %23 = vector.load %arg6[%c0_14, %c0_15] : memref<512x256xbf16, #tpu.memory_space<vmem>>, vector<512x256xbf16>
    %cst_16 = arith.constant dense<0.000000e+00> : vector<64x256xf32>
    %24 = tpu.matmul %22, %23, %cst_16 {dimension_numbers = #tpu.dot_dimension_numbers<[1], [0], [0], [1], [0, 0, 1, 1], [], []>} : vector<64x512xbf16>, vector<512x256xbf16>, vector<64x256xf32> -> vector<64x256xf32>
    %c0_17 = arith.constant 0 : index
    %c0_18 = arith.constant 0 : index
    %25 = vector.load %arg7[%c0_17, %c0_18] : memref<1x256xf32, #tpu.memory_space<vmem>>, vector<1x256xf32>
    %26 = vector.broadcast %25 : vector<1x256xf32> to vector<64x256xf32>
    %27 = arith.addf %24, %26 : vector<64x256xf32>
    %cst_19 = arith.constant 0.000000e+00 : f32
    %28 = vector.broadcast %cst_19 : f32 to vector<64x256xf32>
    %29 = arith.cmpf oge, %27, %28 : vector<64x256xf32>
    %cst_20 = arith.constant 0.00999999977 : f32
    %30 = vector.broadcast %cst_20 : f32 to vector<64x256xf32>
    %31 = arith.mulf %30, %27 : vector<64x256xf32>
    %32 = arith.select %29, %27, %31 : vector<64x256xi1>, vector<64x256xf32>
    %33 = arith.truncf %32 : vector<64x256xf32> to vector<64x256xbf16>
    %c0_21 = arith.constant 0 : index
    %c0_22 = arith.constant 0 : index
    %34 = vector.load %arg8[%c0_21, %c0_22] : memref<256x512xbf16, #tpu.memory_space<vmem>>, vector<256x512xbf16>
    %cst_23 = arith.constant dense<0.000000e+00> : vector<64x512xf32>
    %35 = tpu.matmul %33, %34, %cst_23 {dimension_numbers = #tpu.dot_dimension_numbers<[1], [0], [0], [1], [0, 0, 1, 1], [], []>} : vector<64x256xbf16>, vector<256x512xbf16>, vector<64x512xf32> -> vector<64x512xf32>
    %c0_24 = arith.constant 0 : index
    %c0_25 = arith.constant 0 : index
    %36 = vector.load %arg9[%c0_24, %c0_25] : memref<1x512xf32, #tpu.memory_space<vmem>>, vector<1x512xf32>
    %37 = vector.broadcast %36 : vector<1x512xf32> to vector<64x512xf32>
    %38 = arith.addf %35, %37 : vector<64x512xf32>
    %cst_26 = arith.constant 0.000000e+00 : f32
    %39 = vector.broadcast %cst_26 : f32 to vector<64x512xf32>
    %40 = arith.maximumf %38, %39 : vector<64x512xf32>
    %41 = arith.truncf %40 : vector<64x512xf32> to vector<64x512xbf16>
    %c0_27 = arith.constant 0 : index
    %c0_28 = arith.constant 0 : index
    %42 = vector.load %arg10[%c0_27, %c0_28] : memref<512x128xbf16, #tpu.memory_space<vmem>>, vector<512x128xbf16>
    %cst_29 = arith.constant dense<0.000000e+00> : vector<64x128xf32>
    %43 = tpu.matmul %41, %42, %cst_29 {dimension_numbers = #tpu.dot_dimension_numbers<[1], [0], [0], [1], [0, 0, 1, 1], [], []>} : vector<64x512xbf16>, vector<512x128xbf16>, vector<64x128xf32> -> vector<64x128xf32>
    %c0_30 = arith.constant 0 : index
    %c0_31 = arith.constant 0 : index
    %44 = vector.load %arg11[%c0_30, %c0_31] : memref<1x128xf32, #tpu.memory_space<vmem>>, vector<1x128xf32>
    %45 = vector.broadcast %44 : vector<1x128xf32> to vector<64x128xf32>
    %46 = arith.addf %43, %45 : vector<64x128xf32>
    %cst_32 = arith.constant 0.000000e+00 : f32
    %47 = vector.broadcast %cst_32 : f32 to vector<64x128xf32>
    %48 = arith.maximumf %46, %47 : vector<64x128xf32>
    %49 = arith.truncf %48 : vector<64x128xf32> to vector<64x128xbf16>
    %c0_33 = arith.constant 0 : index
    %c0_34 = arith.constant 0 : index
    %50 = vector.load %arg12[%c0_33, %c0_34] : memref<128x128xbf16, #tpu.memory_space<vmem>>, vector<128x128xbf16>
    %cst_35 = arith.constant dense<0.000000e+00> : vector<64x128xf32>
    %51 = tpu.matmul %49, %50, %cst_35 {dimension_numbers = #tpu.dot_dimension_numbers<[1], [0], [0], [1], [0, 0, 1, 1], [], []>} : vector<64x128xbf16>, vector<128x128xbf16>, vector<64x128xf32> -> vector<64x128xf32>
    %c0_36 = arith.constant 0 : index
    %c0_37 = arith.constant 0 : index
    %52 = vector.load %arg13[%c0_36, %c0_37] : memref<1x128xf32, #tpu.memory_space<vmem>>, vector<1x128xf32>
    %53 = vector.broadcast %52 : vector<1x128xf32> to vector<64x128xf32>
    %54 = arith.addf %51, %53 : vector<64x128xf32>
    %55 = arith.negf %54 : vector<64x128xf32>
    %56 = math.exp %55 : vector<64x128xf32>
    %cst_38 = arith.constant 1.000000e+00 : f32
    %57 = vector.broadcast %cst_38 : f32 to vector<64x128xf32>
    %58 = arith.addf %57, %56 : vector<64x128xf32>
    %59 = arith.divf %57, %58 : vector<64x128xf32>
    %c0_39 = arith.constant 0 : index
    %c0_40 = arith.constant 0 : index
    %60 = vector.load %arg14[%c0_39, %c0_40] : memref<64x128xf32, #tpu.memory_space<vmem>>, vector<64x128xf32>
    tpu.vector_store %arg14[%c0_39, %c0_40], %59 {strides = array<i32>} : memref<64x128xf32, #tpu.memory_space<vmem>>, vector<64x128xf32>,
    return
  }
  func.func @transform_0(%arg0: i32) -> (i32, i32) {
    %c0_i32 = arith.constant 0 : i32
    %c0_i32_0 = arith.constant 0 : i32
    return %arg0, %c0_i32 : i32, i32
  }
  func.func @transform_1(%arg0: i32) -> (i32, i32) {
    %c0_i32 = arith.constant 0 : i32
    %c0_i32_0 = arith.constant 0 : i32
    %c0_i32_1 = arith.constant 0 : i32
    return %c0_i32, %c0_i32_0 : i32, i32
  }
  func.func @transform_2(%arg0: i32) -> (i32, i32) {
    %c0_i32 = arith.constant 0 : i32
    %c0_i32_0 = arith.constant 0 : i32
    %c0_i32_1 = arith.constant 0 : i32
    return %c0_i32, %c0_i32_0 : i32, i32
  }
  func.func @transform_3(%arg0: i32) -> (i32, i32) {
    %c0_i32 = arith.constant 0 : i32
    %c0_i32_0 = arith.constant 0 : i32
    %c0_i32_1 = arith.constant 0 : i32
    return %c0_i32, %c0_i32_0 : i32, i32
  }
  func.func @transform_4(%arg0: i32) -> (i32, i32) {
    %c0_i32 = arith.constant 0 : i32
    %c0_i32_0 = arith.constant 0 : i32
    %c0_i32_1 = arith.constant 0 : i32
    return %c0_i32, %c0_i32_0 : i32, i32
  }
  func.func @transform_5(%arg0: i32) -> (i32, i32) {
    %c0_i32 = arith.constant 0 : i32
    %c0_i32_0 = arith.constant 0 : i32
    %c0_i32_1 = arith.constant 0 : i32
    return %c0_i32, %c0_i32_0 : i32, i32
  }
  func.func @transform_6(%arg0: i32) -> (i32, i32) {
    %c0_i32 = arith.constant 0 : i32
    %c0_i32_0 = arith.constant 0 : i32
    %c0_i32_1 = arith.constant 0 : i32
    return %c0_i32, %c0_i32_0 : i32, i32
  }
  func.func @transform_7(%arg0: i32) -> (i32, i32) {
    %c0_i32 = arith.constant 0 : i32
    %c0_i32_0 = arith.constant 0 : i32
    %c0_i32_1 = arith.constant 0 : i32
    return %c0_i32, %c0_i32_0 : i32, i32
  }
  func.func @transform_8(%arg0: i32) -> (i32, i32) {
    %c0_i32 = arith.constant 0 : i32
    %c0_i32_0 = arith.constant 0 : i32
    %c0_i32_1 = arith.constant 0 : i32
    return %c0_i32, %c0_i32_0 : i32, i32
  }
  func.func @transform_9(%arg0: i32) -> (i32, i32) {
    %c0_i32 = arith.constant 0 : i32
    %c0_i32_0 = arith.constant 0 : i32
    %c0_i32_1 = arith.constant 0 : i32
    return %c0_i32, %c0_i32_0 : i32, i32
  }
  func.func @transform_10(%arg0: i32) -> (i32, i32) {
    %c0_i32 = arith.constant 0 : i32
    %c0_i32_0 = arith.constant 0 : i32
    %c0_i32_1 = arith.constant 0 : i32
    return %c0_i32, %c0_i32_0 : i32, i32
  }
  func.func @transform_11(%arg0: i32) -> (i32, i32) {
    %c0_i32 = arith.constant 0 : i32
    %c0_i32_0 = arith.constant 0 : i32
    %c0_i32_1 = arith.constant 0 : i32
    return %c0_i32, %c0_i32_0 : i32, i32
  }
  func.func @transform_12(%arg0: i32) -> (i32, i32) {
    %c0_i32 = arith.constant 0 : i32
    %c0_i32_0 = arith.constant 0 : i32
    %c0_i32_1 = arith.constant 0 : i32
    return %c0_i32, %c0_i32_0 : i32, i32
  }
  func.func @transform_13(%arg0: i32) -> (i32, i32) {
    %c0_i32 = arith.constant 0 : i32
    %c0_i32_0 = arith.constant 0 : i32
    return %arg0, %c0_i32 : i32, i32
  }
}

</mosaic_0001>

<bundles_post_ra>
// kernel: policy_forward.1
= control target key start
LH: loop header
LB: loop body
LE: loop exit
PB: predicated region body
PF: predicated region fallthrough
CT: control target
= control target key end

     0   :  { %s12677_s0 = inlined_call_operand.vmem [shape: bf16[128,768], index: 0, kind: input, shape index: {}]   ;;  %s12678_s1 = inlined_call_operand.vmem [shape: bf16[768,1024], index: 1, kind: input, shape index: {}]   ;;  %s12679_s2 = inlined_call_operand.vmem [shape: f32[1,1024], index: 2, kind: input, shape index: {}]   ;;  %s12680_s3 = inlined_call_operand.hbm [shape: bf16[1024,512], index: 3, kind: input, shape index: {}]   ;;  %s12681_s4 = inlined_call_operand.vmem [shape: f32[1,512], index: 4, kind: input, shape index: {}]   ;;  %s12682_s5 = inlined_call_operand.vmem [shape: bf16[512,256], index: 5, kind: input, shape index: {}]   ;;  %s12683_s6 = inlined_call_operand.vmem [shape: f32[1,256], index: 6, kind: input, shape index: {}]   ;;  %s12684_s7 = inlined_call_operand.hbm [shape: bf16[256,512], index: 7, kind: input, shape index: {}]   ;;  %s12685_s8 = inlined_call_operand.vmem [shape: f32[1,512], index: 8, kind: input, shape index: {}]   ;;  %s12686_s9 = inlined_call_operand.hbm [shape: bf16[512,128], index: 9, kind: input, shape index: {}]   ;;  %s12687_s10 = inlined_call_operand.vmem [shape: f32[1,128], index: 10, kind: input, shape index: {}]   ;;  %s12688_s11 = inlined_call_operand.vmem [shape: bf16[128,128], index: 11, kind: input, shape index: {}]   ;;  %s12689_s12 = inlined_call_operand.vmem [shape: f32[1,128], index: 12, kind: input, shape index: {}]   ;;  %s12690_s13 = inlined_call_operand.vmem [shape: f32[128,128], index: 13, kind: output, shape index: {}]  }
   0x1   :  { %12692 = sst [smem:[#allocation9_spill]] %s12689_s12 }
   0x2   :  { %12693 = sst [smem:[#allocation10_spill]] %s12690_s13 }
   0x3   :  { %18 = vsyncpa [#allocation3], 0 }
   0x4   :  { %19 = vsyncpa [#allocation5], 0  ;;  %s10491_s25 = smov 0  }
   0x5 LB: > { %s12691_s26 = sadd.s32 4294967295, %s10412_s25   ;;  %p8220_p0 = scmp.ge.s32.totalorder %s10412_s25, 1  ;;  %s10412_s25 = sphi %s10491_s25, %s25_s25  }
   0x6   : > { %p334_p1 = scmp.lt.s32.totalorder %s10412_s25, 3  ;;  %p10501_p2 = scmp.eq.s32.totalorder %s12691_s26, 0 }
   0x7   : > { %s10414_s29 = smov [#allocation4]   ;;  %s10415_s14 = smov [#allocation2]  }
   0x8   : > { %p10505_p3 = pnand %p8220_p0, %p334_p1  ;;  %s374_s30 = sshll.u32 %s10414_s29, 4  ;;  %s10509_s30 = int_to_ptr.vmem [resolvable:$true] %s374_s30 }
   0x9   : > { %s352_s15 = sshll.u32 %s10415_s14, 4  ;;  %s10416_s17 = smov [#allocation6]   ;;  %s10513_s15 = int_to_ptr.vmem [resolvable:$true] %s352_s15 }
   0xa   : > { %p9574_p4 = pneg %p10505_p3  ;;  %s390_s18 = sshll.u32 %s10416_s17, 4  ;;  %s10521_s18 = int_to_ptr.vmem [resolvable:$true] %s390_s18 }
   0xb   : > { %s10314_s21 = scalar_lea.hbm %s12684_s7, 8192 }
   0xc   : > { %p10517_p5 = pnand %p10501_p2, %p9574_p4  ;;  %p10315_p6 = scmp.ne.s32.totalorder %s12684_s7, %s10314_s21 }
   0xd   : > { %p10321_p10 = scmp.lt.u32.totalorder %s10314_s21, %s12684_s7 }
   0xe   : > { %p10531_p7 = pneg %p10517_p5 }
  0x10   : > { %p10317_p8 = pnand %p10531_p7, %p10315_p6 }
  0x12   : > { %p10318_p9 = pneg %p10317_p8 }
  0x14   : > { %p10323_p11 = pnand %p10321_p10, %p10318_p9 }
  0x16   : > { %10326 = shalt.err (!%p10323_p11)
}
  0x17   : > { %s10327_s17 = scalar_lea.vmem %s10509_s30, 8192  ;;  %p10335_p1 = scmp.lt.s32.totalorder %s10509_s30, %s10509_s30 }
  0x18   : > { %p10328_p12 = scmp.ne.s32.totalorder %s10509_s30, %s10327_s17  ;;  %p10336_p4 = scmp.lt.s32.totalorder %s10327_s17, %s10327_s17 }
  0x1a   : > { %p10330_p13 = pnand %p10328_p12, %p10531_p7  ;;  %p10337_p6 = por %p10336_p4, %p10335_p1 }
  0x1c   : > { %p10331_p0 = pneg %p10330_p13 }
  0x1e   : > { %p10338_p8 = pnand %p10337_p6, %p10331_p0 }
  0x20   : > { %10341 = shalt.err (!%p10338_p8)
}
  0x21   : > { %s10417_s19 = smov 256   ;;  %s10418_s20 = smov 16  }
  0x22   : > { %9580 = dma.hbm_to_vmem [thread:$0]  (!%p10517_p5), %s12684_s7, 8192, %s10509_s30, [#allocation5], %s10417_s19, %s10417_s19, %s10418_s20  }
  0x23   : > { %s10342_s14 = scalar_lea.hbm %s12680_s3, 32768 }
  0x24   : > { %p10343_p9 = scmp.ne.s32.totalorder %s12680_s3, %s10342_s14  ;;  %p10349_p12 = scmp.lt.u32.totalorder %s10342_s14, %s12680_s3 }
  0x26   : > { %p10345_p10 = pnand %p10343_p9, %p10531_p7 }
  0x28   : > { %p10346_p11 = pneg %p10345_p10 }
  0x2a   : > { %p10351_p13 = pnand %p10349_p12, %p10346_p11 }
  0x2c   : > { %10354 = shalt.err (!%p10351_p13)
}
  0x2d   : > { %s10355_s30 = scalar_lea.vmem %s10513_s15, 32768  ;;  %p10363_p6 = scmp.lt.s32.totalorder %s10513_s15, %s10513_s15 }
  0x2e   : > { %p10356_p0 = scmp.ne.s32.totalorder %s10513_s15, %s10355_s30  ;;  %p10364_p8 = scmp.lt.s32.totalorder %s10355_s30, %s10355_s30 }
  0x30   : > { %p10358_p1 = pnand %p10356_p0, %p10531_p7  ;;  %p10365_p9 = por %p10364_p8, %p10363_p6 }
  0x32   : > { %p10359_p4 = pneg %p10358_p1 }
  0x34   : > { %p10366_p10 = pnand %p10365_p9, %p10359_p4 }
  0x36   : > { %10369 = shalt.err (!%p10366_p10)
}
  0x37   : > { %9577 = dma.hbm_to_vmem [thread:$0]  (!%p10517_p5), %s12680_s3, 32768, %s10513_s15, [#allocation3], %s10417_s19, %s10417_s19, %s10418_s20  }
  0x38   : > { %s10370_s22 = scalar_lea.hbm %s12686_s9, 4096 }
  0x39   : > { %p10371_p11 = scmp.ne.s32.totalorder %s12686_s9, %s10370_s22  ;;  %p10377_p0 = scmp.lt.u32.totalorder %s10370_s22, %s12686_s9 }
  0x3b   : > { %p10373_p12 = pnand %p10371_p11, %p10531_p7 }
  0x3d   : > { %p10374_p13 = pneg %p10373_p12 }
  0x3f   : > { %p10379_p1 = pnand %p10377_p0, %p10374_p13 }
  0x41   : > { %10382 = shalt.err (!%p10379_p1)
}
  0x42   : > { %s10383_s15 = scalar_lea.vmem %s10521_s18, 4096  ;;  %p10391_p9 = scmp.lt.s32.totalorder %s10521_s18, %s10521_s18 }
  0x43   : > { %p10384_p4 = scmp.ne.s32.totalorder %s10521_s18, %s10383_s15  ;;  %p10392_p10 = scmp.lt.s32.totalorder %s10383_s15, %s10383_s15 }
  0x45   : > { %p10386_p6 = pnand %p10384_p4, %p10531_p7  ;;  %p10393_p11 = por %p10392_p10, %p10391_p9 }
  0x47   : > { %p10387_p8 = pneg %p10386_p6 }
  0x49   : > { %p10394_p12 = pnand %p10393_p11, %p10387_p8 }
  0x4b   : > { %10397 = shalt.err (!%p10394_p12)
}
  0x4c   : > { %s10419_s19 = smov 64   ;;  %s10420_s20 = smov 4  }
  0x4d   : > { %9583 = dma.hbm_to_vmem [thread:$0]  (!%p10517_p5), %s12686_s9, 4096, %s10521_s18, [#allocation5], %s10419_s19, %s10419_s19, %s10420_s20  }
  0x4e   : > { %425 = sbr.rel (%p10505_p3) target bundleno = 2057 (0x809), region = 72 }
  0x55   : > { %10403 = dma.done.wait (%p10501_p2), [#allocation3], 32768  }
  0x56   : > { %10405 = vsyncadd (%p10501_p2), [#allocation3], 4294934528 }
  0x57   : > { %10407 = dma.done.wait (%p10501_p2), [#allocation5], 12288  }
  0x58   : > { %10409 = vsyncadd (%p10501_p2), [#allocation5], 4294955008  ;;  %v516_v0 = vld [vmem:[%s12678_s1] sm:$0xff]  ;;  %v517_v2 = vld [vmem:[%s12678_s1 + $0x8] sm:$0xff]  ;;  %s12698_s21 = sadd.s32 4294967295, %s10412_s25   ;;  %s12699_s28 = sld [smem:[#allocation9_spill]] }
  0x59   : > { %v520_v1 = vld [vmem:[%s12678_s1 + $0x20] sm:$0xff]  ;;  %v521_v4 = vld [vmem:[%s12678_s1 + $0x28] sm:$0xff]  ;;  %s8229_s22 = sshll.u32 %s12698_s21, 3  ;;  %s12700_s29 = sld [smem:[#allocation10_spill]] }
  0x5a   : > { %v8258_v3 = vcombine.high %v516_v0, %v520_v1  ;;  %v8257_v5 = vcombine.low %v516_v0, %v520_v1  ;;  %v524_v6 = vld [vmem:[%s12678_s1 + $0x40] sm:$0xff]  ;;  %v8260_v8 = vcombine.high %v517_v2, %v521_v4  ;;  %v8259_v9 = vcombine.low %v517_v2, %v521_v4  ;;  %v525_v11 = vld [vmem:[%s12678_s1 + $0x48] sm:$0xff]  ;;  %p479_p2 = scmp.lt.s32.totalorder %s8229_s22, 15 }
  0x5b   : > { %v528_v7 = vld [vmem:[%s12678_s1 + $0x60] sm:$0xff]  ;;  %v529_v12 = vld [vmem:[%s12678_s1 + $0x68] sm:$0xff] }
  0x5c   : > { %v8266_v10 = vcombine.high %v524_v6, %v528_v7  ;;  %v532_v13 = vld [vmem:[%s12678_s1 + $0x80] sm:$0xff]  ;;  %2982 = vmatprep.subr.bf16.mxu0 %v8258_v3  ;;  %v8268_v14 = vcombine.high %v525_v11, %v529_v12  ;;  %v533_v16 = vld [vmem:[%s12678_s1 + $0x88] sm:$0xff]  ;;  %3201 = vmatprep.subr.bf16.mxu1 %v8260_v8  ;;  %v8265_v18 = vcombine.low %v524_v6, %v528_v7  ;;  %s12702_s22 = smov (!%p479_p2, %s8229_s22), 15 }
  0x5d   : > { %v536_v15 = vld [vmem:[%s12678_s1 + $0xa0] sm:$0xff]  ;;  %v537_v17 = vld [vmem:[%s12678_s1 + $0xa8] sm:$0xff]  ;;  %2983 = vmatpush1.bf16.msra.mxu0 %v8257_v5  ;;  %3202 = vmatpush1.bf16.msra.mxu1 %v8259_v9  ;;  %v8267_v19 = vcombine.low %v525_v11, %v529_v12  ;;  %s9561_s20 = smul.u32 24, %s12702_s22  ;;  %s8232_s26 = sshll.u32 %s12702_s22, 3 }
  0x5e   : > { %2984 = vmatprep.subr.bf16.mxu0 %v8266_v10  ;;  %v8274_v20 = vcombine.high %v532_v13, %v536_v15  ;;  %3203 = vmatprep.subr.bf16.mxu1 %v8268_v14  ;;  %v8276_v21 = vcombine.high %v533_v16, %v537_v17  ;;  %v540_v22 = vld [vmem:[%s12678_s1 + $0xc0] sm:$0xff]  ;;  %v541_v24 = vld [vmem:[%s12678_s1 + $0xc8] sm:$0xff]  ;;  %v8273_v26 = vcombine.low %v532_v13, %v536_v15 }
  0x5f   : > { %v544_v23 = vld [vmem:[%s12678_s1 + $0xe0] sm:$0xff]  ;;  %v545_v25 = vld [vmem:[%s12678_s1 + $0xe8] sm:$0xff]  ;;  %v8275_v27 = vcombine.low %v533_v16, %v537_v17  ;;  %s10700_s23 = scalar_lea.vmem %s12677_s0, %s9561_s20  ;;  %s489_s14 = scalar_lea.vmem %s12700_s29, %s8232_s26 }
  0x60   : > { %v8282_v28 = vcombine.high %v540_v22, %v544_v23  ;;  %v8284_v29 = vcombine.high %v541_v24, %v545_v25  ;;  %v548_v30 = vld [vmem:[%s12678_s1 + $0x100] sm:$0xff]  ;;  %v549_v32 = vld [vmem:[%s12678_s1 + $0x108] sm:$0xff]  ;;  %v8281_v34 = vcombine.low %v540_v22, %v544_v23  ;;  %v8283_v35 = vcombine.low %v541_v24, %v545_v25 }
  0x61   : > { %2985 = vmatpush1.bf16.msra.mxu0 %v8265_v18  ;;  %3204 = vmatpush1.bf16.msra.mxu1 %v8267_v19  ;;  %v552_v31 = vld [vmem:[%s12678_s1 + $0x120] sm:$0xff]  ;;  %v553_v33 = vld [vmem:[%s12678_s1 + $0x128] sm:$0xff] }
  0x62   : > { %2986 = vmatprep.subr.bf16.mxu0 %v8274_v20  ;;  %3205 = vmatprep.subr.bf16.mxu1 %v8276_v21  ;;  %v8290_v36 = vcombine.high %v548_v30, %v552_v31  ;;  %v8292_v37 = vcombine.high %v549_v32, %v553_v33  ;;  %v556_v38 = vld [vmem:[%s12678_s1 + $0x140] sm:$0xff]  ;;  %v557_v40 = vld [vmem:[%s12678_s1 + $0x148] sm:$0xff]  ;;  %v8289_v42 = vcombine.low %v548_v30, %v552_v31 }
  0x63   : > { %v560_v39 = vld [vmem:[%s12678_s1 + $0x160] sm:$0xff]  ;;  %v561_v41 = vld [vmem:[%s12678_s1 + $0x168] sm:$0xff]  ;;  %v8291_v43 = vcombine.low %v549_v32, %v553_v33 }
  0x64   : > { %v8298_v44 = vcombine.high %v556_v38, %v560_v39  ;;  %v8300_v45 = vcombine.high %v557_v40, %v561_v41  ;;  %v564_v46 = vld [vmem:[%s12678_s1 + $0x180] sm:$0xff]  ;;  %v565_v48 = vld [vmem:[%s12678_s1 + $0x188] sm:$0xff]  ;;  %v8297_v50 = vcombine.low %v556_v38, %v560_v39  ;;  %v8299_v51 = vcombine.low %v557_v40, %v561_v41 }
  0x65   : > { %2987 = vmatpush1.bf16.msra.mxu0 %v8273_v26  ;;  %3206 = vmatpush1.bf16.msra.mxu1 %v8275_v27  ;;  %v568_v47 = vld [vmem:[%s12678_s1 + $0x1a0] sm:$0xff]  ;;  %v569_v49 = vld [vmem:[%s12678_s1 + $0x1a8] sm:$0xff] }
  0x66   : > { %2988 = vmatprep.subr.bf16.mxu0 %v8282_v28  ;;  %3207 = vmatprep.subr.bf16.mxu1 %v8284_v29  ;;  %v8306_v52 = vcombine.high %v564_v46, %v568_v47  ;;  %v8308_v53 = vcombine.high %v565_v48, %v569_v49  ;;  %v572_v54 = vld [vmem:[%s12678_s1 + $0x1c0] sm:$0xff]  ;;  %v573_v57 = vld [vmem:[%s12678_s1 + $0x1c8] sm:$0xff]  ;;  %v8305_v59 = vcombine.low %v564_v46, %v568_v47 }
  0x67   : > { %v576_v55 = vld [vmem:[%s12678_s1 + $0x1e0] sm:$0xff]  ;;  %v577_v58 = vld [vmem:[%s12678_s1 + $0x1e8] sm:$0xff]  ;;  %v8307_v60 = vcombine.low %v565_v48, %v569_v49 }
  0x68   : > { %v9605_v56 = vld [vmem:[%s10700_s23 + $0x4] ss:$24 sps:$4 sm:$0xff]   ;;  %v8314_v61 = vcombine.high %v572_v54, %v576_v55  ;;  %v8316_v62 = vcombine.high %v573_v57, %v577_v58  ;;  %v581_v1 = vld [vmem:[%s12678_s1 + $0x208] sm:$0xff]  ;;  %v8313_v3 = vcombine.low %v572_v54, %v576_v55  ;;  %v8315_v4 = vcombine.low %v573_v57, %v577_v58 }
  0x69   : > { %2989 = vmatpush1.bf16.msra.mxu0 %v8281_v34  ;;  %3208 = vmatpush1.bf16.msra.mxu1 %v8283_v35  ;;  %v580_v63 = vld [vmem:[%s12678_s1 + $0x200] sm:$0xff]  ;;  %v585_v2 = vld [vmem:[%s12678_s1 + $0x228] sm:$0xff] }
  0x6a   : > { %2990 = vmatprep.subr.bf16.mxu0 %v8290_v36  ;;  %3209 = vmatprep.subr.bf16.mxu1 %v8292_v37  ;;  %v584_v0 = vld [vmem:[%s12678_s1 + $0x220] sm:$0xff]  ;;  %v8324_v6 = vcombine.high %v581_v1, %v585_v2  ;;  %v589_v9 = vld [vmem:[%s12678_s1 + $0x248] sm:$0xff]  ;;  %v8323_v12 = vcombine.low %v581_v1, %v585_v2 }
  0x6b   : > { %3014 = vmatprep.mubr.bf16.mxu0 %v9605_v56  ;;  %3233 = vmatprep.mubr.bf16.mxu1 %v9605_v56  ;;  %v8322_v5 = vcombine.high %v580_v63, %v584_v0  ;;  %v588_v7 = vld [vmem:[%s12678_s1 + $0x240] sm:$0xff]  ;;  %v593_v10 = vld [vmem:[%s12678_s1 + $0x268] sm:$0xff]  ;;  %v8321_v11 = vcombine.low %v580_v63, %v584_v0 }
  0x6c   : > { %v592_v8 = vld [vmem:[%s12678_s1 + $0x260] sm:$0xff]  ;;  %v8332_v14 = vcombine.high %v589_v9, %v593_v10  ;;  %v597_v17 = vld [vmem:[%s12678_s1 + $0x288] sm:$0xff]  ;;  %v8331_v20 = vcombine.low %v589_v9, %v593_v10 }
  0x6d   : > { %2991 = vmatpush1.bf16.msra.mxu0 %v8289_v42  ;;  %3210 = vmatpush1.bf16.msra.mxu1 %v8291_v43  ;;  %v8330_v13 = vcombine.high %v588_v7, %v592_v8  ;;  %v596_v15 = vld [vmem:[%s12678_s1 + $0x280] sm:$0xff]  ;;  %v601_v18 = vld [vmem:[%s12678_s1 + $0x2a8] sm:$0xff]  ;;  %v8329_v19 = vcombine.low %v588_v7, %v592_v8 }
  0x6e   : > { %2992 = vmatprep.subr.bf16.mxu0 %v8298_v44  ;;  %3211 = vmatprep.subr.bf16.mxu1 %v8300_v45  ;;  %v600_v16 = vld [vmem:[%s12678_s1 + $0x2a0] sm:$0xff]  ;;  %v8340_v22 = vcombine.high %v597_v17, %v601_v18  ;;  %v605_v25 = vld [vmem:[%s12678_s1 + $0x2c8] sm:$0xff]  ;;  %v8339_v28 = vcombine.low %v597_v17, %v601_v18 }
  0x6f   : > { %v8338_v21 = vcombine.high %v596_v15, %v600_v16  ;;  %v604_v23 = vld [vmem:[%s12678_s1 + $0x2c0] sm:$0xff]  ;;  %v609_v26 = vld [vmem:[%s12678_s1 + $0x2e8] sm:$0xff]  ;;  %v8337_v27 = vcombine.low %v596_v15, %v600_v16 }
  0x70   : > { %v608_v24 = vld [vmem:[%s12678_s1 + $0x2e0] sm:$0xff]  ;;  %v8348_v30 = vcombine.high %v605_v25, %v609_v26  ;;  %v613_v33 = vld [vmem:[%s12678_s1 + $0x308] sm:$0xff]  ;;  %v8347_v36 = vcombine.low %v605_v25, %v609_v26 }
  0x71   : > { %2993 = vmatpush1.bf16.msra.mxu0 %v8297_v50  ;;  %3212 = vmatpush1.bf16.msra.mxu1 %v8299_v51  ;;  %v8346_v29 = vcombine.high %v604_v23, %v608_v24  ;;  %v612_v31 = vld [vmem:[%s12678_s1 + $0x300] sm:$0xff]  ;;  %v617_v34 = vld [vmem:[%s12678_s1 + $0x328] sm:$0xff]  ;;  %v8345_v35 = vcombine.low %v604_v23, %v608_v24 }
  0x72   : > { %2994 = vmatprep.subr.bf16.mxu0 %v8306_v52  ;;  %3213 = vmatprep.subr.bf16.mxu1 %v8308_v53  ;;  %v616_v32 = vld [vmem:[%s12678_s1 + $0x320] sm:$0xff]  ;;  %v8356_v38 = vcombine.high %v613_v33, %v617_v34  ;;  %v621_v41 = vld [vmem:[%s12678_s1 + $0x348] sm:$0xff]  ;;  %v8355_v44 = vcombine.low %v613_v33, %v617_v34 }
  0x73   : > { %v8354_v37 = vcombine.high %v612_v31, %v616_v32  ;;  %v620_v39 = vld [vmem:[%s12678_s1 + $0x340] sm:$0xff]  ;;  %v625_v42 = vld [vmem:[%s12678_s1 + $0x368] sm:$0xff]  ;;  %v8353_v43 = vcombine.low %v612_v31, %v616_v32 }
  0x74   : > { %v624_v40 = vld [vmem:[%s12678_s1 + $0x360] sm:$0xff]  ;;  %v8364_v46 = vcombine.high %v621_v41, %v625_v42  ;;  %v629_v49 = vld [vmem:[%s12678_s1 + $0x388] sm:$0xff]  ;;  %v8363_v52 = vcombine.low %v621_v41, %v625_v42 }
  0x75   : > { %2995 = vmatpush1.bf16.msra.mxu0 %v8305_v59  ;;  %3214 = vmatpush1.bf16.msra.mxu1 %v8307_v60  ;;  %v8362_v45 = vcombine.high %v620_v39, %v624_v40  ;;  %v628_v47 = vld [vmem:[%s12678_s1 + $0x380] sm:$0xff]  ;;  %v633_v50 = vld [vmem:[%s12678_s1 + $0x3a8] sm:$0xff]  ;;  %v8361_v51 = vcombine.low %v620_v39, %v624_v40 }
  0x76   : > { %2996 = vmatprep.subr.bf16.mxu0 %v8314_v61  ;;  %3215 = vmatprep.subr.bf16.mxu1 %v8316_v62  ;;  %v632_v48 = vld [vmem:[%s12678_s1 + $0x3a0] sm:$0xff]  ;;  %v8372_v54 = vcombine.high %v629_v49, %v633_v50  ;;  %v637_v57 = vld [vmem:[%s12678_s1 + $0x3c8] sm:$0xff]  ;;  %v8371_v60 = vcombine.low %v629_v49, %v633_v50 }
  0x77   : > { %v8370_v53 = vcombine.high %v628_v47, %v632_v48  ;;  %v636_v55 = vld [vmem:[%s12678_s1 + $0x3c0] sm:$0xff]  ;;  %v641_v58 = vld [vmem:[%s12678_s1 + $0x3e8] sm:$0xff]  ;;  %v8369_v59 = vcombine.low %v628_v47, %v632_v48 }
  0x78   : > { %v640_v56 = vld [vmem:[%s12678_s1 + $0x3e0] sm:$0xff]  ;;  %v8380_v62 = vcombine.high %v637_v57, %v641_v58  ;;  %v645_v1 = vld [vmem:[%s12678_s1 + $0x408] sm:$0xff] }
  0x79   : > { %2997 = vmatpush1.bf16.msra.mxu0 %v8313_v3  ;;  %3216 = vmatpush1.bf16.msra.mxu1 %v8315_v4  ;;  %v8378_v61 = vcombine.high %v636_v55, %v640_v56  ;;  %v644_v63 = vld [vmem:[%s12678_s1 + $0x400] sm:$0xff]  ;;  %v649_v2 = vld [vmem:[%s12678_s1 + $0x428] sm:$0xff]  ;;  %v8377_v3 = vcombine.low %v636_v55, %v640_v56  ;;  %v8379_v4 = vcombine.low %v637_v57, %v641_v58 }
  0x7a   : > { %2998 = vmatprep.subr.bf16.mxu0 %v8322_v5  ;;  %3217 = vmatprep.subr.bf16.mxu1 %v8324_v6  ;;  %v648_v0 = vld [vmem:[%s12678_s1 + $0x420] sm:$0xff]  ;;  %v8388_v7 = vcombine.high %v645_v1, %v649_v2  ;;  %v653_v10 = vld [vmem:[%s12678_s1 + $0x448] sm:$0xff] }
  0x7b   : > { %v8386_v5 = vcombine.high %v644_v63, %v648_v0  ;;  %v9607_v6 = vld [vmem:[%s10700_s23] ss:$24 sps:$4 sm:$0xff]   ;;  %v9608_v18 = vld [vmem:[%s10700_s23 + $0x34] ss:$24 sps:$4 sm:$0xff]  }
  0x7c   : > { %v652_v8 = vld [vmem:[%s12678_s1 + $0x440] sm:$0xff]  ;;  %v693_v55 = vld [vmem:[%s12678_s1 + $0x588] sm:$0xff] }
  0x7d   : > { %2999 = vmatpush1.bf16.msra.mxu0 %v8321_v11  ;;  %3218 = vmatpush1.bf16.msra.mxu1 %v8323_v12  ;;  %v656_v9 = vld [vmem:[%s12678_s1 + $0x460] sm:$0xff]  ;;  %v657_v11 = vld [vmem:[%s12678_s1 + $0x468] sm:$0xff]  ;;  %v8385_v12 = vcombine.low %v644_v63, %v648_v0 }
  0x7e   : > { %3000 = vmatprep.subr.bf16.mxu0 %v8330_v13  ;;  %3219 = vmatprep.subr.bf16.mxu1 %v8332_v14  ;;  %v8387_v13 = vcombine.low %v645_v1, %v649_v2  ;;  %v8394_v14 = vcombine.high %v652_v8, %v656_v9  ;;  %v660_v15 = vld [vmem:[%s12678_s1 + $0x480] sm:$0xff]  ;;  %v8396_v16 = vcombine.high %v653_v10, %v657_v11  ;;  %v697_v56 = vld [vmem:[%s12678_s1 + $0x5a8] sm:$0xff] }
  0x7f   : > { %v664_v17 = vld [vmem:[%s12678_s1 + $0x4a0] sm:$0xff]  ;;  %v8436_v63 = vcombine.high %v693_v55, %v697_v56  ;;  %v705_v0 = vld [vmem:[%s12678_s1 + $0x5e8] sm:$0xff] }
  0x80   : > { %v8402_v23 = vcombine.high %v660_v15, %v664_v17  ;;  %v668_v24 = vld [vmem:[%s12678_s1 + $0x4c0] sm:$0xff]  ;;  %v9616_v1 = vld [vmem:[%s10700_s23 + $0x90] ss:$24 sps:$4 sm:$0xff]  }
  0x81   : > { %3001 = vmatpush1.bf16.msra.mxu0 %v8329_v19  ;;  %3220 = vmatpush1.bf16.msra.mxu1 %v8331_v20  ;;  %v661_v19 = vld [vmem:[%s12678_s1 + $0x488] sm:$0xff]  ;;  %v672_v26 = vld [vmem:[%s12678_s1 + $0x4e0] sm:$0xff] }
  0x82   : > { %3002 = vmatprep.subr.bf16.mxu0 %v8338_v21  ;;  %3221 = vmatprep.subr.bf16.mxu1 %v8340_v22  ;;  %v665_v20 = vld [vmem:[%s12678_s1 + $0x4a8] sm:$0xff]  ;;  %v8393_v21 = vcombine.low %v652_v8, %v656_v9  ;;  %v8395_v22 = vcombine.low %v653_v10, %v657_v11  ;;  %v8410_v32 = vcombine.high %v668_v24, %v672_v26  ;;  %v676_v33 = vld [vmem:[%s12678_s1 + $0x500] sm:$0xff] }
  0x83   : > { %v8404_v25 = vcombine.high %v661_v19, %v665_v20  ;;  %v8403_v31 = vcombine.low %v661_v19, %v665_v20  ;;  %v8409_v39 = vcombine.low %v668_v24, %v672_v26  ;;  %v684_v42 = vld [vmem:[%s12678_s1 + $0x540] sm:$0xff]  ;;  %v709_v8 = vld [vmem:[%s12678_s1 + $0x608] sm:$0xff] }
  0x84   : > { %v9613_v47 = vld [vmem:[%s10700_s23 + $0x60] ss:$24 sps:$4 sm:$0xff]   ;;  %v713_v9 = vld [vmem:[%s12678_s1 + $0x628] sm:$0xff] }
  0x85   : > { %3003 = vmatpush1.bf16.msra.mxu0 %v8337_v27  ;;  %3222 = vmatpush1.bf16.msra.mxu1 %v8339_v28  ;;  %v669_v27 = vld [vmem:[%s12678_s1 + $0x4c8] sm:$0xff]  ;;  %v8451_v20 = vcombine.low %v709_v8, %v713_v9 }
  0x86   : > { %3004 = vmatprep.subr.bf16.mxu0 %v8346_v29  ;;  %3223 = vmatprep.subr.bf16.mxu1 %v8348_v30  ;;  %v673_v28 = vld [vmem:[%s12678_s1 + $0x4e8] sm:$0xff]  ;;  %v8401_v30 = vcombine.low %v660_v15, %v664_v17  ;;  %v720_v15 = vld [vmem:[%s12678_s1 + $0x660] sm:$0xff]  ;;  %v8452_v17 = vcombine.high %v709_v8, %v713_v9 }
  0x87   : > { %v9610_v29 = vld [vmem:[%s10700_s23 + $0x30] ss:$24 sps:$4 sm:$0xff]   ;;  %v8412_v34 = vcombine.high %v669_v27, %v673_v28  ;;  %v8411_v40 = vcombine.low %v669_v27, %v673_v28  ;;  %v9619_v10 = vld [vmem:[%s10700_s23 + $0xc] ss:$24 sps:$4 sm:$0xff]  }
  0x88   : > { %v725_v24 = vld [vmem:[%s12678_s1 + $0x688] sm:$0xff] }
  0x89   : > { %3005 = vmatpush1.bf16.msra.mxu0 %v8345_v35  ;;  %3224 = vmatpush1.bf16.msra.mxu1 %v8347_v36  ;;  %v680_v35 = vld [vmem:[%s12678_s1 + $0x520] sm:$0xff]  ;;  %v729_v26 = vld [vmem:[%s12678_s1 + $0x6a8] sm:$0xff] }
  0x8a   : > { %3006 = vmatprep.subr.bf16.mxu0 %v8354_v37  ;;  %3225 = vmatprep.subr.bf16.mxu1 %v8356_v38  ;;  %v9611_v36 = vld [vmem:[%s10700_s23 + $0x64] ss:$24 sps:$4 sm:$0xff]   ;;  %v677_v37 = vld [vmem:[%s12678_s1 + $0x508] sm:$0xff]  ;;  %v8418_v41 = vcombine.high %v676_v33, %v680_v35  ;;  %v8417_v48 = vcombine.low %v676_v33, %v680_v35  ;;  %v8468_v33 = vcombine.high %v725_v24, %v729_v26 }
  0x8b   : > { %v681_v38 = vld [vmem:[%s12678_s1 + $0x528] sm:$0xff] }
  0x8c   : > { %v8419_v49 = vcombine.low %v677_v37, %v681_v38  ;;  %v773_v8 = vld [vmem:[%s12678_s1 + $0x808] sm:$0xff] }
  0x8d   : > { %3007 = vmatpush1.bf16.msra.mxu0 %v8353_v43  ;;  %3226 = vmatpush1.bf16.msra.mxu1 %v8355_v44  ;;  %v8420_v43 = vcombine.high %v677_v37, %v681_v38  ;;  %v688_v44 = vld [vmem:[%s12678_s1 + $0x560] sm:$0xff] }
  0x8e   : > { %3008 = vmatprep.subr.bf16.mxu0 %v8362_v45  ;;  %3227 = vmatprep.subr.bf16.mxu1 %v8364_v46  ;;  %v685_v45 = vld [vmem:[%s12678_s1 + $0x548] sm:$0xff]  ;;  %v8426_v50 = vcombine.high %v684_v42, %v688_v44  ;;  %v8425_v57 = vcombine.low %v684_v42, %v688_v44  ;;  %v740_v38 = vld [vmem:[%s12678_s1 + $0x700] sm:$0xff] }
  0x8f   : > { %v689_v46 = vld [vmem:[%s12678_s1 + $0x568] sm:$0xff] }
  0x90   : > { %v8427_v58 = vcombine.low %v685_v45, %v689_v46  ;;  %v745_v42 = vld [vmem:[%s12678_s1 + $0x728] sm:$0xff] }
  0x91   : > { %3009 = vmatpush1.bf16.msra.mxu0 %v8361_v51  ;;  %3228 = vmatpush1.bf16.msra.mxu1 %v8363_v52  ;;  %v692_v51 = vld [vmem:[%s12678_s1 + $0x580] sm:$0xff]  ;;  %v8428_v52 = vcombine.high %v685_v45, %v689_v46 }
  0x92   : > { %3010 = vmatprep.subr.bf16.mxu0 %v8370_v53  ;;  %3229 = vmatprep.subr.bf16.mxu1 %v8372_v54  ;;  %v696_v53 = vld [vmem:[%s12678_s1 + $0x5a0] sm:$0xff]  ;;  %v9614_v54 = vld [vmem:[%s10700_s23 + $0x94] ss:$24 sps:$4 sm:$0xff]  }
  0x93   : > { %v8433_v2 = vcombine.low %v692_v51, %v696_v53  ;;  %v748_v46 = vld [vmem:[%s12678_s1 + $0x740] sm:$0xff] }
  0x95   : > { %3011 = vmatpush1.bf16.msra.mxu0 %v8369_v59  ;;  %3230 = vmatpush1.bf16.msra.mxu1 %v8371_v60  ;;  %v8434_v59 = vcombine.high %v692_v51, %v696_v53  ;;  %v700_v60 = vld [vmem:[%s12678_s1 + $0x5c0] sm:$0xff] }
  0x96   : > { %3012 = vmatprep.subr.bf16.mxu0 %v8378_v61  ;;  %3231 = vmatprep.subr.bf16.mxu1 %v8380_v62  ;;  %v704_v61 = vld [vmem:[%s12678_s1 + $0x5e0] sm:$0xff]  ;;  %v701_v62 = vld [vmem:[%s12678_s1 + $0x5c8] sm:$0xff] }
  0x97   : > { %v8441_v11 = vcombine.low %v700_v60, %v704_v61 }
  0x99   : > { %3013 = vmatpush1.bf16.msra.mxu0 %v8377_v3  ;;  %3232 = vmatpush1.bf16.msra.mxu1 %v8379_v4  ;;  %v8435_v3 = vcombine.low %v693_v55, %v697_v56  ;;  %v8442_v4 = vcombine.high %v700_v60, %v704_v61  ;;  %v760_v55 = vld [vmem:[%s12678_s1 + $0x7a0] sm:$0xff]  ;;  %v757_v56 = vld [vmem:[%s12678_s1 + $0x788] sm:$0xff] }
  0x9a   : > { %3055 = vmatprep.subr.bf16.mxu0 %v8386_v5  ;;  %3274 = vmatprep.subr.bf16.mxu1 %v8388_v7  ;;  %v708_v5 = vld [vmem:[%s12678_s1 + $0x600] sm:$0xff]  ;;  %v8444_v7 = vcombine.high %v701_v62, %v705_v0 }
  0x9c   : > { %3015 = vmatmul.mubr.bf16.vlgmr.msra.gmra.mrb[0].mxu0 %v9607_v6  ;;  %3234 = vmatmul.mubr.bf16.vlgmr.msra.gmra.mrb[0].mxu1 %v9607_v6  ;;  %v712_v6 = vld [vmem:[%s12678_s1 + $0x620] sm:$0xff] }
  0x9d   : > { %3056 = vmatpush1.bf16.msra.mxu0 %v8385_v12  ;;  %3275 = vmatpush1.bf16.msra.mxu1 %v8387_v13  ;;  %v8443_v12 = vcombine.low %v701_v62, %v705_v0  ;;  %v8450_v13 = vcombine.high %v708_v5, %v712_v6  ;;  %v8449_v19 = vcombine.low %v708_v5, %v712_v6  ;;  %v764_v62 = vld [vmem:[%s12678_s1 + $0x7c0] sm:$0xff]  ;;  %v765_v0 = vld [vmem:[%s12678_s1 + $0x7c8] sm:$0xff] }
  0x9e   : > { %3057 = vmatprep.subr.bf16.mxu0 %v8394_v14  ;;  %3276 = vmatprep.subr.bf16.mxu1 %v8396_v16  ;;  %v716_v14 = vld [vmem:[%s12678_s1 + $0x640] sm:$0xff]  ;;  %v717_v16 = vld [vmem:[%s12678_s1 + $0x648] sm:$0xff] }
  0x9f   : > { %3024 = vmatprep.mubr.bf16.mxu0 %v9608_v18  ;;  %3243 = vmatprep.mubr.bf16.mxu1 %v9608_v18  ;;  %v721_v18 = vld [vmem:[%s12678_s1 + $0x668] sm:$0xff]  ;;  %v8457_v27 = vcombine.low %v716_v14, %v720_v15  ;;  %v772_v6 = vld [vmem:[%s12678_s1 + $0x800] sm:$0xff] }
  0xa0   : > { %v8459_v28 = vcombine.low %v717_v16, %v721_v18 }
  0xa1   : > { %3058 = vmatpush1.bf16.msra.mxu0 %v8393_v21  ;;  %3277 = vmatpush1.bf16.msra.mxu1 %v8395_v22  ;;  %v8458_v21 = vcombine.high %v716_v14, %v720_v15  ;;  %v724_v22 = vld [vmem:[%s12678_s1 + $0x680] sm:$0xff] }
  0xa2   : > { %3059 = vmatprep.subr.bf16.mxu0 %v8402_v23  ;;  %3278 = vmatprep.subr.bf16.mxu1 %v8404_v25  ;;  %v728_v23 = vld [vmem:[%s12678_s1 + $0x6a0] sm:$0xff]  ;;  %v8460_v25 = vcombine.high %v717_v16, %v721_v18 }
  0xa3   : > { %v8465_v35 = vcombine.low %v724_v22, %v728_v23  ;;  %v780_v15 = vld [vmem:[%s12678_s1 + $0x840] sm:$0xff] }
  0xa4   : > { %3025 = vmatmul.mubr.bf16.gmra.mrb[4].mxu0 %v9610_v29  ;;  %3244 = vmatmul.mubr.bf16.gmra.mrb[4].mxu1 %v9610_v29  ;;  %v8466_v29 = vcombine.high %v724_v22, %v728_v23  ;;  %v784_v16 = vld [vmem:[%s12678_s1 + $0x860] sm:$0xff] }
  0xa5   : > { %3060 = vmatpush1.bf16.msra.mxu0 %v8401_v30  ;;  %3279 = vmatpush1.bf16.msra.mxu1 %v8403_v31  ;;  %v732_v30 = vld [vmem:[%s12678_s1 + $0x6c0] sm:$0xff]  ;;  %v8522_v23 = vcombine.high %v780_v15, %v784_v16 }
  0xa6   : > { %3061 = vmatprep.subr.bf16.mxu0 %v8410_v32  ;;  %3280 = vmatprep.subr.bf16.mxu1 %v8412_v34  ;;  %v736_v31 = vld [vmem:[%s12678_s1 + $0x6e0] sm:$0xff]  ;;  %v733_v32 = vld [vmem:[%s12678_s1 + $0x6c8] sm:$0xff] }
  0xa7   : > { %3034 = vmatprep.mubr.bf16.mxu0 %v9611_v36  ;;  %3253 = vmatprep.mubr.bf16.mxu1 %v9611_v36  ;;  %v737_v34 = vld [vmem:[%s12678_s1 + $0x6e8] sm:$0xff]  ;;  %v8467_v36 = vcombine.low %v725_v24, %v729_v26  ;;  %v8474_v37 = vcombine.high %v732_v30, %v736_v31  ;;  %v792_v24 = vld [vmem:[%s12678_s1 + $0x8a0] sm:$0xff] }
  0xa8   : > { %v8475_v44 = vcombine.low %v733_v32, %v737_v34  ;;  %v793_v26 = vld [vmem:[%s12678_s1 + $0x8a8] sm:$0xff] }
  0xa9   : > { %3062 = vmatpush1.bf16.msra.mxu0 %v8409_v39  ;;  %3281 = vmatpush1.bf16.msra.mxu1 %v8411_v40  ;;  %v744_v39 = vld [vmem:[%s12678_s1 + $0x720] sm:$0xff]  ;;  %v741_v40 = vld [vmem:[%s12678_s1 + $0x708] sm:$0xff] }
  0xaa   : > { %3063 = vmatprep.subr.bf16.mxu0 %v8418_v41  ;;  %3282 = vmatprep.subr.bf16.mxu1 %v8420_v43  ;;  %v8476_v41 = vcombine.high %v733_v32, %v737_v34  ;;  %v8473_v43 = vcombine.low %v732_v30, %v736_v31  ;;  %v8482_v45 = vcombine.high %v740_v38, %v744_v39  ;;  %v796_v30 = vld [vmem:[%s12678_s1 + $0x8c0] sm:$0xff]  ;;  %v797_v34 = vld [vmem:[%s12678_s1 + $0x8c8] sm:$0xff] }
  0xab   : > { %v8481_v51 = vcombine.low %v740_v38, %v744_v39  ;;  %v804_v39 = vld [vmem:[%s12678_s1 + $0x900] sm:$0xff] }
  0xac   : > { %3035 = vmatmul.mubr.bf16.gmra.mrb[8].mxu0 %v9613_v47  ;;  %3254 = vmatmul.mubr.bf16.gmra.mrb[8].mxu1 %v9613_v47  ;;  %v752_v47 = vld [vmem:[%s12678_s1 + $0x760] sm:$0xff] }
  0xad   : > { %3064 = vmatpush1.bf16.msra.mxu0 %v8417_v48  ;;  %3283 = vmatpush1.bf16.msra.mxu1 %v8419_v49  ;;  %v749_v48 = vld [vmem:[%s12678_s1 + $0x748] sm:$0xff]  ;;  %v8484_v49 = vcombine.high %v741_v40, %v745_v42  ;;  %v8490_v53 = vcombine.high %v748_v46, %v752_v47 }
  0xae   : > { %3065 = vmatprep.subr.bf16.mxu0 %v8426_v50  ;;  %3284 = vmatprep.subr.bf16.mxu1 %v8428_v52  ;;  %v753_v50 = vld [vmem:[%s12678_s1 + $0x768] sm:$0xff]  ;;  %v8483_v52 = vcombine.low %v741_v40, %v745_v42  ;;  %v808_v42 = vld [vmem:[%s12678_s1 + $0x920] sm:$0xff] }
  0xaf   : > { %3044 = vmatprep.mubr.bf16.mxu0 %v9614_v54  ;;  %3263 = vmatprep.mubr.bf16.mxu1 %v9614_v54  ;;  %v756_v54 = vld [vmem:[%s12678_s1 + $0x780] sm:$0xff]  ;;  %v8491_v60 = vcombine.low %v749_v48, %v753_v50 }
  0xb0   : > { %v8498_v61 = vcombine.high %v756_v54, %v760_v55 }
  0xb1   : > { %3066 = vmatpush1.bf16.msra.mxu0 %v8425_v57  ;;  %3285 = vmatpush1.bf16.msra.mxu1 %v8427_v58  ;;  %v8492_v57 = vcombine.high %v749_v48, %v753_v50  ;;  %v761_v58 = vld [vmem:[%s12678_s1 + $0x7a8] sm:$0xff]  ;;  %v812_v48 = vld [vmem:[%s12678_s1 + $0x940] sm:$0xff]  ;;  %v8546_v50 = vcombine.high %v804_v39, %v808_v42 }
  0xb2   : > { %3067 = vmatprep.subr.bf16.mxu0 %v8434_v59  ;;  %3286 = vmatprep.subr.bf16.mxu1 %v8436_v63  ;;  %v8489_v59 = vcombine.low %v748_v46, %v752_v47  ;;  %v768_v63 = vld [vmem:[%s12678_s1 + $0x7e0] sm:$0xff] }
  0xb3   : > { %v8506_v5 = vcombine.high %v764_v62, %v768_v63  ;;  %v9623_v46 = vld [vmem:[%s10700_s23 + $0x6c] ss:$24 sps:$4 sm:$0xff]  }
  0xb4   : > { %3045 = vmatmul.mubr.bf16.gmra.mrb[12].mxu0 %v9616_v1  ;;  %3264 = vmatmul.mubr.bf16.gmra.mrb[12].mxu1 %v9616_v1  ;;  %v8500_v1 = vcombine.high %v757_v56, %v761_v58 }
  0xb5   : > { %3068 = vmatpush1.bf16.msra.mxu0 %v8433_v2  ;;  %3287 = vmatpush1.bf16.msra.mxu1 %v8435_v3  ;;  %v769_v2 = vld [vmem:[%s12678_s1 + $0x7e8] sm:$0xff]  ;;  %v8497_v3 = vcombine.low %v756_v54, %v760_v55 }
  0xb6   : > { %3069 = vmatprep.subr.bf16.mxu0 %v8442_v4  ;;  %3288 = vmatprep.subr.bf16.mxu1 %v8444_v7  ;;  %v8499_v4 = vcombine.low %v757_v56, %v761_v58  ;;  %v776_v7 = vld [vmem:[%s12678_s1 + $0x820] sm:$0xff]  ;;  %v8508_v9 = vcombine.high %v765_v0, %v769_v2  ;;  %v8545_v56 = vcombine.low %v804_v39, %v808_v42  ;;  %v865_v42 = vld [vmem:[%s12678_s1 + $0xae8] sm:$0xff] }
  0xb7   : > { %3087 = vmatprep.mubr.bf16.mxu0 %v9619_v10  ;;  %3306 = vmatprep.mubr.bf16.mxu1 %v9619_v10  ;;  %v777_v10 = vld [vmem:[%s12678_s1 + $0x828] sm:$0xff]  ;;  %v8514_v14 = vcombine.high %v772_v6, %v776_v7  ;;  %v864_v39 = vld [vmem:[%s12678_s1 + $0xae0] sm:$0xff] }
  0xb8   : > { %v8516_v18 = vcombine.high %v773_v8, %v777_v10  ;;  %v8515_v22 = vcombine.low %v773_v8, %v777_v10  ;;  %v9625_v55 = vld [vmem:[%s10700_s23 + $0x68] ss:$24 sps:$4 sm:$0xff]  }
  0xb9   : > { %3070 = vmatpush1.bf16.msra.mxu0 %v8441_v11  ;;  %3289 = vmatpush1.bf16.msra.mxu1 %v8443_v12  ;;  %v8505_v11 = vcombine.low %v764_v62, %v768_v63  ;;  %v8507_v12 = vcombine.low %v765_v0, %v769_v2  ;;  %v825_v62 = vld [vmem:[%s12678_s1 + $0x9a8] sm:$0xff]  ;;  %v9626_v0 = vld [vmem:[%s10700_s23 + $0x9c] ss:$24 sps:$4 sm:$0xff]   ;;  %v828_v2 = vld [vmem:[%s12678_s1 + $0x9c0] sm:$0xff] }
  0xba   : > { %3071 = vmatprep.subr.bf16.mxu0 %v8450_v13  ;;  %3290 = vmatprep.subr.bf16.mxu1 %v8452_v17  ;;  %v9617_v13 = vld [vmem:[%s10700_s23 + $0x8] ss:$24 sps:$4 sm:$0xff]  }
  0xbb   : > { %v781_v17 = vld [vmem:[%s12678_s1 + $0x848] sm:$0xff] }
  0xbd   : > { %3072 = vmatpush1.bf16.msra.mxu0 %v8449_v19  ;;  %3291 = vmatpush1.bf16.msra.mxu1 %v8451_v20  ;;  %v785_v19 = vld [vmem:[%s12678_s1 + $0x868] sm:$0xff]  ;;  %v8513_v20 = vcombine.low %v772_v6, %v776_v7 }
  0xbe   : > { %3073 = vmatprep.subr.bf16.mxu0 %v8458_v21  ;;  %3292 = vmatprep.subr.bf16.mxu1 %v8460_v25  ;;  %v788_v21 = vld [vmem:[%s12678_s1 + $0x880] sm:$0xff]  ;;  %v789_v25 = vld [vmem:[%s12678_s1 + $0x888] sm:$0xff]  ;;  %v8523_v31 = vcombine.low %v781_v17, %v785_v19 }
  0xbf   : > { %v8530_v32 = vcombine.high %v788_v21, %v792_v24  ;;  %v8529_v38 = vcombine.low %v788_v21, %v792_v24  ;;  %v8531_v40 = vcombine.low %v789_v25, %v793_v26  ;;  %v829_v6 = vld [vmem:[%s12678_s1 + $0x9c8] sm:$0xff] }
  0xc0   : > { %v833_v7 = vld [vmem:[%s12678_s1 + $0x9e8] sm:$0xff] }
  0xc1   : > { %3074 = vmatpush1.bf16.msra.mxu0 %v8457_v27  ;;  %3293 = vmatpush1.bf16.msra.mxu1 %v8459_v28  ;;  %v8524_v27 = vcombine.high %v781_v17, %v785_v19  ;;  %v9620_v28 = vld [vmem:[%s10700_s23 + $0x3c] ss:$24 sps:$4 sm:$0xff]   ;;  %v8572_v17 = vcombine.high %v829_v6, %v833_v7  ;;  %v845_v24 = vld [vmem:[%s12678_s1 + $0xa48] sm:$0xff] }
  0xc2   : > { %3075 = vmatprep.subr.bf16.mxu0 %v8466_v29  ;;  %3294 = vmatprep.subr.bf16.mxu1 %v8468_v33  ;;  %v8521_v29 = vcombine.low %v780_v15, %v784_v16  ;;  %v800_v33 = vld [vmem:[%s12678_s1 + $0x8e0] sm:$0xff]  ;;  %v837_v15 = vld [vmem:[%s12678_s1 + $0xa08] sm:$0xff] }
  0xc3   : > { %v8537_v47 = vcombine.low %v796_v30, %v800_v33  ;;  %v841_v16 = vld [vmem:[%s12678_s1 + $0xa28] sm:$0xff] }
  0xc5   : > { %3076 = vmatpush1.bf16.msra.mxu0 %v8465_v35  ;;  %3295 = vmatpush1.bf16.msra.mxu1 %v8467_v36  ;;  %v801_v35 = vld [vmem:[%s12678_s1 + $0x8e8] sm:$0xff]  ;;  %v8532_v36 = vcombine.high %v789_v25, %v793_v26  ;;  %v8580_v25 = vcombine.high %v837_v15, %v841_v16 }
  0xc6   : > { %3077 = vmatprep.subr.bf16.mxu0 %v8474_v37  ;;  %3296 = vmatprep.subr.bf16.mxu1 %v8476_v41  ;;  %v9622_v37 = vld [vmem:[%s10700_s23 + $0x38] ss:$24 sps:$4 sm:$0xff]   ;;  %v8538_v41 = vcombine.high %v796_v30, %v800_v33  ;;  %v849_v26 = vld [vmem:[%s12678_s1 + $0xa68] sm:$0xff]  ;;  %v852_v30 = vld [vmem:[%s12678_s1 + $0xa80] sm:$0xff] }
  0xc7   : > { %v8588_v33 = vcombine.high %v845_v24, %v849_v26 }
  0xc9   : > { %3078 = vmatpush1.bf16.msra.mxu0 %v8473_v43  ;;  %3297 = vmatpush1.bf16.msra.mxu1 %v8475_v44  ;;  %v805_v43 = vld [vmem:[%s12678_s1 + $0x908] sm:$0xff] }
  0xca   : > { %3079 = vmatprep.subr.bf16.mxu0 %v8482_v45  ;;  %3298 = vmatprep.subr.bf16.mxu1 %v8484_v49  ;;  %v809_v44 = vld [vmem:[%s12678_s1 + $0x928] sm:$0xff]  ;;  %v8540_v45 = vcombine.high %v797_v34, %v801_v35  ;;  %v8539_v49 = vcombine.low %v797_v34, %v801_v35 }
  0xcb   : > { %v8548_v54 = vcombine.high %v805_v43, %v809_v44  ;;  %v8547_v58 = vcombine.low %v805_v43, %v809_v44  ;;  %v857_v34 = vld [vmem:[%s12678_s1 + $0xaa8] sm:$0xff] }
  0xcd   : > { %3080 = vmatpush1.bf16.msra.mxu0 %v8481_v51  ;;  %3299 = vmatpush1.bf16.msra.mxu1 %v8483_v52  ;;  %v816_v51 = vld [vmem:[%s12678_s1 + $0x960] sm:$0xff]  ;;  %v813_v52 = vld [vmem:[%s12678_s1 + $0x948] sm:$0xff] }
  0xce   : > { %3081 = vmatprep.subr.bf16.mxu0 %v8490_v53  ;;  %3300 = vmatprep.subr.bf16.mxu1 %v8492_v57  ;;  %v817_v53 = vld [vmem:[%s12678_s1 + $0x968] sm:$0xff]  ;;  %v820_v57 = vld [vmem:[%s12678_s1 + $0x980] sm:$0xff] }
  0xcf   : > { %v8556_v63 = vcombine.high %v813_v52, %v817_v53 }
  0xd1   : > { %3082 = vmatpush1.bf16.msra.mxu0 %v8489_v59  ;;  %3301 = vmatpush1.bf16.msra.mxu1 %v8491_v60  ;;  %v8554_v59 = vcombine.high %v812_v48, %v816_v51  ;;  %v824_v60 = vld [vmem:[%s12678_s1 + $0x9a0] sm:$0xff] }
  0xd2   : > { %3083 = vmatprep.subr.bf16.mxu0 %v8498_v61  ;;  %3302 = vmatprep.subr.bf16.mxu1 %v8500_v1  ;;  %v821_v61 = vld [vmem:[%s12678_s1 + $0x988] sm:$0xff]  ;;  %v8553_v1 = vcombine.low %v812_v48, %v816_v51  ;;  %v8561_v10 = vcombine.low %v820_v57, %v824_v60 }
  0xd3   : > { %v8564_v8 = vcombine.high %v821_v61, %v825_v62  ;;  %v869_v48 = vld [vmem:[%s12678_s1 + $0xb08] sm:$0xff] }
  0xd5   : > { %3084 = vmatpush1.bf16.msra.mxu0 %v8497_v3  ;;  %3303 = vmatpush1.bf16.msra.mxu1 %v8499_v4  ;;  %v8555_v3 = vcombine.low %v813_v52, %v817_v53  ;;  %v8562_v4 = vcombine.high %v820_v57, %v824_v60 }
  0xd6   : > { %3085 = vmatprep.subr.bf16.mxu0 %v8506_v5  ;;  %3304 = vmatprep.subr.bf16.mxu1 %v8508_v9  ;;  %v832_v5 = vld [vmem:[%s12678_s1 + $0x9e0] sm:$0xff]  ;;  %v9628_v9 = vld [vmem:[%s10700_s23 + $0x98] ss:$24 sps:$4 sm:$0xff]  }
  0xd7   : > { %v8569_v19 = vcombine.low %v828_v2, %v832_v5 }
  0xd9   : > { %3086 = vmatpush1.bf16.msra.mxu0 %v8505_v11  ;;  %3305 = vmatpush1.bf16.msra.mxu1 %v8507_v12  ;;  %v836_v11 = vld [vmem:[%s12678_s1 + $0xa00] sm:$0xff]  ;;  %v8563_v12 = vcombine.low %v821_v61, %v825_v62 }
  0xda   : > { %3128 = vmatprep.subr.bf16.mxu0 %v8514_v14  ;;  %3347 = vmatprep.subr.bf16.mxu1 %v8516_v18  ;;  %v840_v14 = vld [vmem:[%s12678_s1 + $0xa20] sm:$0xff]  ;;  %v9631_v18 = vld [vmem:[%s10700_s23 + $0x14] ss:$24 sps:$4 sm:$0xff]  }
  0xdb   : > { %v8578_v21 = vcombine.high %v836_v11, %v840_v14  ;;  %v884_v62 = vld [vmem:[%s12678_s1 + $0xb80] sm:$0xff] }
  0xdc   : > { %3088 = vmatmul.mubr.bf16.vlgmr.msra.gmra.mrb[0].mxu0 %v9617_v13  ;;  %3307 = vmatmul.mubr.bf16.vlgmr.msra.gmra.mrb[0].mxu1 %v9617_v13  ;;  %v8570_v13 = vcombine.high %v828_v2, %v832_v5  ;;  %v889_v2 = vld [vmem:[%s12678_s1 + $0xba8] sm:$0xff] }
  0xdd   : > { %3129 = vmatpush1.bf16.msra.mxu0 %v8513_v20  ;;  %3348 = vmatpush1.bf16.msra.mxu1 %v8515_v22  ;;  %v8571_v20 = vcombine.low %v829_v6, %v833_v7  ;;  %v844_v22 = vld [vmem:[%s12678_s1 + $0xa40] sm:$0xff] }
  0xde   : > { %3130 = vmatprep.subr.bf16.mxu0 %v8522_v23  ;;  %3349 = vmatprep.subr.bf16.mxu1 %v8524_v27  ;;  %v848_v23 = vld [vmem:[%s12678_s1 + $0xa60] sm:$0xff]  ;;  %v8577_v27 = vcombine.low %v836_v11, %v840_v14  ;;  %v518_v14 = vld [vmem:[%s12678_s1 + $0x10] sm:$0xff] }
  0xdf   : > { %3097 = vmatprep.mubr.bf16.mxu0 %v9620_v28  ;;  %3316 = vmatprep.mubr.bf16.mxu1 %v9620_v28  ;;  %v8579_v28 = vcombine.low %v837_v15, %v841_v16  ;;  %v8585_v35 = vcombine.low %v844_v22, %v848_v23  ;;  %v892_v6 = vld [vmem:[%s12678_s1 + $0xbc0] sm:$0xff]  ;;  %v522_v15 = vld [vmem:[%s12678_s1 + $0x30] sm:$0xff]  ;;  %v519_v16 = vld [vmem:[%s12678_s1 + $0x18] sm:$0xff] }
  0xe0   : > { %v896_v7 = vld [vmem:[%s12678_s1 + $0xbe0] sm:$0xff] }
  0xe1   : > { %3131 = vmatpush1.bf16.msra.mxu0 %v8521_v29  ;;  %3350 = vmatpush1.bf16.msra.mxu1 %v8523_v31  ;;  %v8586_v29 = vcombine.high %v844_v22, %v848_v23  ;;  %v856_v31 = vld [vmem:[%s12678_s1 + $0xaa0] sm:$0xff]  ;;  %v8262_v22 = vcombine.high %v518_v14, %v522_v15  ;;  %v526_v23 = vld [vmem:[%s12678_s1 + $0x50] sm:$0xff] }
  0xe2   : > { %3132 = vmatprep.subr.bf16.mxu0 %v8530_v32  ;;  %3351 = vmatprep.subr.bf16.mxu1 %v8532_v36  ;;  %v853_v32 = vld [vmem:[%s12678_s1 + $0xa88] sm:$0xff]  ;;  %v8587_v36 = vcombine.low %v845_v24, %v849_v26  ;;  %v8593_v43 = vcombine.low %v852_v30, %v856_v31  ;;  %v530_v24 = vld [vmem:[%s12678_s1 + $0x70] sm:$0xff] }
  0xe3   : > { %v8595_v44 = vcombine.low %v853_v32, %v857_v34 }
  0xe4   : > { %3098 = vmatmul.mubr.bf16.gmra.mrb[4].mxu0 %v9622_v37  ;;  %3317 = vmatmul.mubr.bf16.gmra.mrb[4].mxu1 %v9622_v37  ;;  %v8594_v37 = vcombine.high %v852_v30, %v856_v31  ;;  %v8270_v31 = vcombine.high %v526_v23, %v530_v24 }
  0xe5   : > { %3133 = vmatpush1.bf16.msra.mxu0 %v8529_v38  ;;  %3352 = vmatpush1.bf16.msra.mxu1 %v8531_v40  ;;  %v860_v38 = vld [vmem:[%s12678_s1 + $0xac0] sm:$0xff]  ;;  %v861_v40 = vld [vmem:[%s12678_s1 + $0xac8] sm:$0xff] }
  0xe6   : > { %3134 = vmatprep.subr.bf16.mxu0 %v8538_v41  ;;  %3353 = vmatprep.subr.bf16.mxu1 %v8540_v45  ;;  %v8596_v41 = vcombine.high %v853_v32, %v857_v34  ;;  %v8602_v45 = vcombine.high %v860_v38, %v864_v39  ;;  %v8601_v51 = vcombine.low %v860_v38, %v864_v39  ;;  %v534_v32 = vld [vmem:[%s12678_s1 + $0x90] sm:$0xff]  ;;  %v535_v34 = vld [vmem:[%s12678_s1 + $0x98] sm:$0xff] }
  0xe7   : > { %3107 = vmatprep.mubr.bf16.mxu0 %v9623_v46  ;;  %3326 = vmatprep.mubr.bf16.mxu1 %v9623_v46  ;;  %v868_v46 = vld [vmem:[%s12678_s1 + $0xb00] sm:$0xff]  ;;  %v8603_v52 = vcombine.low %v861_v40, %v865_v42 }
  0xe8   : > { %v9634_v39 = vld [vmem:[%s10700_s23 + $0x40] ss:$24 sps:$4 sm:$0xff]  }
  0xe9   : > { %3135 = vmatpush1.bf16.msra.mxu0 %v8537_v47  ;;  %3354 = vmatpush1.bf16.msra.mxu1 %v8539_v49  ;;  %v872_v47 = vld [vmem:[%s12678_s1 + $0xb20] sm:$0xff]  ;;  %v8604_v49 = vcombine.high %v861_v40, %v865_v42  ;;  %v546_v42 = vld [vmem:[%s12678_s1 + $0xf0] sm:$0xff] }
  0xea   : > { %3136 = vmatprep.subr.bf16.mxu0 %v8546_v50  ;;  %3355 = vmatprep.subr.bf16.mxu1 %v8548_v54  ;;  %v873_v50 = vld [vmem:[%s12678_s1 + $0xb28] sm:$0xff]  ;;  %v8610_v53 = vcombine.high %v868_v46, %v872_v47  ;;  %v876_v54 = vld [vmem:[%s12678_s1 + $0xb40] sm:$0xff] }
  0xeb   : > { %v8612_v57 = vcombine.high %v869_v48, %v873_v50  ;;  %v8611_v60 = vcombine.low %v869_v48, %v873_v50  ;;  %v550_v50 = vld [vmem:[%s12678_s1 + $0x110] sm:$0xff] }
  0xec   : > { %3108 = vmatmul.mubr.bf16.gmra.mrb[8].mxu0 %v9625_v55  ;;  %3327 = vmatmul.mubr.bf16.gmra.mrb[8].mxu1 %v9625_v55  ;;  %v880_v55 = vld [vmem:[%s12678_s1 + $0xb60] sm:$0xff] }
  0xed   : > { %3137 = vmatpush1.bf16.msra.mxu0 %v8545_v56  ;;  %3356 = vmatpush1.bf16.msra.mxu1 %v8547_v58  ;;  %v877_v56 = vld [vmem:[%s12678_s1 + $0xb48] sm:$0xff]  ;;  %v8618_v61 = vcombine.high %v876_v54, %v880_v55 }
  0xee   : > { %3138 = vmatprep.subr.bf16.mxu0 %v8554_v59  ;;  %3357 = vmatprep.subr.bf16.mxu1 %v8556_v63  ;;  %v881_v58 = vld [vmem:[%s12678_s1 + $0xb68] sm:$0xff]  ;;  %v8609_v59 = vcombine.low %v868_v46, %v872_v47  ;;  %v888_v63 = vld [vmem:[%s12678_s1 + $0xba0] sm:$0xff] }
  0xef   : > { %3117 = vmatprep.mubr.bf16.mxu0 %v9626_v0  ;;  %3336 = vmatprep.mubr.bf16.mxu1 %v9626_v0  ;;  %v885_v0 = vld [vmem:[%s12678_s1 + $0xb88] sm:$0xff]  ;;  %v8626_v5 = vcombine.high %v884_v62, %v888_v63  ;;  %v8625_v11 = vcombine.low %v884_v62, %v888_v63  ;;  %v563_v63 = vld [vmem:[%s12678_s1 + $0x178] sm:$0xff] }
  0xf0   : > { %v9635_v47 = vld [vmem:[%s10700_s23 + $0x74] ss:$24 sps:$4 sm:$0xff]  }
  0xf1   : > { %3139 = vmatpush1.bf16.msra.mxu0 %v8553_v1  ;;  %3358 = vmatpush1.bf16.msra.mxu1 %v8555_v3  ;;  %v8620_v1 = vcombine.high %v877_v56, %v881_v58  ;;  %v8617_v3 = vcombine.low %v876_v54, %v880_v55  ;;  %v555_v54 = vld [vmem:[%s12678_s1 + $0x138] sm:$0xff] }
  0xf2   : > { %3140 = vmatprep.subr.bf16.mxu0 %v8562_v4  ;;  %3359 = vmatprep.subr.bf16.mxu1 %v8564_v8  ;;  %v8619_v4 = vcombine.low %v877_v56, %v881_v58  ;;  %v893_v8 = vld [vmem:[%s12678_s1 + $0xbc8] sm:$0xff] }
  0xf4   : > { %3118 = vmatmul.mubr.bf16.gmra.mrb[12].mxu0 %v9628_v9  ;;  %3337 = vmatmul.mubr.bf16.gmra.mrb[12].mxu1 %v9628_v9  ;;  %v8628_v9 = vcombine.high %v885_v0, %v889_v2 }
  0xf5   : > { %3141 = vmatpush1.bf16.msra.mxu0 %v8561_v10  ;;  %3360 = vmatpush1.bf16.msra.mxu1 %v8563_v12  ;;  %v897_v10 = vld [vmem:[%s12678_s1 + $0xbe8] sm:$0xff]  ;;  %v8627_v12 = vcombine.low %v885_v0, %v889_v2 }
  0xf6   : > { %3142 = vmatprep.subr.bf16.mxu0 %v8570_v13  ;;  %3361 = vmatprep.subr.bf16.mxu1 %v8572_v17  ;;  %v8634_v13 = vcombine.high %v892_v6, %v896_v7  ;;  %v8636_v17 = vcombine.high %v893_v8, %v897_v10 }
  0xf7   : > { %3160 = vmatprep.mubr.bf16.mxu0 %v9631_v18  ;;  %3379 = vmatprep.mubr.bf16.mxu1 %v9631_v18  ;;  %v523_v18 = vld [vmem:[%s12678_s1 + $0x38] sm:$0xff] }
  0xf8   : > { %v8264_v26 = vcombine.high %v519_v16, %v523_v18  ;;  %v8263_v30 = vcombine.low %v519_v16, %v523_v18 }
  0xf9   : > { %3143 = vmatpush1.bf16.msra.mxu0 %v8569_v19  ;;  %3362 = vmatpush1.bf16.msra.mxu1 %v8571_v20  ;;  %v8633_v19 = vcombine.low %v892_v6, %v896_v7  ;;  %v8635_v20 = vcombine.low %v893_v8, %v897_v10  ;;  %v567_v6 = vld [vmem:[%s12678_s1 + $0x198] sm:$0xff] }
  0xfa   : > { %3144 = vmatprep.subr.bf16.mxu0 %v8578_v21  ;;  %3363 = vmatprep.subr.bf16.mxu1 %v8580_v25  ;;  %v9629_v21 = vld [vmem:[%s10700_s23 + $0x10] ss:$24 sps:$4 sm:$0xff]   ;;  %v527_v25 = vld [vmem:[%s12678_s1 + $0x58] sm:$0xff] }
  0xfb   : > { %v571_v8 = vld [vmem:[%s12678_s1 + $0x1b8] sm:$0xff] }
  0xfc   : > { %v8312_v16 = vcombine.high %v567_v6, %v571_v8 }
  0xfd   : > { %3145 = vmatpush1.bf16.msra.mxu0 %v8577_v27  ;;  %3364 = vmatpush1.bf16.msra.mxu1 %v8579_v28  ;;  %v531_v27 = vld [vmem:[%s12678_s1 + $0x78] sm:$0xff]  ;;  %v8261_v28 = vcombine.low %v518_v14, %v522_v15  ;;  %v578_v14 = vld [vmem:[%s12678_s1 + $0x1f0] sm:$0xff] }
  0xfe   : > { %3146 = vmatprep.subr.bf16.mxu0 %v8586_v29  ;;  %3365 = vmatprep.subr.bf16.mxu1 %v8588_v33  ;;  %v9632_v29 = vld [vmem:[%s10700_s23 + $0x44] ss:$24 sps:$4 sm:$0xff]   ;;  %v538_v33 = vld [vmem:[%s12678_s1 + $0xb0] sm:$0xff]  ;;  %v8271_v38 = vcombine.low %v527_v25, %v531_v27 }
  0xff   : > { %v8278_v40 = vcombine.high %v534_v32, %v538_v33  ;;  %v8277_v46 = vcombine.low %v534_v32, %v538_v33  ;;  %v575_v15 = vld [vmem:[%s12678_s1 + $0x1d8] sm:$0xff] }
 0x100   : > { %v595_v33 = vld [vmem:[%s12678_s1 + $0x278] sm:$0xff] }
 0x101   : > { %3147 = vmatpush1.bf16.msra.mxu0 %v8585_v35  ;;  %3366 = vmatpush1.bf16.msra.mxu1 %v8587_v36  ;;  %v8272_v35 = vcombine.high %v527_v25, %v531_v27  ;;  %v539_v36 = vld [vmem:[%s12678_s1 + $0xb8] sm:$0xff] }
 0x102   : > { %3148 = vmatprep.subr.bf16.mxu0 %v8594_v37  ;;  %3367 = vmatprep.subr.bf16.mxu1 %v8596_v41  ;;  %v8269_v37 = vcombine.low %v526_v23, %v530_v24  ;;  %v542_v41 = vld [vmem:[%s12678_s1 + $0xd0] sm:$0xff]  ;;  %v8279_v48 = vcombine.low %v535_v34, %v539_v36  ;;  %v583_v23 = vld [vmem:[%s12678_s1 + $0x218] sm:$0xff] }
 0x103   : > { %v8285_v55 = vcombine.low %v542_v41, %v546_v42  ;;  %v587_v25 = vld [vmem:[%s12678_s1 + $0x238] sm:$0xff] }
 0x104   : > { %v8328_v32 = vcombine.high %v583_v23, %v587_v25 }
 0x105   : > { %3149 = vmatpush1.bf16.msra.mxu0 %v8593_v43  ;;  %3368 = vmatpush1.bf16.msra.mxu1 %v8595_v44  ;;  %v543_v43 = vld [vmem:[%s12678_s1 + $0xd8] sm:$0xff]  ;;  %v8280_v44 = vcombine.high %v535_v34, %v539_v36  ;;  %v8327_v36 = vcombine.low %v583_v23, %v587_v25  ;;  %v650_v23 = vld [vmem:[%s12678_s1 + $0x430] sm:$0xff] }
 0x106   : > { %3150 = vmatprep.subr.bf16.mxu0 %v8602_v45  ;;  %3369 = vmatprep.subr.bf16.mxu1 %v8604_v49  ;;  %v547_v45 = vld [vmem:[%s12678_s1 + $0xf8] sm:$0xff]  ;;  %v8286_v49 = vcombine.high %v542_v41, %v546_v42 }
 0x107   : > { %v8287_v56 = vcombine.low %v543_v43, %v547_v45  ;;  %v10289_v34 = vld [vmem:[%s10700_s23 + $0x4] ss:$24 sps:$4 sm:$0xff]  }
 0x108   : > { %v603_v42 = vld [vmem:[%s12678_s1 + $0x2b8] sm:$0xff] }
 0x109   : > { %3151 = vmatpush1.bf16.msra.mxu0 %v8601_v51  ;;  %3370 = vmatpush1.bf16.msra.mxu1 %v8603_v52  ;;  %v554_v51 = vld [vmem:[%s12678_s1 + $0x130] sm:$0xff]  ;;  %v551_v52 = vld [vmem:[%s12678_s1 + $0x118] sm:$0xff] }
 0x10a   : > { %3152 = vmatprep.subr.bf16.mxu0 %v8610_v53  ;;  %3371 = vmatprep.subr.bf16.mxu1 %v8612_v57  ;;  %v8288_v53 = vcombine.high %v543_v43, %v547_v45  ;;  %v9637_v57 = vld [vmem:[%s10700_s23 + $0x70] ss:$24 sps:$4 sm:$0xff]   ;;  %v8294_v58 = vcombine.high %v550_v50, %v554_v51  ;;  %v8296_v62 = vcombine.high %v551_v52, %v555_v54 }
 0x10b   : > { %v8293_v0 = vcombine.low %v550_v50, %v554_v51  ;;  %v8295_v2 = vcombine.low %v551_v52, %v555_v54  ;;  %v611_v50 = vld [vmem:[%s12678_s1 + $0x2f8] sm:$0xff]  ;;  %v614_v54 = vld [vmem:[%s12678_s1 + $0x310] sm:$0xff] }
 0x10d   : > { %3153 = vmatpush1.bf16.msra.mxu0 %v8609_v59  ;;  %3372 = vmatpush1.bf16.msra.mxu1 %v8611_v60  ;;  %v558_v59 = vld [vmem:[%s12678_s1 + $0x150] sm:$0xff] }
 0x10e   : > { %3154 = vmatprep.subr.bf16.mxu0 %v8618_v61  ;;  %3373 = vmatprep.subr.bf16.mxu1 %v8620_v1  ;;  %v562_v60 = vld [vmem:[%s12678_s1 + $0x170] sm:$0xff]  ;;  %v559_v61 = vld [vmem:[%s12678_s1 + $0x158] sm:$0xff] }
 0x10f   : > { %v9638_v1 = vld [vmem:[%s10700_s23 + $0xa4] ss:$24 sps:$4 sm:$0xff]   ;;  %v8304_v7 = vcombine.high %v559_v61, %v563_v63  ;;  %v8303_v10 = vcombine.low %v559_v61, %v563_v63  ;;  %v626_v63 = vld [vmem:[%s12678_s1 + $0x370] sm:$0xff] }
 0x111   : > { %3155 = vmatpush1.bf16.msra.mxu0 %v8617_v3  ;;  %3374 = vmatpush1.bf16.msra.mxu1 %v8619_v4  ;;  %v8302_v3 = vcombine.high %v558_v59, %v562_v60  ;;  %v566_v4 = vld [vmem:[%s12678_s1 + $0x190] sm:$0xff] }
 0x112   : > { %3156 = vmatprep.subr.bf16.mxu0 %v8626_v5  ;;  %3375 = vmatprep.subr.bf16.mxu1 %v8628_v9  ;;  %v570_v5 = vld [vmem:[%s12678_s1 + $0x1b0] sm:$0xff]  ;;  %v8301_v9 = vcombine.low %v558_v59, %v562_v60 }
 0x113   : > { %v8309_v18 = vcombine.low %v566_v4, %v570_v5 }
 0x115   : > { %3157 = vmatpush1.bf16.msra.mxu0 %v8625_v11  ;;  %3376 = vmatpush1.bf16.msra.mxu1 %v8627_v12  ;;  %v9640_v11 = vld [vmem:[%s10700_s23 + $0xa0] ss:$24 sps:$4 sm:$0xff]   ;;  %v8310_v12 = vcombine.high %v566_v4, %v570_v5 }
 0x116   : > { %3158 = vmatprep.subr.bf16.mxu0 %v8634_v13  ;;  %3377 = vmatprep.subr.bf16.mxu1 %v8636_v17  ;;  %v574_v13 = vld [vmem:[%s12678_s1 + $0x1d0] sm:$0xff]  ;;  %v579_v17 = vld [vmem:[%s12678_s1 + $0x1f8] sm:$0xff] }
 0x117   : > { %v8320_v24 = vcombine.high %v575_v15, %v579_v17  ;;  %v8319_v27 = vcombine.low %v575_v15, %v579_v17  ;;  %v642_v15 = vld [vmem:[%s12678_s1 + $0x3f0] sm:$0xff] }
 0x119   : > { %3159 = vmatpush1.bf16.msra.mxu0 %v8633_v19  ;;  %3378 = vmatpush1.bf16.msra.mxu1 %v8635_v20  ;;  %v8311_v19 = vcombine.low %v567_v6, %v571_v8  ;;  %v8318_v20 = vcombine.high %v574_v13, %v578_v14  ;;  %v630_v6 = vld [vmem:[%s12678_s1 + $0x390] sm:$0xff]  ;;  %v631_v8 = vld [vmem:[%s12678_s1 + $0x398] sm:$0xff] }
 0x11a   : > { %3420 = vmatprep.subr.bf16.mxu0 %v8262_v22  ;;  %3639 = vmatprep.subr.bf16.mxu1 %v8264_v26  ;;  %v586_v22 = vld [vmem:[%s12678_s1 + $0x230] sm:$0xff]  ;;  %v8317_v26 = vcombine.low %v574_v13, %v578_v14 }
 0x11b   : > { %v638_v14 = vld [vmem:[%s12678_s1 + $0x3d0] sm:$0xff] }
 0x11c   : > { %3161 = vmatmul.mubr.bf16.vlgmr.msra.gmra.mrb[0].mxu0 %v9629_v21  ;;  %3380 = vmatmul.mubr.bf16.vlgmr.msra.gmra.mrb[0].mxu1 %v9629_v21  ;;  %v582_v21 = vld [vmem:[%s12678_s1 + $0x210] sm:$0xff] }
 0x11d   : > { %3421 = vmatpush1.bf16.msra.mxu0 %v8261_v28  ;;  %3640 = vmatpush1.bf16.msra.mxu1 %v8263_v30  ;;  %v8326_v28 = vcombine.high %v582_v21, %v586_v22  ;;  %v594_v30 = vld [vmem:[%s12678_s1 + $0x270] sm:$0xff] }
 0x11e   : > { %3422 = vmatprep.subr.bf16.mxu0 %v8270_v31  ;;  %3641 = vmatprep.subr.bf16.mxu1 %v8272_v35  ;;  %v591_v31 = vld [vmem:[%s12678_s1 + $0x258] sm:$0xff]  ;;  %v8325_v35 = vcombine.low %v582_v21, %v586_v22  ;;  %v8382_v21 = vcombine.high %v638_v14, %v642_v15  ;;  %v646_v22 = vld [vmem:[%s12678_s1 + $0x410] sm:$0xff] }
 0x11f   : > { %3170 = vmatprep.mubr.bf16.mxu0 %v9632_v29  ;;  %3389 = vmatprep.mubr.bf16.mxu1 %v9632_v29  ;;  %v590_v29 = vld [vmem:[%s12678_s1 + $0x250] sm:$0xff]  ;;  %v8336_v41 = vcombine.high %v591_v31, %v595_v33 }
 0x120   : > { %v8333_v43 = vcombine.low %v590_v29, %v594_v30 }
 0x121   : > { %3423 = vmatpush1.bf16.msra.mxu0 %v8269_v37  ;;  %3642 = vmatpush1.bf16.msra.mxu1 %v8271_v38  ;;  %v8334_v37 = vcombine.high %v590_v29, %v594_v30  ;;  %v598_v38 = vld [vmem:[%s12678_s1 + $0x290] sm:$0xff]  ;;  %v8390_v29 = vcombine.high %v646_v22, %v650_v23 }
 0x122   : > { %3424 = vmatprep.subr.bf16.mxu0 %v8278_v40  ;;  %3643 = vmatprep.subr.bf16.mxu1 %v8280_v44  ;;  %v599_v40 = vld [vmem:[%s12678_s1 + $0x298] sm:$0xff]  ;;  %v8335_v44 = vcombine.low %v591_v31, %v595_v33  ;;  %v654_v30 = vld [vmem:[%s12678_s1 + $0x450] sm:$0xff] }
 0x123   : > { %v8343_v52 = vcombine.low %v599_v40, %v603_v42  ;;  %v658_v31 = vld [vmem:[%s12678_s1 + $0x470] sm:$0xff] }
 0x124   : > { %3171 = vmatmul.mubr.bf16.gmra.mrb[4].mxu0 %v9634_v39  ;;  %3390 = vmatmul.mubr.bf16.gmra.mrb[4].mxu1 %v9634_v39  ;;  %v602_v39 = vld [vmem:[%s12678_s1 + $0x2b0] sm:$0xff] }
 0x125   : > { %3425 = vmatpush1.bf16.msra.mxu0 %v8277_v46  ;;  %3644 = vmatpush1.bf16.msra.mxu1 %v8279_v48  ;;  %v8342_v45 = vcombine.high %v598_v38, %v602_v39  ;;  %v606_v46 = vld [vmem:[%s12678_s1 + $0x2d0] sm:$0xff]  ;;  %v607_v48 = vld [vmem:[%s12678_s1 + $0x2d8] sm:$0xff]  ;;  %v8341_v51 = vcombine.low %v598_v38, %v602_v39 }
 0x126   : > { %3426 = vmatprep.subr.bf16.mxu0 %v8286_v49  ;;  %3645 = vmatprep.subr.bf16.mxu1 %v8288_v53  ;;  %v8344_v49 = vcombine.high %v599_v40, %v603_v42  ;;  %v8351_v60 = vcombine.low %v607_v48, %v611_v50  ;;  %v662_v39 = vld [vmem:[%s12678_s1 + $0x490] sm:$0xff]  ;;  %v663_v42 = vld [vmem:[%s12678_s1 + $0x498] sm:$0xff] }
 0x127   : > { %3180 = vmatprep.mubr.bf16.mxu0 %v9635_v47  ;;  %3399 = vmatprep.mubr.bf16.mxu1 %v9635_v47  ;;  %v610_v47 = vld [vmem:[%s12678_s1 + $0x2f0] sm:$0xff] }
 0x128   : > { %v8350_v53 = vcombine.high %v606_v46, %v610_v47  ;;  %v8349_v59 = vcombine.low %v606_v46, %v610_v47  ;;  %v666_v40 = vld [vmem:[%s12678_s1 + $0x4b0] sm:$0xff] }
 0x129   : > { %3427 = vmatpush1.bf16.msra.mxu0 %v8285_v55  ;;  %3646 = vmatpush1.bf16.msra.mxu1 %v8287_v56  ;;  %v618_v55 = vld [vmem:[%s12678_s1 + $0x330] sm:$0xff]  ;;  %v615_v56 = vld [vmem:[%s12678_s1 + $0x318] sm:$0xff]  ;;  %v8406_v46 = vcombine.high %v662_v39, %v666_v40 }
 0x12a   : > { %3428 = vmatprep.subr.bf16.mxu0 %v8294_v58  ;;  %3647 = vmatprep.subr.bf16.mxu1 %v8296_v62  ;;  %v619_v58 = vld [vmem:[%s12678_s1 + $0x338] sm:$0xff]  ;;  %v8358_v61 = vcombine.high %v614_v54, %v618_v55  ;;  %v622_v62 = vld [vmem:[%s12678_s1 + $0x350] sm:$0xff] }
 0x12b   : > { %v8359_v4 = vcombine.low %v615_v56, %v619_v58  ;;  %v8366_v5 = vcombine.high %v622_v62, %v626_v63  ;;  %v670_v47 = vld [vmem:[%s12678_s1 + $0x4d0] sm:$0xff] }
 0x12c   : > { %3181 = vmatmul.mubr.bf16.gmra.mrb[8].mxu0 %v9637_v57  ;;  %3400 = vmatmul.mubr.bf16.gmra.mrb[8].mxu1 %v9637_v57  ;;  %v8352_v57 = vcombine.high %v607_v48, %v611_v50  ;;  %v674_v48 = vld [vmem:[%s12678_s1 + $0x4f0] sm:$0xff] }
 0x12d   : > { %3429 = vmatpush1.bf16.msra.mxu0 %v8293_v0  ;;  %3648 = vmatpush1.bf16.msra.mxu1 %v8295_v2  ;;  %v623_v0 = vld [vmem:[%s12678_s1 + $0x358] sm:$0xff] }
 0x12e   : > { %3430 = vmatprep.subr.bf16.mxu0 %v8302_v3  ;;  %3649 = vmatprep.subr.bf16.mxu1 %v8304_v7  ;;  %v627_v2 = vld [vmem:[%s12678_s1 + $0x378] sm:$0xff]  ;;  %v8357_v3 = vcombine.low %v614_v54, %v618_v55  ;;  %v634_v7 = vld [vmem:[%s12678_s1 + $0x3b0] sm:$0xff]  ;;  %v8414_v55 = vcombine.high %v670_v47, %v674_v48 }
 0x12f   : > { %3190 = vmatprep.mubr.bf16.mxu0 %v9638_v1  ;;  %3409 = vmatprep.mubr.bf16.mxu1 %v9638_v1  ;;  %v8360_v1 = vcombine.high %v615_v56, %v619_v58  ;;  %v8374_v13 = vcombine.high %v630_v6, %v634_v7  ;;  %v682_v58 = vld [vmem:[%s12678_s1 + $0x530] sm:$0xff] }
 0x131   : > { %3431 = vmatpush1.bf16.msra.mxu0 %v8301_v9  ;;  %3650 = vmatpush1.bf16.msra.mxu1 %v8303_v10  ;;  %v8368_v9 = vcombine.high %v623_v0, %v627_v2  ;;  %v635_v10 = vld [vmem:[%s12678_s1 + $0x3b8] sm:$0xff] }
 0x132   : > { %3432 = vmatprep.subr.bf16.mxu0 %v8310_v12  ;;  %3651 = vmatprep.subr.bf16.mxu1 %v8312_v16  ;;  %v8367_v12 = vcombine.low %v623_v0, %v627_v2  ;;  %v639_v16 = vld [vmem:[%s12678_s1 + $0x3d8] sm:$0xff]  ;;  %v8376_v17 = vcombine.high %v631_v8, %v635_v10  ;;  %v690_v2 = vld [vmem:[%s12678_s1 + $0x570] sm:$0xff] }
 0x134   : > { %3191 = vmatmul.mubr.bf16.gmra.mrb[12].mxu0 %v9640_v11  ;;  %3410 = vmatmul.mubr.bf16.gmra.mrb[12].mxu1 %v9640_v11  ;;  %v8365_v11 = vcombine.low %v622_v62, %v626_v63  ;;  %v8413_v62 = vcombine.low %v670_v47, %v674_v48  ;;  %v727_v48 = vld [vmem:[%s12678_s1 + $0x698] sm:$0xff] }
 0x135   : > { %3433 = vmatpush1.bf16.msra.mxu0 %v8309_v18  ;;  %3652 = vmatpush1.bf16.msra.mxu1 %v8311_v19  ;;  %v643_v18 = vld [vmem:[%s12678_s1 + $0x3f8] sm:$0xff]  ;;  %v8373_v19 = vcombine.low %v630_v6, %v634_v7 }
 0x136   : > { %3434 = vmatprep.subr.bf16.mxu0 %v8318_v20  ;;  %3653 = vmatprep.subr.bf16.mxu1 %v8320_v24  ;;  %v8375_v20 = vcombine.low %v631_v8, %v635_v10  ;;  %v647_v24 = vld [vmem:[%s12678_s1 + $0x418] sm:$0xff]  ;;  %v8384_v25 = vcombine.high %v639_v16, %v643_v18 }
 0x137   : > { %3452 = vmatprep.mubr.bf16.mxu0 %v10289_v34  ;;  %3671 = vmatprep.mubr.bf16.mxu1 %v10289_v34  ;;  %v659_v34 = vld [vmem:[%s12678_s1 + $0x478] sm:$0xff] }
 0x138   : > { %v10293_v6 = vld [vmem:[%s10700_s23 + $0x64] ss:$24 sps:$4 sm:$0xff]  }
 0x139   : > { %3435 = vmatpush1.bf16.msra.mxu0 %v8317_v26  ;;  %3654 = vmatpush1.bf16.msra.mxu1 %v8319_v27  ;;  %v651_v26 = vld [vmem:[%s12678_s1 + $0x438] sm:$0xff]  ;;  %v8381_v27 = vcombine.low %v638_v14, %v642_v15 }
 0x13a   : > { %3436 = vmatprep.subr.bf16.mxu0 %v8326_v28  ;;  %3655 = vmatprep.subr.bf16.mxu1 %v8328_v32  ;;  %v8383_v28 = vcombine.low %v639_v16, %v643_v18  ;;  %v655_v32 = vld [vmem:[%s12678_s1 + $0x458] sm:$0xff]  ;;  %v8392_v33 = vcombine.high %v647_v24, %v651_v26 }
 0x13b   : > { %v8400_v38 = vcombine.high %v655_v32, %v659_v34  ;;  %v699_v14 = vld [vmem:[%s12678_s1 + $0x5b8] sm:$0xff] }
 0x13c   : > { %v10294_v15 = vld [vmem:[%s10700_s23 + $0x60] ss:$24 sps:$4 sm:$0xff]  }
 0x13d   : > { %3437 = vmatpush1.bf16.msra.mxu0 %v8325_v35  ;;  %3656 = vmatpush1.bf16.msra.mxu1 %v8327_v36  ;;  %v8389_v35 = vcombine.low %v646_v22, %v650_v23  ;;  %v8391_v36 = vcombine.low %v647_v24, %v651_v26  ;;  %v10295_v22 = vld [vmem:[%s10700_s23 + $0x94] ss:$24 sps:$4 sm:$0xff]   ;;  %v703_v23 = vld [vmem:[%s12678_s1 + $0x5d8] sm:$0xff] }
 0x13e   : > { %3438 = vmatprep.subr.bf16.mxu0 %v8334_v37  ;;  %3657 = vmatprep.subr.bf16.mxu1 %v8336_v41  ;;  %v8398_v37 = vcombine.high %v654_v30, %v658_v31  ;;  %v10290_v41 = vld [vmem:[%s10700_s23] ss:$24 sps:$4 sm:$0xff]   ;;  %v710_v26 = vld [vmem:[%s12678_s1 + $0x610] sm:$0xff] }
 0x13f   : > { %v707_v24 = vld [vmem:[%s12678_s1 + $0x5f8] sm:$0xff] }
 0x141   : > { %3439 = vmatpush1.bf16.msra.mxu0 %v8333_v43  ;;  %3658 = vmatpush1.bf16.msra.mxu1 %v8335_v44  ;;  %v667_v43 = vld [vmem:[%s12678_s1 + $0x4b8] sm:$0xff]  ;;  %v8397_v44 = vcombine.low %v654_v30, %v658_v31 }
 0x142   : > { %3440 = vmatprep.subr.bf16.mxu0 %v8342_v45  ;;  %3659 = vmatprep.subr.bf16.mxu1 %v8344_v49  ;;  %v8399_v45 = vcombine.low %v655_v32, %v659_v34  ;;  %v671_v49 = vld [vmem:[%s12678_s1 + $0x4d8] sm:$0xff]  ;;  %v8408_v50 = vcombine.high %v663_v42, %v667_v43  ;;  %v8407_v54 = vcombine.low %v663_v42, %v667_v43  ;;  %v10297_v42 = vld [vmem:[%s10700_s23 + $0xc] ss:$24 sps:$4 sm:$0xff]  }
 0x143   : > { %v711_v30 = vld [vmem:[%s12678_s1 + $0x618] sm:$0xff]  ;;  %v8448_v32 = vcombine.high %v703_v23, %v707_v24 }
 0x144   : > { %v715_v31 = vld [vmem:[%s12678_s1 + $0x638] sm:$0xff] }
 0x145   : > { %3441 = vmatpush1.bf16.msra.mxu0 %v8341_v51  ;;  %3660 = vmatpush1.bf16.msra.mxu1 %v8343_v52  ;;  %v675_v51 = vld [vmem:[%s12678_s1 + $0x4f8] sm:$0xff]  ;;  %v10291_v52 = vld [vmem:[%s10700_s23 + $0x34] ss:$24 sps:$4 sm:$0xff]  }
 0x146   : > { %3442 = vmatprep.subr.bf16.mxu0 %v8350_v53  ;;  %3661 = vmatprep.subr.bf16.mxu1 %v8352_v57  ;;  %v8405_v53 = vcombine.low %v662_v39, %v666_v40  ;;  %v8416_v56 = vcombine.high %v671_v49, %v675_v51  ;;  %v678_v57 = vld [vmem:[%s12678_s1 + $0x510] sm:$0xff]  ;;  %v8415_v63 = vcombine.low %v671_v49, %v675_v51  ;;  %v719_v39 = vld [vmem:[%s12678_s1 + $0x658] sm:$0xff] }
 0x147   : > { %v8422_v0 = vcombine.high %v678_v57, %v682_v58  ;;  %v8421_v7 = vcombine.low %v678_v57, %v682_v58  ;;  %v723_v40 = vld [vmem:[%s12678_s1 + $0x678] sm:$0xff] }
 0x148   : > { %v731_v49 = vld [vmem:[%s12678_s1 + $0x6b8] sm:$0xff] }
 0x149   : > { %3443 = vmatpush1.bf16.msra.mxu0 %v8349_v59  ;;  %3662 = vmatpush1.bf16.msra.mxu1 %v8351_v60  ;;  %v679_v59 = vld [vmem:[%s12678_s1 + $0x518] sm:$0xff] }
 0x14a   : > { %3444 = vmatprep.subr.bf16.mxu0 %v8358_v61  ;;  %3663 = vmatprep.subr.bf16.mxu1 %v8360_v1  ;;  %v683_v60 = vld [vmem:[%s12678_s1 + $0x538] sm:$0xff]  ;;  %v10292_v61 = vld [vmem:[%s10700_s23 + $0x30] ss:$24 sps:$4 sm:$0xff]  }
 0x14b   : > { %v686_v1 = vld [vmem:[%s12678_s1 + $0x550] sm:$0xff]  ;;  %v8423_v8 = vcombine.low %v679_v59, %v683_v60  ;;  %v735_v57 = vld [vmem:[%s12678_s1 + $0x6d8] sm:$0xff] }
 0x14c   : > { %v8429_v16 = vcombine.low %v686_v1, %v690_v2  ;;  %v739_v58 = vld [vmem:[%s12678_s1 + $0x6f8] sm:$0xff] }
 0x14d   : > { %3445 = vmatpush1.bf16.msra.mxu0 %v8357_v3  ;;  %3664 = vmatpush1.bf16.msra.mxu1 %v8359_v4  ;;  %v687_v3 = vld [vmem:[%s12678_s1 + $0x558] sm:$0xff]  ;;  %v8424_v4 = vcombine.high %v679_v59, %v683_v60  ;;  %v8471_v60 = vcombine.low %v727_v48, %v731_v49 }
 0x14e   : > { %3446 = vmatprep.subr.bf16.mxu0 %v8366_v5  ;;  %3665 = vmatprep.subr.bf16.mxu1 %v8368_v9  ;;  %v691_v5 = vld [vmem:[%s12678_s1 + $0x578] sm:$0xff]  ;;  %v8430_v9 = vcombine.high %v686_v1, %v690_v2 }
 0x14f   : > { %v8432_v10 = vcombine.high %v687_v3, %v691_v5  ;;  %v743_v1 = vld [vmem:[%s12678_s1 + $0x718] sm:$0xff] }
 0x150   : > { %v747_v2 = vld [vmem:[%s12678_s1 + $0x738] sm:$0xff] }
 0x151   : > { %3447 = vmatpush1.bf16.msra.mxu0 %v8365_v11  ;;  %3666 = vmatpush1.bf16.msra.mxu1 %v8367_v12  ;;  %v694_v11 = vld [vmem:[%s12678_s1 + $0x590] sm:$0xff] }
 0x152   : > { %3448 = vmatprep.subr.bf16.mxu0 %v8374_v13  ;;  %3667 = vmatprep.subr.bf16.mxu1 %v8376_v17  ;;  %v698_v12 = vld [vmem:[%s12678_s1 + $0x5b0] sm:$0xff]  ;;  %v695_v13 = vld [vmem:[%s12678_s1 + $0x598] sm:$0xff]  ;;  %v8431_v17 = vcombine.low %v687_v3, %v691_v5 }
 0x153   : > { %v8438_v18 = vcombine.high %v694_v11, %v698_v12 }
 0x155   : > { %3449 = vmatpush1.bf16.msra.mxu0 %v8373_v19  ;;  %3668 = vmatpush1.bf16.msra.mxu1 %v8375_v20  ;;  %v8440_v19 = vcombine.high %v695_v13, %v699_v14  ;;  %v702_v20 = vld [vmem:[%s12678_s1 + $0x5d0] sm:$0xff] }
 0x156   : > { %3450 = vmatprep.subr.bf16.mxu0 %v8382_v21  ;;  %3669 = vmatprep.subr.bf16.mxu1 %v8384_v25  ;;  %v706_v21 = vld [vmem:[%s12678_s1 + $0x5f0] sm:$0xff]  ;;  %v8437_v25 = vcombine.low %v694_v11, %v698_v12  ;;  %v8487_v12 = vcombine.low %v743_v1, %v747_v2 }
 0x157   : > { %v8445_v34 = vcombine.low %v702_v20, %v706_v21 }
 0x159   : > { %3451 = vmatpush1.bf16.msra.mxu0 %v8381_v27  ;;  %3670 = vmatpush1.bf16.msra.mxu1 %v8383_v28  ;;  %v714_v27 = vld [vmem:[%s12678_s1 + $0x630] sm:$0xff]  ;;  %v8439_v28 = vcombine.low %v695_v13, %v699_v14 }
 0x15a   : > { %3493 = vmatprep.subr.bf16.mxu0 %v8390_v29  ;;  %3712 = vmatprep.subr.bf16.mxu1 %v8392_v33  ;;  %v8446_v29 = vcombine.high %v702_v20, %v706_v21  ;;  %v10296_v33 = vld [vmem:[%s10700_s23 + $0x90] ss:$24 sps:$4 sm:$0xff]   ;;  %v8453_v43 = vcombine.low %v710_v26, %v714_v27 }
 0x15c   : > { %3453 = vmatmul.mubr.bf16.vlgmr.msra.gmra.mrb[16].mxu0 %v10290_v41  ;;  %3672 = vmatmul.mubr.bf16.vlgmr.msra.gmra.mrb[16].mxu1 %v10290_v41  ;;  %v8456_v41 = vcombine.high %v711_v30, %v715_v31 }
 0x15d   : > { %3494 = vmatpush1.bf16.msra.mxu0 %v8389_v35  ;;  %3713 = vmatpush1.bf16.msra.mxu1 %v8391_v36  ;;  %v718_v35 = vld [vmem:[%s12678_s1 + $0x650] sm:$0xff] }
 0x15e   : > { %3495 = vmatprep.subr.bf16.mxu0 %v8398_v37  ;;  %3714 = vmatprep.subr.bf16.mxu1 %v8400_v38  ;;  %v722_v36 = vld [vmem:[%s12678_s1 + $0x670] sm:$0xff]  ;;  %v8447_v37 = vcombine.low %v703_v23, %v707_v24  ;;  %v8454_v38 = vcombine.high %v710_v26, %v714_v27  ;;  %v771_v26 = vld [vmem:[%s12678_s1 + $0x7f8] sm:$0xff] }
 0x15f   : > { %3462 = vmatprep.mubr.bf16.mxu0 %v10291_v52  ;;  %3681 = vmatprep.mubr.bf16.mxu1 %v10291_v52  ;;  %v8462_v47 = vcombine.high %v718_v35, %v722_v36  ;;  %v8461_v51 = vcombine.low %v718_v35, %v722_v36  ;;  %v8463_v52 = vcombine.low %v719_v39, %v723_v40  ;;  %v766_v23 = vld [vmem:[%s12678_s1 + $0x7d0] sm:$0xff] }
 0x160   : > { %v770_v24 = vld [vmem:[%s12678_s1 + $0x7f0] sm:$0xff] }
 0x161   : > { %3496 = vmatpush1.bf16.msra.mxu0 %v8397_v44  ;;  %3715 = vmatpush1.bf16.msra.mxu1 %v8399_v45  ;;  %v726_v44 = vld [vmem:[%s12678_s1 + $0x690] sm:$0xff]  ;;  %v8509_v35 = vcombine.low %v766_v23, %v770_v24 }
 0x162   : > { %3497 = vmatprep.subr.bf16.mxu0 %v8406_v46  ;;  %3716 = vmatprep.subr.bf16.mxu1 %v8408_v50  ;;  %v730_v45 = vld [vmem:[%s12678_s1 + $0x6b0] sm:$0xff]  ;;  %v8455_v46 = vcombine.low %v711_v30, %v715_v31  ;;  %v8464_v50 = vcombine.high %v719_v39, %v723_v40  ;;  %v783_v40 = vld [vmem:[%s12678_s1 + $0x858] sm:$0xff] }
 0x163   : > { %v8469_v59 = vcombine.low %v726_v44, %v730_v45  ;;  %v774_v31 = vld [vmem:[%s12678_s1 + $0x810] sm:$0xff] }
 0x164   : > { %3463 = vmatmul.mubr.bf16.gmra.mrb[20].mxu0 %v10292_v61  ;;  %3682 = vmatmul.mubr.bf16.gmra.mrb[20].mxu1 %v10292_v61  ;;  %v786_v39 = vld [vmem:[%s12678_s1 + $0x870] sm:$0xff] }
 0x165   : > { %3498 = vmatpush1.bf16.msra.mxu0 %v8405_v53  ;;  %3717 = vmatpush1.bf16.msra.mxu1 %v8407_v54  ;;  %v8470_v53 = vcombine.high %v726_v44, %v730_v45  ;;  %v8472_v54 = vcombine.high %v727_v48, %v731_v49  ;;  %v794_v48 = vld [vmem:[%s12678_s1 + $0x8b0] sm:$0xff]  ;;  %v10298_v49 = vld [vmem:[%s10700_s23 + $0x8] ss:$24 sps:$4 sm:$0xff]  }
 0x166   : > { %3499 = vmatprep.subr.bf16.mxu0 %v8414_v55  ;;  %3718 = vmatprep.subr.bf16.mxu1 %v8416_v56  ;;  %v734_v55 = vld [vmem:[%s12678_s1 + $0x6d0] sm:$0xff] }
 0x167   : > { %3472 = vmatprep.mubr.bf16.mxu0 %v10293_v6  ;;  %3691 = vmatprep.mubr.bf16.mxu1 %v10293_v6  ;;  %v738_v56 = vld [vmem:[%s12678_s1 + $0x6f0] sm:$0xff]  ;;  %v8488_v6 = vcombine.high %v743_v1, %v747_v2 }
 0x168   : > { %v8478_v61 = vcombine.high %v734_v55, %v738_v56  ;;  %v8477_v3 = vcombine.low %v734_v55, %v738_v56  ;;  %v798_v56 = vld [vmem:[%s12678_s1 + $0x8d0] sm:$0xff] }
 0x169   : > { %3500 = vmatpush1.bf16.msra.mxu0 %v8413_v62  ;;  %3719 = vmatpush1.bf16.msra.mxu1 %v8415_v63  ;;  %v8480_v62 = vcombine.high %v735_v57, %v739_v58  ;;  %v742_v63 = vld [vmem:[%s12678_s1 + $0x710] sm:$0xff] }
 0x16a   : > { %3501 = vmatprep.subr.bf16.mxu0 %v8422_v0  ;;  %3720 = vmatprep.subr.bf16.mxu1 %v8424_v4  ;;  %v746_v0 = vld [vmem:[%s12678_s1 + $0x730] sm:$0xff]  ;;  %v8479_v4 = vcombine.low %v735_v57, %v739_v58 }
 0x16b   : > { %v8486_v5 = vcombine.high %v742_v63, %v746_v0  ;;  %v8485_v11 = vcombine.low %v742_v63, %v746_v0  ;;  %v802_v57 = vld [vmem:[%s12678_s1 + $0x8f0] sm:$0xff] }
 0x16c   : > { %3473 = vmatmul.mubr.bf16.gmra.mrb[24].mxu0 %v10294_v15  ;;  %3692 = vmatmul.mubr.bf16.gmra.mrb[24].mxu1 %v10294_v15  ;;  %v758_v15 = vld [vmem:[%s12678_s1 + $0x790] sm:$0xff]  ;;  %v8542_v63 = vcombine.high %v798_v56, %v802_v57 }
 0x16d   : > { %3502 = vmatpush1.bf16.msra.mxu0 %v8421_v7  ;;  %3721 = vmatpush1.bf16.msra.mxu1 %v8423_v8  ;;  %v750_v7 = vld [vmem:[%s12678_s1 + $0x750] sm:$0xff] }
 0x16e   : > { %3503 = vmatprep.subr.bf16.mxu0 %v8430_v9  ;;  %3722 = vmatprep.subr.bf16.mxu1 %v8432_v10  ;;  %v754_v8 = vld [vmem:[%s12678_s1 + $0x770] sm:$0xff]  ;;  %v751_v9 = vld [vmem:[%s12678_s1 + $0x758] sm:$0xff] }
 0x16f   : > { %3482 = vmatprep.mubr.bf16.mxu0 %v10295_v22  ;;  %3701 = vmatprep.mubr.bf16.mxu1 %v10295_v22  ;;  %v755_v10 = vld [vmem:[%s12678_s1 + $0x778] sm:$0xff]  ;;  %v8494_v13 = vcombine.high %v750_v7, %v754_v8  ;;  %v806_v1 = vld [vmem:[%s12678_s1 + $0x910] sm:$0xff] }
 0x170   : > { %v8496_v14 = vcombine.high %v751_v9, %v755_v10  ;;  %v8495_v20 = vcombine.low %v751_v9, %v755_v10  ;;  %v10299_v58 = vld [vmem:[%s10700_s23 + $0x3c] ss:$24 sps:$4 sm:$0xff]  }
 0x171   : > { %3504 = vmatpush1.bf16.msra.mxu0 %v8429_v16  ;;  %3723 = vmatpush1.bf16.msra.mxu1 %v8431_v17  ;;  %v762_v16 = vld [vmem:[%s12678_s1 + $0x7b0] sm:$0xff]  ;;  %v759_v17 = vld [vmem:[%s12678_s1 + $0x798] sm:$0xff] }
 0x172   : > { %3505 = vmatprep.subr.bf16.mxu0 %v8438_v18  ;;  %3724 = vmatprep.subr.bf16.mxu1 %v8440_v19  ;;  %v763_v18 = vld [vmem:[%s12678_s1 + $0x7b8] sm:$0xff]  ;;  %v8493_v19 = vcombine.low %v750_v7, %v754_v8  ;;  %v8502_v21 = vcombine.high %v758_v15, %v762_v16  ;;  %v8501_v27 = vcombine.low %v758_v15, %v762_v16  ;;  %v810_v2 = vld [vmem:[%s12678_s1 + $0x930] sm:$0xff] }
 0x173   : > { %v8504_v22 = vcombine.high %v759_v17, %v763_v18  ;;  %v8550_v8 = vcombine.high %v806_v1, %v810_v2  ;;  %v814_v10 = vld [vmem:[%s12678_s1 + $0x950] sm:$0xff]  ;;  %v8549_v15 = vcombine.low %v806_v1, %v810_v2  ;;  %v863_v1 = vld [vmem:[%s12678_s1 + $0xad8] sm:$0xff] }
 0x174   : > { %3483 = vmatmul.mubr.bf16.gmra.mrb[28].mxu0 %v10296_v33  ;;  %3702 = vmatmul.mubr.bf16.gmra.mrb[28].mxu1 %v10296_v33  ;;  %v775_v33 = vld [vmem:[%s12678_s1 + $0x818] sm:$0xff] }
 0x175   : > { %3506 = vmatpush1.bf16.msra.mxu0 %v8437_v25  ;;  %3725 = vmatpush1.bf16.msra.mxu1 %v8439_v28  ;;  %v767_v25 = vld [vmem:[%s12678_s1 + $0x7d8] sm:$0xff]  ;;  %v8503_v28 = vcombine.low %v759_v17, %v763_v18 }
 0x176   : > { %3507 = vmatprep.subr.bf16.mxu0 %v8446_v29  ;;  %3726 = vmatprep.subr.bf16.mxu1 %v8448_v32  ;;  %v8510_v29 = vcombine.high %v766_v23, %v770_v24  ;;  %v8512_v30 = vcombine.high %v767_v25, %v771_v26  ;;  %v778_v32 = vld [vmem:[%s12678_s1 + $0x830] sm:$0xff]  ;;  %v8511_v36 = vcombine.low %v767_v25, %v771_v26  ;;  %v10302_v23 = vld [vmem:[%s10700_s23 + $0x68] ss:$24 sps:$4 sm:$0xff]   ;;  %v867_v2 = vld [vmem:[%s12678_s1 + $0xaf8] sm:$0xff] }
 0x177   : > { %3525 = vmatprep.mubr.bf16.mxu0 %v10297_v42  ;;  %3744 = vmatprep.mubr.bf16.mxu1 %v10297_v42  ;;  %v787_v42 = vld [vmem:[%s12678_s1 + $0x878] sm:$0xff] }
 0x179   : > { %3508 = vmatpush1.bf16.msra.mxu0 %v8445_v34  ;;  %3727 = vmatpush1.bf16.msra.mxu1 %v8447_v37  ;;  %v779_v34 = vld [vmem:[%s12678_s1 + $0x838] sm:$0xff]  ;;  %v8518_v37 = vcombine.high %v774_v31, %v778_v32 }
 0x17a   : > { %3509 = vmatprep.subr.bf16.mxu0 %v8454_v38  ;;  %3728 = vmatprep.subr.bf16.mxu1 %v8456_v41  ;;  %v782_v38 = vld [vmem:[%s12678_s1 + $0x850] sm:$0xff]  ;;  %v8520_v41 = vcombine.high %v775_v33, %v779_v34  ;;  %v8519_v44 = vcombine.low %v775_v33, %v779_v34 }
 0x17b   : > { %v8526_v45 = vcombine.high %v782_v38, %v786_v39 }
 0x17d   : > { %3510 = vmatpush1.bf16.msra.mxu0 %v8453_v43  ;;  %3729 = vmatpush1.bf16.msra.mxu1 %v8455_v46  ;;  %v8517_v43 = vcombine.low %v774_v31, %v778_v32  ;;  %v8528_v46 = vcombine.high %v783_v40, %v787_v42  ;;  %v831_v31 = vld [vmem:[%s12678_s1 + $0x9d8] sm:$0xff] }
 0x17e   : > { %3511 = vmatprep.subr.bf16.mxu0 %v8462_v47  ;;  %3730 = vmatprep.subr.bf16.mxu1 %v8464_v50  ;;  %v790_v47 = vld [vmem:[%s12678_s1 + $0x890] sm:$0xff]  ;;  %v791_v50 = vld [vmem:[%s12678_s1 + $0x898] sm:$0xff] }
 0x17f   : > { %v835_v32 = vld [vmem:[%s12678_s1 + $0x9f8] sm:$0xff] }
 0x181   : > { %3512 = vmatpush1.bf16.msra.mxu0 %v8461_v51  ;;  %3731 = vmatpush1.bf16.msra.mxu1 %v8463_v52  ;;  %v795_v51 = vld [vmem:[%s12678_s1 + $0x8b8] sm:$0xff]  ;;  %v8525_v52 = vcombine.low %v782_v38, %v786_v39  ;;  %v842_v38 = vld [vmem:[%s12678_s1 + $0xa30] sm:$0xff] }
 0x182   : > { %3513 = vmatprep.subr.bf16.mxu0 %v8470_v53  ;;  %3732 = vmatprep.subr.bf16.mxu1 %v8472_v54  ;;  %v8527_v53 = vcombine.low %v783_v40, %v787_v42  ;;  %v8534_v54 = vcombine.high %v790_v47, %v794_v48  ;;  %v8536_v55 = vcombine.high %v791_v50, %v795_v51  ;;  %v839_v39 = vld [vmem:[%s12678_s1 + $0xa18] sm:$0xff] }
 0x183   : > { %v843_v40 = vld [vmem:[%s12678_s1 + $0xa38] sm:$0xff] }
 0x185   : > { %3514 = vmatpush1.bf16.msra.mxu0 %v8469_v59  ;;  %3733 = vmatpush1.bf16.msra.mxu1 %v8471_v60  ;;  %v799_v59 = vld [vmem:[%s12678_s1 + $0x8d8] sm:$0xff] }
 0x186   : > { %3515 = vmatprep.subr.bf16.mxu0 %v8478_v61  ;;  %3734 = vmatprep.subr.bf16.mxu1 %v8480_v62  ;;  %v803_v60 = vld [vmem:[%s12678_s1 + $0x8f8] sm:$0xff]  ;;  %v8533_v61 = vcombine.low %v790_v47, %v794_v48  ;;  %v8535_v62 = vcombine.low %v791_v50, %v795_v51  ;;  %v850_v47 = vld [vmem:[%s12678_s1 + $0xa70] sm:$0xff] }
 0x187   : > { %v8544_v0 = vcombine.high %v799_v59, %v803_v60  ;;  %v8543_v7 = vcombine.low %v799_v59, %v803_v60  ;;  %v10305_v48 = vld [vmem:[%s10700_s23 + $0x14] ss:$24 sps:$4 sm:$0xff]   ;;  %v851_v50 = vld [vmem:[%s12678_s1 + $0xa78] sm:$0xff] }
 0x189   : > { %3516 = vmatpush1.bf16.msra.mxu0 %v8477_v3  ;;  %3735 = vmatpush1.bf16.msra.mxu1 %v8479_v4  ;;  %v807_v3 = vld [vmem:[%s12678_s1 + $0x918] sm:$0xff] }
 0x18a   : > { %3517 = vmatprep.subr.bf16.mxu0 %v8486_v5  ;;  %3736 = vmatprep.subr.bf16.mxu1 %v8488_v6  ;;  %v811_v4 = vld [vmem:[%s12678_s1 + $0x938] sm:$0xff]  ;;  %v8541_v6 = vcombine.low %v798_v56, %v802_v57  ;;  %v858_v56 = vld [vmem:[%s12678_s1 + $0xab0] sm:$0xff] }
 0x18b   : > { %v10300_v5 = vld [vmem:[%s10700_s23 + $0x38] ss:$24 sps:$4 sm:$0xff]   ;;  %v8552_v9 = vcombine.high %v807_v3, %v811_v4  ;;  %v8551_v16 = vcombine.low %v807_v3, %v811_v4 }
 0x18c   : > { %v855_v57 = vld [vmem:[%s12678_s1 + $0xa98] sm:$0xff] }
 0x18d   : > { %3518 = vmatpush1.bf16.msra.mxu0 %v8485_v11  ;;  %3737 = vmatpush1.bf16.msra.mxu1 %v8487_v12  ;;  %v818_v11 = vld [vmem:[%s12678_s1 + $0x970] sm:$0xff]  ;;  %v10301_v12 = vld [vmem:[%s10700_s23 + $0x6c] ss:$24 sps:$4 sm:$0xff]  }
 0x18e   : > { %3519 = vmatprep.subr.bf16.mxu0 %v8494_v13  ;;  %3738 = vmatprep.subr.bf16.mxu1 %v8496_v14  ;;  %v815_v13 = vld [vmem:[%s12678_s1 + $0x958] sm:$0xff]  ;;  %v8558_v17 = vcombine.high %v814_v10, %v818_v11  ;;  %v8557_v24 = vcombine.low %v814_v10, %v818_v11 }
 0x18f   : > { %v819_v14 = vld [vmem:[%s12678_s1 + $0x978] sm:$0xff] }
 0x190   : > { %v8560_v18 = vcombine.high %v815_v13, %v819_v14  ;;  %v8559_v25 = vcombine.low %v815_v13, %v819_v14  ;;  %v875_v10 = vld [vmem:[%s12678_s1 + $0xb38] sm:$0xff] }
 0x191   : > { %3520 = vmatpush1.bf16.msra.mxu0 %v8493_v19  ;;  %3739 = vmatpush1.bf16.msra.mxu1 %v8495_v20  ;;  %v822_v19 = vld [vmem:[%s12678_s1 + $0x990] sm:$0xff] }
 0x192   : > { %3521 = vmatprep.subr.bf16.mxu0 %v8502_v21  ;;  %3740 = vmatprep.subr.bf16.mxu1 %v8504_v22  ;;  %v826_v20 = vld [vmem:[%s12678_s1 + $0x9b0] sm:$0xff]  ;;  %v823_v21 = vld [vmem:[%s12678_s1 + $0x998] sm:$0xff] }
 0x193   : > { %v827_v22 = vld [vmem:[%s12678_s1 + $0x9b8] sm:$0xff]  ;;  %v8566_v26 = vcombine.high %v822_v19, %v826_v20  ;;  %v8565_v33 = vcombine.low %v822_v19, %v826_v20 }
 0x194   : > { %v8567_v34 = vcombine.low %v823_v21, %v827_v22 }
 0x195   : > { %3522 = vmatpush1.bf16.msra.mxu0 %v8501_v27  ;;  %3741 = vmatpush1.bf16.msra.mxu1 %v8503_v28  ;;  %v8568_v27 = vcombine.high %v823_v21, %v827_v22  ;;  %v830_v28 = vld [vmem:[%s12678_s1 + $0x9d0] sm:$0xff] }
 0x196   : > { %3523 = vmatprep.subr.bf16.mxu0 %v8510_v29  ;;  %3742 = vmatprep.subr.bf16.mxu1 %v8512_v30  ;;  %v834_v29 = vld [vmem:[%s12678_s1 + $0x9f0] sm:$0xff] }
 0x197   : > { %v10303_v30 = vld [vmem:[%s10700_s23 + $0x9c] ss:$24 sps:$4 sm:$0xff]   ;;  %v8573_v42 = vcombine.low %v830_v28, %v834_v29 }
 0x199   : > { %3524 = vmatpush1.bf16.msra.mxu0 %v8509_v35  ;;  %3743 = vmatpush1.bf16.msra.mxu1 %v8511_v36  ;;  %v8574_v35 = vcombine.high %v830_v28, %v834_v29  ;;  %v8576_v36 = vcombine.high %v831_v31, %v835_v32 }
 0x19a   : > { %3566 = vmatprep.subr.bf16.mxu0 %v8518_v37  ;;  %3785 = vmatprep.subr.bf16.mxu1 %v8520_v41  ;;  %v838_v37 = vld [vmem:[%s12678_s1 + $0xa10] sm:$0xff] }
 0x19b   : > { %v10304_v41 = vld [vmem:[%s10700_s23 + $0x98] ss:$24 sps:$4 sm:$0xff]   ;;  %v8581_v51 = vcombine.low %v838_v37, %v842_v38 }
 0x19c   : > { %3526 = vmatmul.mubr.bf16.vlgmr.msra.gmra.mrb[16].mxu0 %v10298_v49  ;;  %3745 = vmatmul.mubr.bf16.vlgmr.msra.gmra.mrb[16].mxu1 %v10298_v49  ;;  %v847_v49 = vld [vmem:[%s12678_s1 + $0xa58] sm:$0xff] }
 0x19d   : > { %3567 = vmatpush1.bf16.msra.mxu0 %v8517_v43  ;;  %3786 = vmatpush1.bf16.msra.mxu1 %v8519_v44  ;;  %v8575_v43 = vcombine.low %v831_v31, %v835_v32  ;;  %v8582_v44 = vcombine.high %v838_v37, %v842_v38  ;;  %v8591_v60 = vcombine.low %v847_v49, %v851_v50  ;;  %v894_v31 = vld [vmem:[%s12678_s1 + $0xbd0] sm:$0xff] }
 0x19e   : > { %3568 = vmatprep.subr.bf16.mxu0 %v8526_v45  ;;  %3787 = vmatprep.subr.bf16.mxu1 %v8528_v46  ;;  %v8584_v45 = vcombine.high %v839_v39, %v843_v40  ;;  %v846_v46 = vld [vmem:[%s12678_s1 + $0xa50] sm:$0xff] }
 0x19f   : > { %3535 = vmatprep.mubr.bf16.mxu0 %v10299_v58  ;;  %3754 = vmatprep.mubr.bf16.mxu1 %v10299_v58  ;;  %v859_v58 = vld [vmem:[%s12678_s1 + $0xab8] sm:$0xff]  ;;  %v8589_v59 = vcombine.low %v846_v46, %v850_v47  ;;  %v898_v32 = vld [vmem:[%s12678_s1 + $0xbf0] sm:$0xff] }
 0x1a0   : > { %v8599_v4 = vcombine.low %v855_v57, %v859_v58  ;;  %v8638_v37 = vcombine.high %v894_v31, %v898_v32 }
 0x1a1   : > { %3569 = vmatpush1.bf16.msra.mxu0 %v8525_v52  ;;  %3788 = vmatpush1.bf16.msra.mxu1 %v8527_v53  ;;  %v8583_v52 = vcombine.low %v839_v39, %v843_v40  ;;  %v8590_v53 = vcombine.high %v846_v46, %v850_v47  ;;  %v8637_v39 = vcombine.low %v894_v31, %v898_v32  ;;  %v9652_v46 = vld [vmem:[#allocation2 + $0x2c] ss:$16 sps:$4 sm:$0xff]   ;;  %v10306_v47 = vld [vmem:[%s10700_s23 + $0x10] ss:$24 sps:$4 sm:$0xff]  }
 0x1a2   : > { %3570 = vmatprep.subr.bf16.mxu0 %v8534_v54  ;;  %3789 = vmatprep.subr.bf16.mxu1 %v8536_v55  ;;  %v8592_v54 = vcombine.high %v847_v49, %v851_v50  ;;  %v854_v55 = vld [vmem:[%s12678_s1 + $0xa90] sm:$0xff]  ;;  %v9650_v49 = vld [vmem:[#allocation2 + $0x28] ss:$16 sps:$4 sm:$0xff]  }
 0x1a3   : > { %v8597_v3 = vcombine.low %v854_v55, %v858_v56  ;;  %v9655_v50 = vld [vmem:[#allocation2 + $0x44] ss:$16 sps:$4 sm:$0xff]  }
 0x1a4   : > { %3536 = vmatmul.mubr.bf16.gmra.mrb[20].mxu0 %v10300_v5  ;;  %3755 = vmatmul.mubr.bf16.gmra.mrb[20].mxu1 %v10300_v5 }
 0x1a5   : > { %3571 = vmatpush1.bf16.msra.mxu0 %v8533_v61  ;;  %3790 = vmatpush1.bf16.msra.mxu1 %v8535_v62  ;;  %v8598_v61 = vcombine.high %v854_v55, %v858_v56  ;;  %v8600_v62 = vcombine.high %v855_v57, %v859_v58  ;;  %v9656_v55 = vld [vmem:[#allocation2 + $0x48] ss:$16 sps:$4 sm:$0xff]   ;;  %v9661_v56 = vld [vmem:[#allocation2 + $0x64] ss:$16 sps:$4 sm:$0xff]   ;;  %v9664_v57 = vld [vmem:[#allocation2 + $0x6c] ss:$16 sps:$4 sm:$0xff]  }
 0x1a6   : > { %3572 = vmatprep.subr.bf16.mxu0 %v8542_v63  ;;  %3791 = vmatprep.subr.bf16.mxu1 %v8544_v0  ;;  %v862_v63 = vld [vmem:[%s12678_s1 + $0xad0] sm:$0xff]  ;;  %v10308_v58 = vld [vmem:[%s10700_s23 + $0x40] ss:$24 sps:$4 sm:$0xff]  }
 0x1a7   : > { %3545 = vmatprep.mubr.bf16.mxu0 %v10301_v12  ;;  %3764 = vmatprep.mubr.bf16.mxu1 %v10301_v12  ;;  %v866_v0 = vld [vmem:[%s12678_s1 + $0xaf0] sm:$0xff]  ;;  %v8607_v12 = vcombine.low %v863_v1, %v867_v2 }
 0x1a8   : > { %v8606_v5 = vcombine.high %v862_v63, %v866_v0  ;;  %v8605_v11 = vcombine.low %v862_v63, %v866_v0  ;;  %v10309_v63 = vld [vmem:[%s10700_s23 + $0x74] ss:$24 sps:$4 sm:$0xff]  }
 0x1a9   : > { %3573 = vmatpush1.bf16.msra.mxu0 %v8541_v6  ;;  %3792 = vmatpush1.bf16.msra.mxu1 %v8543_v7  ;;  %v8608_v6 = vcombine.high %v863_v1, %v867_v2  ;;  %v870_v7 = vld [vmem:[%s12678_s1 + $0xb10] sm:$0xff]  ;;  %v9670_v0 = vld [vmem:[#allocation2 + $0x8c] ss:$16 sps:$4 sm:$0xff]  }
 0x1aa   : > { %3574 = vmatprep.subr.bf16.mxu0 %v8550_v8  ;;  %3793 = vmatprep.subr.bf16.mxu1 %v8552_v9  ;;  %v874_v8 = vld [vmem:[%s12678_s1 + $0xb30] sm:$0xff]  ;;  %v871_v9 = vld [vmem:[%s12678_s1 + $0xb18] sm:$0xff] }
 0x1ab   : > { %v8614_v13 = vcombine.high %v870_v7, %v874_v8  ;;  %v8616_v14 = vcombine.high %v871_v9, %v875_v10  ;;  %v8613_v19 = vcombine.low %v870_v7, %v874_v8  ;;  %v8615_v20 = vcombine.low %v871_v9, %v875_v10  ;;  %v9665_v2 = vld [vmem:[#allocation2 + $0x80] ss:$16 sps:$4 sm:$0xff]   ;;  %v9673_v7 = vld [vmem:[#allocation2 + $0xa4] ss:$16 sps:$4 sm:$0xff]   ;;  %v9676_v8 = vld [vmem:[#allocation2 + $0xac] ss:$16 sps:$4 sm:$0xff]  }
 0x1ac   : > { %3546 = vmatmul.mubr.bf16.gmra.mrb[24].mxu0 %v10302_v23  ;;  %3765 = vmatmul.mubr.bf16.gmra.mrb[24].mxu1 %v10302_v23  ;;  %v886_v23 = vld [vmem:[%s12678_s1 + $0xb90] sm:$0xff] }
 0x1ad   : > { %3575 = vmatpush1.bf16.msra.mxu0 %v8549_v15  ;;  %3794 = vmatpush1.bf16.msra.mxu1 %v8551_v16  ;;  %v878_v15 = vld [vmem:[%s12678_s1 + $0xb50] sm:$0xff] }
 0x1ae   : > { %3576 = vmatprep.subr.bf16.mxu0 %v8558_v17  ;;  %3795 = vmatprep.subr.bf16.mxu1 %v8560_v18  ;;  %v882_v16 = vld [vmem:[%s12678_s1 + $0xb70] sm:$0xff]  ;;  %v879_v17 = vld [vmem:[%s12678_s1 + $0xb58] sm:$0xff] }
 0x1af   : > { %3555 = vmatprep.mubr.bf16.mxu0 %v10303_v30  ;;  %3774 = vmatprep.mubr.bf16.mxu1 %v10303_v30  ;;  %v883_v18 = vld [vmem:[%s12678_s1 + $0xb78] sm:$0xff]  ;;  %v8622_v21 = vcombine.high %v878_v15, %v882_v16  ;;  %v10310_v9 = vld [vmem:[%s10700_s23 + $0x70] ss:$24 sps:$4 sm:$0xff]  }
 0x1b0   : > { %v8624_v22 = vcombine.high %v879_v17, %v883_v18  ;;  %v8623_v28 = vcombine.low %v879_v17, %v883_v18  ;;  %v10311_v18 = vld [vmem:[%s10700_s23 + $0xa4] ss:$24 sps:$4 sm:$0xff]  }
 0x1b1   : > { %3577 = vmatpush1.bf16.msra.mxu0 %v8557_v24  ;;  %3796 = vmatpush1.bf16.msra.mxu1 %v8559_v25  ;;  %v890_v24 = vld [vmem:[%s12678_s1 + $0xbb0] sm:$0xff]  ;;  %v887_v25 = vld [vmem:[%s12678_s1 + $0xb98] sm:$0xff] }
 0x1b2   : > { %3578 = vmatprep.subr.bf16.mxu0 %v8566_v26  ;;  %3797 = vmatprep.subr.bf16.mxu1 %v8568_v27  ;;  %v891_v26 = vld [vmem:[%s12678_s1 + $0xbb8] sm:$0xff]  ;;  %v8621_v27 = vcombine.low %v878_v15, %v882_v16  ;;  %v8630_v29 = vcombine.high %v886_v23, %v890_v24  ;;  %v9679_v16 = vld [vmem:[#allocation2 + $0xc4] ss:$16 sps:$4 sm:$0xff]  }
 0x1b3   : > { %v8632_v30 = vcombine.high %v887_v25, %v891_v26  ;;  %v9674_v15 = vld [vmem:[#allocation2 + $0xa8] ss:$16 sps:$4 sm:$0xff]  }
 0x1b4   : > { %3556 = vmatmul.mubr.bf16.gmra.mrb[28].mxu0 %v10304_v41  ;;  %3775 = vmatmul.mubr.bf16.gmra.mrb[28].mxu1 %v10304_v41  ;;  %v9643_v41 = vld [vmem:[#allocation2 + $0x4] ss:$16 sps:$4 sm:$0xff]  }
 0x1b5   : > { %3579 = vmatpush1.bf16.msra.mxu0 %v8565_v33  ;;  %3798 = vmatpush1.bf16.msra.mxu1 %v8567_v34  ;;  %v895_v33 = vld [vmem:[%s12678_s1 + $0xbd8] sm:$0xff] }
 0x1b6   : > { %3580 = vmatprep.subr.bf16.mxu0 %v8574_v35  ;;  %3799 = vmatprep.subr.bf16.mxu1 %v8576_v36  ;;  %v899_v34 = vld [vmem:[%s12678_s1 + $0xbf8] sm:$0xff]  ;;  %v8629_v35 = vcombine.low %v886_v23, %v890_v24  ;;  %v8631_v36 = vcombine.low %v887_v25, %v891_v26 }
 0x1b7   : > { %3598 = vmatprep.mubr.bf16.mxu0 %v10305_v48  ;;  %3817 = vmatprep.mubr.bf16.mxu1 %v10305_v48  ;;  %v8640_v38 = vcombine.high %v895_v33, %v899_v34  ;;  %v8639_v40 = vcombine.low %v895_v33, %v899_v34  ;;  %v9647_v48 = vld [vmem:[#allocation2 + $0x20] ss:$16 sps:$4 sm:$0xff]   ;;  %v9685_v34 = vld [vmem:[#allocation2 + $0xe4] ss:$16 sps:$4 sm:$0xff]  }
 0x1b9   : > { %3581 = vmatpush1.bf16.msra.mxu0 %v8573_v42  ;;  %3800 = vmatpush1.bf16.msra.mxu1 %v8575_v43  ;;  %v9646_v42 = vld [vmem:[#allocation2 + $0xc] ss:$16 sps:$4 sm:$0xff]   ;;  %v9641_v43 = vld [vmem:[#allocation2] ss:$16 sps:$4 sm:$0xff]  }
 0x1ba   : > { %3582 = vmatprep.subr.bf16.mxu0 %v8582_v44  ;;  %3801 = vmatprep.subr.bf16.mxu1 %v8584_v45  ;;  %v9644_v44 = vld [vmem:[#allocation2 + $0x8] ss:$16 sps:$4 sm:$0xff]   ;;  %v9649_v45 = vld [vmem:[#allocation2 + $0x24] ss:$16 sps:$4 sm:$0xff]  }
 0x1bd   : > { %3583 = vmatpush1.bf16.msra.mxu0 %v8581_v51  ;;  %3802 = vmatpush1.bf16.msra.mxu1 %v8583_v52  ;;  %v10307_v51 = vld [vmem:[%s10700_s23 + $0x44] ss:$24 sps:$4 sm:$0xff]  }
 0x1be   : > { %3584 = vmatprep.subr.bf16.mxu0 %v8590_v53  ;;  %3803 = vmatprep.subr.bf16.mxu1 %v8592_v54  ;;  %v9658_v52 = vld [vmem:[#allocation2 + $0x4c] ss:$16 sps:$4 sm:$0xff]   ;;  %v902_v53 = vlaneseq  ;;  %v9653_v54 = vld [vmem:[#allocation2 + $0x40] ss:$16 sps:$4 sm:$0xff]  }
 0x1c1   : > { %3585 = vmatpush1.bf16.msra.mxu0 %v8589_v59  ;;  %3804 = vmatpush1.bf16.msra.mxu1 %v8591_v60  ;;  %v11814_v59 = vshrl.u32 %v902_v53, 7  ;;  %v9659_v60 = vld [vmem:[#allocation2 + $0x60] ss:$16 sps:$4 sm:$0xff]  }
 0x1c2   : > { %3586 = vmatprep.subr.bf16.mxu0 %v8598_v61  ;;  %3805 = vmatprep.subr.bf16.mxu1 %v8600_v62  ;;  %v9662_v61 = vld [vmem:[#allocation2 + $0x68] ss:$16 sps:$4 sm:$0xff]   ;;  %v9667_v62 = vld [vmem:[#allocation2 + $0x84] ss:$16 sps:$4 sm:$0xff]  }
 0x1c3   : > { %v11818_v1 = vsub.s32 0, %v11814_v59 }
 0x1c5   : > { %3587 = vmatpush1.bf16.msra.mxu0 %v8597_v3  ;;  %3806 = vmatpush1.bf16.msra.mxu1 %v8599_v4  ;;  %v900_v3 = vld [vmem:[%s12679_s2] sm:$0xff]  ;;  %v11824_v4 = vsub.s32 2, %v11814_v59 }
 0x1c6   : > { %3588 = vmatprep.subr.bf16.mxu0 %v8606_v5  ;;  %3807 = vmatprep.subr.bf16.mxu1 %v8608_v6  ;;  %v9668_v5 = vld [vmem:[#allocation2 + $0x88] ss:$16 sps:$4 sm:$0xff]   ;;  %v11827_v6 = vsub.s32 1, %v11814_v59  ;;  %v11831_v10 = vrot.slane %v900_v3, %v11818_v1 }
 0x1c9   : > { %3589 = vmatpush1.bf16.msra.mxu0 %v8605_v11  ;;  %3808 = vmatpush1.bf16.msra.mxu1 %v8607_v12  ;;  %v11834_v11 = vsub.s32 3, %v11814_v59  ;;  %v11837_v12 = vrot.slane %v900_v3, %v11824_v4 }
 0x1ca   : > { %3590 = vmatprep.subr.bf16.mxu0 %v8614_v13  ;;  %3809 = vmatprep.subr.bf16.mxu1 %v8616_v14  ;;  %v9671_v13 = vld [vmem:[#allocation2 + $0xa0] ss:$16 sps:$4 sm:$0xff]   ;;  %v11840_v14 = vrot.slane %v900_v3, %v11827_v6 }
 0x1cb   : > { %v11845_v23 = vrot.slane %v900_v3, %v11834_v11 }
 0x1cd   : > { %3591 = vmatpush1.bf16.msra.mxu0 %v8613_v19  ;;  %3810 = vmatpush1.bf16.msra.mxu1 %v8615_v20  ;;  %v9682_v19 = vld [vmem:[#allocation2 + $0xcc] ss:$16 sps:$4 sm:$0xff]  }
 0x1ce   : > { %3592 = vmatprep.subr.bf16.mxu0 %v8622_v21  ;;  %3811 = vmatprep.subr.bf16.mxu1 %v8624_v22 }
 0x1d1   : > { %3593 = vmatpush1.bf16.msra.mxu0 %v8621_v27  ;;  %3812 = vmatpush1.bf16.msra.mxu1 %v8623_v28  ;;  %v9677_v27 = vld [vmem:[#allocation2 + $0xc0] ss:$16 sps:$4 sm:$0xff]   ;;  %v9680_v28 = vld [vmem:[#allocation2 + $0xc8] ss:$16 sps:$4 sm:$0xff]  }
 0x1d2   : > { %3594 = vmatprep.subr.bf16.mxu0 %v8630_v29  ;;  %3813 = vmatprep.subr.bf16.mxu1 %v8632_v30 }
 0x1d5   : > { %3595 = vmatpush1.bf16.msra.mxu0 %v8629_v35  ;;  %3814 = vmatpush1.bf16.msra.mxu1 %v8631_v36  ;;  %v9688_v35 = vld [vmem:[#allocation2 + $0xec] ss:$16 sps:$4 sm:$0xff]  }
 0x1d6   : > { %3596 = vmatprep.subr.bf16.mxu0 %v8638_v37  ;;  %3815 = vmatprep.subr.bf16.mxu1 %v8640_v38  ;;  %v10312_v38 = vld [vmem:[%s10700_s23 + $0xa0] ss:$24 sps:$4 sm:$0xff]  }
 0x1d9   : > { %3597 = vmatpush1.bf16.msra.mxu0 %v8637_v39  ;;  %3816 = vmatpush1.bf16.msra.mxu1 %v8639_v40  ;;  %v9683_v39 = vld [vmem:[#allocation2 + $0xe0] ss:$16 sps:$4 sm:$0xff]   ;;  %v9686_v40 = vld [vmem:[#allocation2 + $0xe8] ss:$16 sps:$4 sm:$0xff]  }
 0x1da   : > { %5640 = vmatprep.subr.bf16.mxu0 %v9643_v41  ;;  %5932 = vmatprep.subr.bf16.mxu1 %v9646_v42 }
 0x1dc   : > { %3599 = vmatmul.mubr.bf16.vlgmr.msra.gmra.mrb[16].mxu0 %v10306_v47  ;;  %3818 = vmatmul.mubr.bf16.vlgmr.msra.gmra.mrb[16].mxu1 %v10306_v47 }
 0x1dd   : > { %5641 = vmatpush1.bf16.msra.mxu0 %v9641_v43  ;;  %5933 = vmatpush1.bf16.msra.mxu1 %v9644_v44 }
 0x1de   : > { %5642 = vmatprep.subr.bf16.mxu0 %v9649_v45  ;;  %5934 = vmatprep.subr.bf16.mxu1 %v9652_v46  ;;  %v9691_v45 = vld [vmem:[#allocation2 + $0x104] ss:$16 sps:$4 sm:$0xff]  }
 0x1df   : > { %3608 = vmatprep.mubr.bf16.mxu0 %v10307_v51  ;;  %3827 = vmatprep.mubr.bf16.mxu1 %v10307_v51 }
 0x1e1   : > { %5643 = vmatpush1.bf16.msra.mxu0 %v9647_v48  ;;  %5935 = vmatpush1.bf16.msra.mxu1 %v9650_v49  ;;  %v9694_v48 = vld [vmem:[#allocation2 + $0x10c] ss:$16 sps:$4 sm:$0xff]  }
 0x1e2   : > { %5644 = vmatprep.subr.bf16.mxu0 %v9655_v50  ;;  %5936 = vmatprep.subr.bf16.mxu1 %v9658_v52 }
 0x1e4   : > { %3609 = vmatmul.mubr.bf16.gmra.mrb[20].mxu0 %v10308_v58  ;;  %3828 = vmatmul.mubr.bf16.gmra.mrb[20].mxu1 %v10308_v58 }
 0x1e5   : > { %5645 = vmatpush1.bf16.msra.mxu0 %v9653_v54  ;;  %5937 = vmatpush1.bf16.msra.mxu1 %v9656_v55 }
 0x1e6   : > { %5646 = vmatprep.subr.bf16.mxu0 %v9661_v56  ;;  %5938 = vmatprep.subr.bf16.mxu1 %v9664_v57 }
 0x1e7   : > { %3618 = vmatprep.mubr.bf16.mxu0 %v10309_v63  ;;  %3837 = vmatprep.mubr.bf16.mxu1 %v10309_v63  ;;  %v9689_v63 = vld [vmem:[#allocation2 + $0x100] ss:$16 sps:$4 sm:$0xff]  }
 0x1e9   : > { %5647 = vmatpush1.bf16.msra.mxu0 %v9659_v60  ;;  %5939 = vmatpush1.bf16.msra.mxu1 %v9662_v61 }
 0x1ea   : > { %5648 = vmatprep.subr.bf16.mxu0 %v9667_v62  ;;  %5940 = vmatprep.subr.bf16.mxu1 %v9670_v0 }
 0x1ec   : > { %3619 = vmatmul.mubr.bf16.gmra.mrb[24].mxu0 %v10310_v9  ;;  %3838 = vmatmul.mubr.bf16.gmra.mrb[24].mxu1 %v10310_v9  ;;  %v9697_v9 = vld [vmem:[#allocation2 + $0x124] ss:$16 sps:$4 sm:$0xff]  }
 0x1ed   : > { %5649 = vmatpush1.bf16.msra.mxu0 %v9665_v2  ;;  %5941 = vmatpush1.bf16.msra.mxu1 %v9668_v5 }
 0x1ee   : > { %5650 = vmatprep.subr.bf16.mxu0 %v9673_v7  ;;  %5942 = vmatprep.subr.bf16.mxu1 %v9676_v8  ;;  %v9692_v8 = vld [vmem:[#allocation2 + $0x108] ss:$16 sps:$4 sm:$0xff]  }
 0x1ef   : > { %v3162_v17 = vpop.f32.mrb[0].mxu0  ;;  %3628 = vmatprep.mubr.bf16.mxu0 %v10311_v18  ;;  %v3381_v21 = vpop.f32.mrb[0].mxu1  ;;  %3847 = vmatprep.mubr.bf16.mxu1 %v10311_v18 }
 0x1f0   : > { %v9209_v20 = vadd.f32 %v3162_v17, %v11831_v10  ;;  %v3164_v22 = vpop.f32.mrb[1].mxu0  ;;  %v9225_v24 = vadd.f32 %v3381_v21, %v11837_v12  ;;  %v3383_v25 = vpop.f32.mrb[1].mxu1  ;;  %v9700_v17 = vld [vmem:[#allocation2 + $0x12c] ss:$16 sps:$4 sm:$0xff]  }
 0x1f1   : > { %v3166_v26 = vpop.f32.mrb[2].mxu0  ;;  %5651 = vmatpush1.bf16.msra.mxu0 %v9671_v13  ;;  %v9210_v30 = vadd.f32 %v3164_v22, %v11840_v14  ;;  %v3385_v32 = vpop.f32.mrb[2].mxu1  ;;  %5943 = vmatpush1.bf16.msra.mxu1 %v9674_v15  ;;  %v9226_v36 = vadd.f32 %v3383_v25, %v11845_v23 }
 0x1f2   : > { %v3922_v29 = vmul.f32 0.01, %v9209_v20  ;;  %v9211_v31 = vadd.f32 %v3166_v26, %v11831_v10  ;;  %v3168_v33 = vpop.f32.mrb[3].mxu0  ;;  %5652 = vmatprep.subr.bf16.mxu0 %v9679_v16  ;;  %vm3858_vm0 = vcmp.ge.f32.partialorder %v9209_v20, 0.0  ;;  %5944 = vmatprep.subr.bf16.mxu1 %v9682_v19  ;;  %v3387_v37 = vpop.f32.mrb[3].mxu1  ;;  %v9227_v43 = vadd.f32 %v3385_v32, %v11837_v12 }
 0x1f3   : > { %v3924_v41 = vmul.f32 0.01, %v9225_v24  ;;  %v9212_v44 = vadd.f32 %v3168_v33, %v11840_v14  ;;  %vm3860_vm2 = vcmp.ge.f32.partialorder %v9225_v24, 0.0  ;;  %vm3859_vm3 = vcmp.ge.f32.partialorder %v9210_v30, 0.0  ;;  %v9695_v16 = vld [vmem:[#allocation2 + $0x120] ss:$16 sps:$4 sm:$0xff]  }
 0x1f4   : > { %vm3866_vm1 = vcmp.ge.f32.partialorder %v9211_v31, 0.0  ;;  %3629 = vmatmul.mubr.bf16.gmra.mrb[28].mxu0 %v10312_v38  ;;  %v3930_v42 = vmul.f32 0.01, %v9211_v31  ;;  %3848 = vmatmul.mubr.bf16.gmra.mrb[28].mxu1 %v10312_v38  ;;  %v3986_v46 = vsel %vm3858_vm0, %v9209_v20, %v3922_v29  ;;  %v3923_v47 = vmul.f32 0.01, %v9210_v30 }
 0x1f5   : > { %5653 = vmatpush1.bf16.msra.mxu0 %v9677_v27  ;;  %5945 = vmatpush1.bf16.msra.mxu1 %v9680_v28  ;;  %vm3868_vm4 = vcmp.ge.f32.partialorder %v9227_v43, 0.0  ;;  %v3932_v50 = vmul.f32 0.01, %v9227_v43  ;;  %vm3867_vm5 = vcmp.ge.f32.partialorder %v9212_v44, 0.0  ;;  %v3925_v52 = vmul.f32 0.01, %v9226_v36 }
 0x1f6   : > { %5654 = vmatprep.subr.bf16.mxu0 %v9685_v34  ;;  %v3994_v49 = vsel %vm3866_vm1, %v9211_v31, %v3930_v42  ;;  %5946 = vmatprep.subr.bf16.mxu1 %v9688_v35  ;;  %v3931_v54 = vmul.f32 0.01, %v9212_v44  ;;  %v11859_v55 = vadd.f32 %v3387_v37, %v11845_v23  ;;  %v3988_v57 = vsel %vm3860_vm2, %v9225_v24, %v3924_v41  ;;  %v9698_v20 = vld [vmem:[#allocation2 + $0x128] ss:$16 sps:$4 sm:$0xff]   ;;  %v9703_v31 = vld [vmem:[#allocation2 + $0x144] ss:$16 sps:$4 sm:$0xff]  }
 0x1f7   : > { %v3172_v51 = vpop.f32.mrb[4].mxu0  ;;  %v11856_v53 = vpack.c.bf16 %v3994_v49, %v3986_v46  ;;  %v3391_v56 = vpop.f32.mrb[4].mxu1  ;;  %vm3861_vm6 = vcmp.ge.f32.partialorder %v9226_v36, 0.0  ;;  %v3996_v58 = vsel %vm3868_vm4, %v9227_v43, %v3932_v50  ;;  %v3987_v15 = vsel %vm3859_vm3, %v9210_v30, %v3923_v47  ;;  %v9706_v32 = vld [vmem:[#allocation2 + $0x14c] ss:$16 sps:$4 sm:$0xff]  }
 0x1f8   : > { %v9213_v60 = vadd.f32 %v3172_v51, %v11831_v10  ;;  %v3174_v61 = vpop.f32.mrb[5].mxu0  ;;  %v3393_v62 = vpop.f32.mrb[5].mxu1  ;;  %v11863_v0 = vpack.c.bf16 %v3996_v58, %v3988_v57  ;;  %v3995_v7 = vsel %vm3867_vm5, %v9212_v44, %v3931_v54  ;;  %v11868_v13 = vadd.f32 %v3391_v56, %v11837_v12  ;;  %v9701_v37 = vld [vmem:[#allocation2 + $0x140] ss:$16 sps:$4 sm:$0xff]   ;;  %v9704_v41 = vld [vmem:[#allocation2 + $0x148] ss:$16 sps:$4 sm:$0xff]  }
 0x1f9   : > { %5655 = vmatpush1.bf16.msra.mxu0 %v9683_v39  ;;  %v9214_v2 = vadd.f32 %v3174_v61, %v11840_v14  ;;  %v3176_v3 = vpop.f32.mrb[6].mxu0  ;;  %v3395_v5 = vpop.f32.mrb[6].mxu1  ;;  %5947 = vmatpush1.bf16.msra.mxu1 %v9686_v40  ;;  %vm3869_vm7 = vcmp.ge.f32.partialorder %v11859_v55, 0.0  ;;  %v3933_v18 = vmul.f32 0.01, %v11859_v55  ;;  %v11874_v19 = vadd.f32 %v3393_v62, %v11845_v23 }
 0x1fa   : > { %5656 = vmatprep.subr.bf16.mxu0 %v9691_v45  ;;  %5948 = vmatprep.subr.bf16.mxu1 %v9694_v48  ;;  %v11877_v21 = vsel %vm3861_vm6, %v9226_v36, %v3925_v52  ;;  %v3938_v22 = vmul.f32 0.01, %v9213_v60  ;;  %v9215_v25 = vadd.f32 %v3176_v3, %v11831_v10  ;;  %v3178_v26 = vpop.f32.mrb[7].mxu0  ;;  %v3397_v27 = vpop.f32.mrb[7].mxu1  ;;  %v4051_v28 = vpack.c.bf16 %v3995_v7, %v3987_v15  ;;  %v9709_v50 = vld [vmem:[#allocation2 + $0x164] ss:$16 sps:$4 sm:$0xff]  }
 0x1fb   : > { %v3939_v24 = vmul.f32 0.01, %v9214_v2  ;;  %vm3874_vm8 = vcmp.ge.f32.partialorder %v9213_v60, 0.0  ;;  %vm3875_vm9 = vcmp.ge.f32.partialorder %v9214_v2, 0.0  ;;  %v11881_v29 = vadd.f32 %v3395_v5, %v11837_v12  ;;  %v9707_v58 = vld [vmem:[#allocation2 + $0x160] ss:$16 sps:$4 sm:$0xff]  }
 0x1fc   : > { %v9216_v30 = vadd.f32 %v3178_v26, %v11840_v14  ;;  %vm3876_vm10 = vcmp.ge.f32.partialorder %v11868_v13, 0.0  ;;  %v3940_v33 = vmul.f32 0.01, %v11868_v13  ;;  %vm3882_vm11 = vcmp.ge.f32.partialorder %v9215_v25, 0.0  ;;  %5672 = vmatprep.mubr.bf16.mxu0 %v4051_v28  ;;  %5964 = vmatprep.mubr.bf16.mxu1 %v4051_v28  ;;  %v9710_v3 = vld [vmem:[#allocation2 + $0x168] ss:$16 sps:$4 sm:$0xff]  }
 0x1fd   : > { %5657 = vmatpush1.bf16.msra.mxu0 %v9689_v63  ;;  %5949 = vmatpush1.bf16.msra.mxu1 %v9692_v8  ;;  %v3946_v34 = vmul.f32 0.01, %v9215_v25  ;;  %vm3877_vm12 = vcmp.ge.f32.partialorder %v11874_v19, 0.0  ;;  %v11888_v36 = vadd.f32 %v3397_v27, %v11845_v23  ;;  %v3941_v38 = vmul.f32 0.01, %v11874_v19 }
 0x1fe   : > { %5658 = vmatprep.subr.bf16.mxu0 %v9697_v9  ;;  %vm3883_vm13 = vcmp.ge.f32.partialorder %v9216_v30, 0.0  ;;  %v3947_v35 = vmul.f32 0.01, %v9216_v30  ;;  %5950 = vmatprep.subr.bf16.mxu1 %v9700_v17  ;;  %v4003_v42 = vsel %vm3875_vm9, %v9214_v2, %v3939_v24  ;;  %v4002_v43 = vsel %vm3874_vm8, %v9213_v60, %v3938_v22  ;;  %v9712_v60 = vld [vmem:[#allocation2 + $0x16c] ss:$16 sps:$4 sm:$0xff]  }
 0x1ff   : > { %v3182_v39 = vpop.f32.mrb[8].mxu0  ;;  %v3401_v40 = vpop.f32.mrb[8].mxu1  ;;  %v4010_v44 = vsel %vm3882_vm11, %v9215_v25, %v3946_v34  ;;  %v11895_v45 = vmul.f32 0.01, %v11881_v29  ;;  %vm3885_vm14 = vcmp.ge.f32.partialorder %v11888_v36, 0.0  ;;  %v3997_v5 = vsel %vm3869_vm7, %v11859_v55, %v3933_v18 }
 0x200   : > { %v9217_v46 = vadd.f32 %v3182_v39, %v11831_v10  ;;  %v11899_v47 = vadd.f32 %v3401_v40, %v11837_v12  ;;  %v3184_v48 = vpop.f32.mrb[9].mxu0  ;;  %v3403_v49 = vpop.f32.mrb[9].mxu1  ;;  %v4011_v51 = vsel %vm3883_vm13, %v9216_v30, %v3947_v35  ;;  %v11908_v62 = vpack.c.bf16 %v4010_v44, %v4002_v43  ;;  %v9715_v8 = vld [vmem:[#allocation2 + $0x184] ss:$16 sps:$4 sm:$0xff]   ;;  %v9718_v18 = vld [vmem:[#allocation2 + $0x18c] ss:$16 sps:$4 sm:$0xff]  }
 0x201   : > { %5659 = vmatpush1.bf16.msra.mxu0 %v9695_v16  ;;  %5951 = vmatpush1.bf16.msra.mxu1 %v9698_v20  ;;  %v9218_v52 = vadd.f32 %v3184_v48, %v11840_v14  ;;  %v11904_v54 = vadd.f32 %v3403_v49, %v11845_v23  ;;  %v3186_v56 = vpop.f32.mrb[10].mxu0  ;;  %v3405_v57 = vpop.f32.mrb[10].mxu1  ;;  %v11906_v61 = vpack.c.bf16 %v4011_v51, %v4003_v42  ;;  %v3949_v63 = vmul.f32 0.01, %v11888_v36  ;;  %v9713_v27 = vld [vmem:[#allocation2 + $0x180] ss:$16 sps:$4 sm:$0xff]  }
 0x202   : > { %5660 = vmatprep.subr.bf16.mxu0 %v9703_v31  ;;  %5952 = vmatprep.subr.bf16.mxu1 %v9706_v32  ;;  %v3954_v2 = vmul.f32 0.01, %v9217_v46  ;;  %vm3890_vm15 = vcmp.ge.f32.partialorder %v9217_v46, 0.0  ;;  %v11918_v9 = vsel %vm3877_vm12, %v11874_v19, %v3941_v38  ;;  %v11921_v15 = vmul.f32 0.01, %v11899_v47  ;;  %v3188_v20 = vpop.f32.mrb[11].mxu0 }
 0x203   : > { %vm3891_vm0 = vcmp.ge.f32.partialorder %v9218_v52, 0.0  ;;  %v3955_v7 = vmul.f32 0.01, %v9218_v52  ;;  %v9219_v16 = vadd.f32 %v3186_v56, %v11831_v10  ;;  %v11925_v17 = vadd.f32 %v3405_v57, %v11837_v12  ;;  %v3407_v55 = vpop.f32.mrb[11].mxu1  ;;  %v9716_v30 = vld [vmem:[#allocation2 + $0x188] ss:$16 sps:$4 sm:$0xff]  }
 0x204   : > { %v11930_v22 = vsel %vm3876_vm10, %v11868_v13, %v3940_v33  ;;  %vm3884_vm1 = vcmp.ge.f32.partialorder %v11881_v29, 0.0  ;;  %v11934_v19 = vmul.f32 0.01, %v11904_v54  ;;  %v9220_v24 = vadd.f32 %v3188_v20, %v11840_v14  ;;  %v9721_v39 = vld [vmem:[#allocation2 + $0x1a4] ss:$16 sps:$4 sm:$0xff]  }
 0x205   : > { %5661 = vmatpush1.bf16.msra.mxu0 %v9701_v37  ;;  %5953 = vmatpush1.bf16.msra.mxu1 %v9704_v41  ;;  %v11938_v25 = vadd.f32 %v3407_v55, %v11845_v23  ;;  %v11941_v28 = vpack.c.bf16 %v3997_v5, %v11877_v21  ;;  %vm3893_vm2 = vcmp.ge.f32.partialorder %v11904_v54, 0.0  ;;  %vm3898_vm3 = vcmp.ge.f32.partialorder %v9219_v16, 0.0  ;;  %v9719_v48 = vld [vmem:[#allocation2 + $0x1a0] ss:$16 sps:$4 sm:$0xff]   ;;  %v9724_v49 = vld [vmem:[#allocation2 + $0x1ac] ss:$16 sps:$4 sm:$0xff]  }
 0x206   : > { %5662 = vmatprep.subr.bf16.mxu0 %v9709_v50  ;;  %5954 = vmatprep.subr.bf16.mxu1 %v9712_v60  ;;  %v3962_v13 = vmul.f32 0.01, %v9219_v16  ;;  %v4019_v31 = vsel %vm3891_vm0, %v9218_v52, %v3955_v7  ;;  %v4018_v32 = vsel %vm3890_vm15, %v9217_v46, %v3954_v2  ;;  %vm3892_vm4 = vcmp.ge.f32.partialorder %v11899_v47, 0.0  ;;  %v9722_v60 = vld [vmem:[#allocation2 + $0x1a8] ss:$16 sps:$4 sm:$0xff]  }
 0x207   : > { %v3192_v26 = vpop.f32.mrb[12].mxu0  ;;  %vm3900_vm5 = vcmp.ge.f32.partialorder %v11925_v17, 0.0  ;;  %v11949_v33 = vmul.f32 0.01, %v11925_v17  ;;  %vm3899_vm6 = vcmp.ge.f32.partialorder %v9220_v24, 0.0  ;;  %vm3901_vm7 = vcmp.ge.f32.partialorder %v11938_v25, 0.0 }
 0x208   : > { %v3963_v34 = vmul.f32 0.01, %v9220_v24  ;;  %v11953_v21 = vmul.f32 0.01, %v11938_v25  ;;  %v9221_v35 = vadd.f32 %v3192_v26, %v11831_v10  ;;  %v3411_v37 = vpop.f32.mrb[12].mxu1  ;;  %v3194_v38 = vpop.f32.mrb[13].mxu0  ;;  %v4026_v40 = vsel %vm3898_vm3, %v9219_v16, %v3962_v13 }
 0x209   : > { %5663 = vmatpush1.bf16.msra.mxu0 %v9707_v58  ;;  %5955 = vmatpush1.bf16.msra.mxu1 %v9710_v3  ;;  %v4013_v41 = vsel %vm3885_vm14, %v11888_v36, %v3949_v63  ;;  %v11961_v42 = vadd.f32 %v3411_v37, %v11837_v12  ;;  %v9222_v43 = vadd.f32 %v3194_v38, %v11840_v14  ;;  %v3413_v44 = vpop.f32.mrb[13].mxu1  ;;  %v3196_v46 = vpop.f32.mrb[14].mxu0  ;;  %v9727_v63 = vld [vmem:[#allocation2 + $0x1c4] ss:$16 sps:$4 sm:$0xff]   ;;  %v9730_v20 = vld [vmem:[#allocation2 + $0x1cc] ss:$16 sps:$4 sm:$0xff]  }
 0x20a   : > { %5664 = vmatprep.subr.bf16.mxu0 %v9715_v8  ;;  %5956 = vmatprep.subr.bf16.mxu1 %v9718_v18  ;;  %v4027_v50 = vsel %vm3899_vm6, %v9220_v24, %v3963_v34  ;;  %v11965_v51 = vpack.c.bf16 %v4026_v40, %v4018_v32  ;;  %vm3906_vm8 = vcmp.ge.f32.partialorder %v9221_v35, 0.0  ;;  %v3970_v52 = vmul.f32 0.01, %v9221_v35  ;;  %v3415_v57 = vpop.f32.mrb[14].mxu1  ;;  %v3198_v58 = vpop.f32.mrb[15].mxu0 }
 0x20b   : > { %v9238_v56 = vadd.f32 %v3413_v44, %v11845_v23  ;;  %v9223_v36 = vadd.f32 %v3196_v46, %v11831_v10  ;;  %vm3908_vm9 = vcmp.ge.f32.partialorder %v11961_v42, 0.0  ;;  %v3972_v2 = vmul.f32 0.01, %v11961_v42  ;;  %v3417_v16 = vpop.f32.mrb[15].mxu1  ;;  %v9725_v26 = vld [vmem:[#allocation2 + $0x1c0] ss:$16 sps:$4 sm:$0xff]  }
 0x20c   : > { %vm3907_vm10 = vcmp.ge.f32.partialorder %v9222_v43, 0.0  ;;  %v3971_v3 = vmul.f32 0.01, %v9222_v43  ;;  %v9239_v8 = vadd.f32 %v3415_v57, %v11837_v12  ;;  %v9224_v10 = vadd.f32 %v3198_v58, %v11840_v14  ;;  %v9739_v44 = vld [vmem:[#allocation2 + $0x204] ss:$16 sps:$4 sm:$0xff]  }
 0x20d   : > { %5665 = vmatpush1.bf16.msra.mxu0 %v9713_v27  ;;  %vm3909_vm11 = vcmp.ge.f32.partialorder %v9238_v56, 0.0  ;;  %v3973_v5 = vmul.f32 0.01, %v9238_v56  ;;  %vm3914_vm12 = vcmp.ge.f32.partialorder %v9223_v36, 0.0  ;;  %v3978_v7 = vmul.f32 0.01, %v9223_v36  ;;  %5957 = vmatpush1.bf16.msra.mxu1 %v9716_v30 }
 0x20e   : > { %5666 = vmatprep.subr.bf16.mxu0 %v9721_v39  ;;  %5958 = vmatprep.subr.bf16.mxu1 %v9724_v49  ;;  %v11973_v55 = vpack.c.bf16 %v4027_v50, %v4019_v31  ;;  %v4035_v18 = vsel %vm3907_vm10, %v9222_v43, %v3971_v3  ;;  %v9240_v24 = vadd.f32 %v3417_v16, %v11845_v23  ;;  %v9728_v27 = vld [vmem:[#allocation2 + $0x1c8] ss:$16 sps:$4 sm:$0xff]   ;;  %vm3916_vm13 = vcmp.ge.f32.partialorder %v9239_v8, 0.0  ;;  %v9733_v31 = vld [vmem:[#allocation2 + $0x1e4] ss:$16 sps:$4 sm:$0xff]  }
 0x20f   : > { %v4034_v13 = vsel %vm3906_vm8, %v9221_v35, %v3970_v52  ;;  %v4042_v32 = vsel %vm3914_vm12, %v9223_v36, %v3978_v7  ;;  %v11978_v30 = vpack.c.bf16 %v4013_v41, %v11918_v9  ;;  %v3980_v12 = vmul.f32 0.01, %v9239_v8  ;;  %v9736_v9 = vld [vmem:[#allocation2 + $0x1ec] ss:$16 sps:$4 sm:$0xff]   ;;  %v9740_v49 = vld [vmem:[#allocation2 + $0x208] ss:$16 sps:$4 sm:$0xff]  }
 0x210   : > { %vm3915_vm14 = vcmp.ge.f32.partialorder %v9224_v10, 0.0  ;;  %v3979_v14 = vmul.f32 0.01, %v9224_v10  ;;  %vm3917_vm15 = vcmp.ge.f32.partialorder %v9240_v24, 0.0  ;;  %v3981_v34 = vmul.f32 0.01, %v9240_v24 }
 0x211   : > { %5667 = vmatpush1.bf16.msra.mxu0 %v9719_v48  ;;  %5959 = vmatpush1.bf16.msra.mxu1 %v9722_v60  ;;  %v11980_v37 = vpack.c.bf16 %v4042_v32, %v4034_v13  ;;  %v4012_v23 = vsel %vm3884_vm1, %v11881_v29, %v11895_v45  ;;  %v4021_v39 = vsel %vm3893_vm2, %v11904_v54, %v11934_v19  ;;  %v9731_v54 = vld [vmem:[#allocation2 + $0x1e0] ss:$16 sps:$4 sm:$0xff]   ;;  %v9745_v50 = vld [vmem:[#allocation2 + $0x224] ss:$16 sps:$4 sm:$0xff]   ;;  %v9748_v52 = vld [vmem:[#allocation2 + $0x22c] ss:$16 sps:$4 sm:$0xff]  }
 0x212   : > { %5668 = vmatprep.subr.bf16.mxu0 %v9727_v63  ;;  %5960 = vmatprep.subr.bf16.mxu1 %v9730_v20  ;;  %v4043_v35 = vsel %vm3915_vm14, %v9224_v10, %v3979_v14  ;;  %v11987_v38 = vpack.c.bf16 %v4012_v23, %v11930_v22  ;;  %v4029_v40 = vsel %vm3901_vm7, %v11938_v25, %v11953_v21  ;;  %v9734_v21 = vld [vmem:[#allocation2 + $0x1e8] ss:$16 sps:$4 sm:$0xff]   ;;  %v9737_v48 = vld [vmem:[#allocation2 + $0x200] ss:$16 sps:$4 sm:$0xff]   ;;  %v9751_v36 = vld [vmem:[#allocation2 + $0x244] ss:$16 sps:$4 sm:$0xff]  }
 0x213   : > { %v11997_v41 = vpack.c.bf16 %v4043_v35, %v4035_v18  ;;  %v11999_v43 = vpack.c.bf16 %v4029_v40, %v4021_v39  ;;  %v4020_v29 = vsel %vm3892_vm4, %v11899_v47, %v11921_v15  ;;  %v4028_v45 = vsel %vm3900_vm5, %v11925_v17, %v11949_v33  ;;  %v9742_v17 = vld [vmem:[#allocation2 + $0x20c] ss:$16 sps:$4 sm:$0xff]   ;;  %v9749_v58 = vld [vmem:[#allocation2 + $0x240] ss:$16 sps:$4 sm:$0xff]   ;;  %v9752_v60 = vld [vmem:[#allocation2 + $0x248] ss:$16 sps:$4 sm:$0xff]  }
 0x214   : > { %v12009_v22 = vpack.c.bf16 %v4028_v45, %v4020_v29  ;;  %v4037_v19 = vsel %vm3909_vm11, %v9238_v56, %v3973_v5  ;;  %v4045_v25 = vsel %vm3917_vm15, %v9240_v24, %v3981_v34  ;;  %v4036_v47 = vsel %vm3908_vm9, %v11961_v42, %v3972_v2  ;;  %v9743_v42 = vld [vmem:[#allocation2 + $0x220] ss:$16 sps:$4 sm:$0xff]   ;;  %v9746_v56 = vld [vmem:[#allocation2 + $0x228] ss:$16 sps:$4 sm:$0xff]   ;;  %v9754_v57 = vld [vmem:[#allocation2 + $0x24c] ss:$16 sps:$4 sm:$0xff]  }
 0x215   : > { %5669 = vmatpush1.bf16.msra.mxu0 %v9725_v26  ;;  %5961 = vmatpush1.bf16.msra.mxu1 %v9728_v27  ;;  %v12013_v46 = vpack.c.bf16 %v4045_v25, %v4037_v19  ;;  %v4044_v15 = vsel %vm3916_vm13, %v9239_v8, %v3980_v12  ;;  %v9757_v63 = vld [vmem:[#allocation2 + $0x264] ss:$16 sps:$4 sm:$0xff]   ;;  %v9758_v2 = vld [vmem:[#allocation2 + $0x268] ss:$16 sps:$4 sm:$0xff]   ;;  %v9766_v5 = vld [vmem:[#allocation2 + $0x28c] ss:$16 sps:$4 sm:$0xff]  }
 0x216   : > { %5670 = vmatprep.subr.bf16.mxu0 %v9733_v31  ;;  %5962 = vmatprep.subr.bf16.mxu1 %v9736_v9  ;;  %v12019_v33 = vpack.c.bf16 %v4044_v15, %v4036_v47  ;;  %v9763_v3 = vld [vmem:[#allocation2 + $0x284] ss:$16 sps:$4 sm:$0xff]   ;;  %v9761_v7 = vld [vmem:[#allocation2 + $0x280] ss:$16 sps:$4 sm:$0xff]   ;;  %v9764_v8 = vld [vmem:[#allocation2 + $0x288] ss:$16 sps:$4 sm:$0xff]  }
 0x217   : > { %v9769_v10 = vld [vmem:[#allocation2 + $0x2a4] ss:$16 sps:$4 sm:$0xff]   ;;  %v9767_v16 = vld [vmem:[#allocation2 + $0x2a0] ss:$16 sps:$4 sm:$0xff]   ;;  %v9770_v20 = vld [vmem:[#allocation2 + $0x2a8] ss:$16 sps:$4 sm:$0xff]  }
 0x218   : > { %v9778_v18 = vld [vmem:[#allocation2 + $0x2cc] ss:$16 sps:$4 sm:$0xff]   ;;  %v9773_v24 = vld [vmem:[#allocation2 + $0x2c0] ss:$16 sps:$4 sm:$0xff]   ;;  %v9776_v26 = vld [vmem:[#allocation2 + $0x2c8] ss:$16 sps:$4 sm:$0xff]  }
 0x219   : > { %5671 = vmatpush1.bf16.msra.mxu0 %v9731_v54  ;;  %5963 = vmatpush1.bf16.msra.mxu1 %v9734_v21  ;;  %v9781_v27 = vld [vmem:[#allocation2 + $0x2e4] ss:$16 sps:$4 sm:$0xff]   ;;  %v9779_v13 = vld [vmem:[#allocation2 + $0x2e0] ss:$16 sps:$4 sm:$0xff]   ;;  %v9782_v32 = vld [vmem:[#allocation2 + $0x2e8] ss:$16 sps:$4 sm:$0xff]  }
 0x21a   : > { %5713 = vmatprep.subr.bf16.mxu0 %v9739_v44  ;;  %6005 = vmatprep.subr.bf16.mxu1 %v9742_v17  ;;  %v9787_v12 = vld [vmem:[#allocation2 + $0x304] ss:$16 sps:$4 sm:$0xff]   ;;  %v9790_v14 = vld [vmem:[#allocation2 + $0x30c] ss:$16 sps:$4 sm:$0xff]   ;;  %v9785_v34 = vld [vmem:[#allocation2 + $0x300] ss:$16 sps:$4 sm:$0xff]  }
 0x21b   : > { %v9788_v31 = vld [vmem:[#allocation2 + $0x308] ss:$16 sps:$4 sm:$0xff]   ;;  %v9793_v23 = vld [vmem:[#allocation2 + $0x324] ss:$16 sps:$4 sm:$0xff]   ;;  %v9791_v9 = vld [vmem:[#allocation2 + $0x320] ss:$16 sps:$4 sm:$0xff]  }
 0x21c   : > { %5673 = vmatmul.mubr.bf16.vlgmr.msra.gmra.mrb[32].mxu0 %v11856_v53  ;;  %5965 = vmatmul.mubr.bf16.vlgmr.msra.gmra.mrb[32].mxu1 %v11856_v53  ;;  %v9760_v53 = vld [vmem:[#allocation2 + $0x26c] ss:$16 sps:$4 sm:$0xff]   ;;  %v9799_v35 = vld [vmem:[#allocation2 + $0x344] ss:$16 sps:$4 sm:$0xff]   ;;  %v9797_v40 = vld [vmem:[#allocation2 + $0x340] ss:$16 sps:$4 sm:$0xff]  }
 0x21d   : > { %5682 = vmatprep.mubr.bf16.mxu0 %v11906_v61  ;;  %5714 = vmatpush1.bf16.msra.mxu0 %v9737_v48  ;;  %v9802_v39 = vld [vmem:[#allocation2 + $0x34c] ss:$16 sps:$4 sm:$0xff]   ;;  %v9805_v29 = vld [vmem:[#allocation2 + $0x364] ss:$16 sps:$4 sm:$0xff]   ;;  %v9803_v54 = vld [vmem:[#allocation2 + $0x360] ss:$16 sps:$4 sm:$0xff]  }
 0x21e   : > { %5974 = vmatprep.mubr.bf16.mxu1 %v11906_v61  ;;  %6006 = vmatpush1.bf16.msra.mxu1 %v9740_v49  ;;  %v9755_v61 = vld [vmem:[#allocation2 + $0x260] ss:$16 sps:$4 sm:$0xff]   ;;  %v9808_v45 = vld [vmem:[#allocation2 + $0x36c] ss:$16 sps:$4 sm:$0xff]   ;;  %v9806_v19 = vld [vmem:[#allocation2 + $0x368] ss:$16 sps:$4 sm:$0xff]  }
 0x21f   : > { %5715 = vmatprep.subr.bf16.mxu0 %v9745_v50  ;;  %6007 = vmatprep.subr.bf16.mxu1 %v9748_v52  ;;  %v9811_v25 = vld [vmem:[#allocation2 + $0x384] ss:$16 sps:$4 sm:$0xff]   ;;  %v9814_v21 = vld [vmem:[#allocation2 + $0x38c] ss:$16 sps:$4 sm:$0xff]   ;;  %v9809_v44 = vld [vmem:[#allocation2 + $0x380] ss:$16 sps:$4 sm:$0xff]  }
 0x220   : > { %v9812_v47 = vld [vmem:[#allocation2 + $0x388] ss:$16 sps:$4 sm:$0xff]   ;;  %v9817_v15 = vld [vmem:[#allocation2 + $0x3a4] ss:$16 sps:$4 sm:$0xff]   ;;  %v9820_v17 = vld [vmem:[#allocation2 + $0x3ac] ss:$16 sps:$4 sm:$0xff]  }
 0x221   : > { %5716 = vmatpush1.bf16.msra.mxu0 %v9743_v42  ;;  %v9815_v48 = vld [vmem:[#allocation2 + $0x3a0] ss:$16 sps:$4 sm:$0xff]   ;;  %v9818_v49 = vld [vmem:[#allocation2 + $0x3a8] ss:$16 sps:$4 sm:$0xff]   ;;  %v9823_v50 = vld [vmem:[#allocation2 + $0x3c4] ss:$16 sps:$4 sm:$0xff]  }
 0x222   : > { %6008 = vmatpush1.bf16.msra.mxu1 %v9746_v56  ;;  %5717 = vmatprep.subr.bf16.mxu0 %v9751_v36  ;;  %v9826_v52 = vld [vmem:[#allocation2 + $0x3cc] ss:$16 sps:$4 sm:$0xff]   ;;  %v9821_v42 = vld [vmem:[#allocation2 + $0x3c0] ss:$16 sps:$4 sm:$0xff]   ;;  %v9824_v56 = vld [vmem:[#allocation2 + $0x3c8] ss:$16 sps:$4 sm:$0xff]  }
 0x223   : > { %6009 = vmatprep.subr.bf16.mxu1 %v9754_v57  ;;  %v9829_v36 = vld [vmem:[#allocation2 + $0x3e4] ss:$16 sps:$4 sm:$0xff]   ;;  %v9832_v57 = vld [vmem:[#allocation2 + $0x3ec] ss:$16 sps:$4 sm:$0xff]  }
 0x224   : > { %5683 = vmatmul.mubr.bf16.gmra.mrb[36].mxu0 %v11908_v62  ;;  %5975 = vmatmul.mubr.bf16.gmra.mrb[36].mxu1 %v11908_v62  ;;  %v9772_v62 = vld [vmem:[#allocation2 + $0x2ac] ss:$16 sps:$4 sm:$0xff]  }
 0x225   : > { %5692 = vmatprep.mubr.bf16.mxu0 %v11973_v55  ;;  %5718 = vmatpush1.bf16.msra.mxu0 %v9749_v58  ;;  %v9827_v58 = vld [vmem:[#allocation2 + $0x3e0] ss:$16 sps:$4 sm:$0xff]  }
 0x226   : > { %5984 = vmatprep.mubr.bf16.mxu1 %v11973_v55  ;;  %6010 = vmatpush1.bf16.msra.mxu1 %v9752_v60  ;;  %v9775_v55 = vld [vmem:[#allocation2 + $0x2c4] ss:$16 sps:$4 sm:$0xff]   ;;  %v9830_v60 = vld [vmem:[#allocation2 + $0x3e8] ss:$16 sps:$4 sm:$0xff]  }
 0x227   : > { %5719 = vmatprep.subr.bf16.mxu0 %v9757_v63  ;;  %6011 = vmatprep.subr.bf16.mxu1 %v9760_v53  ;;  %v9835_v63 = vld [vmem:[#allocation2 + $0x404] ss:$16 sps:$4 sm:$0xff]   ;;  %v9838_v53 = vld [vmem:[#allocation2 + $0x40c] ss:$16 sps:$4 sm:$0xff]  }
 0x229   : > { %5720 = vmatpush1.bf16.msra.mxu0 %v9755_v61  ;;  %v9833_v61 = vld [vmem:[#allocation2 + $0x400] ss:$16 sps:$4 sm:$0xff]  }
 0x22a   : > { %6012 = vmatpush1.bf16.msra.mxu1 %v9758_v2  ;;  %5721 = vmatprep.subr.bf16.mxu0 %v9763_v3  ;;  %v9836_v2 = vld [vmem:[#allocation2 + $0x408] ss:$16 sps:$4 sm:$0xff]   ;;  %v9841_v3 = vld [vmem:[#allocation2 + $0x424] ss:$16 sps:$4 sm:$0xff]  }
 0x22b   : > { %6013 = vmatprep.subr.bf16.mxu1 %v9766_v5  ;;  %v9844_v5 = vld [vmem:[#allocation2 + $0x42c] ss:$16 sps:$4 sm:$0xff]  }
 0x22c   : > { %5693 = vmatmul.mubr.bf16.gmra.mrb[40].mxu0 %v11965_v51  ;;  %5985 = vmatmul.mubr.bf16.gmra.mrb[40].mxu1 %v11965_v51  ;;  %v9784_v51 = vld [vmem:[#allocation2 + $0x2ec] ss:$16 sps:$4 sm:$0xff]  }
 0x22d   : > { %5702 = vmatprep.mubr.bf16.mxu0 %v11997_v41  ;;  %5722 = vmatpush1.bf16.msra.mxu0 %v9761_v7  ;;  %v9839_v7 = vld [vmem:[#allocation2 + $0x420] ss:$16 sps:$4 sm:$0xff]  }
 0x22e   : > { %5994 = vmatprep.mubr.bf16.mxu1 %v11997_v41  ;;  %6014 = vmatpush1.bf16.msra.mxu1 %v9764_v8  ;;  %v9800_v41 = vld [vmem:[#allocation2 + $0x348] ss:$16 sps:$4 sm:$0xff]  }
 0x22f   : > { %5723 = vmatprep.subr.bf16.mxu0 %v9769_v10  ;;  %6015 = vmatprep.subr.bf16.mxu1 %v9772_v62  ;;  %v9842_v8 = vld [vmem:[#allocation2 + $0x428] ss:$16 sps:$4 sm:$0xff]   ;;  %v9847_v10 = vld [vmem:[#allocation2 + $0x444] ss:$16 sps:$4 sm:$0xff]   ;;  %v9850_v62 = vld [vmem:[#allocation2 + $0x44c] ss:$16 sps:$4 sm:$0xff]  }
 0x231   : > { %5724 = vmatpush1.bf16.msra.mxu0 %v9767_v16  ;;  %v9845_v16 = vld [vmem:[#allocation2 + $0x440] ss:$16 sps:$4 sm:$0xff]  }
 0x232   : > { %6016 = vmatpush1.bf16.msra.mxu1 %v9770_v20  ;;  %5725 = vmatprep.subr.bf16.mxu0 %v9775_v55  ;;  %v9848_v20 = vld [vmem:[#allocation2 + $0x448] ss:$16 sps:$4 sm:$0xff]   ;;  %v9853_v55 = vld [vmem:[#allocation2 + $0x464] ss:$16 sps:$4 sm:$0xff]  }
 0x233   : > { %6017 = vmatprep.subr.bf16.mxu1 %v9778_v18  ;;  %v9854_v18 = vld [vmem:[#allocation2 + $0x468] ss:$16 sps:$4 sm:$0xff]  }
 0x234   : > { %5703 = vmatmul.mubr.bf16.gmra.mrb[44].mxu0 %v11980_v37  ;;  %5995 = vmatmul.mubr.bf16.gmra.mrb[44].mxu1 %v11980_v37  ;;  %v9796_v37 = vld [vmem:[#allocation2 + $0x32c] ss:$16 sps:$4 sm:$0xff]  }
 0x235   : > { %5745 = vmatprep.mubr.bf16.mxu0 %v11941_v28  ;;  %5726 = vmatpush1.bf16.msra.mxu0 %v9773_v24  ;;  %v9859_v24 = vld [vmem:[#allocation2 + $0x484] ss:$16 sps:$4 sm:$0xff]  }
 0x236   : > { %6037 = vmatprep.mubr.bf16.mxu1 %v11941_v28  ;;  %6018 = vmatpush1.bf16.msra.mxu1 %v9776_v26  ;;  %v9794_v28 = vld [vmem:[#allocation2 + $0x328] ss:$16 sps:$4 sm:$0xff]   ;;  %v9862_v26 = vld [vmem:[#allocation2 + $0x48c] ss:$16 sps:$4 sm:$0xff]  }
 0x237   : > { %5727 = vmatprep.subr.bf16.mxu0 %v9781_v27  ;;  %6019 = vmatprep.subr.bf16.mxu1 %v9784_v51  ;;  %v9857_v27 = vld [vmem:[#allocation2 + $0x480] ss:$16 sps:$4 sm:$0xff]   ;;  %v9860_v51 = vld [vmem:[#allocation2 + $0x488] ss:$16 sps:$4 sm:$0xff]  }
 0x239   : > { %5728 = vmatpush1.bf16.msra.mxu0 %v9779_v13  ;;  %v9865_v13 = vld [vmem:[#allocation2 + $0x4a4] ss:$16 sps:$4 sm:$0xff]  }
 0x23a   : > { %6020 = vmatpush1.bf16.msra.mxu1 %v9782_v32  ;;  %5729 = vmatprep.subr.bf16.mxu0 %v9787_v12  ;;  %v9866_v32 = vld [vmem:[#allocation2 + $0x4a8] ss:$16 sps:$4 sm:$0xff]   ;;  %v9871_v12 = vld [vmem:[#allocation2 + $0x4c4] ss:$16 sps:$4 sm:$0xff]  }
 0x23b   : > { %6021 = vmatprep.subr.bf16.mxu1 %v9790_v14  ;;  %v9874_v14 = vld [vmem:[#allocation2 + $0x4cc] ss:$16 sps:$4 sm:$0xff]  }
 0x23d   : > { %5730 = vmatpush1.bf16.msra.mxu0 %v9785_v34  ;;  %v9869_v34 = vld [vmem:[#allocation2 + $0x4c0] ss:$16 sps:$4 sm:$0xff]  }
 0x23e   : > { %6022 = vmatpush1.bf16.msra.mxu1 %v9788_v31  ;;  %5731 = vmatprep.subr.bf16.mxu0 %v9793_v23  ;;  %v9872_v31 = vld [vmem:[#allocation2 + $0x4c8] ss:$16 sps:$4 sm:$0xff]   ;;  %v9877_v23 = vld [vmem:[#allocation2 + $0x4e4] ss:$16 sps:$4 sm:$0xff]  }
 0x23f   : > { %6023 = vmatprep.subr.bf16.mxu1 %v9796_v37  ;;  %v9878_v37 = vld [vmem:[#allocation2 + $0x4e8] ss:$16 sps:$4 sm:$0xff]  }
 0x241   : > { %5732 = vmatpush1.bf16.msra.mxu0 %v9791_v9  ;;  %v9883_v9 = vld [vmem:[#allocation2 + $0x504] ss:$16 sps:$4 sm:$0xff]  }
 0x242   : > { %6024 = vmatpush1.bf16.msra.mxu1 %v9794_v28  ;;  %5733 = vmatprep.subr.bf16.mxu0 %v9799_v35  ;;  %v9886_v28 = vld [vmem:[#allocation2 + $0x50c] ss:$16 sps:$4 sm:$0xff]   ;;  %v9881_v35 = vld [vmem:[#allocation2 + $0x500] ss:$16 sps:$4 sm:$0xff]  }
 0x243   : > { %6025 = vmatprep.subr.bf16.mxu1 %v9802_v39  ;;  %v9884_v39 = vld [vmem:[#allocation2 + $0x508] ss:$16 sps:$4 sm:$0xff]  }
 0x245   : > { %5734 = vmatpush1.bf16.msra.mxu0 %v9797_v40  ;;  %v9889_v40 = vld [vmem:[#allocation2 + $0x524] ss:$16 sps:$4 sm:$0xff]  }
 0x246   : > { %6026 = vmatpush1.bf16.msra.mxu1 %v9800_v41  ;;  %5735 = vmatprep.subr.bf16.mxu0 %v9805_v29  ;;  %v9892_v41 = vld [vmem:[#allocation2 + $0x52c] ss:$16 sps:$4 sm:$0xff]   ;;  %v9887_v29 = vld [vmem:[#allocation2 + $0x520] ss:$16 sps:$4 sm:$0xff]  }
 0x247   : > { %6027 = vmatprep.subr.bf16.mxu1 %v9808_v45  ;;  %v9895_v45 = vld [vmem:[#allocation2 + $0x544] ss:$16 sps:$4 sm:$0xff]  }
 0x249   : > { %5736 = vmatpush1.bf16.msra.mxu0 %v9803_v54  ;;  %v9898_v54 = vld [vmem:[#allocation2 + $0x54c] ss:$16 sps:$4 sm:$0xff]  }
 0x24a   : > { %6028 = vmatpush1.bf16.msra.mxu1 %v9806_v19  ;;  %5737 = vmatprep.subr.bf16.mxu0 %v9811_v25  ;;  %v9893_v19 = vld [vmem:[#allocation2 + $0x540] ss:$16 sps:$4 sm:$0xff]   ;;  %v9896_v25 = vld [vmem:[#allocation2 + $0x548] ss:$16 sps:$4 sm:$0xff]  }
 0x24b   : > { %6029 = vmatprep.subr.bf16.mxu1 %v9814_v21  ;;  %v9901_v21 = vld [vmem:[#allocation2 + $0x564] ss:$16 sps:$4 sm:$0xff]  }
 0x24d   : > { %5738 = vmatpush1.bf16.msra.mxu0 %v9809_v44  ;;  %v9904_v44 = vld [vmem:[#allocation2 + $0x56c] ss:$16 sps:$4 sm:$0xff]  }
 0x24e   : > { %6030 = vmatpush1.bf16.msra.mxu1 %v9812_v47  ;;  %5739 = vmatprep.subr.bf16.mxu0 %v9817_v15  ;;  %v9899_v47 = vld [vmem:[#allocation2 + $0x560] ss:$16 sps:$4 sm:$0xff]   ;;  %v9902_v15 = vld [vmem:[#allocation2 + $0x568] ss:$16 sps:$4 sm:$0xff]  }
 0x24f   : > { %6031 = vmatprep.subr.bf16.mxu1 %v9820_v17  ;;  %v9907_v17 = vld [vmem:[#allocation2 + $0x584] ss:$16 sps:$4 sm:$0xff]  }
 0x251   : > { %5740 = vmatpush1.bf16.msra.mxu0 %v9815_v48  ;;  %v9910_v48 = vld [vmem:[#allocation2 + $0x58c] ss:$16 sps:$4 sm:$0xff]  }
 0x252   : > { %6032 = vmatpush1.bf16.msra.mxu1 %v9818_v49  ;;  %5741 = vmatprep.subr.bf16.mxu0 %v9823_v50  ;;  %v9905_v49 = vld [vmem:[#allocation2 + $0x580] ss:$16 sps:$4 sm:$0xff]   ;;  %v9908_v50 = vld [vmem:[#allocation2 + $0x588] ss:$16 sps:$4 sm:$0xff]  }
 0x253   : > { %6033 = vmatprep.subr.bf16.mxu1 %v9826_v52  ;;  %v9913_v52 = vld [vmem:[#allocation2 + $0x5a4] ss:$16 sps:$4 sm:$0xff]  }
 0x255   : > { %5742 = vmatpush1.bf16.msra.mxu0 %v9821_v42  ;;  %v9916_v42 = vld [vmem:[#allocation2 + $0x5ac] ss:$16 sps:$4 sm:$0xff]  }
 0x256   : > { %6034 = vmatpush1.bf16.msra.mxu1 %v9824_v56  ;;  %5743 = vmatprep.subr.bf16.mxu0 %v9829_v36  ;;  %v9911_v56 = vld [vmem:[#allocation2 + $0x5a0] ss:$16 sps:$4 sm:$0xff]   ;;  %v9914_v36 = vld [vmem:[#allocation2 + $0x5a8] ss:$16 sps:$4 sm:$0xff]  }
 0x257   : > { %6035 = vmatprep.subr.bf16.mxu1 %v9832_v57  ;;  %v9919_v57 = vld [vmem:[#allocation2 + $0x5c4] ss:$16 sps:$4 sm:$0xff]  }
 0x259   : > { %5744 = vmatpush1.bf16.msra.mxu0 %v9827_v58  ;;  %v9922_v58 = vld [vmem:[#allocation2 + $0x5cc] ss:$16 sps:$4 sm:$0xff]  }
 0x25a   : > { %6036 = vmatpush1.bf16.msra.mxu1 %v9830_v60  ;;  %5786 = vmatprep.subr.bf16.mxu0 %v9835_v63  ;;  %v9917_v60 = vld [vmem:[#allocation2 + $0x5c0] ss:$16 sps:$4 sm:$0xff]   ;;  %v9920_v63 = vld [vmem:[#allocation2 + $0x5c8] ss:$16 sps:$4 sm:$0xff]  }
 0x25b   : > { %6078 = vmatprep.subr.bf16.mxu1 %v9838_v53  ;;  %v9925_v53 = vld [vmem:[#allocation2 + $0x5e4] ss:$16 sps:$4 sm:$0xff]  }
 0x25c   : > { %5746 = vmatmul.mubr.bf16.vlgmr.msra.gmra.mrb[32].mxu0 %v11863_v0 }
 0x25d   : > { %6038 = vmatmul.mubr.bf16.vlgmr.msra.gmra.mrb[32].mxu1 %v11863_v0  ;;  %5755 = vmatprep.mubr.bf16.mxu0 %v11978_v30  ;;  %v9856_v0 = vld [vmem:[#allocation2 + $0x46c] ss:$16 sps:$4 sm:$0xff]  }
 0x25e   : > { %6047 = vmatprep.mubr.bf16.mxu1 %v11978_v30  ;;  %5787 = vmatpush1.bf16.msra.mxu0 %v9833_v61  ;;  %v9851_v30 = vld [vmem:[#allocation2 + $0x460] ss:$16 sps:$4 sm:$0xff]   ;;  %v9928_v61 = vld [vmem:[#allocation2 + $0x5ec] ss:$16 sps:$4 sm:$0xff]  }
 0x25f   : > { %6079 = vmatpush1.bf16.msra.mxu1 %v9836_v2  ;;  %5788 = vmatprep.subr.bf16.mxu0 %v9841_v3  ;;  %v9923_v2 = vld [vmem:[#allocation2 + $0x5e0] ss:$16 sps:$4 sm:$0xff]   ;;  %v9926_v3 = vld [vmem:[#allocation2 + $0x5e8] ss:$16 sps:$4 sm:$0xff]  }
 0x260   : > { %6080 = vmatprep.subr.bf16.mxu1 %v9844_v5  ;;  %v9931_v5 = vld [vmem:[#allocation2 + $0x604] ss:$16 sps:$4 sm:$0xff]  }
 0x262   : > { %5789 = vmatpush1.bf16.msra.mxu0 %v9839_v7  ;;  %v9934_v7 = vld [vmem:[#allocation2 + $0x60c] ss:$16 sps:$4 sm:$0xff]  }
 0x263   : > { %6081 = vmatpush1.bf16.msra.mxu1 %v9842_v8  ;;  %5790 = vmatprep.subr.bf16.mxu0 %v9847_v10  ;;  %v920_v8 = vsub.s32 4, %v11814_v59  ;;  %v928_v10 = vsub.s32 6, %v11814_v59 }
 0x264   : > { %5756 = vmatmul.mubr.bf16.gmra.mrb[36].mxu0 %v11987_v38  ;;  %6082 = vmatprep.subr.bf16.mxu1 %v9850_v62  ;;  %v10313_v62 = vld [vmem:[%s12679_s2] sm:$0xff] }
 0x265   : > { %6048 = vmatmul.mubr.bf16.gmra.mrb[36].mxu1 %v11987_v38  ;;  %5765 = vmatprep.mubr.bf16.mxu0 %v11999_v43  ;;  %v9868_v38 = vld [vmem:[#allocation2 + $0x4ac] ss:$16 sps:$4 sm:$0xff]  }
 0x266   : > { %6057 = vmatprep.mubr.bf16.mxu1 %v11999_v43  ;;  %5791 = vmatpush1.bf16.msra.mxu0 %v9845_v16  ;;  %v9863_v43 = vld [vmem:[#allocation2 + $0x4a0] ss:$16 sps:$4 sm:$0xff]   ;;  %v12056_v16 = vrot.slane %v10313_v62, %v920_v8 }
 0x267   : > { %6083 = vmatpush1.bf16.msra.mxu1 %v9848_v20  ;;  %5792 = vmatprep.subr.bf16.mxu0 %v9853_v55  ;;  %v924_v20 = vsub.s32 5, %v11814_v59  ;;  %v12059_v55 = vrot.slane %v10313_v62, %v928_v10  ;;  %v9940_v10 = vld [vmem:[#allocation2 + $0x62c] ss:$16 sps:$4 sm:$0xff]  }
 0x268   : > { %6084 = vmatprep.subr.bf16.mxu1 %v9856_v0  ;;  %v932_v0 = vsub.s32 7, %v11814_v59 }
 0x26a   : > { %5793 = vmatpush1.bf16.msra.mxu0 %v9851_v30 }
 0x26b   : > { %6085 = vmatpush1.bf16.msra.mxu1 %v9854_v18  ;;  %5794 = vmatprep.subr.bf16.mxu0 %v9859_v24 }
 0x26c   : > { %5766 = vmatmul.mubr.bf16.gmra.mrb[40].mxu0 %v12009_v22  ;;  %6086 = vmatprep.subr.bf16.mxu1 %v9862_v26  ;;  %v12063_v26 = vrot.slane %v10313_v62, %v924_v20 }
 0x26d   : > { %6058 = vmatmul.mubr.bf16.gmra.mrb[40].mxu1 %v12009_v22  ;;  %5775 = vmatprep.mubr.bf16.mxu0 %v12013_v46  ;;  %v9880_v22 = vld [vmem:[#allocation2 + $0x4ec] ss:$16 sps:$4 sm:$0xff]  }
 0x26e   : > { %6067 = vmatprep.mubr.bf16.mxu1 %v12013_v46  ;;  %5795 = vmatpush1.bf16.msra.mxu0 %v9857_v27  ;;  %v9875_v46 = vld [vmem:[#allocation2 + $0x4e0] ss:$16 sps:$4 sm:$0xff]  }
 0x26f   : > { %6087 = vmatpush1.bf16.msra.mxu1 %v9860_v51  ;;  %5796 = vmatprep.subr.bf16.mxu0 %v9865_v13 }
 0x270   : > { %6088 = vmatprep.subr.bf16.mxu1 %v9868_v38 }
 0x272   : > { %5797 = vmatpush1.bf16.msra.mxu0 %v9863_v43 }
 0x273   : > { %6089 = vmatpush1.bf16.msra.mxu1 %v9866_v32  ;;  %5798 = vmatprep.subr.bf16.mxu0 %v9871_v12  ;;  %v12066_v32 = vrot.slane %v10313_v62, %v932_v0 }
 0x274   : > { %5776 = vmatmul.mubr.bf16.gmra.mrb[44].mxu0 %v12019_v33  ;;  %6090 = vmatprep.subr.bf16.mxu1 %v9874_v14 }
 0x275   : > { %6068 = vmatmul.mubr.bf16.gmra.mrb[44].mxu1 %v12019_v33  ;;  %v9890_v33 = vld [vmem:[#allocation2 + $0x528] ss:$16 sps:$4 sm:$0xff]  }
 0x276   : > { %5799 = vmatpush1.bf16.msra.mxu0 %v9869_v34 }
 0x277   : > { %6091 = vmatpush1.bf16.msra.mxu1 %v9872_v31  ;;  %5800 = vmatprep.subr.bf16.mxu0 %v9877_v23 }
 0x278   : > { %6092 = vmatprep.subr.bf16.mxu1 %v9880_v22 }
 0x27a   : > { %5801 = vmatpush1.bf16.msra.mxu0 %v9875_v46 }
 0x27b   : > { %6093 = vmatpush1.bf16.msra.mxu1 %v9878_v37  ;;  %5802 = vmatprep.subr.bf16.mxu0 %v9883_v9 }
 0x27c   : > { %6094 = vmatprep.subr.bf16.mxu1 %v9886_v28 }
 0x27e   : > { %5803 = vmatpush1.bf16.msra.mxu0 %v9881_v35 }
 0x27f   : > { %6095 = vmatpush1.bf16.msra.mxu1 %v9884_v39  ;;  %5804 = vmatprep.subr.bf16.mxu0 %v9889_v40 }
 0x280   : > { %6096 = vmatprep.subr.bf16.mxu1 %v9892_v41 }
 0x282   : > { %5805 = vmatpush1.bf16.msra.mxu0 %v9887_v29 }
 0x283   : > { %6097 = vmatpush1.bf16.msra.mxu1 %v9890_v33  ;;  %5806 = vmatprep.subr.bf16.mxu0 %v9895_v45 }
 0x284   : > { %6098 = vmatprep.subr.bf16.mxu1 %v9898_v54 }
 0x286   : > { %5807 = vmatpush1.bf16.msra.mxu0 %v9893_v19 }
 0x287   : > { %6099 = vmatpush1.bf16.msra.mxu1 %v9896_v25  ;;  %5808 = vmatprep.subr.bf16.mxu0 %v9901_v21 }
 0x288   : > { %6100 = vmatprep.subr.bf16.mxu1 %v9904_v44 }
 0x28a   : > { %5809 = vmatpush1.bf16.msra.mxu0 %v9899_v47 }
 0x28b   : > { %6101 = vmatpush1.bf16.msra.mxu1 %v9902_v15  ;;  %5810 = vmatprep.subr.bf16.mxu0 %v9907_v17 }
 0x28c   : > { %6102 = vmatprep.subr.bf16.mxu1 %v9910_v48 }
 0x28e   : > { %5811 = vmatpush1.bf16.msra.mxu0 %v9905_v49 }
 0x28f   : > { %6103 = vmatpush1.bf16.msra.mxu1 %v9908_v50  ;;  %5812 = vmatprep.subr.bf16.mxu0 %v9913_v52 }
 0x290   : > { %6104 = vmatprep.subr.bf16.mxu1 %v9916_v42 }
 0x292   : > { %5813 = vmatpush1.bf16.msra.mxu0 %v9911_v56 }
 0x293   : > { %6105 = vmatpush1.bf16.msra.mxu1 %v9914_v36  ;;  %5814 = vmatprep.subr.bf16.mxu0 %v9919_v57  ;;  %v9929_v57 = vld [vmem:[#allocation2 + $0x600] ss:$16 sps:$4 sm:$0xff]  }
 0x294   : > { %6106 = vmatprep.subr.bf16.mxu1 %v9922_v58  ;;  %v9932_v58 = vld [vmem:[#allocation2 + $0x608] ss:$16 sps:$4 sm:$0xff]  }
 0x296   : > { %5815 = vmatpush1.bf16.msra.mxu0 %v9917_v60 }
 0x297   : > { %6107 = vmatpush1.bf16.msra.mxu1 %v9920_v63  ;;  %5816 = vmatprep.subr.bf16.mxu0 %v9925_v53 }
 0x298   : > { %6108 = vmatprep.subr.bf16.mxu1 %v9928_v61 }
 0x29a   : > { %5817 = vmatpush1.bf16.msra.mxu0 %v9923_v2 }
 0x29b   : > { %6109 = vmatpush1.bf16.msra.mxu1 %v9926_v3  ;;  %5859 = vmatprep.subr.bf16.mxu0 %v9931_v5  ;;  %v9937_v5 = vld [vmem:[#allocation2 + $0x624] ss:$16 sps:$4 sm:$0xff]  }
 0x29c   : > { %6151 = vmatprep.subr.bf16.mxu1 %v9934_v7 }
 0x2af   : > { %v3600_v30 = vpop.f32.mrb[16].mxu0  ;;  %v3819_v24 = vpop.f32.mrb[16].mxu1 }
 0x2b0   : > { %v9241_v18 = vadd.f32 %v3600_v30, %v12056_v16  ;;  %v3602_v27 = vpop.f32.mrb[17].mxu0  ;;  %v9257_v51 = vadd.f32 %v3819_v24, %v12059_v55  ;;  %v3821_v13 = vpop.f32.mrb[17].mxu1 }
 0x2b1   : > { %v3604_v38 = vpop.f32.mrb[18].mxu0  ;;  %v3823_v14 = vpop.f32.mrb[18].mxu1  ;;  %v9242_v59 = vadd.f32 %v3602_v27, %v12063_v26  ;;  %v9258_v28 = vadd.f32 %v3821_v13, %v12066_v32  ;;  %v9935_v27 = vld [vmem:[#allocation2 + $0x620] ss:$16 sps:$4 sm:$0xff]   ;;  %v9938_v13 = vld [vmem:[#allocation2 + $0x628] ss:$16 sps:$4 sm:$0xff]  }
 0x2b2   : > { %v3926_v43 = vmul.f32 0.01, %v9241_v18  ;;  %v9243_v12 = vadd.f32 %v3604_v38, %v12056_v16  ;;  %v3606_v34 = vpop.f32.mrb[19].mxu0  ;;  %vm3862_vm0 = vcmp.ge.f32.partialorder %v9241_v18, 0.0  ;;  %v3825_v31 = vpop.f32.mrb[19].mxu1  ;;  %v9259_v46 = vadd.f32 %v3823_v14, %v12059_v55 }
 0x2b3   : > { %v3928_v23 = vmul.f32 0.01, %v9257_v51  ;;  %v9244_v37 = vadd.f32 %v3606_v34, %v12063_v26  ;;  %vm3864_vm2 = vcmp.ge.f32.partialorder %v9257_v51, 0.0  ;;  %v9260_v35 = vadd.f32 %v3825_v31, %v12066_v32 }
 0x2b4   : > { %vm3870_vm1 = vcmp.ge.f32.partialorder %v9243_v12, 0.0  ;;  %v3934_v22 = vmul.f32 0.01, %v9243_v12  ;;  %v3990_v9 = vsel %vm3862_vm0, %v9241_v18, %v3926_v43  ;;  %vm3872_vm3 = vcmp.ge.f32.partialorder %v9259_v46, 0.0 }
 0x2b5   : > { %v3936_v40 = vmul.f32 0.01, %v9259_v46  ;;  %vm3871_vm4 = vcmp.ge.f32.partialorder %v9244_v37, 0.0  ;;  %v3927_v29 = vmul.f32 0.01, %v9242_v59  ;;  %v3992_v19 = vsel %vm3864_vm2, %v9257_v51, %v3928_v23 }
 0x2b6   : > { %v3998_v39 = vsel %vm3870_vm1, %v9243_v12, %v3934_v22  ;;  %v3935_v45 = vmul.f32 0.01, %v9244_v37  ;;  %vm3863_vm5 = vcmp.ge.f32.partialorder %v9242_v59, 0.0  ;;  %v3937_v17 = vmul.f32 0.01, %v9260_v35 }
 0x2b7   : > { %v3610_v41 = vpop.f32.mrb[20].mxu0  ;;  %v4054_v33 = vpack.c.bf16 %v3998_v39, %v3990_v9  ;;  %v3829_v54 = vpop.f32.mrb[20].mxu1  ;;  %v4000_v25 = vsel %vm3872_vm3, %v9259_v46, %v3936_v40  ;;  %v3929_v42 = vmul.f32 0.01, %v9258_v28  ;;  %vm3873_vm6 = vcmp.ge.f32.partialorder %v9260_v35, 0.0 }
 0x2b8   : > { %v9245_v21 = vadd.f32 %v3610_v41, %v12056_v16  ;;  %v3612_v44 = vpop.f32.mrb[21].mxu0  ;;  %v3831_v47 = vpop.f32.mrb[21].mxu1  ;;  %v12075_v15 = vpack.c.bf16 %v4000_v25, %v3992_v19  ;;  %v3999_v52 = vsel %vm3871_vm4, %v9244_v37, %v3935_v45  ;;  %vm3865_vm7 = vcmp.ge.f32.partialorder %v9258_v28, 0.0  ;;  %v9943_v9 = vld [vmem:[#allocation2 + $0x644] ss:$16 sps:$4 sm:$0xff]  }
 0x2b9   : > { %v9246_v48 = vadd.f32 %v3612_v44, %v12063_v26  ;;  %v3614_v49 = vpop.f32.mrb[22].mxu0  ;;  %v3833_v50 = vpop.f32.mrb[22].mxu1  ;;  %v12080_v56 = vadd.f32 %v3829_v54, %v12059_v55  ;;  %v3991_v36 = vsel %vm3863_vm5, %v9242_v59, %v3927_v29  ;;  %v12083_v63 = vadd.f32 %v3831_v47, %v12066_v32  ;;  %v9941_v29 = vld [vmem:[#allocation2 + $0x640] ss:$16 sps:$4 sm:$0xff]   ;;  %v9946_v45 = vld [vmem:[#allocation2 + $0x64c] ss:$16 sps:$4 sm:$0xff]  }
 0x2ba   : > { %v3942_v60 = vmul.f32 0.01, %v9245_v21  ;;  %v9247_v53 = vadd.f32 %v3614_v49, %v12056_v16  ;;  %v3616_v61 = vpop.f32.mrb[23].mxu0  ;;  %v3835_v2 = vpop.f32.mrb[23].mxu1  ;;  %v4055_v3 = vpack.c.bf16 %v3999_v52, %v3991_v36  ;;  %vm3878_vm8 = vcmp.ge.f32.partialorder %v9245_v21, 0.0 }
 0x2bb   : > { %v3943_v7 = vmul.f32 0.01, %v9246_v48  ;;  %v9248_v8 = vadd.f32 %v3616_v61, %v12063_v26  ;;  %v4001_v62 = vsel %vm3873_vm6, %v9260_v35, %v3937_v17  ;;  %vm3879_vm9 = vcmp.ge.f32.partialorder %v9246_v48, 0.0 }
 0x2bc   : > { %vm3886_vm10 = vcmp.ge.f32.partialorder %v9247_v53, 0.0  ;;  %v3950_v20 = vmul.f32 0.01, %v9247_v53  ;;  %5818 = vmatprep.mubr.bf16.mxu0 %v4055_v3  ;;  %6110 = vmatprep.mubr.bf16.mxu1 %v4055_v3  ;;  %v3993_v0 = vsel %vm3865_vm7, %v9258_v28, %v3929_v42  ;;  %v12090_v30 = vadd.f32 %v3833_v50, %v12059_v55  ;;  %v9952_v42 = vld [vmem:[#allocation2 + $0x66c] ss:$16 sps:$4 sm:$0xff]  }
 0x2bd   : > { %vm3887_vm11 = vcmp.ge.f32.partialorder %v9248_v8, 0.0  ;;  %v3951_v18 = vmul.f32 0.01, %v9248_v8  ;;  %v12093_v24 = vadd.f32 %v3835_v2, %v12066_v32  ;;  %5819 = vmatmul.mubr.bf16.vlgmr.msra.gmra.mrb[32].mxu0 %v4054_v33  ;;  %6111 = vmatmul.mubr.bf16.vlgmr.msra.gmra.mrb[32].mxu1 %v4054_v33  ;;  %v12096_v51 = vmul.f32 0.01, %v12080_v56 }
 0x2be   : > { %5860 = vmatpush1.bf16.msra.mxu0 %v9929_v57  ;;  %6152 = vmatpush1.bf16.msra.mxu1 %v9932_v58  ;;  %v4006_v12 = vsel %vm3878_vm8, %v9245_v21, %v3942_v60  ;;  %v4014_v14 = vsel %vm3886_vm10, %v9247_v53, %v3950_v20  ;;  %v12100_v34 = vpack.c.bf16 %v4001_v62, %v3993_v0  ;;  %v3945_v59 = vmul.f32 0.01, %v12083_v63  ;;  %v9944_v33 = vld [vmem:[#allocation2 + $0x648] ss:$16 sps:$4 sm:$0xff]   ;;  %v9949_v21 = vld [vmem:[#allocation2 + $0x664] ss:$16 sps:$4 sm:$0xff]  }
 0x2bf   : > { %v3620_v38 = vpop.f32.mrb[24].mxu0  ;;  %v3839_v43 = vpop.f32.mrb[24].mxu1  ;;  %5861 = vmatprep.subr.bf16.mxu0 %v9937_v5  ;;  %6153 = vmatprep.subr.bf16.mxu1 %v9940_v10  ;;  %v4007_v46 = vsel %vm3879_vm9, %v9246_v48, %v3943_v7  ;;  %v4015_v37 = vsel %vm3887_vm11, %v9248_v8, %v3951_v18  ;;  %v4062_v54 = vpack.c.bf16 %v4014_v14, %v4006_v12  ;;  %vm3881_vm12 = vcmp.ge.f32.partialorder %v12083_v63, 0.0  ;;  %v9947_v60 = vld [vmem:[#allocation2 + $0x660] ss:$16 sps:$4 sm:$0xff]  }
 0x2c0   : > { %v9249_v31 = vadd.f32 %v3620_v38, %v12056_v16  ;;  %v3622_v23 = vpop.f32.mrb[25].mxu0  ;;  %v3841_v22 = vpop.f32.mrb[25].mxu1  ;;  %v12107_v28 = vadd.f32 %v3839_v43, %v12059_v55  ;;  %v4063_v41 = vpack.c.bf16 %v4015_v37, %v4007_v46  ;;  %v12112_v19 = vmul.f32 0.01, %v12090_v30  ;;  %v9950_v53 = vld [vmem:[#allocation2 + $0x668] ss:$16 sps:$4 sm:$0xff]  }
 0x2c1   : > { %v9250_v35 = vadd.f32 %v3622_v23, %v12063_v26  ;;  %v3624_v39 = vpop.f32.mrb[26].mxu0  ;;  %v3843_v40 = vpop.f32.mrb[26].mxu1  ;;  %vm3889_vm13 = vcmp.ge.f32.partialorder %v12093_v24, 0.0  ;;  %v12116_v25 = vadd.f32 %v3841_v22, %v12066_v32  ;;  %v3953_v44 = vmul.f32 0.01, %v12093_v24 }
 0x2c2   : > { %v3958_v47 = vmul.f32 0.01, %v9249_v31  ;;  %5862 = vmatpush1.bf16.msra.mxu0 %v9935_v27  ;;  %6154 = vmatpush1.bf16.msra.mxu1 %v9938_v13  ;;  %vm3894_vm14 = vcmp.ge.f32.partialorder %v9249_v31, 0.0  ;;  %v9251_v48 = vadd.f32 %v3624_v39, %v12056_v16  ;;  %v12121_v49 = vadd.f32 %v3843_v40, %v12059_v55  ;;  %v3626_v50 = vpop.f32.mrb[27].mxu0  ;;  %v3845_v52 = vpop.f32.mrb[27].mxu1 }
 0x2c3   : > { %v3959_v17 = vmul.f32 0.01, %v9250_v35  ;;  %vm3895_vm15 = vcmp.ge.f32.partialorder %v9250_v35, 0.0  ;;  %5828 = vmatprep.mubr.bf16.mxu0 %v4063_v41  ;;  %5863 = vmatprep.subr.bf16.mxu0 %v9943_v9  ;;  %vm3880_vm0 = vcmp.ge.f32.partialorder %v12080_v56, 0.0  ;;  %v12125_v36 = vmul.f32 0.01, %v12107_v28 }
 0x2c4   : > { %v9252_v57 = vadd.f32 %v3626_v50, %v12063_v26  ;;  %v12129_v58 = vadd.f32 %v3845_v52, %v12066_v32  ;;  %6120 = vmatprep.mubr.bf16.mxu1 %v4063_v41  ;;  %6155 = vmatprep.subr.bf16.mxu1 %v9946_v45  ;;  %v12134_v2 = vsel %vm3881_vm12, %v12083_v63, %v3945_v59  ;;  %vm3888_vm1 = vcmp.ge.f32.partialorder %v12090_v30, 0.0  ;;  %v9955_v7 = vld [vmem:[#allocation2 + $0x684] ss:$16 sps:$4 sm:$0xff]   ;;  %v9958_v63 = vld [vmem:[#allocation2 + $0x68c] ss:$16 sps:$4 sm:$0xff]  }
 0x2c5   : > { %vm3897_vm2 = vcmp.ge.f32.partialorder %v12116_v25, 0.0  ;;  %v12139_v3 = vmul.f32 0.01, %v12116_v25  ;;  %vm3902_vm3 = vcmp.ge.f32.partialorder %v9251_v48, 0.0  ;;  %v3966_v5 = vmul.f32 0.01, %v9251_v48  ;;  %5829 = vmatmul.mubr.bf16.gmra.mrb[36].mxu0 %v4062_v54  ;;  %6121 = vmatmul.mubr.bf16.gmra.mrb[36].mxu1 %v4062_v54 }
 0x2c6   : > { %vm3903_vm4 = vcmp.ge.f32.partialorder %v9252_v57, 0.0  ;;  %v3967_v8 = vmul.f32 0.01, %v9252_v57  ;;  %5864 = vmatpush1.bf16.msra.mxu0 %v9941_v29  ;;  %6156 = vmatpush1.bf16.msra.mxu1 %v9944_v33  ;;  %v4023_v10 = vsel %vm3895_vm15, %v9250_v35, %v3959_v17  ;;  %v4022_v62 = vsel %vm3894_vm14, %v9249_v31, %v3958_v47  ;;  %v9953_v54 = vld [vmem:[#allocation2 + $0x680] ss:$16 sps:$4 sm:$0xff]  }
 0x2c7   : > { %v3630_v61 = vpop.f32.mrb[28].mxu0  ;;  %vm3896_vm5 = vcmp.ge.f32.partialorder %v12107_v28, 0.0  ;;  %vm3904_vm6 = vcmp.ge.f32.partialorder %v12121_v49, 0.0  ;;  %v12146_v20 = vmul.f32 0.01, %v12121_v49  ;;  %vm3905_vm7 = vcmp.ge.f32.partialorder %v12129_v58, 0.0  ;;  %5865 = vmatprep.subr.bf16.mxu0 %v9949_v21  ;;  %6157 = vmatprep.subr.bf16.mxu1 %v9952_v42 }
 0x2c8   : > { %v9253_v0 = vadd.f32 %v3630_v61, %v12056_v16  ;;  %v3849_v18 = vpop.f32.mrb[28].mxu1  ;;  %v3632_v27 = vpop.f32.mrb[29].mxu0  ;;  %v4030_v13 = vsel %vm3902_vm3, %v9251_v48, %v3966_v5  ;;  %v12152_v38 = vmul.f32 0.01, %v12129_v58  ;;  %v4031_v9 = vsel %vm3903_vm4, %v9252_v57, %v3967_v8  ;;  %v9956_v21 = vld [vmem:[#allocation2 + $0x688] ss:$16 sps:$4 sm:$0xff]  }
 0x2c9   : > { %v12155_v43 = vadd.f32 %v3849_v18, %v12059_v55  ;;  %v9254_v12 = vadd.f32 %v3632_v27, %v12063_v26  ;;  %v3851_v14 = vpop.f32.mrb[29].mxu1  ;;  %v3634_v59 = vpop.f32.mrb[30].mxu0  ;;  %v4070_v31 = vpack.c.bf16 %v4030_v13, %v4022_v62  ;;  %v4017_v35 = vsel %vm3889_vm13, %v12093_v24, %v3953_v44  ;;  %v9961_v17 = vld [vmem:[#allocation2 + $0x6a4] ss:$16 sps:$4 sm:$0xff]   ;;  %v9964_v48 = vld [vmem:[#allocation2 + $0x6ac] ss:$16 sps:$4 sm:$0xff]  }
 0x2ca   : > { %v12159_v23 = vadd.f32 %v3851_v14, %v12066_v32  ;;  %v9255_v22 = vadd.f32 %v3634_v59, %v12056_v16  ;;  %v3853_v46 = vpop.f32.mrb[30].mxu1  ;;  %v3636_v37 = vpop.f32.mrb[31].mxu0  ;;  %vm3910_vm8 = vcmp.ge.f32.partialorder %v9253_v0, 0.0  ;;  %v3974_v39 = vmul.f32 0.01, %v9253_v0  ;;  %5866 = vmatpush1.bf16.msra.mxu0 %v9947_v60  ;;  %6158 = vmatpush1.bf16.msra.mxu1 %v9950_v53 }
 0x2cb   : > { %vm3912_vm9 = vcmp.ge.f32.partialorder %v12155_v43, 0.0  ;;  %v3975_v40 = vmul.f32 0.01, %v9254_v12  ;;  %v3976_v41 = vmul.f32 0.01, %v12155_v43  ;;  %vm3911_vm10 = vcmp.ge.f32.partialorder %v9254_v12, 0.0  ;;  %5867 = vmatprep.subr.bf16.mxu0 %v9955_v7  ;;  %6159 = vmatprep.subr.bf16.mxu1 %v9958_v63 }
 0x2cc   : > { %vm3918_vm11 = vcmp.ge.f32.partialorder %v9255_v22, 0.0  ;;  %v3982_v16 = vmul.f32 0.01, %v9255_v22  ;;  %vm3913_vm12 = vcmp.ge.f32.partialorder %v12159_v23, 0.0  ;;  %v9271_v29 = vadd.f32 %v3853_v46, %v12059_v55  ;;  %v3855_v33 = vpop.f32.mrb[31].mxu1 }
 0x2cd   : > { %v9256_v24 = vadd.f32 %v3636_v37, %v12063_v26  ;;  %v4071_v45 = vpack.c.bf16 %v4031_v9, %v4023_v10  ;;  %v3977_v44 = vmul.f32 0.01, %v12159_v23  ;;  %v9272_v47 = vadd.f32 %v3855_v33, %v12066_v32  ;;  %v9959_v61 = vld [vmem:[#allocation2 + $0x6a0] ss:$16 sps:$4 sm:$0xff]   ;;  %v9970_v10 = vld [vmem:[#allocation2 + $0x6cc] ss:$16 sps:$4 sm:$0xff]  }
 0x2ce   : > { %v4046_v50 = vsel %vm3918_vm11, %v9255_v22, %v3982_v16  ;;  %v12174_v52 = vpack.c.bf16 %v4017_v35, %v12134_v2  ;;  %v4039_v55 = vsel %vm3911_vm10, %v9254_v12, %v3975_v40  ;;  %v4038_v26 = vsel %vm3910_vm8, %v9253_v0, %v3974_v39  ;;  %5868 = vmatpush1.bf16.msra.mxu0 %v9953_v54  ;;  %v9962_v2 = vld [vmem:[#allocation2 + $0x6a8] ss:$16 sps:$4 sm:$0xff]   ;;  %v9965_v18 = vld [vmem:[#allocation2 + $0x6c0] ss:$16 sps:$4 sm:$0xff]   ;;  %v9973_v13 = vld [vmem:[#allocation2 + $0x6e4] ss:$16 sps:$4 sm:$0xff]  }
 0x2cf   : > { %vm3919_vm13 = vcmp.ge.f32.partialorder %v9256_v24, 0.0  ;;  %v3983_v42 = vmul.f32 0.01, %v9256_v24  ;;  %5838 = vmatprep.mubr.bf16.mxu0 %v4071_v45  ;;  %6130 = vmatprep.mubr.bf16.mxu1 %v4071_v45  ;;  %v3984_v57 = vmul.f32 0.01, %v9271_v29  ;;  %v4078_v53 = vpack.c.bf16 %v4046_v50, %v4038_v26 }
 0x2d0   : > { %v3985_v60 = vmul.f32 0.01, %v9272_v47  ;;  %5839 = vmatmul.mubr.bf16.gmra.mrb[40].mxu0 %v4070_v31  ;;  %6131 = vmatmul.mubr.bf16.gmra.mrb[40].mxu1 %v4070_v31  ;;  %v4008_v32 = vsel %vm3880_vm0, %v12080_v56, %v12096_v51  ;;  %vm3921_vm14 = vcmp.ge.f32.partialorder %v9272_v47, 0.0  ;;  %v4016_v7 = vsel %vm3888_vm1, %v12090_v30, %v12112_v19  ;;  %v9967_v51 = vld [vmem:[#allocation2 + $0x6c4] ss:$16 sps:$4 sm:$0xff]  }
 0x2d1   : > { %6160 = vmatpush1.bf16.msra.mxu1 %v9956_v21  ;;  %v4047_v5 = vsel %vm3919_vm13, %v9256_v24, %v3983_v42  ;;  %v4025_v8 = vsel %vm3897_vm2, %v12116_v25, %v12139_v3  ;;  %vm3920_vm15 = vcmp.ge.f32.partialorder %v9271_v29, 0.0  ;;  %5869 = vmatprep.subr.bf16.mxu0 %v9961_v17  ;;  %v12191_v63 = vpack.c.bf16 %v4016_v7, %v4008_v32  ;;  %v9968_v27 = vld [vmem:[#allocation2 + $0x6c8] ss:$16 sps:$4 sm:$0xff]   ;;  %v9971_v12 = vld [vmem:[#allocation2 + $0x6e0] ss:$16 sps:$4 sm:$0xff]  }
 0x2d2   : > { %6161 = vmatprep.subr.bf16.mxu1 %v9964_v48  ;;  %v4079_v56 = vpack.c.bf16 %v4047_v5, %v4039_v55  ;;  %v4033_v62 = vsel %vm3905_vm7, %v12129_v58, %v12152_v38  ;;  %v4024_v30 = vsel %vm3896_vm5, %v12107_v28, %v12125_v36  ;;  %v4032_v19 = vsel %vm3904_vm6, %v12121_v49, %v12146_v20  ;;  %v9976_v38 = vld [vmem:[#allocation2 + $0x6ec] ss:$16 sps:$4 sm:$0xff]   ;;  %v9974_v14 = vld [vmem:[#allocation2 + $0x6e8] ss:$16 sps:$4 sm:$0xff]   ;;  %v9979_v59 = vld [vmem:[#allocation2 + $0x704] ss:$16 sps:$4 sm:$0xff]  }
 0x2d3   : > { %v12197_v0 = vpack.c.bf16 %v4033_v62, %v4025_v8  ;;  %v12207_v25 = vpack.c.bf16 %v4032_v19, %v4024_v30  ;;  %v4041_v58 = vsel %vm3913_vm12, %v12159_v23, %v3977_v44  ;;  %v4049_v3 = vsel %vm3921_vm14, %v9272_v47, %v3985_v60  ;;  %5870 = vmatpush1.bf16.msra.mxu0 %v9959_v61  ;;  %v9977_v31 = vld [vmem:[#allocation2 + $0x700] ss:$16 sps:$4 sm:$0xff]   ;;  %v9980_v23 = vld [vmem:[#allocation2 + $0x708] ss:$16 sps:$4 sm:$0xff]   ;;  %v9985_v22 = vld [vmem:[#allocation2 + $0x724] ss:$16 sps:$4 sm:$0xff]  }
 0x2d4   : > { %5848 = vmatprep.mubr.bf16.mxu0 %v4079_v56  ;;  %6140 = vmatprep.mubr.bf16.mxu1 %v4079_v56  ;;  %v12213_v28 = vpack.c.bf16 %v4049_v3, %v4041_v58  ;;  %v4040_v49 = vsel %vm3912_vm9, %v12155_v43, %v3976_v41  ;;  %v4048_v36 = vsel %vm3920_vm15, %v9271_v29, %v3984_v57  ;;  %v9982_v43 = vld [vmem:[#allocation2 + $0x70c] ss:$16 sps:$4 sm:$0xff]   ;;  %v9983_v37 = vld [vmem:[#allocation2 + $0x720] ss:$16 sps:$4 sm:$0xff]   ;;  %v9986_v9 = vld [vmem:[#allocation2 + $0x728] ss:$16 sps:$4 sm:$0xff]  }
 0x2d5   : > { %6162 = vmatpush1.bf16.msra.mxu1 %v9962_v2  ;;  %5871 = vmatprep.subr.bf16.mxu0 %v9967_v51  ;;  %v12219_v20 = vpack.c.bf16 %v4048_v36, %v4040_v49  ;;  %v9988_v46 = vld [vmem:[#allocation2 + $0x72c] ss:$16 sps:$4 sm:$0xff]   ;;  %v9991_v35 = vld [vmem:[#allocation2 + $0x744] ss:$16 sps:$4 sm:$0xff]   ;;  %v9989_v39 = vld [vmem:[#allocation2 + $0x740] ss:$16 sps:$4 sm:$0xff]  }
 0x2d6   : > { %6163 = vmatprep.subr.bf16.mxu1 %v9970_v10  ;;  %v9992_v40 = vld [vmem:[#allocation2 + $0x748] ss:$16 sps:$4 sm:$0xff]   ;;  %v9997_v41 = vld [vmem:[#allocation2 + $0x764] ss:$16 sps:$4 sm:$0xff]   ;;  %v10000_v16 = vld [vmem:[#allocation2 + $0x76c] ss:$16 sps:$4 sm:$0xff]  }
 0x2d7   : > { %5872 = vmatpush1.bf16.msra.mxu0 %v9965_v18  ;;  %v9995_v29 = vld [vmem:[#allocation2 + $0x760] ss:$16 sps:$4 sm:$0xff]   ;;  %v9998_v24 = vld [vmem:[#allocation2 + $0x768] ss:$16 sps:$4 sm:$0xff]   ;;  %v10003_v33 = vld [vmem:[#allocation2 + $0x784] ss:$16 sps:$4 sm:$0xff]  }
 0x2d8   : > { %5849 = vmatmul.mubr.bf16.gmra.mrb[44].mxu0 %v4078_v53  ;;  %6141 = vmatmul.mubr.bf16.gmra.mrb[44].mxu1 %v4078_v53  ;;  %v10006_v45 = vld [vmem:[#allocation2 + $0x78c] ss:$16 sps:$4 sm:$0xff]   ;;  %v10001_v54 = vld [vmem:[#allocation2 + $0x780] ss:$16 sps:$4 sm:$0xff]   ;;  %v10004_v21 = vld [vmem:[#allocation2 + $0x788] ss:$16 sps:$4 sm:$0xff]  }
 0x2d9   : > { %6164 = vmatpush1.bf16.msra.mxu1 %v9968_v27  ;;  %5891 = vmatprep.mubr.bf16.mxu0 %v12100_v34  ;;  %v10009_v44 = vld [vmem:[#allocation2 + $0x7a4] ss:$16 sps:$4 sm:$0xff]   ;;  %v10012_v47 = vld [vmem:[#allocation2 + $0x7ac] ss:$16 sps:$4 sm:$0xff]   ;;  %v10007_v17 = vld [vmem:[#allocation2 + $0x7a0] ss:$16 sps:$4 sm:$0xff]  }
 0x2da   : > { %6183 = vmatprep.mubr.bf16.mxu1 %v12100_v34  ;;  %5873 = vmatprep.subr.bf16.mxu0 %v9973_v13  ;;  %v9994_v34 = vld [vmem:[#allocation2 + $0x74c] ss:$16 sps:$4 sm:$0xff]   ;;  %v10010_v48 = vld [vmem:[#allocation2 + $0x7a8] ss:$16 sps:$4 sm:$0xff]   ;;  %v10015_v50 = vld [vmem:[#allocation2 + $0x7c4] ss:$16 sps:$4 sm:$0xff]  }
 0x2db   : > { %6165 = vmatprep.subr.bf16.mxu1 %v9976_v38  ;;  %5874 = vmatpush1.bf16.msra.mxu0 %v9971_v12  ;;  %v10018_v42 = vld [vmem:[#allocation2 + $0x7cc] ss:$16 sps:$4 sm:$0xff]   ;;  %v10013_v55 = vld [vmem:[#allocation2 + $0x7c0] ss:$16 sps:$4 sm:$0xff]   ;;  %v10016_v26 = vld [vmem:[#allocation2 + $0x7c8] ss:$16 sps:$4 sm:$0xff]  }
 0x2dc   : > { %5875 = vmatprep.subr.bf16.mxu0 %v9979_v59  ;;  %v10021_v57 = vld [vmem:[#allocation2 + $0x7e4] ss:$16 sps:$4 sm:$0xff]   ;;  %v10024_v60 = vld [vmem:[#allocation2 + $0x7ec] ss:$16 sps:$4 sm:$0xff]   ;;  %v10019_v53 = vld [vmem:[#allocation2 + $0x7e0] ss:$16 sps:$4 sm:$0xff]  }
 0x2dd   : > { %6166 = vmatpush1.bf16.msra.mxu1 %v9974_v14  ;;  %v10022_v32 = vld [vmem:[#allocation2 + $0x7e8] ss:$16 sps:$4 sm:$0xff]   ;;  %v10027_v61 = vld [vmem:[%s12682_s5 + $0x4] ss:$8 sps:$4 sm:$0xff]   ;;  %v10030_v5 = vld [vmem:[%s12682_s5 + $0x14] ss:$8 sps:$4 sm:$0xff]  }
 0x2de   : > { %6167 = vmatprep.subr.bf16.mxu1 %v9982_v43  ;;  %v10025_v2 = vld [vmem:[%s12682_s5] ss:$8 sps:$4 sm:$0xff]   ;;  %v10028_v7 = vld [vmem:[%s12682_s5 + $0x10] ss:$8 sps:$4 sm:$0xff]   ;;  %v10033_v8 = vld [vmem:[%s12682_s5 + $0x24] ss:$8 sps:$4 sm:$0xff]  }
 0x2df   : > { %5876 = vmatpush1.bf16.msra.mxu0 %v9977_v31  ;;  %v10031_v56 = vld [vmem:[%s12682_s5 + $0x20] ss:$8 sps:$4 sm:$0xff]   ;;  %v10039_v51 = vld [vmem:[%s12682_s5 + $0x44] ss:$8 sps:$4 sm:$0xff]   ;;  %v10040_v62 = vld [vmem:[%s12682_s5 + $0x50] ss:$8 sps:$4 sm:$0xff]  }
 0x2e0   : > { %5877 = vmatprep.subr.bf16.mxu0 %v9985_v22  ;;  %v10037_v10 = vld [vmem:[%s12682_s5 + $0x40] ss:$8 sps:$4 sm:$0xff]   ;;  %v10048_v19 = vld [vmem:[%s12682_s5 + $0x74] ss:$8 sps:$4 sm:$0xff]   ;;  %v10051_v58 = vld [vmem:[%s12682_s5 + $0x84] ss:$8 sps:$4 sm:$0xff]  }
 0x2e1   : > { %6168 = vmatpush1.bf16.msra.mxu1 %v9980_v23  ;;  %v10043_v30 = vld [vmem:[%s12682_s5 + $0x60] ss:$8 sps:$4 sm:$0xff]   ;;  %v10054_v18 = vld [vmem:[%s12682_s5 + $0x94] ss:$8 sps:$4 sm:$0xff]   ;;  %v10052_v27 = vld [vmem:[%s12682_s5 + $0x90] ss:$8 sps:$4 sm:$0xff]  }
 0x2e2   : > { %6169 = vmatprep.subr.bf16.mxu1 %v9988_v46  ;;  %v10049_v3 = vld [vmem:[%s12682_s5 + $0x80] ss:$8 sps:$4 sm:$0xff]   ;;  %v10060_v36 = vld [vmem:[%s12682_s5 + $0xb4] ss:$8 sps:$4 sm:$0xff]   ;;  %v10063_v13 = vld [vmem:[%s12682_s5 + $0xc4] ss:$8 sps:$4 sm:$0xff]  }
 0x2e3   : > { %5878 = vmatpush1.bf16.msra.mxu0 %v9983_v37  ;;  %v10055_v49 = vld [vmem:[%s12682_s5 + $0xa0] ss:$8 sps:$4 sm:$0xff]   ;;  %v10066_v12 = vld [vmem:[%s12682_s5 + $0xd4] ss:$8 sps:$4 sm:$0xff]   ;;  %v10064_v14 = vld [vmem:[%s12682_s5 + $0xd0] ss:$8 sps:$4 sm:$0xff]  }
 0x2e4   : > { %5879 = vmatprep.subr.bf16.mxu0 %v9991_v35  ;;  %v10061_v38 = vld [vmem:[%s12682_s5 + $0xc0] ss:$8 sps:$4 sm:$0xff]   ;;  %v10069_v43 = vld [vmem:[%s12682_s5 + $0xe4] ss:$8 sps:$4 sm:$0xff]   ;;  %v10072_v31 = vld [vmem:[%s12682_s5 + $0xf4] ss:$8 sps:$4 sm:$0xff]  }
 0x2e5   : > { %6170 = vmatpush1.bf16.msra.mxu1 %v9986_v9  ;;  %v10067_v59 = vld [vmem:[%s12682_s5 + $0xe0] ss:$8 sps:$4 sm:$0xff]   ;;  %v10070_v23 = vld [vmem:[%s12682_s5 + $0xf0] ss:$8 sps:$4 sm:$0xff]   ;;  %v10075_v22 = vld [vmem:[%s12682_s5 + $0x104] ss:$8 sps:$4 sm:$0xff]  }
 0x2e6   : > { %6171 = vmatprep.subr.bf16.mxu1 %v9994_v34  ;;  %v10121_v46 = vld [vmem:[#allocation4] ss:$16 sps:$4 sm:$0xff]   ;;  %v10123_v37 = vld [vmem:[#allocation4 + $0x4] ss:$16 sps:$4 sm:$0xff]  }
 0x2e7   : > { %5880 = vmatpush1.bf16.msra.mxu0 %v9989_v39  ;;  %v10126_v9 = vld [vmem:[#allocation4 + $0x24] ss:$16 sps:$4 sm:$0xff]   ;;  %v10124_v35 = vld [vmem:[#allocation4 + $0x20] ss:$16 sps:$4 sm:$0xff]  }
 0x2e8   : > { %5881 = vmatprep.subr.bf16.mxu0 %v9997_v41  ;;  %v10129_v34 = vld [vmem:[#allocation4 + $0x44] ss:$16 sps:$4 sm:$0xff]   ;;  %v10127_v39 = vld [vmem:[#allocation4 + $0x40] ss:$16 sps:$4 sm:$0xff]  }
 0x2e9   : > { %6172 = vmatpush1.bf16.msra.mxu1 %v9992_v40  ;;  %v10132_v40 = vld [vmem:[#allocation4 + $0x64] ss:$16 sps:$4 sm:$0xff]   ;;  %v10130_v41 = vld [vmem:[#allocation4 + $0x60] ss:$16 sps:$4 sm:$0xff]  }
 0x2ea   : > { %6173 = vmatprep.subr.bf16.mxu1 %v10000_v16  ;;  %v10135_v16 = vld [vmem:[#allocation4 + $0x84] ss:$16 sps:$4 sm:$0xff]  }
 0x2eb   : > { %5882 = vmatpush1.bf16.msra.mxu0 %v9995_v29  ;;  %v10133_v29 = vld [vmem:[#allocation4 + $0x80] ss:$16 sps:$4 sm:$0xff]  }
 0x2ec   : > { %5883 = vmatprep.subr.bf16.mxu0 %v10003_v33  ;;  %v10138_v33 = vld [vmem:[#allocation4 + $0xa4] ss:$16 sps:$4 sm:$0xff]  }
 0x2ed   : > { %6174 = vmatpush1.bf16.msra.mxu1 %v9998_v24  ;;  %v4338_v24 = vld [vmem:[%s12681_s4] sm:$0xf] }
 0x2ee   : > { %6175 = vmatprep.subr.bf16.mxu1 %v10006_v45  ;;  %v12340_v45 = vrot.slane %v4338_v24, %v11818_v1 }
 0x2ef   : > { %5884 = vmatpush1.bf16.msra.mxu0 %v10001_v54  ;;  %v12343_v54 = vrot.slane %v4338_v24, %v11824_v4 }
 0x2f0   : > { %5885 = vmatprep.subr.bf16.mxu0 %v10009_v44  ;;  %v12346_v44 = vrot.slane %v4338_v24, %v11827_v6 }
 0x2f1   : > { %6176 = vmatpush1.bf16.msra.mxu1 %v10004_v21  ;;  %v10136_v21 = vld [vmem:[#allocation4 + $0xa0] ss:$16 sps:$4 sm:$0xff]  }
 0x2f2   : > { %6177 = vmatprep.subr.bf16.mxu1 %v10012_v47  ;;  %v12349_v47 = vrot.slane %v4338_v24, %v11834_v11 }
 0x2f3   : > { %5886 = vmatpush1.bf16.msra.mxu0 %v10007_v17  ;;  %v10141_v17 = vld [vmem:[#allocation4 + $0xc4] ss:$16 sps:$4 sm:$0xff]  }
 0x2f4   : > { %5887 = vmatprep.subr.bf16.mxu0 %v10015_v50 }
 0x2f5   : > { %6178 = vmatpush1.bf16.msra.mxu1 %v10010_v48 }
 0x2f6   : > { %6179 = vmatprep.subr.bf16.mxu1 %v10018_v42 }
 0x2f7   : > { %5888 = vmatpush1.bf16.msra.mxu0 %v10013_v55 }
 0x2f8   : > { %5889 = vmatprep.subr.bf16.mxu0 %v10021_v57 }
 0x2f9   : > { %6180 = vmatpush1.bf16.msra.mxu1 %v10016_v26 }
 0x2fa   : > { %6181 = vmatprep.subr.bf16.mxu1 %v10024_v60  ;;  %v10139_v60 = vld [vmem:[#allocation4 + $0xc0] ss:$16 sps:$4 sm:$0xff]  }
 0x2fb   : > { %5890 = vmatpush1.bf16.msra.mxu0 %v10019_v53 }
 0x2fc   : > { %6732 = vmatprep.subr.bf16.mxu0 %v10027_v61 }
 0x2fd   : > { %6182 = vmatpush1.bf16.msra.mxu1 %v10022_v32 }
 0x2fe   : > { %5892 = vmatmul.mubr.bf16.vlgmr.msra.gmra.mrb[32].mxu0 %v12075_v15  ;;  %7340 = vmatprep.subr.bf16.mxu1 %v10123_v37 }
 0x2ff   : > { %5901 = vmatprep.mubr.bf16.mxu0 %v12174_v52  ;;  %6733 = vmatpush1.bf16.msra.mxu0 %v10025_v2 }
 0x300   : > { %6184 = vmatmul.mubr.bf16.vlgmr.msra.gmra.mrb[32].mxu1 %v12075_v15  ;;  %6734 = vmatprep.subr.bf16.mxu0 %v10030_v5  ;;  %v10036_v15 = vld [vmem:[%s12682_s5 + $0x34] ss:$8 sps:$4 sm:$0xff]  }
 0x301   : > { %6193 = vmatprep.mubr.bf16.mxu1 %v12174_v52  ;;  %v10034_v52 = vld [vmem:[%s12682_s5 + $0x30] ss:$8 sps:$4 sm:$0xff]   ;;  %7341 = vmatpush1.bf16.msra.mxu1 %v10121_v46  ;;  %v10144_v5 = vld [vmem:[#allocation4 + $0xe4] ss:$16 sps:$4 sm:$0xff]  }
 0x302   : > { %7342 = vmatprep.subr.bf16.mxu1 %v10126_v9  ;;  %v10150_v46 = vld [vmem:[#allocation4 + $0x124] ss:$16 sps:$4 sm:$0xff]  }
 0x303   : > { %6735 = vmatpush1.bf16.msra.mxu0 %v10028_v7 }
 0x304   : > { %6736 = vmatprep.subr.bf16.mxu0 %v10033_v8 }
 0x305   : > { %7343 = vmatpush1.bf16.msra.mxu1 %v10124_v35 }
 0x306   : > { %5902 = vmatmul.mubr.bf16.gmra.mrb[36].mxu0 %v12191_v63  ;;  %7344 = vmatprep.subr.bf16.mxu1 %v10129_v34 }
 0x307   : > { %5911 = vmatprep.mubr.bf16.mxu0 %v12197_v0  ;;  %6737 = vmatpush1.bf16.msra.mxu0 %v10031_v56  ;;  %v10142_v56 = vld [vmem:[#allocation4 + $0xe0] ss:$16 sps:$4 sm:$0xff]  }
 0x308   : > { %6194 = vmatmul.mubr.bf16.gmra.mrb[36].mxu1 %v12191_v63  ;;  %6738 = vmatprep.subr.bf16.mxu0 %v10036_v15  ;;  %v10042_v63 = vld [vmem:[%s12682_s5 + $0x54] ss:$8 sps:$4 sm:$0xff]  }
 0x309   : > { %6203 = vmatprep.mubr.bf16.mxu1 %v12197_v0  ;;  %v10045_v0 = vld [vmem:[%s12682_s5 + $0x64] ss:$8 sps:$4 sm:$0xff]   ;;  %7345 = vmatpush1.bf16.msra.mxu1 %v10127_v39 }
 0x30a   : > { %7346 = vmatprep.subr.bf16.mxu1 %v10132_v40 }
 0x30b   : > { %6739 = vmatpush1.bf16.msra.mxu0 %v10034_v52 }
 0x30c   : > { %6740 = vmatprep.subr.bf16.mxu0 %v10039_v51 }
 0x30d   : > { %7347 = vmatpush1.bf16.msra.mxu1 %v10130_v41 }
 0x30e   : > { %5912 = vmatmul.mubr.bf16.gmra.mrb[40].mxu0 %v12207_v25  ;;  %7348 = vmatprep.subr.bf16.mxu1 %v10135_v16 }
 0x30f   : > { %5921 = vmatprep.mubr.bf16.mxu0 %v12213_v28  ;;  %6741 = vmatpush1.bf16.msra.mxu0 %v10037_v10 }
 0x310   : > { %6204 = vmatmul.mubr.bf16.gmra.mrb[40].mxu1 %v12207_v25  ;;  %6742 = vmatprep.subr.bf16.mxu0 %v10042_v63  ;;  %v10046_v25 = vld [vmem:[%s12682_s5 + $0x70] ss:$8 sps:$4 sm:$0xff]  }
 0x311   : > { %6213 = vmatprep.mubr.bf16.mxu1 %v12213_v28  ;;  %v10057_v28 = vld [vmem:[%s12682_s5 + $0xa4] ss:$8 sps:$4 sm:$0xff]   ;;  %7349 = vmatpush1.bf16.msra.mxu1 %v10133_v29  ;;  %v10148_v29 = vld [vmem:[#allocation4 + $0x120] ss:$16 sps:$4 sm:$0xff]  }
 0x312   : > { %7350 = vmatprep.subr.bf16.mxu1 %v10138_v33 }
 0x313   : > { %6743 = vmatpush1.bf16.msra.mxu0 %v10040_v62 }
 0x314   : > { %6744 = vmatprep.subr.bf16.mxu0 %v10045_v0 }
 0x315   : > { %7351 = vmatpush1.bf16.msra.mxu1 %v10136_v21 }
 0x316   : > { %5922 = vmatmul.mubr.bf16.gmra.mrb[44].mxu0 %v12219_v20  ;;  %7352 = vmatprep.subr.bf16.mxu1 %v10141_v17 }
 0x317   : > { %6745 = vmatpush1.bf16.msra.mxu0 %v10043_v30 }
 0x318   : > { %6214 = vmatmul.mubr.bf16.gmra.mrb[44].mxu1 %v12219_v20  ;;  %6746 = vmatprep.subr.bf16.mxu0 %v10048_v19  ;;  %v10058_v20 = vld [vmem:[%s12682_s5 + $0xb0] ss:$8 sps:$4 sm:$0xff]  }
 0x319   : > { %7353 = vmatpush1.bf16.msra.mxu1 %v10139_v60 }
 0x31a   : > { %7354 = vmatprep.subr.bf16.mxu1 %v10144_v5  ;;  %v10153_v5 = vld [vmem:[#allocation4 + $0x144] ss:$16 sps:$4 sm:$0xff]  }
 0x31b   : > { %6747 = vmatpush1.bf16.msra.mxu0 %v10046_v25  ;;  %v10147_v25 = vld [vmem:[#allocation4 + $0x104] ss:$16 sps:$4 sm:$0xff]  }
 0x31c   : > { %6748 = vmatprep.subr.bf16.mxu0 %v10051_v58 }
 0x31d   : > { %7355 = vmatpush1.bf16.msra.mxu1 %v10142_v56 }
 0x31e   : > { %7356 = vmatprep.subr.bf16.mxu1 %v10147_v25 }
 0x31f   : > { %6749 = vmatpush1.bf16.msra.mxu0 %v10049_v3 }
 0x320   : > { %6750 = vmatprep.subr.bf16.mxu0 %v10054_v18 }
 0x323   : > { %6751 = vmatpush1.bf16.msra.mxu0 %v10052_v27 }
 0x324   : > { %6752 = vmatprep.subr.bf16.mxu0 %v10057_v28 }
 0x327   : > { %6753 = vmatpush1.bf16.msra.mxu0 %v10055_v49 }
 0x328   : > { %6754 = vmatprep.subr.bf16.mxu0 %v10060_v36 }
 0x32b   : > { %6755 = vmatpush1.bf16.msra.mxu0 %v10058_v20 }
 0x32c   : > { %6756 = vmatprep.subr.bf16.mxu0 %v10063_v13 }
 0x32f   : > { %6757 = vmatpush1.bf16.msra.mxu0 %v10061_v38 }
 0x330   : > { %6758 = vmatprep.subr.bf16.mxu0 %v10066_v12  ;;  %v10145_v12 = vld [vmem:[#allocation4 + $0x100] ss:$16 sps:$4 sm:$0xff]  }
 0x331   : > { %7357 = vmatpush1.bf16.msra.mxu1 %v10145_v12 }
 0x332   : > { %7358 = vmatprep.subr.bf16.mxu1 %v10150_v46  ;;  %v10159_v46 = vld [vmem:[#allocation4 + $0x184] ss:$16 sps:$4 sm:$0xff]  }
 0x333   : > { %6759 = vmatpush1.bf16.msra.mxu0 %v10064_v14 }
 0x334   : > { %6760 = vmatprep.subr.bf16.mxu0 %v10069_v43 }
 0x335   : > { %7359 = vmatpush1.bf16.msra.mxu1 %v10148_v29 }
 0x336   : > { %7360 = vmatprep.subr.bf16.mxu1 %v10153_v5 }
 0x337   : > { %6761 = vmatpush1.bf16.msra.mxu0 %v10067_v59 }
 0x338   : > { %6762 = vmatprep.subr.bf16.mxu0 %v10072_v31 }
 0x33b   : > { %6763 = vmatpush1.bf16.msra.mxu0 %v10070_v23 }
 0x33c   : > { %6805 = vmatprep.subr.bf16.mxu0 %v10075_v22 }
 0x3d1   : > { %v5893_v48 = vpop.f32.mrb[32].mxu0 }
 0x3d2   : > { %v9273_v42 = vadd.f32 %v5893_v48, %v12340_v45  ;;  %v5895_v26 = vpop.f32.mrb[33].mxu0 }
 0x3d3   : > { %v6185_v50 = vpop.f32.mrb[32].mxu1  ;;  %v9274_v53 = vadd.f32 %v5895_v26, %v12346_v44  ;;  %v5897_v61 = vpop.f32.mrb[34].mxu0  ;;  %v10073_v26 = vld [vmem:[%s12682_s5 + $0x100] ss:$8 sps:$4 sm:$0xff]  }
 0x3d4   : > { %v9289_v55 = vadd.f32 %v6185_v50, %v12343_v54  ;;  %v6187_v57 = vpop.f32.mrb[33].mxu1  ;;  %vm6224_vm0 = vcmp.ge.f32.partialorder %v9273_v42, 0.0  ;;  %v6256_v7 = vmul.f32 0.01, %v9273_v42  ;;  %v9275_v52 = vadd.f32 %v5897_v61, %v12340_v45  ;;  %v5899_v10 = vpop.f32.mrb[35].mxu0 }
 0x3d5   : > { %v9290_v32 = vadd.f32 %v6187_v57, %v12349_v47  ;;  %v6189_v2 = vpop.f32.mrb[34].mxu1  ;;  %vm6225_vm2 = vcmp.ge.f32.partialorder %v9274_v53, 0.0  ;;  %v6257_v15 = vmul.f32 0.01, %v9274_v53  ;;  %v9276_v30 = vadd.f32 %v5899_v10, %v12346_v44 }
 0x3d6   : > { %vm6226_vm1 = vcmp.ge.f32.partialorder %v9289_v55, 0.0  ;;  %v6258_v8 = vmul.f32 0.01, %v9289_v55  ;;  %v9291_v51 = vadd.f32 %v6189_v2, %v12343_v54  ;;  %v6191_v63 = vpop.f32.mrb[35].mxu1  ;;  %v12357_v62 = vsel %vm6224_vm0, %v9273_v42, %v6256_v7  ;;  %v10151_v2 = vld [vmem:[#allocation4 + $0x140] ss:$16 sps:$4 sm:$0xff]  }
 0x3d7   : > { %vm6227_vm3 = vcmp.ge.f32.partialorder %v9290_v32, 0.0  ;;  %v6259_v0 = vmul.f32 0.01, %v9290_v32  ;;  %v9292_v19 = vadd.f32 %v6191_v63, %v12349_v47  ;;  %vm6228_vm4 = vcmp.ge.f32.partialorder %v9275_v52, 0.0  ;;  %7361 = vmatpush1.bf16.msra.mxu1 %v10151_v2  ;;  %v10162_v2 = vld [vmem:[#allocation4 + $0x1a4] ss:$16 sps:$4 sm:$0xff]  }
 0x3d8   : > { %v6260_v58 = vmul.f32 0.01, %v9275_v52  ;;  %vm6230_vm5 = vcmp.ge.f32.partialorder %v9291_v51, 0.0  ;;  %v6262_v3 = vmul.f32 0.01, %v9291_v51  ;;  %v12362_v18 = vsel %vm6226_vm1, %v9289_v55, %v6258_v8 }
 0x3d9   : > { %vm6229_vm6 = vcmp.ge.f32.partialorder %v9276_v30, 0.0  ;;  %v6261_v27 = vmul.f32 0.01, %v9276_v30  ;;  %v6263_v28 = vmul.f32 0.01, %v9292_v19  ;;  %vm6231_vm7 = vcmp.ge.f32.partialorder %v9292_v19, 0.0 }
 0x3da   : > { %v6292_v49 = vsel %vm6228_vm4, %v9275_v52, %v6260_v58  ;;  %v12364_v36 = vsel %vm6230_vm5, %v9291_v51, %v6262_v3  ;;  %v5903_v20 = vpop.f32.mrb[36].mxu0  ;;  %v6289_v38 = vsel %vm6225_vm2, %v9274_v53, %v6257_v15  ;;  %v12376_v40 = vsel %vm6227_vm3, %v9290_v32, %v6259_v0  ;;  %v10078_v53 = vld [vmem:[%s12682_s5 + $0x114] ss:$8 sps:$4 sm:$0xff]   ;;  %v10076_v51 = vld [vmem:[%s12682_s5 + $0x110] ss:$8 sps:$4 sm:$0xff]  }
 0x3db   : > { %v6195_v13 = vpop.f32.mrb[36].mxu1  ;;  %v6320_v14 = vpack.c.bf16 %v6292_v49, %v12357_v62  ;;  %v6322_v59 = vpack.c.bf16 %v12364_v36, %v12362_v18  ;;  %v9277_v43 = vadd.f32 %v5903_v20, %v12340_v45  ;;  %v5905_v23 = vpop.f32.mrb[37].mxu0  ;;  %v6293_v39 = vsel %vm6229_vm6, %v9276_v30, %v6261_v27  ;;  %v10154_v20 = vld [vmem:[#allocation4 + $0x160] ss:$16 sps:$4 sm:$0xff]   ;;  %v10171_v18 = vld [vmem:[#allocation4 + $0xc] ss:$16 sps:$4 sm:$0xff]  }
 0x3dc   : > { %v9293_v31 = vadd.f32 %v6195_v13, %v12343_v54  ;;  %v6197_v22 = vpop.f32.mrb[37].mxu1  ;;  %v9278_v37 = vadd.f32 %v5905_v23, %v12346_v44  ;;  %v5907_v35 = vpop.f32.mrb[38].mxu0  ;;  %v12379_v16 = vsel %vm6231_vm7, %v9292_v19, %v6263_v28  ;;  %v6321_v55 = vpack.c.bf16 %v6293_v39, %v6289_v38  ;;  %v10081_v28 = vld [vmem:[%s12682_s5 + $0x124] ss:$8 sps:$4 sm:$0xff]  }
 0x3dd   : > { %v9294_v9 = vadd.f32 %v6197_v22, %v12349_v47  ;;  %v6199_v34 = vpop.f32.mrb[38].mxu1  ;;  %vm6232_vm8 = vcmp.ge.f32.partialorder %v9277_v43, 0.0  ;;  %v6264_v41 = vmul.f32 0.01, %v9277_v43  ;;  %v9279_v17 = vadd.f32 %v5907_v35, %v12340_v45  ;;  %v5909_v50 = vpop.f32.mrb[39].mxu0  ;;  %v10217_v36 = vld [vmem:[#allocation6 + $0x40] sm:$0xff]  }
 0x3de   : > { %vm6234_vm9 = vcmp.ge.f32.partialorder %v9293_v31, 0.0  ;;  %v6266_v24 = vmul.f32 0.01, %v9293_v31  ;;  %vm6233_vm10 = vcmp.ge.f32.partialorder %v9278_v37, 0.0  ;;  %v6265_v33 = vmul.f32 0.01, %v9278_v37  ;;  %6764 = vmatprep.mubr.bf16.mxu0 %v6321_v55 }
 0x3df   : > { %vm6235_vm11 = vcmp.ge.f32.partialorder %v9294_v9, 0.0  ;;  %v6267_v21 = vmul.f32 0.01, %v9294_v9  ;;  %v9295_v48 = vadd.f32 %v6199_v34, %v12343_v54  ;;  %v6201_v42 = vpop.f32.mrb[39].mxu1  ;;  %v9280_v57 = vadd.f32 %v5909_v50, %v12346_v44  ;;  %6765 = vmatmul.mubr.bf16.vlgmr.msra.gmra.mrb[48].mxu0 %v6320_v14  ;;  %v10156_v22 = vld [vmem:[#allocation4 + $0x164] ss:$16 sps:$4 sm:$0xff]  }
 0x3e0   : > { %v9296_v60 = vadd.f32 %v6201_v42, %v12349_v47  ;;  %v12392_v32 = vsel %vm6232_vm8, %v9277_v43, %v6264_v41  ;;  %v6323_v61 = vpack.c.bf16 %v12379_v16, %v12376_v40  ;;  %vm6236_vm12 = vcmp.ge.f32.partialorder %v9279_v17, 0.0  ;;  %6806 = vmatpush1.bf16.msra.mxu0 %v10073_v26  ;;  %v10082_v55 = vld [vmem:[%s12682_s5 + $0x130] ss:$8 sps:$4 sm:$0xff]   ;;  %7362 = vmatprep.subr.bf16.mxu1 %v10156_v22  ;;  %v10102_v40 = vld [vmem:[%s12682_s5 + $0x194] ss:$8 sps:$4 sm:$0xff]  }
 0x3e1   : > { %v6268_v7 = vmul.f32 0.01, %v9279_v17  ;;  %v6270_v8 = vmul.f32 0.01, %v9295_v48  ;;  %v6297_v56 = vsel %vm6233_vm10, %v9278_v37, %v6265_v33  ;;  %vm6237_vm13 = vcmp.ge.f32.partialorder %v9280_v57, 0.0  ;;  %v5913_v10 = vpop.f32.mrb[40].mxu0  ;;  %6807 = vmatprep.subr.bf16.mxu0 %v10078_v53  ;;  %7363 = vmatpush1.bf16.msra.mxu1 %v10154_v20 }
 0x3e2   : > { %v6269_v15 = vmul.f32 0.01, %v9280_v57  ;;  %vm6239_vm14 = vcmp.ge.f32.partialorder %v9296_v60, 0.0  ;;  %v6271_v52 = vmul.f32 0.01, %v9296_v60  ;;  %vm6238_vm15 = vcmp.ge.f32.partialorder %v9295_v48, 0.0  ;;  %7364 = vmatprep.subr.bf16.mxu1 %v10159_v46 }
 0x3e3   : > { %v6205_v63 = vpop.f32.mrb[40].mxu1  ;;  %v6300_v62 = vsel %vm6236_vm12, %v9279_v17, %v6268_v7  ;;  %v12402_v0 = vsel %vm6235_vm11, %v9294_v9, %v6267_v21  ;;  %v12405_v30 = vsel %vm6234_vm9, %v9293_v31, %v6266_v24  ;;  %v9281_v19 = vadd.f32 %v5913_v10, %v12340_v45  ;;  %v5915_v58 = vpop.f32.mrb[41].mxu0  ;;  %v10079_v31 = vld [vmem:[%s12682_s5 + $0x120] ss:$8 sps:$4 sm:$0xff]   ;;  %v10084_v21 = vld [vmem:[%s12682_s5 + $0x134] ss:$8 sps:$4 sm:$0xff]  }
 0x3e4   : > { %v12409_v25 = vadd.f32 %v6205_v63, %v12343_v54  ;;  %v6207_v3 = vpop.f32.mrb[41].mxu1  ;;  %v6301_v27 = vsel %vm6237_vm13, %v9280_v57, %v6269_v15  ;;  %v6324_v49 = vpack.c.bf16 %v6300_v62, %v12392_v32  ;;  %v9282_v13 = vadd.f32 %v5915_v58, %v12346_v44  ;;  %v5917_v12 = vpop.f32.mrb[42].mxu0  ;;  %6808 = vmatpush1.bf16.msra.mxu0 %v10076_v51  ;;  %v10157_v32 = vld [vmem:[#allocation4 + $0x180] ss:$16 sps:$4 sm:$0xff]   ;;  %v10087_v63 = vld [vmem:[%s12682_s5 + $0x144] ss:$8 sps:$4 sm:$0xff]  }
 0x3e5   : > { %v9298_v38 = vadd.f32 %v6207_v3, %v12349_v47  ;;  %v6209_v14 = vpop.f32.mrb[42].mxu1  ;;  %v6325_v43 = vpack.c.bf16 %v6301_v27, %v6297_v56  ;;  %v12422_v23 = vsel %vm6239_vm14, %v9296_v60, %v6271_v52  ;;  %vm6240_vm0 = vcmp.ge.f32.partialorder %v9281_v19, 0.0  ;;  %v5919_v24 = vpop.f32.mrb[43].mxu0  ;;  %6809 = vmatprep.subr.bf16.mxu0 %v10081_v28  ;;  %7365 = vmatpush1.bf16.msra.mxu1 %v10157_v32  ;;  %v10100_v16 = vld [vmem:[%s12682_s5 + $0x190] ss:$8 sps:$4 sm:$0xff]  }
 0x3e6   : > { %v6272_v37 = vmul.f32 0.01, %v9281_v19  ;;  %v12425_v9 = vmul.f32 0.01, %v12409_v25  ;;  %v12428_v35 = vsel %vm6238_vm15, %v9295_v48, %v6270_v8  ;;  %vm6241_vm1 = vcmp.ge.f32.partialorder %v9282_v13, 0.0  ;;  %v6211_v33 = vpop.f32.mrb[43].mxu1  ;;  %7366 = vmatprep.subr.bf16.mxu1 %v10162_v2 }
 0x3e7   : > { %v6273_v34 = vmul.f32 0.01, %v9282_v13  ;;  %vm6243_vm2 = vcmp.ge.f32.partialorder %v9298_v38, 0.0  ;;  %v6275_v39 = vmul.f32 0.01, %v9298_v38  ;;  %6774 = vmatprep.mubr.bf16.mxu0 %v6325_v43  ;;  %v9283_v41 = vadd.f32 %v5917_v12, %v12340_v45 }
 0x3e8   : > { %v12432_v29 = vadd.f32 %v6209_v14, %v12343_v54  ;;  %v12438_v17 = vsel %vm6240_vm0, %v9281_v19, %v6272_v37  ;;  %v6327_v48 = vpack.c.bf16 %v12422_v23, %v12402_v0  ;;  %vm6242_vm3 = vcmp.ge.f32.partialorder %v12409_v25, 0.0  ;;  %6775 = vmatmul.mubr.bf16.gmra.mrb[52].mxu0 %v6324_v49  ;;  %v10093_v2 = vld [vmem:[%s12682_s5 + $0x164] ss:$8 sps:$4 sm:$0xff]   ;;  %v10221_v23 = vld [vmem:[#allocation6 + $0x50] sm:$0xff]  }
 0x3e9   : > { %v9284_v50 = vadd.f32 %v5919_v24, %v12346_v44  ;;  %v9300_v42 = vadd.f32 %v6211_v33, %v12349_v47  ;;  %v5923_v26 = vpop.f32.mrb[44].mxu0  ;;  %v6305_v60 = vsel %vm6241_vm1, %v9282_v13, %v6273_v34  ;;  %v6326_v53 = vpack.c.bf16 %v12428_v35, %v12405_v30  ;;  %6810 = vmatpush1.bf16.msra.mxu0 %v10079_v31  ;;  %v10160_v13 = vld [vmem:[#allocation4 + $0x1a0] ss:$16 sps:$4 sm:$0xff]   ;;  %v10219_v0 = vld [vmem:[#allocation6 + $0x48] sm:$0xff]  }
 0x3ea   : > { %vm6244_vm4 = vcmp.ge.f32.partialorder %v9283_v41, 0.0  ;;  %v6276_v5 = vmul.f32 0.01, %v9283_v41  ;;  %vm6246_vm5 = vcmp.ge.f32.partialorder %v12432_v29, 0.0  ;;  %v12453_v7 = vmul.f32 0.01, %v12432_v29  ;;  %6811 = vmatprep.subr.bf16.mxu0 %v10084_v21  ;;  %7367 = vmatpush1.bf16.msra.mxu1 %v10160_v13 }
 0x3eb   : > { %v6215_v57 = vpop.f32.mrb[44].mxu1  ;;  %vm6245_vm6 = vcmp.ge.f32.partialorder %v9284_v50, 0.0  ;;  %v6277_v8 = vmul.f32 0.01, %v9284_v50  ;;  %vm6247_vm7 = vcmp.ge.f32.partialorder %v9300_v42, 0.0  ;;  %v9285_v15 = vadd.f32 %v5923_v26, %v12340_v45  ;;  %v5925_v51 = vpop.f32.mrb[45].mxu0 }
 0x3ec   : > { %v6279_v56 = vmul.f32 0.01, %v9300_v42  ;;  %v12457_v52 = vadd.f32 %v6215_v57, %v12343_v54  ;;  %v6217_v10 = vpop.f32.mrb[45].mxu1  ;;  %v6308_v62 = vsel %vm6244_vm4, %v9283_v41, %v6276_v5  ;;  %v12464_v19 = vsel %vm6243_vm2, %v9298_v38, %v6275_v39  ;;  %v5927_v27 = vpop.f32.mrb[46].mxu0  ;;  %v10085_v39 = vld [vmem:[%s12682_s5 + $0x140] ss:$8 sps:$4 sm:$0xff]  }
 0x3ed   : > { %v9286_v58 = vadd.f32 %v5925_v51, %v12346_v44  ;;  %v9302_v3 = vadd.f32 %v6217_v10, %v12349_v47  ;;  %v6219_v28 = vpop.f32.mrb[46].mxu1  ;;  %v6309_v49 = vsel %vm6245_vm6, %v9284_v50, %v6277_v8  ;;  %v6328_v20 = vpack.c.bf16 %v6308_v62, %v12438_v17  ;;  %6812 = vmatpush1.bf16.msra.mxu0 %v10082_v55  ;;  %v5929_v46 = vpop.f32.mrb[47].mxu0  ;;  %v10091_v10 = vld [vmem:[%s12682_s5 + $0x160] ss:$8 sps:$4 sm:$0xff]   ;;  %v10099_v62 = vld [vmem:[%s12682_s5 + $0x184] ss:$8 sps:$4 sm:$0xff]  }
 0x3ee   : > { %vm6248_vm8 = vcmp.ge.f32.partialorder %v9285_v15, 0.0  ;;  %v6280_v12 = vmul.f32 0.01, %v9285_v15  ;;  %vm6250_vm9 = vcmp.ge.f32.partialorder %v12457_v52, 0.0  ;;  %v6282_v14 = vmul.f32 0.01, %v12457_v52  ;;  %6813 = vmatprep.subr.bf16.mxu0 %v10087_v63 }
 0x3ef   : > { %vm6249_vm10 = vcmp.ge.f32.partialorder %v9286_v58, 0.0  ;;  %v6281_v38 = vmul.f32 0.01, %v9286_v58  ;;  %vm6251_vm11 = vcmp.ge.f32.partialorder %v9302_v3, 0.0  ;;  %v6283_v43 = vmul.f32 0.01, %v9302_v3 }
 0x3f0   : > { %v9287_v31 = vadd.f32 %v5927_v27, %v12340_v45  ;;  %v9303_v22 = vadd.f32 %v6219_v28, %v12343_v54  ;;  %v6221_v37 = vpop.f32.mrb[47].mxu1  ;;  %v6329_v34 = vpack.c.bf16 %v6309_v49, %v6305_v60  ;;  %v6312_v41 = vsel %vm6248_vm8, %v9285_v15, %v6280_v12  ;;  %v10090_v45 = vld [vmem:[%s12682_s5 + $0x154] ss:$8 sps:$4 sm:$0xff]   ;;  %v10106_v27 = vld [vmem:[%s12682_s5 + $0x1b0] ss:$8 sps:$4 sm:$0xff]   ;;  %v10220_v30 = vld [vmem:[#allocation6 + $0x8] sm:$0xff]  }
 0x3f1   : > { %v9288_v24 = vadd.f32 %v5929_v46, %v12346_v44  ;;  %v9304_v33 = vadd.f32 %v6221_v37, %v12349_v47  ;;  %v6313_v54 = vsel %vm6249_vm10, %v9286_v58, %v6281_v38  ;;  %v12485_v21 = vsel %vm6247_vm7, %v9300_v42, %v6279_v56  ;;  %6814 = vmatpush1.bf16.msra.mxu0 %v10085_v39  ;;  %v10088_v47 = vld [vmem:[%s12682_s5 + $0x150] ss:$8 sps:$4 sm:$0xff]   ;;  %v10096_v63 = vld [vmem:[%s12682_s5 + $0x174] ss:$8 sps:$4 sm:$0xff]   ;;  %v10103_v58 = vld [vmem:[%s12682_s5 + $0x1a0] ss:$8 sps:$4 sm:$0xff]  }
 0x3f2   : > { %vm6252_vm12 = vcmp.ge.f32.partialorder %v9287_v31, 0.0  ;;  %v6284_v17 = vmul.f32 0.01, %v9287_v31  ;;  %vm6254_vm13 = vcmp.ge.f32.partialorder %v9303_v22, 0.0  ;;  %v6286_v50 = vmul.f32 0.01, %v9303_v22  ;;  %6784 = vmatprep.mubr.bf16.mxu0 %v6329_v34  ;;  %6815 = vmatprep.subr.bf16.mxu0 %v10090_v45 }
 0x3f3   : > { %vm6253_vm14 = vcmp.ge.f32.partialorder %v9288_v24, 0.0  ;;  %v6285_v55 = vmul.f32 0.01, %v9288_v24  ;;  %vm6255_vm15 = vcmp.ge.f32.partialorder %v9304_v33, 0.0  ;;  %v6287_v44 = vmul.f32 0.01, %v9304_v33  ;;  %6785 = vmatmul.mubr.bf16.gmra.mrb[56].mxu0 %v6328_v20 }
 0x3f4   : > { %v6316_v26 = vsel %vm6252_vm12, %v9287_v31, %v6284_v17  ;;  %v6331_v42 = vpack.c.bf16 %v12485_v21, %v12464_v19  ;;  %v6306_v57 = vsel %vm6242_vm3, %v12409_v25, %v12425_v9  ;;  %v6310_v60 = vsel %vm6246_vm5, %v12432_v29, %v12453_v7  ;;  %v10097_v19 = vld [vmem:[%s12682_s5 + $0x180] ss:$8 sps:$4 sm:$0xff]   ;;  %v10111_v28 = vld [vmem:[%s12682_s5 + $0x1c4] ss:$8 sps:$4 sm:$0xff]   ;;  %v10114_v20 = vld [vmem:[%s12682_s5 + $0x1d4] ss:$8 sps:$4 sm:$0xff]  }
 0x3f5   : > { %v6317_v32 = vsel %vm6253_vm14, %v9288_v24, %v6285_v55  ;;  %v6332_v5 = vpack.c.bf16 %v6316_v26, %v6312_v41  ;;  %v6330_v8 = vpack.c.bf16 %v6310_v60, %v6306_v57  ;;  %v6315_v56 = vsel %vm6251_vm11, %v9302_v3, %v6283_v43  ;;  %6816 = vmatpush1.bf16.msra.mxu0 %v10088_v47  ;;  %v10108_v3 = vld [vmem:[%s12682_s5 + $0x1b4] ss:$8 sps:$4 sm:$0xff]   ;;  %v10109_v49 = vld [vmem:[%s12682_s5 + $0x1c0] ss:$8 sps:$4 sm:$0xff]   ;;  %v10112_v13 = vld [vmem:[%s12682_s5 + $0x1d0] ss:$8 sps:$4 sm:$0xff]  }
 0x3f6   : > { %v6333_v15 = vpack.c.bf16 %v6317_v32, %v6313_v54  ;;  %v6319_v51 = vsel %vm6255_vm15, %v9304_v33, %v6287_v44  ;;  %v6314_v25 = vsel %vm6250_vm9, %v12457_v52, %v6282_v14  ;;  %v6318_v9 = vsel %vm6254_vm13, %v9303_v22, %v6286_v50  ;;  %6817 = vmatprep.subr.bf16.mxu0 %v10093_v2  ;;  %v10094_v52 = vld [vmem:[%s12682_s5 + $0x170] ss:$8 sps:$4 sm:$0xff]   ;;  %v10117_v12 = vld [vmem:[%s12682_s5 + $0x1e4] ss:$8 sps:$4 sm:$0xff]   ;;  %v10115_v14 = vld [vmem:[%s12682_s5 + $0x1e0] ss:$8 sps:$4 sm:$0xff]  }
 0x3f7   : > { %v6335_v29 = vpack.c.bf16 %v6319_v51, %v6315_v56  ;;  %v6334_v7 = vpack.c.bf16 %v6318_v9, %v6314_v25  ;;  %v10120_v38 = vld [vmem:[%s12682_s5 + $0x1f4] ss:$8 sps:$4 sm:$0xff]   ;;  %v10118_v43 = vld [vmem:[%s12682_s5 + $0x1f0] ss:$8 sps:$4 sm:$0xff]   ;;  %v10225_v34 = vld [vmem:[#allocation6 + $0x60] sm:$0xff]  }
 0x3f8   : > { %6794 = vmatprep.mubr.bf16.mxu0 %v6333_v15  ;;  %v10163_v31 = vld [vmem:[#allocation4 + $0x1c0] ss:$16 sps:$4 sm:$0xff]   ;;  %v10165_v22 = vld [vmem:[#allocation4 + $0x1c4] ss:$16 sps:$4 sm:$0xff]   ;;  %v10227_v41 = vld [vmem:[#allocation6 + $0x68] sm:$0xff]  }
 0x3f9   : > { %6818 = vmatpush1.bf16.msra.mxu0 %v10091_v10  ;;  %v10168_v46 = vld [vmem:[#allocation4 + $0x1e4] ss:$16 sps:$4 sm:$0xff]   ;;  %7368 = vmatprep.subr.bf16.mxu1 %v10165_v22  ;;  %v10166_v37 = vld [vmem:[#allocation4 + $0x1e0] ss:$16 sps:$4 sm:$0xff]  }
 0x3fa   : > { %6819 = vmatprep.subr.bf16.mxu0 %v10096_v63  ;;  %7369 = vmatpush1.bf16.msra.mxu1 %v10163_v31  ;;  %v10222_v35 = vld [vmem:[#allocation6 + $0x10] sm:$0xff]   ;;  %v10226_v39 = vld [vmem:[#allocation6 + $0x20] sm:$0xff]  }
 0x3fb   : > { %6795 = vmatmul.mubr.bf16.gmra.mrb[60].mxu0 %v6332_v5  ;;  %7370 = vmatprep.subr.bf16.mxu1 %v10168_v46  ;;  %v6400_v24 = vld [vmem:[%s12683_s6] sm:$0x3]  ;;  %v10175_v46 = vld [vmem:[#allocation4 + $0x48] ss:$16 sps:$4 sm:$0xff]  }
 0x3fc   : > { %6837 = vmatprep.mubr.bf16.mxu0 %v6323_v61  ;;  %v10105_v61 = vld [vmem:[%s12682_s5 + $0x1a4] ss:$8 sps:$4 sm:$0xff]   ;;  %v12582_v33 = vrot.slane %v6400_v24, %v11818_v1  ;;  %v12585_v45 = vrot.slane %v6400_v24, %v11827_v6 }
 0x3fd   : > { %6820 = vmatpush1.bf16.msra.mxu0 %v10094_v52  ;;  %v10174_v52 = vld [vmem:[#allocation4 + $0x2c] ss:$16 sps:$4 sm:$0xff]  }
 0x3fe   : > { %6821 = vmatprep.subr.bf16.mxu0 %v10099_v62  ;;  %7371 = vmatpush1.bf16.msra.mxu1 %v10166_v37 }
 0x3ff   : > { %7413 = vmatprep.subr.bf16.mxu1 %v10171_v18 }
 0x401   : > { %6822 = vmatpush1.bf16.msra.mxu0 %v10097_v19 }
 0x402   : > { %6823 = vmatprep.subr.bf16.mxu0 %v10102_v40 }
 0x405   : > { %6824 = vmatpush1.bf16.msra.mxu0 %v10100_v16 }
 0x406   : > { %6825 = vmatprep.subr.bf16.mxu0 %v10105_v61 }
 0x409   : > { %6826 = vmatpush1.bf16.msra.mxu0 %v10103_v58 }
 0x40a   : > { %6827 = vmatprep.subr.bf16.mxu0 %v10108_v3  ;;  %v10172_v3 = vld [vmem:[#allocation4 + $0x28] ss:$16 sps:$4 sm:$0xff]  }
 0x40d   : > { %6828 = vmatpush1.bf16.msra.mxu0 %v10106_v27 }
 0x40e   : > { %6829 = vmatprep.subr.bf16.mxu0 %v10111_v28  ;;  %v10177_v28 = vld [vmem:[#allocation4 + $0x4c] ss:$16 sps:$4 sm:$0xff]  }
 0x411   : > { %6830 = vmatpush1.bf16.msra.mxu0 %v10109_v49 }
 0x412   : > { %6831 = vmatprep.subr.bf16.mxu0 %v10114_v20 }
 0x415   : > { %6832 = vmatpush1.bf16.msra.mxu0 %v10112_v13 }
 0x416   : > { %6833 = vmatprep.subr.bf16.mxu0 %v10117_v12 }
 0x419   : > { %6834 = vmatpush1.bf16.msra.mxu0 %v10115_v14 }
 0x41a   : > { %6835 = vmatprep.subr.bf16.mxu0 %v10120_v38 }
 0x41d   : > { %6836 = vmatpush1.bf16.msra.mxu0 %v10118_v43 }
 0x41e   : > { %9077 = vmatprep.subr.bf16.mxu0 %v10217_v36  ;;  %v10180_v36 = vld [vmem:[#allocation4 + $0x6c] ss:$16 sps:$4 sm:$0xff]  }
 0x420   : > { %6838 = vmatmul.mubr.bf16.vlgmr.msra.gmra.mrb[48].mxu0 %v6322_v59  ;;  %v10218_v59 = vld [vmem:[#allocation6] sm:$0xff]  }
 0x421   : > { %6847 = vmatprep.mubr.bf16.mxu0 %v6327_v48  ;;  %9078 = vmatpush3.bf16.msra.mxu0 %v10218_v59  ;;  %v10223_v48 = vld [vmem:[#allocation6 + $0x58] sm:$0xff]  }
 0x422   : > { %9079 = vmatprep.subr.bf16.mxu0 %v10219_v0 }
 0x425   : > { %9080 = vmatpush3.bf16.msra.mxu0 %v10220_v30 }
 0x426   : > { %9081 = vmatprep.subr.bf16.mxu0 %v10221_v23 }
 0x428   : > { %6848 = vmatmul.mubr.bf16.gmra.mrb[52].mxu0 %v6326_v53  ;;  %v10224_v53 = vld [vmem:[#allocation6 + $0x18] sm:$0xff]  }
 0x429   : > { %6857 = vmatprep.mubr.bf16.mxu0 %v6331_v42  ;;  %9082 = vmatpush3.bf16.msra.mxu0 %v10222_v35 }
 0x42a   : > { %9083 = vmatprep.subr.bf16.mxu0 %v10223_v48 }
 0x42d   : > { %9084 = vmatpush3.bf16.msra.mxu0 %v10224_v53  ;;  %v10178_v53 = vld [vmem:[#allocation4 + $0x68] ss:$16 sps:$4 sm:$0xff]  }
 0x42e   : > { %9085 = vmatprep.subr.bf16.mxu0 %v10225_v34 }
 0x430   : > { %6858 = vmatmul.mubr.bf16.gmra.mrb[56].mxu0 %v6330_v8 }
 0x431   : > { %6867 = vmatprep.mubr.bf16.mxu0 %v6335_v29  ;;  %9086 = vmatpush3.bf16.msra.mxu0 %v10226_v39  ;;  %v10183_v39 = vld [vmem:[#allocation4 + $0x8c] ss:$16 sps:$4 sm:$0xff]  }
 0x432   : > { %9087 = vmatprep.subr.bf16.mxu0 %v10227_v41 }
 0x438   : > { %6868 = vmatmul.mubr.bf16.gmra.mrb[60].mxu0 %v6334_v7  ;;  %v10169_v7 = vld [vmem:[#allocation4 + $0x8] ss:$16 sps:$4 sm:$0xff]  }
 0x4f3   : > { %v6839_v54 = vpop.f32.mrb[48].mxu0 }
 0x4f4   : > { %v9305_v21 = vadd.f32 %v6839_v54, %v12582_v33  ;;  %v6841_v17 = vpop.f32.mrb[49].mxu0 }
 0x4f5   : > { %v9306_v50 = vadd.f32 %v6841_v17, %v12585_v45  ;;  %v6843_v55 = vpop.f32.mrb[50].mxu0 }
 0x4f6   : > { %v6894_v44 = vmul.f32 0.01, %v9305_v21  ;;  %v9307_v47 = vadd.f32 %v6843_v55, %v12582_v33  ;;  %v6845_v26 = vpop.f32.mrb[51].mxu0  ;;  %vm6878_vm0 = vcmp.ge.f32.partialorder %v9305_v21, 0.0 }
 0x4f7   : > { %v6895_v42 = vmul.f32 0.01, %v9306_v50  ;;  %v9308_v57 = vadd.f32 %v6845_v26, %v12585_v45  ;;  %vm6879_vm1 = vcmp.ge.f32.partialorder %v9306_v50, 0.0  ;;  %v10181_v26 = vld [vmem:[#allocation4 + $0x88] ss:$16 sps:$4 sm:$0xff]  }
 0x4f8   : > { %vm6880_vm2 = vcmp.ge.f32.partialorder %v9307_v47, 0.0  ;;  %v6896_v60 = vmul.f32 0.01, %v9307_v47  ;;  %v6910_v2 = vsel %vm6878_vm0, %v9305_v21, %v6894_v44 }
 0x4f9   : > { %vm6881_vm3 = vcmp.ge.f32.partialorder %v9308_v57, 0.0  ;;  %v6897_v32 = vmul.f32 0.01, %v9308_v57  ;;  %v6911_v15 = vsel %vm6879_vm1, %v9306_v50, %v6895_v42 }
 0x4fa   : > { %v6912_v5 = vsel %vm6880_vm2, %v9307_v47, %v6896_v60  ;;  %v10186_v60 = vld [vmem:[#allocation4 + $0xac] ss:$16 sps:$4 sm:$0xff]  }
 0x4fb   : > { %v12591_v8 = vpack.c.bf16 %v6912_v5, %v6910_v2  ;;  %v6849_v56 = vpop.f32.mrb[52].mxu0  ;;  %v6913_v51 = vsel %vm6881_vm3, %v9308_v57, %v6897_v32 }
 0x4fc   : > { %v9309_v25 = vadd.f32 %v6849_v56, %v12582_v33  ;;  %v6851_v9 = vpop.f32.mrb[53].mxu0  ;;  %v12594_v29 = vpack.c.bf16 %v6913_v51, %v6911_v15 }
 0x4fd   : > { %v9310_v10 = vadd.f32 %v6851_v9, %v12585_v45  ;;  %v6853_v63 = vpop.f32.mrb[54].mxu0 }
 0x4fe   : > { %v6898_v62 = vmul.f32 0.01, %v9309_v25  ;;  %v9311_v19 = vadd.f32 %v6853_v63, %v12582_v33  ;;  %v6855_v40 = vpop.f32.mrb[55].mxu0  ;;  %7372 = vmatprep.mubr.bf16.mxu1 %v12594_v29  ;;  %vm6882_vm4 = vcmp.ge.f32.partialorder %v9309_v25, 0.0 }
 0x4ff   : > { %v6899_v16 = vmul.f32 0.01, %v9310_v10  ;;  %v9312_v61 = vadd.f32 %v6855_v40, %v12585_v45  ;;  %7373 = vmatmul.mubr.bf16.vlgmr.msra.gmra.mrb[48].mxu1 %v12591_v8  ;;  %vm6883_vm5 = vcmp.ge.f32.partialorder %v9310_v10, 0.0  ;;  %v10187_v40 = vld [vmem:[#allocation4 + $0xc8] ss:$16 sps:$4 sm:$0xff]  }
 0x500   : > { %vm6884_vm6 = vcmp.ge.f32.partialorder %v9311_v19, 0.0  ;;  %v6900_v58 = vmul.f32 0.01, %v9311_v19  ;;  %7414 = vmatpush1.bf16.msra.mxu1 %v10169_v7  ;;  %v6914_v49 = vsel %vm6882_vm4, %v9309_v25, %v6898_v62  ;;  %v10184_v25 = vld [vmem:[#allocation4 + $0xa8] ss:$16 sps:$4 sm:$0xff]  }
 0x501   : > { %vm6885_vm7 = vcmp.ge.f32.partialorder %v9312_v61, 0.0  ;;  %v6901_v27 = vmul.f32 0.01, %v9312_v61  ;;  %7415 = vmatprep.subr.bf16.mxu1 %v10174_v52  ;;  %v6915_v12 = vsel %vm6883_vm5, %v9310_v10, %v6899_v16  ;;  %v10189_v7 = vld [vmem:[#allocation4 + $0xcc] ss:$16 sps:$4 sm:$0xff]  }
 0x502   : > { %v6916_v20 = vsel %vm6884_vm6, %v9311_v19, %v6900_v58  ;;  %v10190_v16 = vld [vmem:[#allocation4 + $0xe8] ss:$16 sps:$4 sm:$0xff]  }
 0x503   : > { %v6859_v13 = vpop.f32.mrb[56].mxu0  ;;  %v6917_v14 = vsel %vm6885_vm7, %v9312_v61, %v6901_v27  ;;  %v12601_v38 = vpack.c.bf16 %v6916_v20, %v6914_v49  ;;  %v10195_v61 = vld [vmem:[#allocation4 + $0x10c] ss:$16 sps:$4 sm:$0xff]   ;;  %v10193_v58 = vld [vmem:[#allocation4 + $0x108] ss:$16 sps:$4 sm:$0xff]  }
 0x504   : > { %v9313_v43 = vadd.f32 %v6859_v13, %v12582_v33  ;;  %7416 = vmatpush1.bf16.msra.mxu1 %v10172_v3  ;;  %v6861_v31 = vpop.f32.mrb[57].mxu0  ;;  %v12604_v22 = vpack.c.bf16 %v6917_v14, %v6915_v12  ;;  %v10198_v3 = vld [vmem:[#allocation4 + $0x12c] ss:$16 sps:$4 sm:$0xff]   ;;  %v10196_v27 = vld [vmem:[#allocation4 + $0x128] ss:$16 sps:$4 sm:$0xff]  }
 0x505   : > { %v9314_v37 = vadd.f32 %v6861_v31, %v12585_v45  ;;  %v6863_v18 = vpop.f32.mrb[58].mxu0  ;;  %7417 = vmatprep.subr.bf16.mxu1 %v10177_v28  ;;  %v10201_v28 = vld [vmem:[#allocation4 + $0x14c] ss:$16 sps:$4 sm:$0xff]   ;;  %v10199_v49 = vld [vmem:[#allocation4 + $0x148] ss:$16 sps:$4 sm:$0xff]  }
 0x506   : > { %v6902_v59 = vmul.f32 0.01, %v9313_v43  ;;  %v9315_v0 = vadd.f32 %v6863_v18, %v12582_v33  ;;  %v6865_v30 = vpop.f32.mrb[59].mxu0  ;;  %7382 = vmatprep.mubr.bf16.mxu1 %v12604_v22  ;;  %vm6886_vm8 = vcmp.ge.f32.partialorder %v9313_v43, 0.0  ;;  %v10204_v20 = vld [vmem:[#allocation4 + $0x16c] ss:$16 sps:$4 sm:$0xff]  }
 0x507   : > { %v6903_v23 = vmul.f32 0.01, %v9314_v37  ;;  %v9316_v35 = vadd.f32 %v6865_v30, %v12585_v45  ;;  %7383 = vmatmul.mubr.bf16.gmra.mrb[52].mxu1 %v12601_v38  ;;  %vm6887_vm9 = vcmp.ge.f32.partialorder %v9314_v37, 0.0  ;;  %v10202_v13 = vld [vmem:[#allocation4 + $0x168] ss:$16 sps:$4 sm:$0xff]  }
 0x508   : > { %vm6888_vm10 = vcmp.ge.f32.partialorder %v9315_v0, 0.0  ;;  %v6904_v48 = vmul.f32 0.01, %v9315_v0  ;;  %7418 = vmatpush1.bf16.msra.mxu1 %v10175_v46  ;;  %v6918_v41 = vsel %vm6886_vm8, %v9313_v43, %v6902_v59  ;;  %v10207_v12 = vld [vmem:[#allocation4 + $0x18c] ss:$16 sps:$4 sm:$0xff]   ;;  %v10229_v59 = vld [vmem:[#allocation6 + $0x70] sm:$0xff]  }
 0x509   : > { %vm6889_vm11 = vcmp.ge.f32.partialorder %v9316_v35, 0.0  ;;  %v6905_v34 = vmul.f32 0.01, %v9316_v35  ;;  %7419 = vmatprep.subr.bf16.mxu1 %v10180_v36  ;;  %v6919_v21 = vsel %vm6887_vm9, %v9314_v37, %v6903_v23  ;;  %v10210_v14 = vld [vmem:[#allocation4 + $0x1ac] ss:$16 sps:$4 sm:$0xff]  }
 0x50a   : > { %v6920_v24 = vsel %vm6888_vm10, %v9315_v0, %v6904_v48  ;;  %v10208_v43 = vld [vmem:[#allocation4 + $0x1a8] ss:$16 sps:$4 sm:$0xff]   ;;  %v10213_v31 = vld [vmem:[#allocation4 + $0x1cc] ss:$16 sps:$4 sm:$0xff]   ;;  %v10230_v0 = vld [vmem:[#allocation6 + $0x30] sm:$0xff]  }
 0x50b   : > { %v6869_v54 = vpop.f32.mrb[60].mxu0  ;;  %v6921_v17 = vsel %vm6889_vm11, %v9316_v35, %v6905_v34  ;;  %v12611_v50 = vpack.c.bf16 %v6920_v24, %v6918_v41  ;;  %v10211_v46 = vld [vmem:[#allocation4 + $0x1c8] ss:$16 sps:$4 sm:$0xff]   ;;  %v10216_v37 = vld [vmem:[#allocation4 + $0x1ec] ss:$16 sps:$4 sm:$0xff]   ;;  %v10237_v48 = vld [vmem:[#allocation6 + $0xd0] sm:$0xff]  }
 0x50c   : > { %v9317_v55 = vadd.f32 %v6869_v54, %v12582_v33  ;;  %7420 = vmatpush1.bf16.msra.mxu1 %v10178_v53  ;;  %v6871_v44 = vpop.f32.mrb[61].mxu0  ;;  %v12614_v47 = vpack.c.bf16 %v6921_v17, %v6919_v21  ;;  %v10214_v18 = vld [vmem:[#allocation4 + $0x1e8] ss:$16 sps:$4 sm:$0xff]   ;;  %v10238_v53 = vld [vmem:[#allocation6 + $0x90] sm:$0xff]   ;;  %v10241_v41 = vld [vmem:[#allocation6 + $0xe0] sm:$0xff]  }
 0x50d   : > { %v9318_v42 = vadd.f32 %v6871_v44, %v12585_v45  ;;  %v6873_v57 = vpop.f32.mrb[62].mxu0  ;;  %7421 = vmatprep.subr.bf16.mxu1 %v10183_v39  ;;  %v10228_v36 = vld [vmem:[#allocation6 + $0x28] sm:$0xff]   ;;  %v10231_v30 = vld [vmem:[#allocation6 + $0x78] sm:$0xff]   ;;  %v10242_v24 = vld [vmem:[#allocation6 + $0xa0] sm:$0xff]  }
 0x50e   : > { %v6906_v32 = vmul.f32 0.01, %v9317_v55  ;;  %v9319_v2 = vadd.f32 %v6873_v57, %v12582_v33  ;;  %v6875_v5 = vpop.f32.mrb[63].mxu0  ;;  %7392 = vmatprep.mubr.bf16.mxu1 %v12614_v47  ;;  %vm6890_vm12 = vcmp.ge.f32.partialorder %v9317_v55, 0.0  ;;  %9088 = vmatpush3.bf16.msra.mxu0 %v10228_v36  ;;  %v10232_v23 = vld [vmem:[#allocation6 + $0x38] sm:$0xff]   ;;  %v10235_v35 = vld [vmem:[#allocation6 + $0xc8] sm:$0xff]  }
 0x50f   : > { %v6907_v56 = vmul.f32 0.01, %v9318_v42  ;;  %v9320_v15 = vadd.f32 %v6875_v5, %v12585_v45  ;;  %7393 = vmatmul.mubr.bf16.gmra.mrb[56].mxu1 %v12611_v50  ;;  %vm6891_vm13 = vcmp.ge.f32.partialorder %v9318_v42, 0.0  ;;  %v10192_v45 = vld [vmem:[#allocation4 + $0xec] ss:$16 sps:$4 sm:$0xff]   ;;  %9089 = vmatprep.subr.bf16.mxu0 %v10229_v59  ;;  %v10245_v17 = vld [vmem:[#allocation6 + $0xf0] sm:$0xff]  }
 0x510   : > { %vm6892_vm14 = vcmp.ge.f32.partialorder %v9319_v2, 0.0  ;;  %v6908_v51 = vmul.f32 0.01, %v9319_v2  ;;  %7422 = vmatpush1.bf16.msra.mxu1 %v10181_v26  ;;  %v6922_v10 = vsel %vm6890_vm12, %v9317_v55, %v6906_v32  ;;  %v10239_v34 = vld [vmem:[#allocation6 + $0xd8] sm:$0xff]   ;;  %v10243_v54 = vld [vmem:[#allocation6 + $0xe8] sm:$0xff]  }
 0x511   : > { %vm6893_vm15 = vcmp.ge.f32.partialorder %v9320_v15, 0.0  ;;  %v6909_v9 = vmul.f32 0.01, %v9320_v15  ;;  %7423 = vmatprep.subr.bf16.mxu1 %v10186_v60  ;;  %v6923_v63 = vsel %vm6891_vm13, %v9318_v42, %v6907_v56  ;;  %v10240_v39 = vld [vmem:[#allocation6 + $0x98] sm:$0xff]   ;;  %v10244_v21 = vld [vmem:[#allocation6 + $0xa8] sm:$0xff]  }
 0x512   : > { %v6924_v33 = vsel %vm6892_vm14, %v9319_v2, %v6908_v51  ;;  %9090 = vmatpush3.bf16.msra.mxu0 %v10230_v0  ;;  %v10247_v55 = vld [vmem:[#allocation6 + $0xf8] sm:$0xff]  }
 0x513   : > { %v6925_v52 = vsel %vm6893_vm15, %v9320_v15, %v6909_v9  ;;  %v6932_v62 = vpack.c.bf16 %v6924_v33, %v6922_v10  ;;  %9091 = vmatprep.subr.bf16.mxu0 %v10231_v30  ;;  %v10248_v44 = vld [vmem:[#allocation6 + $0xb8] sm:$0xff]  }
 0x514   : > { %7424 = vmatpush1.bf16.msra.mxu1 %v10184_v25  ;;  %v6933_v19 = vpack.c.bf16 %v6925_v52, %v6923_v63 }
 0x515   : > { %7425 = vmatprep.subr.bf16.mxu1 %v10189_v7 }
 0x516   : > { %7402 = vmatprep.mubr.bf16.mxu1 %v6933_v19  ;;  %9092 = vmatpush3.bf16.msra.mxu0 %v10232_v23 }
 0x517   : > { %7403 = vmatmul.mubr.bf16.gmra.mrb[60].mxu1 %v6932_v62 }
 0x518   : > { %7426 = vmatpush1.bf16.msra.mxu1 %v10187_v40  ;;  %7445 = vmatprep.mubr.bf16.mxu1 %v12594_v29  ;;  %v10205_v29 = vld [vmem:[#allocation4 + $0x188] ss:$16 sps:$4 sm:$0xff]  }
 0x519   : > { %7427 = vmatprep.subr.bf16.mxu1 %v10192_v45 }
 0x51c   : > { %7428 = vmatpush1.bf16.msra.mxu1 %v10190_v16 }
 0x51d   : > { %7429 = vmatprep.subr.bf16.mxu1 %v10195_v61 }
 0x520   : > { %7430 = vmatpush1.bf16.msra.mxu1 %v10193_v58 }
 0x521   : > { %7431 = vmatprep.subr.bf16.mxu1 %v10198_v3 }
 0x524   : > { %7432 = vmatpush1.bf16.msra.mxu1 %v10196_v27 }
 0x525   : > { %7433 = vmatprep.subr.bf16.mxu1 %v10201_v28 }
 0x528   : > { %7434 = vmatpush1.bf16.msra.mxu1 %v10199_v49 }
 0x529   : > { %7435 = vmatprep.subr.bf16.mxu1 %v10204_v20 }
 0x52c   : > { %7436 = vmatpush1.bf16.msra.mxu1 %v10202_v13 }
 0x52d   : > { %7437 = vmatprep.subr.bf16.mxu1 %v10207_v12 }
 0x530   : > { %7438 = vmatpush1.bf16.msra.mxu1 %v10205_v29 }
 0x531   : > { %7439 = vmatprep.subr.bf16.mxu1 %v10210_v14 }
 0x534   : > { %7440 = vmatpush1.bf16.msra.mxu1 %v10208_v43 }
 0x535   : > { %7441 = vmatprep.subr.bf16.mxu1 %v10213_v31 }
 0x538   : > { %7442 = vmatpush1.bf16.msra.mxu1 %v10211_v46 }
 0x539   : > { %7443 = vmatprep.subr.bf16.mxu1 %v10216_v37 }
 0x53c   : > { %7444 = vmatpush1.bf16.msra.mxu1 %v10214_v18 }
 0x53f   : > { %7446 = vmatmul.mubr.bf16.vlgmr.msra.gmra.mrb[64].mxu1 %v12591_v8  ;;  %v10233_v8 = vld [vmem:[#allocation6 + $0xc0] sm:$0xff]  }
 0x540   : > { %7455 = vmatprep.mubr.bf16.mxu1 %v12604_v22  ;;  %v10234_v22 = vld [vmem:[#allocation6 + $0x80] sm:$0xff]   ;;  %9117 = vmatprep.subr.bf16.mxu1 %v10233_v8 }
 0x541   : > { %9118 = vmatpush3.bf16.msra.mxu1 %v10234_v22 }
 0x542   : > { %9119 = vmatprep.subr.bf16.mxu1 %v10235_v35 }
 0x547   : > { %7456 = vmatmul.mubr.bf16.gmra.mrb[68].mxu1 %v12601_v38  ;;  %v10236_v38 = vld [vmem:[#allocation6 + $0x88] sm:$0xff]  }
 0x548   : > { %7465 = vmatprep.mubr.bf16.mxu1 %v12614_v47  ;;  %9120 = vmatpush3.bf16.msra.mxu1 %v10236_v38  ;;  %v12630_v47 = vld [vmem:[%s12685_s8] sm:$0xf] }
 0x549   : > { %9121 = vmatprep.subr.bf16.mxu1 %v10237_v48  ;;  %v7003_v26 = vrot.slane %v12630_v47, %v11818_v1  ;;  %v7007_v42 = vrot.slane %v12630_v47, %v11827_v6 }
 0x54c   : > { %9122 = vmatpush3.bf16.msra.mxu1 %v10238_v53 }
 0x54d   : > { %9123 = vmatprep.subr.bf16.mxu1 %v10239_v34 }
 0x54f   : > { %7466 = vmatmul.mubr.bf16.gmra.mrb[72].mxu1 %v12611_v50  ;;  %v10246_v50 = vld [vmem:[#allocation6 + $0xb0] sm:$0xff]  }
 0x550   : > { %7475 = vmatprep.mubr.bf16.mxu1 %v6933_v19  ;;  %9124 = vmatpush3.bf16.msra.mxu1 %v10240_v39 }
 0x551   : > { %9125 = vmatprep.subr.bf16.mxu1 %v10241_v41 }
 0x554   : > { %9126 = vmatpush3.bf16.msra.mxu1 %v10242_v24 }
 0x555   : > { %9127 = vmatprep.subr.bf16.mxu1 %v10243_v54 }
 0x557   : > { %7476 = vmatmul.mubr.bf16.gmra.mrb[76].mxu1 %v6932_v62 }
 0x558   : > { %9128 = vmatpush3.bf16.msra.mxu1 %v10244_v21 }
 0x559   : > { %9129 = vmatprep.subr.bf16.mxu1 %v10245_v17 }
 0x55c   : > { %9130 = vmatpush3.bf16.msra.mxu1 %v10246_v50  ;;  %v7011_v50 = vrot.slane %v12630_v47, %v11824_v4 }
 0x55d   : > { %9131 = vmatprep.subr.bf16.mxu1 %v10247_v55  ;;  %v7015_v55 = vrot.slane %v12630_v47, %v11834_v11 }
 0x560   : > { %9132 = vmatpush3.bf16.msra.mxu1 %v10248_v44 }
 0x5d2   : > { %v7374_v57 = vpop.f32.mrb[48].mxu1 }
 0x5d3   : > { %v7375_v60 = vadd.f32 %v7374_v57, %v7003_v26  ;;  %v7376_v32 = vpop.f32.mrb[49].mxu1 }
 0x5d4   : > { %v7377_v2 = vadd.f32 %v7376_v32, %v7007_v42  ;;  %v7378_v5 = vpop.f32.mrb[50].mxu1 }
 0x5d5   : > { %v7379_v56 = vadd.f32 %v7378_v5, %v7003_v26  ;;  %v7380_v15 = vpop.f32.mrb[51].mxu1  ;;  %v7486_v25 = vmax.f32 %v7375_v60, 0.0 }
 0x5d6   : > { %v7381_v51 = vadd.f32 %v7380_v15, %v7007_v42  ;;  %v7487_v7 = vmax.f32 %v7377_v2, 0.0 }
 0x5d7   : > { %v7490_v9 = vmax.f32 %v7379_v56, 0.0 }
 0x5d8   : > { %v7491_v10 = vmax.f32 %v7381_v51, 0.0 }
 0x5d9   : > { %v7518_v33 = vpack.c.bf16 %v7490_v9, %v7486_v25 }
 0x5da   : > { %v7519_v63 = vpack.c.bf16 %v7491_v10, %v7487_v7  ;;  %v7384_v52 = vpop.f32.mrb[52].mxu1 }
 0x5db   : > { %v7385_v62 = vadd.f32 %v7384_v52, %v7003_v26  ;;  %v7386_v1 = vpop.f32.mrb[53].mxu1 }
 0x5dc   : > { %v7387_v19 = vadd.f32 %v7386_v1, %v7007_v42  ;;  %v7388_v40 = vpop.f32.mrb[54].mxu1  ;;  %7829 = vmatprep.mubr.bf16.mxu0 %v7519_v63 }
 0x5dd   : > { %v7389_v6 = vadd.f32 %v7388_v40, %v7003_v26  ;;  %v7390_v45 = vpop.f32.mrb[55].mxu1  ;;  %7830 = vmatmul.mubr.bf16.vlgmr.msra.gmra.mrb[64].mxu0 %v7518_v33  ;;  %v7494_v61 = vmax.f32 %v7385_v62, 0.0 }
 0x5de   : > { %v7391_v16 = vadd.f32 %v7390_v45, %v7007_v42  ;;  %v7495_v3 = vmax.f32 %v7387_v19, 0.0 }
 0x5df   : > { %v7498_v58 = vmax.f32 %v7389_v6, 0.0 }
 0x5e0   : > { %v7499_v27 = vmax.f32 %v7391_v16, 0.0 }
 0x5e1   : > { %v7522_v28 = vpack.c.bf16 %v7498_v58, %v7494_v61 }
 0x5e2   : > { %v7523_v49 = vpack.c.bf16 %v7499_v27, %v7495_v3  ;;  %v7394_v20 = vpop.f32.mrb[56].mxu1 }
 0x5e3   : > { %v7395_v13 = vadd.f32 %v7394_v20, %v7003_v26  ;;  %v7396_v12 = vpop.f32.mrb[57].mxu1 }
 0x5e4   : > { %v7397_v29 = vadd.f32 %v7396_v12, %v7007_v42  ;;  %v7398_v14 = vpop.f32.mrb[58].mxu1  ;;  %7837 = vmatprep.mubr.bf16.mxu0 %v7523_v49 }
 0x5e5   : > { %v7399_v43 = vadd.f32 %v7398_v14, %v7003_v26  ;;  %v7400_v31 = vpop.f32.mrb[59].mxu1  ;;  %7838 = vmatmul.mubr.bf16.gmra.mrb[68].mxu0 %v7522_v28  ;;  %v7502_v37 = vmax.f32 %v7395_v13, 0.0 }
 0x5e6   : > { %v7401_v46 = vadd.f32 %v7400_v31, %v7007_v42  ;;  %v7503_v36 = vmax.f32 %v7397_v29, 0.0 }
 0x5e7   : > { %v7506_v18 = vmax.f32 %v7399_v43, 0.0 }
 0x5e8   : > { %v7507_v59 = vmax.f32 %v7401_v46, 0.0 }
 0x5e9   : > { %v7526_v0 = vpack.c.bf16 %v7506_v18, %v7502_v37 }
 0x5ea   : > { %v7527_v30 = vpack.c.bf16 %v7507_v59, %v7503_v36  ;;  %v7404_v23 = vpop.f32.mrb[60].mxu1 }
 0x5eb   : > { %v7405_v8 = vadd.f32 %v7404_v23, %v7003_v26  ;;  %v7406_v22 = vpop.f32.mrb[61].mxu1 }
 0x5ec   : > { %v7407_v35 = vadd.f32 %v7406_v22, %v7007_v42  ;;  %v7408_v38 = vpop.f32.mrb[62].mxu1  ;;  %7845 = vmatprep.mubr.bf16.mxu0 %v7527_v30 }
 0x5ed   : > { %v7409_v48 = vadd.f32 %v7408_v38, %v7003_v26  ;;  %v7410_v53 = vpop.f32.mrb[63].mxu1  ;;  %7846 = vmatmul.mubr.bf16.gmra.mrb[72].mxu0 %v7526_v0  ;;  %v7510_v39 = vmax.f32 %v7405_v8, 0.0 }
 0x5ee   : > { %v7411_v34 = vadd.f32 %v7410_v53, %v7007_v42  ;;  %v7511_v24 = vmax.f32 %v7407_v35, 0.0 }
 0x5ef   : > { %v7514_v41 = vmax.f32 %v7409_v48, 0.0 }
 0x5f0   : > { %v7515_v54 = vmax.f32 %v7411_v34, 0.0 }
 0x5f1   : > { %v7530_v21 = vpack.c.bf16 %v7514_v41, %v7510_v39  ;;  %v10249_v39 = vld [vmem:[%s12688_s11] sm:$0xff]   ;;  %v10250_v41 = vld [vmem:[%s12688_s11 + $0x8] sm:$0xff]  }
 0x5f2   : > { %v7531_v17 = vpack.c.bf16 %v7515_v54, %v7511_v24  ;;  %9169 = vmatprep.subr.bf16.mxu0 %v10249_v39  ;;  %9193 = vmatprep.subr.bf16.mxu1 %v10249_v39  ;;  %v10251_v24 = vld [vmem:[%s12688_s11 + $0x10] sm:$0xff]   ;;  %v10252_v54 = vld [vmem:[%s12688_s11 + $0x18] sm:$0xff]  }
 0x5f3   : > { %9170 = vmatpush3.bf16.msra.mxu0 %v10249_v39 }
 0x5f4   : > { %7853 = vmatprep.mubr.bf16.mxu0 %v7531_v17  ;;  %9171 = vmatprep.subr.bf16.mxu0 %v10250_v41  ;;  %v10254_v17 = vld [vmem:[%s12688_s11 + $0x28] sm:$0xff]  }
 0x5f5   : > { %7854 = vmatmul.mubr.bf16.gmra.mrb[76].mxu0 %v7530_v21  ;;  %v10253_v21 = vld [vmem:[%s12688_s11 + $0x20] sm:$0xff]  }
 0x5f7   : > { %9172 = vmatpush3.bf16.msra.mxu0 %v10250_v41 }
 0x5f8   : > { %9173 = vmatprep.subr.bf16.mxu0 %v10251_v24 }
 0x5fb   : > { %9174 = vmatpush3.bf16.msra.mxu0 %v10251_v24 }
 0x5fc   : > { %9175 = vmatprep.subr.bf16.mxu0 %v10252_v54 }
 0x5ff   : > { %9176 = vmatpush3.bf16.msra.mxu0 %v10252_v54 }
 0x600   : > { %9177 = vmatprep.subr.bf16.mxu0 %v10253_v21 }
 0x603   : > { %9178 = vmatpush3.bf16.msra.mxu0 %v10253_v21 }
 0x604   : > { %9179 = vmatprep.subr.bf16.mxu0 %v10254_v17 }
 0x607   : > { %9180 = vmatpush3.bf16.msra.mxu0 %v10254_v17 }
 0x612   : > { %v7447_v44 = vpop.f32.mrb[64].mxu1 }
 0x613   : > { %v7448_v57 = vadd.f32 %v7447_v44, %v7011_v50  ;;  %v7449_v26 = vpop.f32.mrb[65].mxu1 }
 0x614   : > { %v7450_v60 = vadd.f32 %v7449_v26, %v7015_v55  ;;  %v7451_v32 = vpop.f32.mrb[66].mxu1 }
 0x615   : > { %v7452_v42 = vadd.f32 %v7451_v32, %v7011_v50  ;;  %v7453_v2 = vpop.f32.mrb[67].mxu1  ;;  %v7488_v56 = vmax.f32 %v7448_v57, 0.0 }
 0x616   : > { %v7454_v5 = vadd.f32 %v7453_v2, %v7015_v55  ;;  %v7489_v51 = vmax.f32 %v7450_v60, 0.0 }
 0x617   : > { %v7492_v15 = vmax.f32 %v7452_v42, 0.0 }
 0x618   : > { %v7493_v25 = vmax.f32 %v7454_v5, 0.0 }
 0x619   : > { %v7520_v9 = vpack.c.bf16 %v7492_v15, %v7488_v56 }
 0x61a   : > { %v7521_v7 = vpack.c.bf16 %v7493_v25, %v7489_v51  ;;  %v7457_v10 = vpop.f32.mrb[68].mxu1 }
 0x61b   : > { %v7458_v33 = vadd.f32 %v7457_v10, %v7011_v50  ;;  %v7459_v4 = vpop.f32.mrb[69].mxu1 }
 0x61c   : > { %v7460_v63 = vadd.f32 %v7459_v4, %v7015_v55  ;;  %v7461_v52 = vpop.f32.mrb[70].mxu1  ;;  %7894 = vmatprep.mubr.bf16.mxu1 %v7521_v7 }
 0x61d   : > { %v7462_v11 = vadd.f32 %v7461_v52, %v7011_v50  ;;  %v7463_v47 = vpop.f32.mrb[71].mxu1  ;;  %7895 = vmatmul.mubr.bf16.vlgmr.msra.gmra.mrb[80].mxu1 %v7520_v9  ;;  %v7496_v1 = vmax.f32 %v7458_v33, 0.0 }
 0x61e   : > { %v7464_v62 = vadd.f32 %v7463_v47, %v7015_v55  ;;  %v7497_v40 = vmax.f32 %v7460_v63, 0.0  ;;  %9201 = vmatpush3.bf16.msra.mxu1 %v10249_v39 }
 0x61f   : > { %v7500_v19 = vmax.f32 %v7462_v11, 0.0  ;;  %9194 = vmatprep.subr.bf16.mxu1 %v10250_v41 }
 0x620   : > { %v7501_v6 = vmax.f32 %v7464_v62, 0.0 }
 0x621   : > { %v7524_v45 = vpack.c.bf16 %v7500_v19, %v7496_v1 }
 0x622   : > { %v7525_v16 = vpack.c.bf16 %v7501_v6, %v7497_v40  ;;  %v7467_v61 = vpop.f32.mrb[72].mxu1  ;;  %9202 = vmatpush3.bf16.msra.mxu1 %v10250_v41  ;;  %v9025_v40 = vld [vmem:[%s12687_s10] ss:$0 sm:$0xff] }
 0x623   : > { %v7468_v58 = vadd.f32 %v7467_v61, %v7011_v50  ;;  %v7469_v3 = vpop.f32.mrb[73].mxu1  ;;  %9195 = vmatprep.subr.bf16.mxu1 %v10251_v24 }
 0x624   : > { %v7470_v27 = vadd.f32 %v7469_v3, %v7015_v55  ;;  %v7471_v28 = vpop.f32.mrb[74].mxu1  ;;  %7902 = vmatprep.mubr.bf16.mxu1 %v7525_v16 }
 0x625   : > { %v7472_v49 = vadd.f32 %v7471_v28, %v7011_v50  ;;  %v7473_v20 = vpop.f32.mrb[75].mxu1  ;;  %7903 = vmatmul.mubr.bf16.gmra.mrb[84].mxu1 %v7524_v45  ;;  %v7504_v12 = vmax.f32 %v7468_v58, 0.0 }
 0x626   : > { %v7474_v13 = vadd.f32 %v7473_v20, %v7015_v55  ;;  %v7505_v14 = vmax.f32 %v7470_v27, 0.0  ;;  %9203 = vmatpush3.bf16.msra.mxu1 %v10251_v24 }
 0x627   : > { %v7508_v29 = vmax.f32 %v7472_v49, 0.0  ;;  %9196 = vmatprep.subr.bf16.mxu1 %v10252_v54 }
 0x628   : > { %v7509_v43 = vmax.f32 %v7474_v13, 0.0 }
 0x629   : > { %v7528_v31 = vpack.c.bf16 %v7508_v29, %v7504_v12 }
 0x62a   : > { %v7529_v46 = vpack.c.bf16 %v7509_v43, %v7505_v14  ;;  %v7477_v37 = vpop.f32.mrb[76].mxu1  ;;  %9204 = vmatpush3.bf16.msra.mxu1 %v10252_v54 }
 0x62b   : > { %v7478_v18 = vadd.f32 %v7477_v37, %v7011_v50  ;;  %v7479_v36 = vpop.f32.mrb[77].mxu1  ;;  %9197 = vmatprep.subr.bf16.mxu1 %v10253_v21 }
 0x62c   : > { %v7480_v59 = vadd.f32 %v7479_v36, %v7015_v55  ;;  %v7481_v0 = vpop.f32.mrb[78].mxu1  ;;  %7910 = vmatprep.mubr.bf16.mxu1 %v7529_v46 }
 0x62d   : > { %v7482_v30 = vadd.f32 %v7481_v0, %v7011_v50  ;;  %v7483_v23 = vpop.f32.mrb[79].mxu1  ;;  %7911 = vmatmul.mubr.bf16.gmra.mrb[88].mxu1 %v7528_v31  ;;  %v7512_v22 = vmax.f32 %v7478_v18, 0.0  ;;  %v10255_v50 = vld [vmem:[%s12688_s11 + $0x30] sm:$0xff]  }
 0x62e   : > { %v7484_v8 = vadd.f32 %v7483_v23, %v7015_v55  ;;  %v7513_v38 = vmax.f32 %v7480_v59, 0.0  ;;  %9205 = vmatpush3.bf16.msra.mxu1 %v10253_v21  ;;  %9181 = vmatprep.subr.bf16.mxu0 %v10255_v50  ;;  %v10256_v55 = vld [vmem:[%s12688_s11 + $0x38] sm:$0xff]  }
 0x62f   : > { %v7516_v35 = vmax.f32 %v7482_v30, 0.0  ;;  %9198 = vmatprep.subr.bf16.mxu1 %v10254_v17  ;;  %9182 = vmatpush3.bf16.msra.mxu0 %v10255_v50 }
 0x630   : > { %v7517_v48 = vmax.f32 %v7484_v8, 0.0  ;;  %9183 = vmatprep.subr.bf16.mxu0 %v10256_v55 }
 0x631   : > { %v7532_v53 = vpack.c.bf16 %v7516_v35, %v7512_v22 }
 0x632   : > { %v7533_v34 = vpack.c.bf16 %v7517_v48, %v7513_v38  ;;  %9206 = vmatpush3.bf16.msra.mxu1 %v10254_v17 }
 0x633   : > { %9199 = vmatprep.subr.bf16.mxu1 %v10255_v50  ;;  %9184 = vmatpush3.bf16.msra.mxu0 %v10256_v55 }
 0x634   : > { %7918 = vmatprep.mubr.bf16.mxu1 %v7533_v34 }
 0x635   : > { %7919 = vmatmul.mubr.bf16.gmra.mrb[92].mxu1 %v7532_v53 }
 0x636   : > { %9207 = vmatpush3.bf16.msra.mxu1 %v10255_v50 }
 0x637   : > { %9200 = vmatprep.subr.bf16.mxu1 %v10256_v55 }
 0x63a   : > { %9208 = vmatpush3.bf16.msra.mxu1 %v10256_v55 }
 0x6b0   : > { %v9093_v44 = vpop.f32.mrb[64].mxu0 }
 0x6b1   : > { %v9094_v57 = vpop.f32.mrb[65].mxu0 }
 0x6b2   : > { %v9095_v26 = vadd.f32 %v9094_v57, %v9093_v44  ;;  %v9096_v60 = vpop.f32.mrb[66].mxu0 }
 0x6b3   : > { %v9097_v32 = vpop.f32.mrb[67].mxu0 }
 0x6b4   : > { %v9098_v42 = vadd.f32 %v9097_v32, %v9096_v60  ;;  %v7832_v16 = vadd.f32 %v9095_v26, %v9025_v40 }
 0x6b6   : > { %v7835_v27 = vadd.f32 %v9098_v42, %v9025_v40 }
 0x6b8   : > { %v9099_v2 = vpop.f32.mrb[68].mxu0 }
 0x6b9   : > { %v9100_v5 = vpop.f32.mrb[69].mxu0 }
 0x6ba   : > { %v9101_v56 = vadd.f32 %v9100_v5, %v9099_v2  ;;  %v9102_v15 = vpop.f32.mrb[70].mxu0 }
 0x6bb   : > { %v9103_v51 = vpop.f32.mrb[71].mxu0 }
 0x6bc   : > { %v9104_v25 = vadd.f32 %v9103_v51, %v9102_v15  ;;  %v7840_v43 = vadd.f32 %v9101_v56, %v9025_v40 }
 0x6be   : > { %v7843_v36 = vadd.f32 %v9104_v25, %v9025_v40 }
 0x6c0   : > { %v9105_v9 = vpop.f32.mrb[72].mxu0 }
 0x6c1   : > { %v9106_v7 = vpop.f32.mrb[73].mxu0 }
 0x6c2   : > { %v9107_v10 = vadd.f32 %v9106_v7, %v9105_v9  ;;  %v9108_v33 = vpop.f32.mrb[74].mxu0  ;;  %v9058_v7 = vld [vmem:[%s12699_s28] ss:$0 sm:$0xff] }
 0x6c3   : > { %v9109_v4 = vpop.f32.mrb[75].mxu0 }
 0x6c4   : > { %v9110_v63 = vadd.f32 %v9109_v4, %v9108_v33  ;;  %v7848_v38 = vadd.f32 %v9107_v10, %v9025_v40 }
 0x6c6   : > { %v7851_v41 = vadd.f32 %v9110_v63, %v9025_v40 }
 0x6c8   : > { %v9111_v52 = vpop.f32.mrb[76].mxu0 }
 0x6c9   : > { %v9112_v11 = vpop.f32.mrb[77].mxu0 }
 0x6ca   : > { %v9113_v47 = vadd.f32 %v9112_v11, %v9111_v52  ;;  %v9114_v62 = vpop.f32.mrb[78].mxu0 }
 0x6cb   : > { %v9115_v1 = vpop.f32.mrb[79].mxu0 }
 0x6cc   : > { %v9116_v19 = vadd.f32 %v9115_v1, %v9114_v62  ;;  %v7856_v57 = vadd.f32 %v9113_v47, %v9025_v40 }
 0x6ce   : > { %v7859_v2 = vadd.f32 %v9116_v19, %v9025_v40 }
 0x6f0   : > { %v9133_v6 = vpop.f32.mrb[80].mxu1 }
 0x6f1   : > { %v9134_v45 = vpop.f32.mrb[81].mxu1 }
 0x6f2   : > { %v9135_v61 = vadd.f32 %v9134_v45, %v9133_v6  ;;  %v9136_v58 = vpop.f32.mrb[82].mxu1 }
 0x6f3   : > { %v9137_v3 = vpop.f32.mrb[83].mxu1 }
 0x6f4   : > { %v7897_v28 = vadd.f32 %v9135_v61, %v7832_v16  ;;  %v9138_v49 = vadd.f32 %v9137_v3, %v9136_v58 }
 0x6f6   : > { %v7900_v20 = vadd.f32 %v9138_v49, %v7835_v27  ;;  %v7927_v13 = vmax.f32 %v7897_v28, 0.0 }
 0x6f8   : > { %v7928_v12 = vmax.f32 %v7900_v20, 0.0  ;;  %v9139_v29 = vpop.f32.mrb[84].mxu1 }
 0x6f9   : > { %v9140_v14 = vpop.f32.mrb[85].mxu1 }
 0x6fa   : > { %v9141_v31 = vadd.f32 %v9140_v14, %v9139_v29  ;;  %v9142_v46 = vpop.f32.mrb[86].mxu1  ;;  %v7935_v37 = vpack.c.bf16 %v7928_v12, %v7927_v13 }
 0x6fb   : > { %v9143_v18 = vpop.f32.mrb[87].mxu1 }
 0x6fc   : > { %v7905_v59 = vadd.f32 %v9141_v31, %v7840_v43  ;;  %v9144_v0 = vadd.f32 %v9143_v18, %v9142_v46  ;;  %9185 = vmatprep.mubr.bf16.mxu0 %v7935_v37 }
 0x6fe   : > { %v7908_v30 = vadd.f32 %v9144_v0, %v7843_v36  ;;  %v7929_v23 = vmax.f32 %v7905_v59, 0.0 }
 0x700   : > { %v7930_v8 = vmax.f32 %v7908_v30, 0.0  ;;  %v9145_v22 = vpop.f32.mrb[88].mxu1 }
 0x701   : > { %v9146_v35 = vpop.f32.mrb[89].mxu1 }
 0x702   : > { %v7936_v48 = vpack.c.bf16 %v7930_v8, %v7929_v23  ;;  %v9147_v53 = vadd.f32 %v9146_v35, %v9145_v22  ;;  %v9148_v34 = vpop.f32.mrb[90].mxu1 }
 0x703   : > { %v9149_v39 = vpop.f32.mrb[91].mxu1 }
 0x704   : > { %v7913_v24 = vadd.f32 %v9147_v53, %v7848_v38  ;;  %v9150_v54 = vadd.f32 %v9149_v39, %v9148_v34  ;;  %9186 = vmatmul.mubr.bf16.vlgmr.msra.gmra.mrb[80].mxu0 %v7936_v48 }
 0x706   : > { %v7916_v21 = vadd.f32 %v9150_v54, %v7851_v41  ;;  %v7931_v17 = vmax.f32 %v7913_v24, 0.0 }
 0x708   : > { %v7932_v50 = vmax.f32 %v7916_v21, 0.0  ;;  %v9151_v55 = vpop.f32.mrb[92].mxu1 }
 0x709   : > { %v9152_v44 = vpop.f32.mrb[93].mxu1 }
 0x70a   : > { %v9153_v26 = vadd.f32 %v9152_v44, %v9151_v55  ;;  %v9154_v60 = vpop.f32.mrb[94].mxu1  ;;  %v7937_v32 = vpack.c.bf16 %v7932_v50, %v7931_v17 }
 0x70b   : > { %v9155_v42 = vpop.f32.mrb[95].mxu1 }
 0x70c   : > { %v7921_v5 = vadd.f32 %v9153_v26, %v7856_v57  ;;  %v9156_v56 = vadd.f32 %v9155_v42, %v9154_v60  ;;  %9189 = vmatprep.mubr.bf16.mxu1 %v7937_v32 }
 0x70e   : > { %v7924_v15 = vadd.f32 %v9156_v56, %v7859_v2  ;;  %v7933_v51 = vmax.f32 %v7921_v5, 0.0 }
 0x710   : > { %v7934_v25 = vmax.f32 %v7924_v15, 0.0 }
 0x712   : > { %v7938_v9 = vpack.c.bf16 %v7934_v25, %v7933_v51 }
 0x714   : > { %9190 = vmatmul.mubr.bf16.vlgmr.msra.gmra.mrb[96].mxu1 %v7938_v9 }
 0x7d7   : > { %v9187_v10 = vpop.f32.mrb[80].mxu0 }
 0x7d8   : > { %v8053_v33 = vadd.f32 %v9187_v10, %v9058_v7  ;;  %v8044_v4 = vpop.f32.mrb[81].mxu0 }
 0x7d9   : > { %v8045_v63 = vadd.f32 %v9058_v7, %v8044_v4  ;;  %v9188_v52 = vpop.f32.mrb[82].mxu0 }
 0x7da   : > { %v9069_v11 = vmul.f32 -1.442695, %v8053_v33  ;;  %v8056_v47 = vadd.f32 %v9188_v52, %v9058_v7  ;;  %v8047_v62 = vpop.f32.mrb[83].mxu0 }
 0x7db   : > { %v9067_v1 = vmul.f32 -1.442695, %v8045_v63  ;;  %v8048_v19 = vadd.f32 %v9058_v7, %v8047_v62 }
 0x7dc   : > { %10257 = vpow2.f32 %v9069_v11  ;;  %v9070_v40 = vmul.f32 -1.442695, %v8056_v47 }
 0x7dd   : > { %10259 = vpow2.f32 %v9067_v1  ;;  %v9068_v6 = vmul.f32 -1.442695, %v8048_v19 }
 0x7de   : > { %10261 = vpow2.f32 %v9070_v40 }
 0x7df   : > { %10263 = vpow2.f32 %v9068_v6 }
 0x7e6   : > { %v10258_v45 = vpop.eup %10257 }
 0x7e7   : > { %v10260_v16 = vpop.eup %10259  ;;  %v8101_v61 = vadd.f32 1.0, %v10258_v45  ;;  %v9191_v58 = vpop.f32.mrb[96].mxu1 }
 0x7e8   : > { %v10262_v3 = vpop.eup %10261  ;;  %v8099_v27 = vadd.f32 1.0, %v10260_v16  ;;  %v8069_v28 = vadd.f32 %v9191_v58, %v9058_v7  ;;  %v8060_v49 = vpop.f32.mrb[97].mxu1 }
 0x7e9   : > { %v10264_v20 = vpop.eup %10263  ;;  %10265 = vrcp.f32 %v8101_v61  ;;  %v8102_v13 = vadd.f32 1.0, %v10262_v3  ;;  %v8061_v12 = vadd.f32 %v9058_v7, %v8060_v49  ;;  %v9192_v29 = vpop.f32.mrb[98].mxu1 }
 0x7ea   : > { %10267 = vrcp.f32 %v8099_v27  ;;  %v8100_v14 = vadd.f32 1.0, %v10264_v20  ;;  %v9073_v43 = vmul.f32 -1.442695, %v8069_v28  ;;  %v8072_v31 = vadd.f32 %v9192_v29, %v9058_v7  ;;  %v8063_v46 = vpop.f32.mrb[99].mxu1 }
 0x7eb   : > { %10269 = vrcp.f32 %v8102_v13  ;;  %v9071_v37 = vmul.f32 -1.442695, %v8061_v12  ;;  %v8064_v18 = vadd.f32 %v9058_v7, %v8063_v46 }
 0x7ec   : > { %10271 = vrcp.f32 %v8100_v14  ;;  %v9074_v36 = vmul.f32 -1.442695, %v8072_v31 }
 0x7ed   : > { %10273 = vpow2.f32 %v9073_v43  ;;  %v9072_v59 = vmul.f32 -1.442695, %v8064_v18 }
 0x7ee   : > { %10275 = vpow2.f32 %v9071_v37 }
 0x7ef   : > { %10277 = vpow2.f32 %v9074_v36 }
 0x7f0   : > { %10279 = vpow2.f32 %v9072_v59 }
 0x7f3   : > { %v10266_v0 = vpop.eup %10265 }
 0x7f4   : > { %v10268_v30 = vpop.eup %10267  ;;  %8125 = vst [vmem:[%s489_s14 + $0x10] sm:$0xff] %v10266_v0 }
 0x7f5   : > { %v10270_v23 = vpop.eup %10269  ;;  %8123 = vst [vmem:[%s489_s14] sm:$0xff] %v10268_v30 }
 0x7f6   : > { %v10272_v8 = vpop.eup %10271  ;;  %8126 = vst [vmem:[%s489_s14 + $0x18] sm:$0xff] %v10270_v23 }
 0x7f7   : > { %v10274_v22 = vpop.eup %10273  ;;  %8124 = vst [vmem:[%s489_s14 + $0x8] sm:$0xff] %v10272_v8 }
 0x7f8   : > { %v10276_v35 = vpop.eup %10275  ;;  %v8105_v38 = vadd.f32 1.0, %v10274_v22 }
 0x7f9   : > { %v10278_v48 = vpop.eup %10277  ;;  %v8103_v53 = vadd.f32 1.0, %v10276_v35 }
 0x7fa   : > { %v10280_v34 = vpop.eup %10279  ;;  %10281 = vrcp.f32 %v8105_v38  ;;  %v8106_v39 = vadd.f32 1.0, %v10278_v48 }
 0x7fb   : > { %10283 = vrcp.f32 %v8103_v53  ;;  %v8104_v41 = vadd.f32 1.0, %v10280_v34 }
 0x7fc   : > { %10285 = vrcp.f32 %v8106_v39 }
 0x7fd   : > { %10287 = vrcp.f32 %v8104_v41 }
 0x804   : > { %v10282_v24 = vpop.eup %10281 }
 0x805   : > { %v10284_v54 = vpop.eup %10283  ;;  %8129 = vst [vmem:[%s489_s14 + $0x30] sm:$0xff] %v10282_v24 }
 0x806   : > { %v10286_v21 = vpop.eup %10285  ;;  %8127 = vst [vmem:[%s489_s14 + $0x20] sm:$0xff] %v10284_v54 }
 0x807   : > { %v10288_v17 = vpop.eup %10287  ;;  %8130 = vst [vmem:[%s489_s14 + $0x38] sm:$0xff] %v10286_v21 }
 0x808   : > { %8128 = vst [vmem:[%s489_s14 + $0x28] sm:$0xff] %v10288_v17 }
 0x809 PF: > { %s25_s25 = sadd.s32 1, %s10412_s25  }
 0x80a   : > { %p22_p3 = scmp.ge.s32.totalorder %s25_s25, 4  }
 0x80c   :  { %24 = sbr.rel (!%p22_p3) target bundleno = 5 (0x5), region = 115 }
 0x813   :  { %8153 = vsyncpa [#allocation3], 1 }
 0x814   :  { %8155 = vsyncpa [#allocation3 + $0x1], 1 }
 0x815   :  { %8156 = vsyncpa [#allocation5], 1 }

// kernel: policy_forward.1
= control target key start
LH: loop header
LB: loop body
LE: loop exit
PB: predicated region body
PF: predicated region fallthrough
CT: control target
= control target key end

     0   :  { %s12677_s0 = inlined_call_operand.vmem [shape: bf16[128,768], index: 0, kind: input, shape index: {}]   ;;  %s12678_s1 = inlined_call_operand.vmem [shape: bf16[768,1024], index: 1, kind: input, shape index: {}]   ;;  %s12679_s2 = inlined_call_operand.vmem [shape: f32[1,1024], index: 2, kind: input, shape index: {}]   ;;  %s12680_s3 = inlined_call_operand.hbm [shape: bf16[1024,512], index: 3, kind: input, shape index: {}]   ;;  %s12681_s4 = inlined_call_operand.vmem [shape: f32[1,512], index: 4, kind: input, shape index: {}]   ;;  %s12682_s5 = inlined_call_operand.vmem [shape: bf16[512,256], index: 5, kind: input, shape index: {}]   ;;  %s12683_s6 = inlined_call_operand.vmem [shape: f32[1,256], index: 6, kind: input, shape index: {}]   ;;  %s12684_s7 = inlined_call_operand.hbm [shape: bf16[256,512], index: 7, kind: input, shape index: {}]   ;;  %s12685_s8 = inlined_call_operand.vmem [shape: f32[1,512], index: 8, kind: input, shape index: {}]   ;;  %s12686_s9 = inlined_call_operand.hbm [shape: bf16[512,128], index: 9, kind: input, shape index: {}]   ;;  %s12687_s10 = inlined_call_operand.vmem [shape: f32[1,128], index: 10, kind: input, shape index: {}]   ;;  %s12688_s11 = inlined_call_operand.vmem [shape: bf16[128,128], index: 11, kind: input, shape index: {}]   ;;  %s12689_s12 = inlined_call_operand.vmem [shape: f32[1,128], index: 12, kind: input, shape index: {}]   ;;  %s12690_s13 = inlined_call_operand.vmem [shape: f32[128,128], index: 13, kind: output, shape index: {}]  }
   0x1   :  { %12692 = sst [smem:[#allocation9_spill]] %s12689_s12 }
   0x2   :  { %12693 = sst [smem:[#allocation10_spill]] %s12690_s13 }
   0x3   :  { %18 = vsyncpa [#allocation3], 0 }
   0x4   :  { %19 = vsyncpa [#allocation5], 0  ;;  %s10491_s25 = smov 0  }
   0x5 LB: > { %s12691_s26 = sadd.s32 4294967295, %s10412_s25   ;;  %p8220_p0 = scmp.ge.s32.totalorder %s10412_s25, 1  ;;  %s10412_s25 = sphi %s10491_s25, %s25_s25  }
   0x6   : > { %p334_p1 = scmp.lt.s32.totalorder %s10412_s25, 3  ;;  %p10501_p2 = scmp.eq.s32.totalorder %s12691_s26, 0 }
   0x7   : > { %s10414_s29 = smov [#allocation4]   ;;  %s10415_s14 = smov [#allocation2]  }
   0x8   : > { %p10505_p3 = pnand %p8220_p0, %p334_p1  ;;  %s374_s30 = sshll.u32 %s10414_s29, 4  ;;  %s10509_s30 = int_to_ptr.vmem [resolvable:$true] %s374_s30 }
   0x9   : > { %s352_s15 = sshll.u32 %s10415_s14, 4  ;;  %s10416_s17 = smov [#allocation6]   ;;  %s10513_s15 = int_to_ptr.vmem [resolvable:$true] %s352_s15 }
   0xa   : > { %p9574_p4 = pneg %p10505_p3  ;;  %s390_s18 = sshll.u32 %s10416_s17, 4  ;;  %s10521_s18 = int_to_ptr.vmem [resolvable:$true] %s390_s18 }
   0xb   : > { %s10314_s21 = scalar_lea.hbm %s12684_s7, 8192 }
   0xc   : > { %p10517_p5 = pnand %p10501_p2, %p9574_p4  ;;  %p10315_p6 = scmp.ne.s32.totalorder %s12684_s7, %s10314_s21 }
   0xd   : > { %p10321_p10 = scmp.lt.u32.totalorder %s10314_s21, %s12684_s7 }
   0xe   : > { %p10531_p7 = pneg %p10517_p5 }
  0x10   : > { %p10317_p8 = pnand %p10531_p7, %p10315_p6 }
  0x12   : > { %p10318_p9 = pneg %p10317_p8 }
  0x14   : > { %p10323_p11 = pnand %p10321_p10, %p10318_p9 }
  0x16   : > { %10326 = shalt.err (!%p10323_p11)
}
  0x17   : > { %s10327_s17 = scalar_lea.vmem %s10509_s30, 8192  ;;  %p10335_p1 = scmp.lt.s32.totalorder %s10509_s30, %s10509_s30 }
  0x18   : > { %p10328_p12 = scmp.ne.s32.totalorder %s10509_s30, %s10327_s17  ;;  %p10336_p4 = scmp.lt.s32.totalorder %s10327_s17, %s10327_s17 }
  0x1a   : > { %p10330_p13 = pnand %p10328_p12, %p10531_p7  ;;  %p10337_p6 = por %p10336_p4, %p10335_p1 }
  0x1c   : > { %p10331_p0 = pneg %p10330_p13 }
  0x1e   : > { %p10338_p8 = pnand %p10337_p6, %p10331_p0 }
  0x20   : > { %10341 = shalt.err (!%p10338_p8)
}
  0x21   : > { %s10417_s19 = smov 256   ;;  %s10418_s20 = smov 16  }
  0x22   : > { %9580 = dma.hbm_to_vmem [thread:$0]  (!%p10517_p5), %s12684_s7, 8192, %s10509_s30, [#allocation5], %s10417_s19, %s10417_s19, %s10418_s20  }
  0x23   : > { %s10342_s14 = scalar_lea.hbm %s12680_s3, 32768 }
  0x24   : > { %p10343_p9 = scmp.ne.s32.totalorder %s12680_s3, %s10342_s14  ;;  %p10349_p12 = scmp.lt.u32.totalorder %s10342_s14, %s12680_s3 }
  0x26   : > { %p10345_p10 = pnand %p10343_p9, %p10531_p7 }
  0x28   : > { %p10346_p11 = pneg %p10345_p10 }
  0x2a   : > { %p10351_p13 = pnand %p10349_p12, %p10346_p11 }
  0x2c   : > { %10354 = shalt.err (!%p10351_p13)
}
  0x2d   : > { %s10355_s30 = scalar_lea.vmem %s10513_s15, 32768  ;;  %p10363_p6 = scmp.lt.s32.totalorder %s10513_s15, %s10513_s15 }
  0x2e   : > { %p10356_p0 = scmp.ne.s32.totalorder %s10513_s15, %s10355_s30  ;;  %p10364_p8 = scmp.lt.s32.totalorder %s10355_s30, %s10355_s30 }
  0x30   : > { %p10358_p1 = pnand %p10356_p0, %p10531_p7  ;;  %p10365_p9 = por %p10364_p8, %p10363_p6 }
  0x32   : > { %p10359_p4 = pneg %p10358_p1 }
  0x34   : > { %p10366_p10 = pnand %p10365_p9, %p10359_p4 }
  0x36   : > { %10369 = shalt.err (!%p10366_p10)
}
  0x37   : > { %9577 = dma.hbm_to_vmem [thread:$0]  (!%p10517_p5), %s12680_s3, 32768, %s10513_s15, [#allocation3], %s10417_s19, %s10417_s19, %s10418_s20  }
  0x38   : > { %s10370_s22 = scalar_lea.hbm %s12686_s9, 4096 }
  0x39   : > { %p10371_p11 = scmp.ne.s32.totalorder %s12686_s9, %s10370_s22  ;;  %p10377_p0 = scmp.lt.u32.totalorder %s10370_s22, %s12686_s9 }
  0x3b   : > { %p10373_p12 = pnand %p10371_p11, %p10531_p7 }
  0x3d   : > { %p10374_p13 = pneg %p10373_p12 }
  0x3f   : > { %p10379_p1 = pnand %p10377_p0, %p10374_p13 }
  0x41   : > { %10382 = shalt.err (!%p10379_p1)
}
  0x42   : > { %s10383_s15 = scalar_lea.vmem %s10521_s18, 4096  ;;  %p10391_p9 = scmp.lt.s32.totalorder %s10521_s18, %s10521_s18 }
  0x43   : > { %p10384_p4 = scmp.ne.s32.totalorder %s10521_s18, %s10383_s15  ;;  %p10392_p10 = scmp.lt.s32.totalorder %s10383_s15, %s10383_s15 }
  0x45   : > { %p10386_p6 = pnand %p10384_p4, %p10531_p7  ;;  %p10393_p11 = por %p10392_p10, %p10391_p9 }
  0x47   : > { %p10387_p8 = pneg %p10386_p6 }
  0x49   : > { %p10394_p12 = pnand %p10393_p11, %p10387_p8 }
  0x4b   : > { %10397 = shalt.err (!%p10394_p12)
}
  0x4c   : > { %s10419_s19 = smov 64   ;;  %s10420_s20 = smov 4  }
  0x4d   : > { %9583 = dma.hbm_to_vmem [thread:$0]  (!%p10517_p5), %s12686_s9, 4096, %s10521_s18, [#allocation5], %s10419_s19, %s10419_s19, %s10420_s20  }
  0x4e   : > { %425 = sbr.rel (%p10505_p3) target bundleno = 2057 (0x809), region = 72 }
  0x55   : > { %10403 = dma.done.wait (%p10501_p2), [#allocation3], 32768  }
  0x56   : > { %10405 = vsyncadd (%p10501_p2), [#allocation3], 4294934528 }
  0x57   : > { %10407 = dma.done.wait (%p10501_p2), [#allocation5], 12288  }
  0x58   : > { %10409 = vsyncadd (%p10501_p2), [#allocation5], 4294955008  ;;  %v516_v0 = vld [vmem:[%s12678_s1] sm:$0xff]  ;;  %v517_v2 = vld [vmem:[%s12678_s1 + $0x8] sm:$0xff]  ;;  %s12698_s21 = sadd.s32 4294967295, %s10412_s25   ;;  %s12699_s28 = sld [smem:[#allocation9_spill]] }
  0x59   : > { %v520_v1 = vld [vmem:[%s12678_s1 + $0x20] sm:$0xff]  ;;  %v521_v4 = vld [vmem:[%s12678_s1 + $0x28] sm:$0xff]  ;;  %s8229_s22 = sshll.u32 %s12698_s21, 3  ;;  %s12700_s29 = sld [smem:[#allocation10_spill]] }
  0x5a   : > { %v8258_v3 = vcombine.high %v516_v0, %v520_v1  ;;  %v8257_v5 = vcombine.low %v516_v0, %v520_v1  ;;  %v524_v6 = vld [vmem:[%s12678_s1 + $0x40] sm:$0xff]  ;;  %v8260_v8 = vcombine.high %v517_v2, %v521_v4  ;;  %v8259_v9 = vcombine.low %v517_v2, %v521_v4  ;;  %v525_v11 = vld [vmem:[%s12678_s1 + $0x48] sm:$0xff]  ;;  %p479_p2 = scmp.lt.s32.totalorder %s8229_s22, 15 }
  0x5b   : > { %v528_v7 = vld [vmem:[%s12678_s1 + $0x60] sm:$0xff]  ;;  %v529_v12 = vld [vmem:[%s12678_s1 + $0x68] sm:$0xff] }
  0x5c   : > { %v8266_v10 = vcombine.high %v524_v6, %v528_v7  ;;  %v532_v13 = vld [vmem:[%s12678_s1 + $0x80] sm:$0xff]  ;;  %2982 = vmatprep.subr.bf16.mxu0 %v8258_v3  ;;  %v8268_v14 = vcombine.high %v525_v11, %v529_v12  ;;  %v533_v16 = vld [vmem:[%s12678_s1 + $0x88] sm:$0xff]  ;;  %3201 = vmatprep.subr.bf16.mxu1 %v8260_v8  ;;  %v8265_v18 = vcombine.low %v524_v6, %v528_v7  ;;  %s12702_s22 = smov (!%p479_p2, %s8229_s22), 15 }
  0x5d   : > { %v536_v15 = vld [vmem:[%s12678_s1 + $0xa0] sm:$0xff]  ;;  %v537_v17 = vld [vmem:[%s12678_s1 + $0xa8] sm:$0xff]  ;;  %2983 = vmatpush1.bf16.msra.mxu0 %v8257_v5  ;;  %3202 = vmatpush1.bf16.msra.mxu1 %v8259_v9  ;;  %v8267_v19 = vcombine.low %v525_v11, %v529_v12  ;;  %s9561_s20 = smul.u32 24, %s12702_s22  ;;  %s8232_s26 = sshll.u32 %s12702_s22, 3 }
  0x5e   : > { %2984 = vmatprep.subr.bf16.mxu0 %v8266_v10  ;;  %v8274_v20 = vcombine.high %v532_v13, %v536_v15  ;;  %3203 = vmatprep.subr.bf16.mxu1 %v8268_v14  ;;  %v8276_v21 = vcombine.high %v533_v16, %v537_v17  ;;  %v540_v22 = vld [vmem:[%s12678_s1 + $0xc0] sm:$0xff]  ;;  %v541_v24 = vld [vmem:[%s12678_s1 + $0xc8] sm:$0xff]  ;;  %v8273_v26 = vcombine.low %v532_v13, %v536_v15 }
  0x5f   : > { %v544_v23 = vld [vmem:[%s12678_s1 + $0xe0] sm:$0xff]  ;;  %v545_v25 = vld [vmem:[%s12678_s1 + $0xe8] sm:$0xff]  ;;  %v8275_v27 = vcombine.low %v533_v16, %v537_v17  ;;  %s10700_s23 = scalar_lea.vmem %s12677_s0, %s9561_s20  ;;  %s489_s14 = scalar_lea.vmem %s12700_s29, %s8232_s26 }
  0x60   : > { %v8282_v28 = vcombine.high %v540_v22, %v544_v23  ;;  %v8284_v29 = vcombine.high %v541_v24, %v545_v25  ;;  %v548_v30 = vld [vmem:[%s12678_s1 + $0x100] sm:$0xff]  ;;  %v549_v32 = vld [vmem:[%s12678_s1 + $0x108] sm:$0xff]  ;;  %v8281_v34 = vcombine.low %v540_v22, %v544_v23  ;;  %v8283_v35 = vcombine.low %v541_v24, %v545_v25 }
  0x61   : > { %2985 = vmatpush1.bf16.msra.mxu0 %v8265_v18  ;;  %3204 = vmatpush1.bf16.msra.mxu1 %v8267_v19  ;;  %v552_v31 = vld [vmem:[%s12678_s1 + $0x120] sm:$0xff]  ;;  %v553_v33 = vld [vmem:[%s12678_s1 + $0x128] sm:$0xff] }
  0x62   : > { %2986 = vmatprep.subr.bf16.mxu0 %v8274_v20  ;;  %3205 = vmatprep.subr.bf16.mxu1 %v8276_v21  ;;  %v8290_v36 = vcombine.high %v548_v30, %v552_v31  ;;  %v8292_v37 = vcombine.high %v549_v32, %v553_v33  ;;  %v556_v38 = vld [vmem:[%s12678_s1 + $0x140] sm:$0xff]  ;;  %v557_v40 = vld [vmem:[%s12678_s1 + $0x148] sm:$0xff]  ;;  %v8289_v42 = vcombine.low %v548_v30, %v552_v31 }
  0x63   : > { %v560_v39 = vld [vmem:[%s12678_s1 + $0x160] sm:$0xff]  ;;  %v561_v41 = vld [vmem:[%s12678_s1 + $0x168] sm:$0xff]  ;;  %v8291_v43 = vcombine.low %v549_v32, %v553_v33 }
  0x64   : > { %v8298_v44 = vcombine.high %v556_v38, %v560_v39  ;;  %v8300_v45 = vcombine.high %v557_v40, %v561_v41  ;;  %v564_v46 = vld [vmem:[%s12678_s1 + $0x180] sm:$0xff]  ;;  %v565_v48 = vld [vmem:[%s12678_s1 + $0x188] sm:$0xff]  ;;  %v8297_v50 = vcombine.low %v556_v38, %v560_v39  ;;  %v8299_v51 = vcombine.low %v557_v40, %v561_v41 }
  0x65   : > { %2987 = vmatpush1.bf16.msra.mxu0 %v8273_v26  ;;  %3206 = vmatpush1.bf16.msra.mxu1 %v8275_v27  ;;  %v568_v47 = vld [vmem:[%s12678_s1 + $0x1a0] sm:$0xff]  ;;  %v569_v49 = vld [vmem:[%s12678_s1 + $0x1a8] sm:$0xff] }
  0x66   : > { %2988 = vmatprep.subr.bf16.mxu0 %v8282_v28  ;;  %3207 = vmatprep.subr.bf16.mxu1 %v8284_v29  ;;  %v8306_v52 = vcombine.high %v564_v46, %v568_v47  ;;  %v8308_v53 = vcombine.high %v565_v48, %v569_v49  ;;  %v572_v54 = vld [vmem:[%s12678_s1 + $0x1c0] sm:$0xff]  ;;  %v573_v57 = vld [vmem:[%s12678_s1 + $0x1c8] sm:$0xff]  ;;  %v8305_v59 = vcombine.low %v564_v46, %v568_v47 }
  0x67   : > { %v576_v55 = vld [vmem:[%s12678_s1 + $0x1e0] sm:$0xff]  ;;  %v577_v58 = vld [vmem:[%s12678_s1 + $0x1e8] sm:$0xff]  ;;  %v8307_v60 = vcombine.low %v565_v48, %v569_v49 }
  0x68   : > { %v9605_v56 = vld [vmem:[%s10700_s23 + $0x4] ss:$24 sps:$4 sm:$0xff]   ;;  %v8314_v61 = vcombine.high %v572_v54, %v576_v55  ;;  %v8316_v62 = vcombine.high %v573_v57, %v577_v58  ;;  %v581_v1 = vld [vmem:[%s12678_s1 + $0x208] sm:$0xff]  ;;  %v8313_v3 = vcombine.low %v572_v54, %v576_v55  ;;  %v8315_v4 = vcombine.low %v573_v57, %v577_v58 }
  0x69   : > { %2989 = vmatpush1.bf16.msra.mxu0 %v8281_v34  ;;  %3208 = vmatpush1.bf16.msra.mxu1 %v8283_v35  ;;  %v580_v63 = vld [vmem:[%s12678_s1 + $0x200] sm:$0xff]  ;;  %v585_v2 = vld [vmem:[%s12678_s1 + $0x228] sm:$0xff] }
  0x6a   : > { %2990 = vmatprep.subr.bf16.mxu0 %v8290_v36  ;;  %3209 = vmatprep.subr.bf16.mxu1 %v8292_v37  ;;  %v584_v0 = vld [vmem:[%s12678_s1 + $0x220] sm:$0xff]  ;;  %v8324_v6 = vcombine.high %v581_v1, %v585_v2  ;;  %v589_v9 = vld [vmem:[%s12678_s1 + $0x248] sm:$0xff]  ;;  %v8323_v12 = vcombine.low %v581_v1, %v585_v2 }
  0x6b   : > { %3014 = vmatprep.mubr.bf16.mxu0 %v9605_v56  ;;  %3233 = vmatprep.mubr.bf16.mxu1 %v9605_v56  ;;  %v8322_v5 = vcombine.high %v580_v63, %v584_v0  ;;  %v588_v7 = vld [vmem:[%s12678_s1 + $0x240] sm:$0xff]  ;;  %v593_v10 = vld [vmem:[%s12678_s1 + $0x268] sm:$0xff]  ;;  %v8321_v11 = vcombine.low %v580_v63, %v584_v0 }
  0x6c   : > { %v592_v8 = vld [vmem:[%s12678_s1 + $0x260] sm:$0xff]  ;;  %v8332_v14 = vcombine.high %v589_v9, %v593_v10  ;;  %v597_v17 = vld [vmem:[%s12678_s1 + $0x288] sm:$0xff]  ;;  %v8331_v20 = vcombine.low %v589_v9, %v593_v10 }
  0x6d   : > { %2991 = vmatpush1.bf16.msra.mxu0 %v8289_v42  ;;  %3210 = vmatpush1.bf16.msra.mxu1 %v8291_v43  ;;  %v8330_v13 = vcombine.high %v588_v7, %v592_v8  ;;  %v596_v15 = vld [vmem:[%s12678_s1 + $0x280] sm:$0xff]  ;;  %v601_v18 = vld [vmem:[%s12678_s1 + $0x2a8] sm:$0xff]  ;;  %v8329_v19 = vcombine.low %v588_v7, %v592_v8 }
  0x6e   : > { %2992 = vmatprep.subr.bf16.mxu0 %v8298_v44  ;;  %3211 = vmatprep.subr.bf16.mxu1 %v8300_v45  ;;  %v600_v16 = vld [vmem:[%s12678_s1 + $0x2a0] sm:$0xff]  ;;  %v8340_v22 = vcombine.high %v597_v17, %v601_v18  ;;  %v605_v25 = vld [vmem:[%s12678_s1 + $0x2c8] sm:$0xff]  ;;  %v8339_v28 = vcombine.low %v597_v17, %v601_v18 }
  0x6f   : > { %v8338_v21 = vcombine.high %v596_v15, %v600_v16  ;;  %v604_v23 = vld [vmem:[%s12678_s1 + $0x2c0] sm:$0xff]  ;;  %v609_v26 = vld [vmem:[%s12678_s1 + $0x2e8] sm:$0xff]  ;;  %v8337_v27 = vcombine.low %v596_v15, %v600_v16 }
  0x70   : > { %v608_v24 = vld [vmem:[%s12678_s1 + $0x2e0] sm:$0xff]  ;;  %v8348_v30 = vcombine.high %v605_v25, %v609_v26  ;;  %v613_v33 = vld [vmem:[%s12678_s1 + $0x308] sm:$0xff]  ;;  %v8347_v36 = vcombine.low %v605_v25, %v609_v26 }
  0x71   : > { %2993 = vmatpush1.bf16.msra.mxu0 %v8297_v50  ;;  %3212 = vmatpush1.bf16.msra.mxu1 %v8299_v51  ;;  %v8346_v29 = vcombine.high %v604_v23, %v608_v24  ;;  %v612_v31 = vld [vmem:[%s12678_s1 + $0x300] sm:$0xff]  ;;  %v617_v34 = vld [vmem:[%s12678_s1 + $0x328] sm:$0xff]  ;;  %v8345_v35 = vcombine.low %v604_v23, %v608_v24 }
  0x72   : > { %2994 = vmatprep.subr.bf16.mxu0 %v8306_v52  ;;  %3213 = vmatprep.subr.bf16.mxu1 %v8308_v53  ;;  %v616_v32 = vld [vmem:[%s12678_s1 + $0x320] sm:$0xff]  ;;  %v8356_v38 = vcombine.high %v613_v33, %v617_v34  ;;  %v621_v41 = vld [vmem:[%s12678_s1 + $0x348] sm:$0xff]  ;;  %v8355_v44 = vcombine.low %v613_v33, %v617_v34 }
  0x73   : > { %v8354_v37 = vcombine.high %v612_v31, %v616_v32  ;;  %v620_v39 = vld [vmem:[%s12678_s1 + $0x340] sm:$0xff]  ;;  %v625_v42 = vld [vmem:[%s12678_s1 + $0x368] sm:$0xff]  ;;  %v8353_v43 = vcombine.low %v612_v31, %v616_v32 }
  0x74   : > { %v624_v40 = vld [vmem:[%s12678_s1 + $0x360] sm:$0xff]  ;;  %v8364_v46 = vcombine.high %v621_v41, %v625_v42  ;;  %v629_v49 = vld [vmem:[%s12678_s1 + $0x388] sm:$0xff]  ;;  %v8363_v52 = vcombine.low %v621_v41, %v625_v42 }
  0x75   : > { %2995 = vmatpush1.bf16.msra.mxu0 %v8305_v59  ;;  %3214 = vmatpush1.bf16.msra.mxu1 %v8307_v60  ;;  %v8362_v45 = vcombine.high %v620_v39, %v624_v40  ;;  %v628_v47 = vld [vmem:[%s12678_s1 + $0x380] sm:$0xff]  ;;  %v633_v50 = vld [vmem:[%s12678_s1 + $0x3a8] sm:$0xff]  ;;  %v8361_v51 = vcombine.low %v620_v39, %v624_v40 }
  0x76   : > { %2996 = vmatprep.subr.bf16.mxu0 %v8314_v61  ;;  %3215 = vmatprep.subr.bf16.mxu1 %v8316_v62  ;;  %v632_v48 = vld [vmem:[%s12678_s1 + $0x3a0] sm:$0xff]  ;;  %v8372_v54 = vcombine.high %v629_v49, %v633_v50  ;;  %v637_v57 = vld [vmem:[%s12678_s1 + $0x3c8] sm:$0xff]  ;;  %v8371_v60 = vcombine.low %v629_v49, %v633_v50 }
  0x77   : > { %v8370_v53 = vcombine.high %v628_v47, %v632_v48  ;;  %v636_v55 = vld [vmem:[%s12678_s1 + $0x3c0] sm:$0xff]  ;;  %v641_v58 = vld [vmem:[%s12678_s1 + $0x3e8] sm:$0xff]  ;;  %v8369_v59 = vcombine.low %v628_v47, %v632_v48 }
  0x78   : > { %v640_v56 = vld [vmem:[%s12678_s1 + $0x3e0] sm:$0xff]  ;;  %v8380_v62 = vcombine.high %v637_v57, %v641_v58  ;;  %v645_v1 = vld [vmem:[%s12678_s1 + $0x408] sm:$0xff] }
  0x79   : > { %2997 = vmatpush1.bf16.msra.mxu0 %v8313_v3  ;;  %3216 = vmatpush1.bf16.msra.mxu1 %v8315_v4  ;;  %v8378_v61 = vcombine.high %v636_v55, %v640_v56  ;;  %v644_v63 = vld [vmem:[%s12678_s1 + $0x400] sm:$0xff]  ;;  %v649_v2 = vld [vmem:[%s12678_s1 + $0x428] sm:$0xff]  ;;  %v8377_v3 = vcombine.low %v636_v55, %v640_v56  ;;  %v8379_v4 = vcombine.low %v637_v57, %v641_v58 }
  0x7a   : > { %2998 = vmatprep.subr.bf16.mxu0 %v8322_v5  ;;  %3217 = vmatprep.subr.bf16.mxu1 %v8324_v6  ;;  %v648_v0 = vld [vmem:[%s12678_s1 + $0x420] sm:$0xff]  ;;  %v8388_v7 = vcombine.high %v645_v1, %v649_v2  ;;  %v653_v10 = vld [vmem:[%s12678_s1 + $0x448] sm:$0xff] }
  0x7b   : > { %v8386_v5 = vcombine.high %v644_v63, %v648_v0  ;;  %v9607_v6 = vld [vmem:[%s10700_s23] ss:$24 sps:$4 sm:$0xff]   ;;  %v9608_v18 = vld [vmem:[%s10700_s23 + $0x34] ss:$24 sps:$4 sm:$0xff]  }
  0x7c   : > { %v652_v8 = vld [vmem:[%s12678_s1 + $0x440] sm:$0xff]  ;;  %v693_v55 = vld [vmem:[%s12678_s1 + $0x588] sm:$0xff] }
  0x7d   : > { %2999 = vmatpush1.bf16.msra.mxu0 %v8321_v11  ;;  %3218 = vmatpush1.bf16.msra.mxu1 %v8323_v12  ;;  %v656_v9 = vld [vmem:[%s12678_s1 + $0x460] sm:$0xff]  ;;  %v657_v11 = vld [vmem:[%s12678_s1 + $0x468] sm:$0xff]  ;;  %v8385_v12 = vcombine.low %v644_v63, %v648_v0 }
  0x7e   : > { %3000 = vmatprep.subr.bf16.mxu0 %v8330_v13  ;;  %3219 = vmatprep.subr.bf16.mxu1 %v8332_v14  ;;  %v8387_v13 = vcombine.low %v645_v1, %v649_v2  ;;  %v8394_v14 = vcombine.high %v652_v8, %v656_v9  ;;  %v660_v15 = vld [vmem:[%s12678_s1 + $0x480] sm:$0xff]  ;;  %v8396_v16 = vcombine.high %v653_v10, %v657_v11  ;;  %v697_v56 = vld [vmem:[%s12678_s1 + $0x5a8] sm:$0xff] }
  0x7f   : > { %v664_v17 = vld [vmem:[%s12678_s1 + $0x4a0] sm:$0xff]  ;;  %v8436_v63 = vcombine.high %v693_v55, %v697_v56  ;;  %v705_v0 = vld [vmem:[%s12678_s1 + $0x5e8] sm:$0xff] }
  0x80   : > { %v8402_v23 = vcombine.high %v660_v15, %v664_v17  ;;  %v668_v24 = vld [vmem:[%s12678_s1 + $0x4c0] sm:$0xff]  ;;  %v9616_v1 = vld [vmem:[%s10700_s23 + $0x90] ss:$24 sps:$4 sm:$0xff]  }
  0x81   : > { %3001 = vmatpush1.bf16.msra.mxu0 %v8329_v19  ;;  %3220 = vmatpush1.bf16.msra.mxu1 %v8331_v20  ;;  %v661_v19 = vld [vmem:[%s12678_s1 + $0x488] sm:$0xff]  ;;  %v672_v26 = vld [vmem:[%s12678_s1 + $0x4e0] sm:$0xff] }
  0x82   : > { %3002 = vmatprep.subr.bf16.mxu0 %v8338_v21  ;;  %3221 = vmatprep.subr.bf16.mxu1 %v8340_v22  ;;  %v665_v20 = vld [vmem:[%s12678_s1 + $0x4a8] sm:$0xff]  ;;  %v8393_v21 = vcombine.low %v652_v8, %v656_v9  ;;  %v8395_v22 = vcombine.low %v653_v10, %v657_v11  ;;  %v8410_v32 = vcombine.high %v668_v24, %v672_v26  ;;  %v676_v33 = vld [vmem:[%s12678_s1 + $0x500] sm:$0xff] }
  0x83   : > { %v8404_v25 = vcombine.high %v661_v19, %v665_v20  ;;  %v8403_v31 = vcombine.low %v661_v19, %v665_v20  ;;  %v8409_v39 = vcombine.low %v668_v24, %v672_v26  ;;  %v684_v42 = vld [vmem:[%s12678_s1 + $0x540] sm:$0xff]  ;;  %v709_v8 = vld [vmem:[%s12678_s1 + $0x608] sm:$0xff] }
  0x84   : > { %v9613_v47 = vld [vmem:[%s10700_s23 + $0x60] ss:$24 sps:$4 sm:$0xff]   ;;  %v713_v9 = vld [vmem:[%s12678_s1 + $0x628] sm:$0xff] }
  0x85   : > { %3003 = vmatpush1.bf16.msra.mxu0 %v8337_v27  ;;  %3222 = vmatpush1.bf16.msra.mxu1 %v8339_v28  ;;  %v669_v27 = vld [vmem:[%s12678_s1 + $0x4c8] sm:$0xff]  ;;  %v8451_v20 = vcombine.low %v709_v8, %v713_v9 }
  0x86   : > { %3004 = vmatprep.subr.bf16.mxu0 %v8346_v29  ;;  %3223 = vmatprep.subr.bf16.mxu1 %v8348_v30  ;;  %v673_v28 = vld [vmem:[%s12678_s1 + $0x4e8] sm:$0xff]  ;;  %v8401_v30 = vcombine.low %v660_v15, %v664_v17  ;;  %v720_v15 = vld [vmem:[%s12678_s1 + $0x660] sm:$0xff]  ;;  %v8452_v17 = vcombine.high %v709_v8, %v713_v9 }
  0x87   : > { %v9610_v29 = vld [vmem:[%s10700_s23 + $0x30] ss:$24 sps:$4 sm:$0xff]   ;;  %v8412_v34 = vcombine.high %v669_v27, %v673_v28  ;;  %v8411_v40 = vcombine.low %v669_v27, %v673_v28  ;;  %v9619_v10 = vld [vmem:[%s10700_s23 + $0xc] ss:$24 sps:$4 sm:$0xff]  }
  0x88   : > { %v725_v24 = vld [vmem:[%s12678_s1 + $0x688] sm:$0xff] }
  0x89   : > { %3005 = vmatpush1.bf16.msra.mxu0 %v8345_v35  ;;  %3224 = vmatpush1.bf16.msra.mxu1 %v8347_v36  ;;  %v680_v35 = vld [vmem:[%s12678_s1 + $0x520] sm:$0xff]  ;;  %v729_v26 = vld [vmem:[%s12678_s1 + $0x6a8] sm:$0xff] }
  0x8a   : > { %3006 = vmatprep.subr.bf16.mxu0 %v8354_v37  ;;  %3225 = vmatprep.subr.bf16.mxu1 %v8356_v38  ;;  %v9611_v36 = vld [vmem:[%s10700_s23 + $0x64] ss:$24 sps:$4 sm:$0xff]   ;;  %v677_v37 = vld [vmem:[%s12678_s1 + $0x508] sm:$0xff]  ;;  %v8418_v41 = vcombine.high %v676_v33, %v680_v35  ;;  %v8417_v48 = vcombine.low %v676_v33, %v680_v35  ;;  %v8468_v33 = vcombine.high %v725_v24, %v729_v26 }
  0x8b   : > { %v681_v38 = vld [vmem:[%s12678_s1 + $0x528] sm:$0xff] }
  0x8c   : > { %v8419_v49 = vcombine.low %v677_v37, %v681_v38  ;;  %v773_v8 = vld [vmem:[%s12678_s1 + $0x808] sm:$0xff] }
  0x8d   : > { %3007 = vmatpush1.bf16.msra.mxu0 %v8353_v43  ;;  %3226 = vmatpush1.bf16.msra.mxu1 %v8355_v44  ;;  %v8420_v43 = vcombine.high %v677_v37, %v681_v38  ;;  %v688_v44 = vld [vmem:[%s12678_s1 + $0x560] sm:$0xff] }
  0x8e   : > { %3008 = vmatprep.subr.bf16.mxu0 %v8362_v45  ;;  %3227 = vmatprep.subr.bf16.mxu1 %v8364_v46  ;;  %v685_v45 = vld [vmem:[%s12678_s1 + $0x548] sm:$0xff]  ;;  %v8426_v50 = vcombine.high %v684_v42, %v688_v44  ;;  %v8425_v57 = vcombine.low %v684_v42, %v688_v44  ;;  %v740_v38 = vld [vmem:[%s12678_s1 + $0x700] sm:$0xff] }
  0x8f   : > { %v689_v46 = vld [vmem:[%s12678_s1 + $0x568] sm:$0xff] }
  0x90   : > { %v8427_v58 = vcombine.low %v685_v45, %v689_v46  ;;  %v745_v42 = vld [vmem:[%s12678_s1 + $0x728] sm:$0xff] }
  0x91   : > { %3009 = vmatpush1.bf16.msra.mxu0 %v8361_v51  ;;  %3228 = vmatpush1.bf16.msra.mxu1 %v8363_v52  ;;  %v692_v51 = vld [vmem:[%s12678_s1 + $0x580] sm:$0xff]  ;;  %v8428_v52 = vcombine.high %v685_v45, %v689_v46 }
  0x92   : > { %3010 = vmatprep.subr.bf16.mxu0 %v8370_v53  ;;  %3229 = vmatprep.subr.bf16.mxu1 %v8372_v54  ;;  %v696_v53 = vld [vmem:[%s12678_s1 + $0x5a0] sm:$0xff]  ;;  %v9614_v54 = vld [vmem:[%s10700_s23 + $0x94] ss:$24 sps:$4 sm:$0xff]  }
  0x93   : > { %v8433_v2 = vcombine.low %v692_v51, %v696_v53  ;;  %v748_v46 = vld [vmem:[%s12678_s1 + $0x740] sm:$0xff] }
  0x95   : > { %3011 = vmatpush1.bf16.msra.mxu0 %v8369_v59  ;;  %3230 = vmatpush1.bf16.msra.mxu1 %v8371_v60  ;;  %v8434_v59 = vcombine.high %v692_v51, %v696_v53  ;;  %v700_v60 = vld [vmem:[%s12678_s1 + $0x5c0] sm:$0xff] }
  0x96   : > { %3012 = vmatprep.subr.bf16.mxu0 %v8378_v61  ;;  %3231 = vmatprep.subr.bf16.mxu1 %v8380_v62  ;;  %v704_v61 = vld [vmem:[%s12678_s1 + $0x5e0] sm:$0xff]  ;;  %v701_v62 = vld [vmem:[%s12678_s1 + $0x5c8] sm:$0xff] }
  0x97   : > { %v8441_v11 = vcombine.low %v700_v60, %v704_v61 }
  0x99   : > { %3013 = vmatpush1.bf16.msra.mxu0 %v8377_v3  ;;  %3232 = vmatpush1.bf16.msra.mxu1 %v8379_v4  ;;  %v8435_v3 = vcombine.low %v693_v55, %v697_v56  ;;  %v8442_v4 = vcombine.high %v700_v60, %v704_v61  ;;  %v760_v55 = vld [vmem:[%s12678_s1 + $0x7a0] sm:$0xff]  ;;  %v757_v56 = vld [vmem:[%s12678_s1 + $0x788] sm:$0xff] }
  0x9a   : > { %3055 = vmatprep.subr.bf16.mxu0 %v8386_v5  ;;  %3274 = vmatprep.subr.bf16.mxu1 %v8388_v7  ;;  %v708_v5 = vld [vmem:[%s12678_s1 + $0x600] sm:$0xff]  ;;  %v8444_v7 = vcombine.high %v701_v62, %v705_v0 }
  0x9c   : > { %3015 = vmatmul.mubr.bf16.vlgmr.msra.gmra.mrb[0].mxu0 %v9607_v6  ;;  %3234 = vmatmul.mubr.bf16.vlgmr.msra.gmra.mrb[0].mxu1 %v9607_v6  ;;  %v712_v6 = vld [vmem:[%s12678_s1 + $0x620] sm:$0xff] }
  0x9d   : > { %3056 = vmatpush1.bf16.msra.mxu0 %v8385_v12  ;;  %3275 = vmatpush1.bf16.msra.mxu1 %v8387_v13  ;;  %v8443_v12 = vcombine.low %v701_v62, %v705_v0  ;;  %v8450_v13 = vcombine.high %v708_v5, %v712_v6  ;;  %v8449_v19 = vcombine.low %v708_v5, %v712_v6  ;;  %v764_v62 = vld [vmem:[%s12678_s1 + $0x7c0] sm:$0xff]  ;;  %v765_v0 = vld [vmem:[%s12678_s1 + $0x7c8] sm:$0xff] }
  0x9e   : > { %3057 = vmatprep.subr.bf16.mxu0 %v8394_v14  ;;  %3276 = vmatprep.subr.bf16.mxu1 %v8396_v16  ;;  %v716_v14 = vld [vmem:[%s12678_s1 + $0x640] sm:$0xff]  ;;  %v717_v16 = vld [vmem:[%s12678_s1 + $0x648] sm:$0xff] }
  0x9f   : > { %3024 = vmatprep.mubr.bf16.mxu0 %v9608_v18  ;;  %3243 = vmatprep.mubr.bf16.mxu1 %v9608_v18  ;;  %v721_v18 = vld [vmem:[%s12678_s1 + $0x668] sm:$0xff]  ;;  %v8457_v27 = vcombine.low %v716_v14, %v720_v15  ;;  %v772_v6 = vld [vmem:[%s12678_s1 + $0x800] sm:$0xff] }
  0xa0   : > { %v8459_v28 = vcombine.low %v717_v16, %v721_v18 }
  0xa1   : > { %3058 = vmatpush1.bf16.msra.mxu0 %v8393_v21  ;;  %3277 = vmatpush1.bf16.msra.mxu1 %v8395_v22  ;;  %v8458_v21 = vcombine.high %v716_v14, %v720_v15  ;;  %v724_v22 = vld [vmem:[%s12678_s1 + $0x680] sm:$0xff] }
  0xa2   : > { %3059 = vmatprep.subr.bf16.mxu0 %v8402_v23  ;;  %3278 = vmatprep.subr.bf16.mxu1 %v8404_v25  ;;  %v728_v23 = vld [vmem:[%s12678_s1 + $0x6a0] sm:$0xff]  ;;  %v8460_v25 = vcombine.high %v717_v16, %v721_v18 }
  0xa3   : > { %v8465_v35 = vcombine.low %v724_v22, %v728_v23  ;;  %v780_v15 = vld [vmem:[%s12678_s1 + $0x840] sm:$0xff] }
  0xa4   : > { %3025 = vmatmul.mubr.bf16.gmra.mrb[4].mxu0 %v9610_v29  ;;  %3244 = vmatmul.mubr.bf16.gmra.mrb[4].mxu1 %v9610_v29  ;;  %v8466_v29 = vcombine.high %v724_v22, %v728_v23  ;;  %v784_v16 = vld [vmem:[%s12678_s1 + $0x860] sm:$0xff] }
  0xa5   : > { %3060 = vmatpush1.bf16.msra.mxu0 %v8401_v30  ;;  %3279 = vmatpush1.bf16.msra.mxu1 %v8403_v31  ;;  %v732_v30 = vld [vmem:[%s12678_s1 + $0x6c0] sm:$0xff]  ;;  %v8522_v23 = vcombine.high %v780_v15, %v784_v16 }
  0xa6   : > { %3061 = vmatprep.subr.bf16.mxu0 %v8410_v32  ;;  %3280 = vmatprep.subr.bf16.mxu1 %v8412_v34  ;;  %v736_v31 = vld [vmem:[%s12678_s1 + $0x6e0] sm:$0xff]  ;;  %v733_v32 = vld [vmem:[%s12678_s1 + $0x6c8] sm:$0xff] }
  0xa7   : > { %3034 = vmatprep.mubr.bf16.mxu0 %v9611_v36  ;;  %3253 = vmatprep.mubr.bf16.mxu1 %v9611_v36  ;;  %v737_v34 = vld [vmem:[%s12678_s1 + $0x6e8] sm:$0xff]  ;;  %v8467_v36 = vcombine.low %v725_v24, %v729_v26  ;;  %v8474_v37 = vcombine.high %v732_v30, %v736_v31  ;;  %v792_v24 = vld [vmem:[%s12678_s1 + $0x8a0] sm:$0xff] }
  0xa8   : > { %v8475_v44 = vcombine.low %v733_v32, %v737_v34  ;;  %v793_v26 = vld [vmem:[%s12678_s1 + $0x8a8] sm:$0xff] }
  0xa9   : > { %3062 = vmatpush1.bf16.msra.mxu0 %v8409_v39  ;;  %3281 = vmatpush1.bf16.msra.mxu1 %v8411_v40  ;;  %v744_v39 = vld [vmem:[%s12678_s1 + $0x720] sm:$0xff]  ;;  %v741_v40 = vld [vmem:[%s12678_s1 + $0x708] sm:$0xff] }
  0xaa   : > { %3063 = vmatprep.subr.bf16.mxu0 %v8418_v41  ;;  %3282 = vmatprep.subr.bf16.mxu1 %v8420_v43  ;;  %v8476_v41 = vcombine.high %v733_v32, %v737_v34  ;;  %v8473_v43 = vcombine.low %v732_v30, %v736_v31  ;;  %v8482_v45 = vcombine.high %v740_v38, %v744_v39  ;;  %v796_v30 = vld [vmem:[%s12678_s1 + $0x8c0] sm:$0xff]  ;;  %v797_v34 = vld [vmem:[%s12678_s1 + $0x8c8] sm:$0xff] }
  0xab   : > { %v8481_v51 = vcombine.low %v740_v38, %v744_v39  ;;  %v804_v39 = vld [vmem:[%s12678_s1 + $0x900] sm:$0xff] }
  0xac   : > { %3035 = vmatmul.mubr.bf16.gmra.mrb[8].mxu0 %v9613_v47  ;;  %3254 = vmatmul.mubr.bf16.gmra.mrb[8].mxu1 %v9613_v47  ;;  %v752_v47 = vld [vmem:[%s12678_s1 + $0x760] sm:$0xff] }
  0xad   : > { %3064 = vmatpush1.bf16.msra.mxu0 %v8417_v48  ;;  %3283 = vmatpush1.bf16.msra.mxu1 %v8419_v49  ;;  %v749_v48 = vld [vmem:[%s12678_s1 + $0x748] sm:$0xff]  ;;  %v8484_v49 = vcombine.high %v741_v40, %v745_v42  ;;  %v8490_v53 = vcombine.high %v748_v46, %v752_v47 }
  0xae   : > { %3065 = vmatprep.subr.bf16.mxu0 %v8426_v50  ;;  %3284 = vmatprep.subr.bf16.mxu1 %v8428_v52  ;;  %v753_v50 = vld [vmem:[%s12678_s1 + $0x768] sm:$0xff]  ;;  %v8483_v52 = vcombine.low %v741_v40, %v745_v42  ;;  %v808_v42 = vld [vmem:[%s12678_s1 + $0x920] sm:$0xff] }
  0xaf   : > { %3044 = vmatprep.mubr.bf16.mxu0 %v9614_v54  ;;  %3263 = vmatprep.mubr.bf16.mxu1 %v9614_v54  ;;  %v756_v54 = vld [vmem:[%s12678_s1 + $0x780] sm:$0xff]  ;;  %v8491_v60 = vcombine.low %v749_v48, %v753_v50 }
  0xb0   : > { %v8498_v61 = vcombine.high %v756_v54, %v760_v55 }
  0xb1   : > { %3066 = vmatpush1.bf16.msra.mxu0 %v8425_v57  ;;  %3285 = vmatpush1.bf16.msra.mxu1 %v8427_v58  ;;  %v8492_v57 = vcombine.high %v749_v48, %v753_v50  ;;  %v761_v58 = vld [vmem:[%s12678_s1 + $0x7a8] sm:$0xff]  ;;  %v812_v48 = vld [vmem:[%s12678_s1 + $0x940] sm:$0xff]  ;;  %v8546_v50 = vcombine.high %v804_v39, %v808_v42 }
  0xb2   : > { %3067 = vmatprep.subr.bf16.mxu0 %v8434_v59  ;;  %3286 = vmatprep.subr.bf16.mxu1 %v8436_v63  ;;  %v8489_v59 = vcombine.low %v748_v46, %v752_v47  ;;  %v768_v63 = vld [vmem:[%s12678_s1 + $0x7e0] sm:$0xff] }
  0xb3   : > { %v8506_v5 = vcombine.high %v764_v62, %v768_v63  ;;  %v9623_v46 = vld [vmem:[%s10700_s23 + $0x6c] ss:$24 sps:$4 sm:$0xff]  }
  0xb4   : > { %3045 = vmatmul.mubr.bf16.gmra.mrb[12].mxu0 %v9616_v1  ;;  %3264 = vmatmul.mubr.bf16.gmra.mrb[12].mxu1 %v9616_v1  ;;  %v8500_v1 = vcombine.high %v757_v56, %v761_v58 }
  0xb5   : > { %3068 = vmatpush1.bf16.msra.mxu0 %v8433_v2  ;;  %3287 = vmatpush1.bf16.msra.mxu1 %v8435_v3  ;;  %v769_v2 = vld [vmem:[%s12678_s1 + $0x7e8] sm:$0xff]  ;;  %v8497_v3 = vcombine.low %v756_v54, %v760_v55 }
  0xb6   : > { %3069 = vmatprep.subr.bf16.mxu0 %v8442_v4  ;;  %3288 = vmatprep.subr.bf16.mxu1 %v8444_v7  ;;  %v8499_v4 = vcombine.low %v757_v56, %v761_v58  ;;  %v776_v7 = vld [vmem:[%s12678_s1 + $0x820] sm:$0xff]  ;;  %v8508_v9 = vcombine.high %v765_v0, %v769_v2  ;;  %v8545_v56 = vcombine.low %v804_v39, %v808_v42  ;;  %v865_v42 = vld [vmem:[%s12678_s1 + $0xae8] sm:$0xff] }
  0xb7   : > { %3087 = vmatprep.mubr.bf16.mxu0 %v9619_v10  ;;  %3306 = vmatprep.mubr.bf16.mxu1 %v9619_v10  ;;  %v777_v10 = vld [vmem:[%s12678_s1 + $0x828] sm:$0xff]  ;;  %v8514_v14 = vcombine.high %v772_v6, %v776_v7  ;;  %v864_v39 = vld [vmem:[%s12678_s1 + $0xae0] sm:$0xff] }
  0xb8   : > { %v8516_v18 = vcombine.high %v773_v8, %v777_v10  ;;  %v8515_v22 = vcombine.low %v773_v8, %v777_v10  ;;  %v9625_v55 = vld [vmem:[%s10700_s23 + $0x68] ss:$24 sps:$4 sm:$0xff]  }
  0xb9   : > { %3070 = vmatpush1.bf16.msra.mxu0 %v8441_v11  ;;  %3289 = vmatpush1.bf16.msra.mxu1 %v8443_v12  ;;  %v8505_v11 = vcombine.low %v764_v62, %v768_v63  ;;  %v8507_v12 = vcombine.low %v765_v0, %v769_v2  ;;  %v825_v62 = vld [vmem:[%s12678_s1 + $0x9a8] sm:$0xff]  ;;  %v9626_v0 = vld [vmem:[%s10700_s23 + $0x9c] ss:$24 sps:$4 sm:$0xff]   ;;  %v828_v2 = vld [vmem:[%s12678_s1 + $0x9c0] sm:$0xff] }
  0xba   : > { %3071 = vmatprep.subr.bf16.mxu0 %v8450_v13  ;;  %3290 = vmatprep.subr.bf16.mxu1 %v8452_v17  ;;  %v9617_v13 = vld [vmem:[%s10700_s23 + $0x8] ss:$24 sps:$4 sm:$0xff]  }
  0xbb   : > { %v781_v17 = vld [vmem:[%s12678_s1 + $0x848] sm:$0xff] }
  0xbd   : > { %3072 = vmatpush1.bf16.msra.mxu0 %v8449_v19  ;;  %3291 = vmatpush1.bf16.msra.mxu1 %v8451_v20  ;;  %v785_v19 = vld [vmem:[%s12678_s1 + $0x868] sm:$0xff]  ;;  %v8513_v20 = vcombine.low %v772_v6, %v776_v7 }
  0xbe   : > { %3073 = vmatprep.subr.bf16.mxu0 %v8458_v21  ;;  %3292 = vmatprep.subr.bf16.mxu1 %v8460_v25  ;;  %v788_v21 = vld [vmem:[%s12678_s1 + $0x880] sm:$0xff]  ;;  %v789_v25 = vld [vmem:[%s12678_s1 + $0x888] sm:$0xff]  ;;  %v8523_v31 = vcombine.low %v781_v17, %v785_v19 }
  0xbf   : > { %v8530_v32 = vcombine.high %v788_v21, %v792_v24  ;;  %v8529_v38 = vcombine.low %v788_v21, %v792_v24  ;;  %v8531_v40 = vcombine.low %v789_v25, %v793_v26  ;;  %v829_v6 = vld [vmem:[%s12678_s1 + $0x9c8] sm:$0xff] }
  0xc0   : > { %v833_v7 = vld [vmem:[%s12678_s1 + $0x9e8] sm:$0xff] }
  0xc1   : > { %3074 = vmatpush1.bf16.msra.mxu0 %v8457_v27  ;;  %3293 = vmatpush1.bf16.msra.mxu1 %v8459_v28  ;;  %v8524_v27 = vcombine.high %v781_v17, %v785_v19  ;;  %v9620_v28 = vld [vmem:[%s10700_s23 + $0x3c] ss:$24 sps:$4 sm:$0xff]   ;;  %v8572_v17 = vcombine.high %v829_v6, %v833_v7  ;;  %v845_v24 = vld [vmem:[%s12678_s1 + $0xa48] sm:$0xff] }
  0xc2   : > { %3075 = vmatprep.subr.bf16.mxu0 %v8466_v29  ;;  %3294 = vmatprep.subr.bf16.mxu1 %v8468_v33  ;;  %v8521_v29 = vcombine.low %v780_v15, %v784_v16  ;;  %v800_v33 = vld [vmem:[%s12678_s1 + $0x8e0] sm:$0xff]  ;;  %v837_v15 = vld [vmem:[%s12678_s1 + $0xa08] sm:$0xff] }
  0xc3   : > { %v8537_v47 = vcombine.low %v796_v30, %v800_v33  ;;  %v841_v16 = vld [vmem:[%s12678_s1 + $0xa28] sm:$0xff] }
  0xc5   : > { %3076 = vmatpush1.bf16.msra.mxu0 %v8465_v35  ;;  %3295 = vmatpush1.bf16.msra.mxu1 %v8467_v36  ;;  %v801_v35 = vld [vmem:[%s12678_s1 + $0x8e8] sm:$0xff]  ;;  %v8532_v36 = vcombine.high %v789_v25, %v793_v26  ;;  %v8580_v25 = vcombine.high %v837_v15, %v841_v16 }
  0xc6   : > { %3077 = vmatprep.subr.bf16.mxu0 %v8474_v37  ;;  %3296 = vmatprep.subr.bf16.mxu1 %v8476_v41  ;;  %v9622_v37 = vld [vmem:[%s10700_s23 + $0x38] ss:$24 sps:$4 sm:$0xff]   ;;  %v8538_v41 = vcombine.high %v796_v30, %v800_v33  ;;  %v849_v26 = vld [vmem:[%s12678_s1 + $0xa68] sm:$0xff]  ;;  %v852_v30 = vld [vmem:[%s12678_s1 + $0xa80] sm:$0xff] }
  0xc7   : > { %v8588_v33 = vcombine.high %v845_v24, %v849_v26 }
  0xc9   : > { %3078 = vmatpush1.bf16.msra.mxu0 %v8473_v43  ;;  %3297 = vmatpush1.bf16.msra.mxu1 %v8475_v44  ;;  %v805_v43 = vld [vmem:[%s12678_s1 + $0x908] sm:$0xff] }
  0xca   : > { %3079 = vmatprep.subr.bf16.mxu0 %v8482_v45  ;;  %3298 = vmatprep.subr.bf16.mxu1 %v8484_v49  ;;  %v809_v44 = vld [vmem:[%s12678_s1 + $0x928] sm:$0xff]  ;;  %v8540_v45 = vcombine.high %v797_v34, %v801_v35  ;;  %v8539_v49 = vcombine.low %v797_v34, %v801_v35 }
  0xcb   : > { %v8548_v54 = vcombine.high %v805_v43, %v809_v44  ;;  %v8547_v58 = vcombine.low %v805_v43, %v809_v44  ;;  %v857_v34 = vld [vmem:[%s12678_s1 + $0xaa8] sm:$0xff] }
  0xcd   : > { %3080 = vmatpush1.bf16.msra.mxu0 %v8481_v51  ;;  %3299 = vmatpush1.bf16.msra.mxu1 %v8483_v52  ;;  %v816_v51 = vld [vmem:[%s12678_s1 + $0x960] sm:$0xff]  ;;  %v813_v52 = vld [vmem:[%s12678_s1 + $0x948] sm:$0xff] }
  0xce   : > { %3081 = vmatprep.subr.bf16.mxu0 %v8490_v53  ;;  %3300 = vmatprep.subr.bf16.mxu1 %v8492_v57  ;;  %v817_v53 = vld [vmem:[%s12678_s1 + $0x968] sm:$0xff]  ;;  %v820_v57 = vld [vmem:[%s12678_s1 + $0x980] sm:$0xff] }
  0xcf   : > { %v8556_v63 = vcombine.high %v813_v52, %v817_v53 }
  0xd1   : > { %3082 = vmatpush1.bf16.msra.mxu0 %v8489_v59  ;;  %3301 = vmatpush1.bf16.msra.mxu1 %v8491_v60  ;;  %v8554_v59 = vcombine.high %v812_v48, %v816_v51  ;;  %v824_v60 = vld [vmem:[%s12678_s1 + $0x9a0] sm:$0xff] }
  0xd2   : > { %3083 = vmatprep.subr.bf16.mxu0 %v8498_v61  ;;  %3302 = vmatprep.subr.bf16.mxu1 %v8500_v1  ;;  %v821_v61 = vld [vmem:[%s12678_s1 + $0x988] sm:$0xff]  ;;  %v8553_v1 = vcombine.low %v812_v48, %v816_v51  ;;  %v8561_v10 = vcombine.low %v820_v57, %v824_v60 }
  0xd3   : > { %v8564_v8 = vcombine.high %v821_v61, %v825_v62  ;;  %v869_v48 = vld [vmem:[%s12678_s1 + $0xb08] sm:$0xff] }
  0xd5   : > { %3084 = vmatpush1.bf16.msra.mxu0 %v8497_v3  ;;  %3303 = vmatpush1.bf16.msra.mxu1 %v8499_v4  ;;  %v8555_v3 = vcombine.low %v813_v52, %v817_v53  ;;  %v8562_v4 = vcombine.high %v820_v57, %v824_v60 }
  0xd6   : > { %3085 = vmatprep.subr.bf16.mxu0 %v8506_v5  ;;  %3304 = vmatprep.subr.bf16.mxu1 %v8508_v9  ;;  %v832_v5 = vld [vmem:[%s12678_s1 + $0x9e0] sm:$0xff]  ;;  %v9628_v9 = vld [vmem:[%s10700_s23 + $0x98] ss:$24 sps:$4 sm:$0xff]  }
  0xd7   : > { %v8569_v19 = vcombine.low %v828_v2, %v832_v5 }
  0xd9   : > { %3086 = vmatpush1.bf16.msra.mxu0 %v8505_v11  ;;  %3305 = vmatpush1.bf16.msra.mxu1 %v8507_v12  ;;  %v836_v11 = vld [vmem:[%s12678_s1 + $0xa00] sm:$0xff]  ;;  %v8563_v12 = vcombine.low %v821_v61, %v825_v62 }
  0xda   : > { %3128 = vmatprep.subr.bf16.mxu0 %v8514_v14  ;;  %3347 = vmatprep.subr.bf16.mxu1 %v8516_v18  ;;  %v840_v14 = vld [vmem:[%s12678_s1 + $0xa20] sm:$0xff]  ;;  %v9631_v18 = vld [vmem:[%s10700_s23 + $0x14] ss:$24 sps:$4 sm:$0xff]  }
  0xdb   : > { %v8578_v21 = vcombine.high %v836_v11, %v840_v14  ;;  %v884_v62 = vld [vmem:[%s12678_s1 + $0xb80] sm:$0xff] }
  0xdc   : > { %3088 = vmatmul.mubr.bf16.vlgmr.msra.gmra.mrb[0].mxu0 %v9617_v13  ;;  %3307 = vmatmul.mubr.bf16.vlgmr.msra.gmra.mrb[0].mxu1 %v9617_v13  ;;  %v8570_v13 = vcombine.high %v828_v2, %v832_v5  ;;  %v889_v2 = vld [vmem:[%s12678_s1 + $0xba8] sm:$0xff] }
  0xdd   : > { %3129 = vmatpush1.bf16.msra.mxu0 %v8513_v20  ;;  %3348 = vmatpush1.bf16.msra.mxu1 %v8515_v22  ;;  %v8571_v20 = vcombine.low %v829_v6, %v833_v7  ;;  %v844_v22 = vld [vmem:[%s12678_s1 + $0xa40] sm:$0xff] }
  0xde   : > { %3130 = vmatprep.subr.bf16.mxu0 %v8522_v23  ;;  %3349 = vmatprep.subr.bf16.mxu1 %v8524_v27  ;;  %v848_v23 = vld [vmem:[%s12678_s1 + $0xa60] sm:$0xff]  ;;  %v8577_v27 = vcombine.low %v836_v11, %v840_v14  ;;  %v518_v14 = vld [vmem:[%s12678_s1 + $0x10] sm:$0xff] }
  0xdf   : > { %3097 = vmatprep.mubr.bf16.mxu0 %v9620_v28  ;;  %3316 = vmatprep.mubr.bf16.mxu1 %v9620_v28  ;;  %v8579_v28 = vcombine.low %v837_v15, %v841_v16  ;;  %v8585_v35 = vcombine.low %v844_v22, %v848_v23  ;;  %v892_v6 = vld [vmem:[%s12678_s1 + $0xbc0] sm:$0xff]  ;;  %v522_v15 = vld [vmem:[%s12678_s1 + $0x30] sm:$0xff]  ;;  %v519_v16 = vld [vmem:[%s12678_s1 + $0x18] sm:$0xff] }
  0xe0   : > { %v896_v7 = vld [vmem:[%s12678_s1 + $0xbe0] sm:$0xff] }
  0xe1   : > { %3131 = vmatpush1.bf16.msra.mxu0 %v8521_v29  ;;  %3350 = vmatpush1.bf16.msra.mxu1 %v8523_v31  ;;  %v8586_v29 = vcombine.high %v844_v22, %v848_v23  ;;  %v856_v31 = vld [vmem:[%s12678_s1 + $0xaa0] sm:$0xff]  ;;  %v8262_v22 = vcombine.high %v518_v14, %v522_v15  ;;  %v526_v23 = vld [vmem:[%s12678_s1 + $0x50] sm:$0xff] }
  0xe2   : > { %3132 = vmatprep.subr.bf16.mxu0 %v8530_v32  ;;  %3351 = vmatprep.subr.bf16.mxu1 %v8532_v36  ;;  %v853_v32 = vld [vmem:[%s12678_s1 + $0xa88] sm:$0xff]  ;;  %v8587_v36 = vcombine.low %v845_v24, %v849_v26  ;;  %v8593_v43 = vcombine.low %v852_v30, %v856_v31  ;;  %v530_v24 = vld [vmem:[%s12678_s1 + $0x70] sm:$0xff] }
  0xe3   : > { %v8595_v44 = vcombine.low %v853_v32, %v857_v34 }
  0xe4   : > { %3098 = vmatmul.mubr.bf16.gmra.mrb[4].mxu0 %v9622_v37  ;;  %3317 = vmatmul.mubr.bf16.gmra.mrb[4].mxu1 %v9622_v37  ;;  %v8594_v37 = vcombine.high %v852_v30, %v856_v31  ;;  %v8270_v31 = vcombine.high %v526_v23, %v530_v24 }
  0xe5   : > { %3133 = vmatpush1.bf16.msra.mxu0 %v8529_v38  ;;  %3352 = vmatpush1.bf16.msra.mxu1 %v8531_v40  ;;  %v860_v38 = vld [vmem:[%s12678_s1 + $0xac0] sm:$0xff]  ;;  %v861_v40 = vld [vmem:[%s12678_s1 + $0xac8] sm:$0xff] }
  0xe6   : > { %3134 = vmatprep.subr.bf16.mxu0 %v8538_v41  ;;  %3353 = vmatprep.subr.bf16.mxu1 %v8540_v45  ;;  %v8596_v41 = vcombine.high %v853_v32, %v857_v34  ;;  %v8602_v45 = vcombine.high %v860_v38, %v864_v39  ;;  %v8601_v51 = vcombine.low %v860_v38, %v864_v39  ;;  %v534_v32 = vld [vmem:[%s12678_s1 + $0x90] sm:$0xff]  ;;  %v535_v34 = vld [vmem:[%s12678_s1 + $0x98] sm:$0xff] }
  0xe7   : > { %3107 = vmatprep.mubr.bf16.mxu0 %v9623_v46  ;;  %3326 = vmatprep.mubr.bf16.mxu1 %v9623_v46  ;;  %v868_v46 = vld [vmem:[%s12678_s1 + $0xb00] sm:$0xff]  ;;  %v8603_v52 = vcombine.low %v861_v40, %v865_v42 }
  0xe8   : > { %v9634_v39 = vld [vmem:[%s10700_s23 + $0x40] ss:$24 sps:$4 sm:$0xff]  }
  0xe9   : > { %3135 = vmatpush1.bf16.msra.mxu0 %v8537_v47  ;;  %3354 = vmatpush1.bf16.msra.mxu1 %v8539_v49  ;;  %v872_v47 = vld [vmem:[%s12678_s1 + $0xb20] sm:$0xff]  ;;  %v8604_v49 = vcombine.high %v861_v40, %v865_v42  ;;  %v546_v42 = vld [vmem:[%s12678_s1 + $0xf0] sm:$0xff] }
  0xea   : > { %3136 = vmatprep.subr.bf16.mxu0 %v8546_v50  ;;  %3355 = vmatprep.subr.bf16.mxu1 %v8548_v54  ;;  %v873_v50 = vld [vmem:[%s12678_s1 + $0xb28] sm:$0xff]  ;;  %v8610_v53 = vcombine.high %v868_v46, %v872_v47  ;;  %v876_v54 = vld [vmem:[%s12678_s1 + $0xb40] sm:$0xff] }
  0xeb   : > { %v8612_v57 = vcombine.high %v869_v48, %v873_v50  ;;  %v8611_v60 = vcombine.low %v869_v48, %v873_v50  ;;  %v550_v50 = vld [vmem:[%s12678_s1 + $0x110] sm:$0xff] }
  0xec   : > { %3108 = vmatmul.mubr.bf16.gmra.mrb[8].mxu0 %v9625_v55  ;;  %3327 = vmatmul.mubr.bf16.gmra.mrb[8].mxu1 %v9625_v55  ;;  %v880_v55 = vld [vmem:[%s12678_s1 + $0xb60] sm:$0xff] }
  0xed   : > { %3137 = vmatpush1.bf16.msra.mxu0 %v8545_v56  ;;  %3356 = vmatpush1.bf16.msra.mxu1 %v8547_v58  ;;  %v877_v56 = vld [vmem:[%s12678_s1 + $0xb48] sm:$0xff]  ;;  %v8618_v61 = vcombine.high %v876_v54, %v880_v55 }
  0xee   : > { %3138 = vmatprep.subr.bf16.mxu0 %v8554_v59  ;;  %3357 = vmatprep.subr.bf16.mxu1 %v8556_v63  ;;  %v881_v58 = vld [vmem:[%s12678_s1 + $0xb68] sm:$0xff]  ;;  %v8609_v59 = vcombine.low %v868_v46, %v872_v47  ;;  %v888_v63 = vld [vmem:[%s12678_s1 + $0xba0] sm:$0xff] }
  0xef   : > { %3117 = vmatprep.mubr.bf16.mxu0 %v9626_v0  ;;  %3336 = vmatprep.mubr.bf16.mxu1 %v9626_v0  ;;  %v885_v0 = vld [vmem:[%s12678_s1 + $0xb88] sm:$0xff]  ;;  %v8626_v5 = vcombine.high %v884_v62, %v888_v63  ;;  %v8625_v11 = vcombine.low %v884_v62, %v888_v63  ;;  %v563_v63 = vld [vmem:[%s12678_s1 + $0x178] sm:$0xff] }
  0xf0   : > { %v9635_v47 = vld [vmem:[%s10700_s23 + $0x74] ss:$24 sps:$4 sm:$0xff]  }
  0xf1   : > { %3139 = vmatpush1.bf16.msra.mxu0 %v8553_v1  ;;  %3358 = vmatpush1.bf16.msra.mxu1 %v8555_v3  ;;  %v8620_v1 = vcombine.high %v877_v56, %v881_v58  ;;  %v8617_v3 = vcombine.low %v876_v54, %v880_v55  ;;  %v555_v54 = vld [vmem:[%s12678_s1 + $0x138] sm:$0xff] }
  0xf2   : > { %3140 = vmatprep.subr.bf16.mxu0 %v8562_v4  ;;  %3359 = vmatprep.subr.bf16.mxu1 %v8564_v8  ;;  %v8619_v4 = vcombine.low %v877_v56, %v881_v58  ;;  %v893_v8 = vld [vmem:[%s12678_s1 + $0xbc8] sm:$0xff] }
  0xf4   : > { %3118 = vmatmul.mubr.bf16.gmra.mrb[12].mxu0 %v9628_v9  ;;  %3337 = vmatmul.mubr.bf16.gmra.mrb[12].mxu1 %v9628_v9  ;;  %v8628_v9 = vcombine.high %v885_v0, %v889_v2 }
  0xf5   : > { %3141 = vmatpush1.bf16.msra.mxu0 %v8561_v10  ;;  %3360 = vmatpush1.bf16.msra.mxu1 %v8563_v12  ;;  %v897_v10 = vld [vmem:[%s12678_s1 + $0xbe8] sm:$0xff]  ;;  %v8627_v12 = vcombine.low %v885_v0, %v889_v2 }
  0xf6   : > { %3142 = vmatprep.subr.bf16.mxu0 %v8570_v13  ;;  %3361 = vmatprep.subr.bf16.mxu1 %v8572_v17  ;;  %v8634_v13 = vcombine.high %v892_v6, %v896_v7  ;;  %v8636_v17 = vcombine.high %v893_v8, %v897_v10 }
  0xf7   : > { %3160 = vmatprep.mubr.bf16.mxu0 %v9631_v18  ;;  %3379 = vmatprep.mubr.bf16.mxu1 %v9631_v18  ;;  %v523_v18 = vld [vmem:[%s12678_s1 + $0x38] sm:$0xff] }
  0xf8   : > { %v8264_v26 = vcombine.high %v519_v16, %v523_v18  ;;  %v8263_v30 = vcombine.low %v519_v16, %v523_v18 }
  0xf9   : > { %3143 = vmatpush1.bf16.msra.mxu0 %v8569_v19  ;;  %3362 = vmatpush1.bf16.msra.mxu1 %v8571_v20  ;;  %v8633_v19 = vcombine.low %v892_v6, %v896_v7  ;;  %v8635_v20 = vcombine.low %v893_v8, %v897_v10  ;;  %v567_v6 = vld [vmem:[%s12678_s1 + $0x198] sm:$0xff] }
  0xfa   : > { %3144 = vmatprep.subr.bf16.mxu0 %v8578_v21  ;;  %3363 = vmatprep.subr.bf16.mxu1 %v8580_v25  ;;  %v9629_v21 = vld [vmem:[%s10700_s23 + $0x10] ss:$24 sps:$4 sm:$0xff]   ;;  %v527_v25 = vld [vmem:[%s12678_s1 + $0x58] sm:$0xff] }
  0xfb   : > { %v571_v8 = vld [vmem:[%s12678_s1 + $0x1b8] sm:$0xff] }
  0xfc   : > { %v8312_v16 = vcombine.high %v567_v6, %v571_v8 }
  0xfd   : > { %3145 = vmatpush1.bf16.msra.mxu0 %v8577_v27  ;;  %3364 = vmatpush1.bf16.msra.mxu1 %v8579_v28  ;;  %v531_v27 = vld [vmem:[%s12678_s1 + $0x78] sm:$0xff]  ;;  %v8261_v28 = vcombine.low %v518_v14, %v522_v15  ;;  %v578_v14 = vld [vmem:[%s12678_s1 + $0x1f0] sm:$0xff] }
  0xfe   : > { %3146 = vmatprep.subr.bf16.mxu0 %v8586_v29  ;;  %3365 = vmatprep.subr.bf16.mxu1 %v8588_v33  ;;  %v9632_v29 = vld [vmem:[%s10700_s23 + $0x44] ss:$24 sps:$4 sm:$0xff]   ;;  %v538_v33 = vld [vmem:[%s12678_s1 + $0xb0] sm:$0xff]  ;;  %v8271_v38 = vcombine.low %v527_v25, %v531_v27 }
  0xff   : > { %v8278_v40 = vcombine.high %v534_v32, %v538_v33  ;;  %v8277_v46 = vcombine.low %v534_v32, %v538_v33  ;;  %v575_v15 = vld [vmem:[%s12678_s1 + $0x1d8] sm:$0xff] }
 0x100   : > { %v595_v33 = vld [vmem:[%s12678_s1 + $0x278] sm:$0xff] }
 0x101   : > { %3147 = vmatpush1.bf16.msra.mxu0 %v8585_v35  ;;  %3366 = vmatpush1.bf16.msra.mxu1 %v8587_v36  ;;  %v8272_v35 = vcombine.high %v527_v25, %v531_v27  ;;  %v539_v36 = vld [vmem:[%s12678_s1 + $0xb8] sm:$0xff] }
 0x102   : > { %3148 = vmatprep.subr.bf16.mxu0 %v8594_v37  ;;  %3367 = vmatprep.subr.bf16.mxu1 %v8596_v41  ;;  %v8269_v37 = vcombine.low %v526_v23, %v530_v24  ;;  %v542_v41 = vld [vmem:[%s12678_s1 + $0xd0] sm:$0xff]  ;;  %v8279_v48 = vcombine.low %v535_v34, %v539_v36  ;;  %v583_v23 = vld [vmem:[%s12678_s1 + $0x218] sm:$0xff] }
 0x103   : > { %v8285_v55 = vcombine.low %v542_v41, %v546_v42  ;;  %v587_v25 = vld [vmem:[%s12678_s1 + $0x238] sm:$0xff] }
 0x104   : > { %v8328_v32 = vcombine.high %v583_v23, %v587_v25 }
 0x105   : > { %3149 = vmatpush1.bf16.msra.mxu0 %v8593_v43  ;;  %3368 = vmatpush1.bf16.msra.mxu1 %v8595_v44  ;;  %v543_v43 = vld [vmem:[%s12678_s1 + $0xd8] sm:$0xff]  ;;  %v8280_v44 = vcombine.high %v535_v34, %v539_v36  ;;  %v8327_v36 = vcombine.low %v583_v23, %v587_v25  ;;  %v650_v23 = vld [vmem:[%s12678_s1 + $0x430] sm:$0xff] }
 0x106   : > { %3150 = vmatprep.subr.bf16.mxu0 %v8602_v45  ;;  %3369 = vmatprep.subr.bf16.mxu1 %v8604_v49  ;;  %v547_v45 = vld [vmem:[%s12678_s1 + $0xf8] sm:$0xff]  ;;  %v8286_v49 = vcombine.high %v542_v41, %v546_v42 }
 0x107   : > { %v8287_v56 = vcombine.low %v543_v43, %v547_v45  ;;  %v10289_v34 = vld [vmem:[%s10700_s23 + $0x4] ss:$24 sps:$4 sm:$0xff]  }
 0x108   : > { %v603_v42 = vld [vmem:[%s12678_s1 + $0x2b8] sm:$0xff] }
 0x109   : > { %3151 = vmatpush1.bf16.msra.mxu0 %v8601_v51  ;;  %3370 = vmatpush1.bf16.msra.mxu1 %v8603_v52  ;;  %v554_v51 = vld [vmem:[%s12678_s1 + $0x130] sm:$0xff]  ;;  %v551_v52 = vld [vmem:[%s12678_s1 + $0x118] sm:$0xff] }
 0x10a   : > { %3152 = vmatprep.subr.bf16.mxu0 %v8610_v53  ;;  %3371 = vmatprep.subr.bf16.mxu1 %v8612_v57  ;;  %v8288_v53 = vcombine.high %v543_v43, %v547_v45  ;;  %v9637_v57 = vld [vmem:[%s10700_s23 + $0x70] ss:$24 sps:$4 sm:$0xff]   ;;  %v8294_v58 = vcombine.high %v550_v50, %v554_v51  ;;  %v8296_v62 = vcombine.high %v551_v52, %v555_v54 }
 0x10b   : > { %v8293_v0 = vcombine.low %v550_v50, %v554_v51  ;;  %v8295_v2 = vcombine.low %v551_v52, %v555_v54  ;;  %v611_v50 = vld [vmem:[%s12678_s1 + $0x2f8] sm:$0xff]  ;;  %v614_v54 = vld [vmem:[%s12678_s1 + $0x310] sm:$0xff] }
 0x10d   : > { %3153 = vmatpush1.bf16.msra.mxu0 %v8609_v59  ;;  %3372 = vmatpush1.bf16.msra.mxu1 %v8611_v60  ;;  %v558_v59 = vld [vmem:[%s12678_s1 + $0x150] sm:$0xff] }
 0x10e   : > { %3154 = vmatprep.subr.bf16.mxu0 %v8618_v61  ;;  %3373 = vmatprep.subr.bf16.mxu1 %v8620_v1  ;;  %v562_v60 = vld [vmem:[%s12678_s1 + $0x170] sm:$0xff]  ;;  %v559_v61 = vld [vmem:[%s12678_s1 + $0x158] sm:$0xff] }
 0x10f   : > { %v9638_v1 = vld [vmem:[%s10700_s23 + $0xa4] ss:$24 sps:$4 sm:$0xff]   ;;  %v8304_v7 = vcombine.high %v559_v61, %v563_v63  ;;  %v8303_v10 = vcombine.low %v559_v61, %v563_v63  ;;  %v626_v63 = vld [vmem:[%s12678_s1 + $0x370] sm:$0xff] }
 0x111   : > { %3155 = vmatpush1.bf16.msra.mxu0 %v8617_v3  ;;  %3374 = vmatpush1.bf16.msra.mxu1 %v8619_v4  ;;  %v8302_v3 = vcombine.high %v558_v59, %v562_v60  ;;  %v566_v4 = vld [vmem:[%s12678_s1 + $0x190] sm:$0xff] }
 0x112   : > { %3156 = vmatprep.subr.bf16.mxu0 %v8626_v5  ;;  %3375 = vmatprep.subr.bf16.mxu1 %v8628_v9  ;;  %v570_v5 = vld [vmem:[%s12678_s1 + $0x1b0] sm:$0xff]  ;;  %v8301_v9 = vcombine.low %v558_v59, %v562_v60 }
 0x113   : > { %v8309_v18 = vcombine.low %v566_v4, %v570_v5 }
 0x115   : > { %3157 = vmatpush1.bf16.msra.mxu0 %v8625_v11  ;;  %3376 = vmatpush1.bf16.msra.mxu1 %v8627_v12  ;;  %v9640_v11 = vld [vmem:[%s10700_s23 + $0xa0] ss:$24 sps:$4 sm:$0xff]   ;;  %v8310_v12 = vcombine.high %v566_v4, %v570_v5 }
 0x116   : > { %3158 = vmatprep.subr.bf16.mxu0 %v8634_v13  ;;  %3377 = vmatprep.subr.bf16.mxu1 %v8636_v17  ;;  %v574_v13 = vld [vmem:[%s12678_s1 + $0x1d0] sm:$0xff]  ;;  %v579_v17 = vld [vmem:[%s12678_s1 + $0x1f8] sm:$0xff] }
 0x117   : > { %v8320_v24 = vcombine.high %v575_v15, %v579_v17  ;;  %v8319_v27 = vcombine.low %v575_v15, %v579_v17  ;;  %v642_v15 = vld [vmem:[%s12678_s1 + $0x3f0] sm:$0xff] }
 0x119   : > { %3159 = vmatpush1.bf16.msra.mxu0 %v8633_v19  ;;  %3378 = vmatpush1.bf16.msra.mxu1 %v8635_v20  ;;  %v8311_v19 = vcombine.low %v567_v6, %v571_v8  ;;  %v8318_v20 = vcombine.high %v574_v13, %v578_v14  ;;  %v630_v6 = vld [vmem:[%s12678_s1 + $0x390] sm:$0xff]  ;;  %v631_v8 = vld [vmem:[%s12678_s1 + $0x398] sm:$0xff] }
 0x11a   : > { %3420 = vmatprep.subr.bf16.mxu0 %v8262_v22  ;;  %3639 = vmatprep.subr.bf16.mxu1 %v8264_v26  ;;  %v586_v22 = vld [vmem:[%s12678_s1 + $0x230] sm:$0xff]  ;;  %v8317_v26 = vcombine.low %v574_v13, %v578_v14 }
 0x11b   : > { %v638_v14 = vld [vmem:[%s12678_s1 + $0x3d0] sm:$0xff] }
 0x11c   : > { %3161 = vmatmul.mubr.bf16.vlgmr.msra.gmra.mrb[0].mxu0 %v9629_v21  ;;  %3380 = vmatmul.mubr.bf16.vlgmr.msra.gmra.mrb[0].mxu1 %v9629_v21  ;;  %v582_v21 = vld [vmem:[%s12678_s1 + $0x210] sm:$0xff] }
 0x11d   : > { %3421 = vmatpush1.bf16.msra.mxu0 %v8261_v28  ;;  %3640 = vmatpush1.bf16.msra.mxu1 %v8263_v30  ;;  %v8326_v28 = vcombine.high %v582_v21, %v586_v22  ;;  %v594_v30 = vld [vmem:[%s12678_s1 + $0x270] sm:$0xff] }
 0x11e   : > { %3422 = vmatprep.subr.bf16.mxu0 %v8270_v31  ;;  %3641 = vmatprep.subr.bf16.mxu1 %v8272_v35  ;;  %v591_v31 = vld [vmem:[%s12678_s1 + $0x258] sm:$0xff]  ;;  %v8325_v35 = vcombine.low %v582_v21, %v586_v22  ;;  %v8382_v21 = vcombine.high %v638_v14, %v642_v15  ;;  %v646_v22 = vld [vmem:[%s12678_s1 + $0x410] sm:$0xff] }
 0x11f   : > { %3170 = vmatprep.mubr.bf16.mxu0 %v9632_v29  ;;  %3389 = vmatprep.mubr.bf16.mxu1 %v9632_v29  ;;  %v590_v29 = vld [vmem:[%s12678_s1 + $0x250] sm:$0xff]  ;;  %v8336_v41 = vcombine.high %v591_v31, %v595_v33 }
 0x120   : > { %v8333_v43 = vcombine.low %v590_v29, %v594_v30 }
 0x121   : > { %3423 = vmatpush1.bf16.msra.mxu0 %v8269_v37  ;;  %3642 = vmatpush1.bf16.msra.mxu1 %v8271_v38  ;;  %v8334_v37 = vcombine.high %v590_v29, %v594_v30  ;;  %v598_v38 = vld [vmem:[%s12678_s1 + $0x290] sm:$0xff]  ;;  %v8390_v29 = vcombine.high %v646_v22, %v650_v23 }
 0x122   : > { %3424 = vmatprep.subr.bf16.mxu0 %v8278_v40  ;;  %3643 = vmatprep.subr.bf16.mxu1 %v8280_v44  ;;  %v599_v40 = vld [vmem:[%s12678_s1 + $0x298] sm:$0xff]  ;;  %v8335_v44 = vcombine.low %v591_v31, %v595_v33  ;;  %v654_v30 = vld [vmem:[%s12678_s1 + $0x450] sm:$0xff] }
 0x123   : > { %v8343_v52 = vcombine.low %v599_v40, %v603_v42  ;;  %v658_v31 = vld [vmem:[%s12678_s1 + $0x470] sm:$0xff] }
 0x124   : > { %3171 = vmatmul.mubr.bf16.gmra.mrb[4].mxu0 %v9634_v39  ;;  %3390 = vmatmul.mubr.bf16.gmra.mrb[4].mxu1 %v9634_v39  ;;  %v602_v39 = vld [vmem:[%s12678_s1 + $0x2b0] sm:$0xff] }
 0x125   : > { %3425 = vmatpush1.bf16.msra.mxu0 %v8277_v46  ;;  %3644 = vmatpush1.bf16.msra.mxu1 %v8279_v48  ;;  %v8342_v45 = vcombine.high %v598_v38, %v602_v39  ;;  %v606_v46 = vld [vmem:[%s12678_s1 + $0x2d0] sm:$0xff]  ;;  %v607_v48 = vld [vmem:[%s12678_s1 + $0x2d8] sm:$0xff]  ;;  %v8341_v51 = vcombine.low %v598_v38, %v602_v39 }
 0x126   : > { %3426 = vmatprep.subr.bf16.mxu0 %v8286_v49  ;;  %3645 = vmatprep.subr.bf16.mxu1 %v8288_v53  ;;  %v8344_v49 = vcombine.high %v599_v40, %v603_v42  ;;  %v8351_v60 = vcombine.low %v607_v48, %v611_v50  ;;  %v662_v39 = vld [vmem:[%s12678_s1 + $0x490] sm:$0xff]  ;;  %v663_v42 = vld [vmem:[%s12678_s1 + $0x498] sm:$0xff] }
 0x127   : > { %3180 = vmatprep.mubr.bf16.mxu0 %v9635_v47  ;;  %3399 = vmatprep.mubr.bf16.mxu1 %v9635_v47  ;;  %v610_v47 = vld [vmem:[%s12678_s1 + $0x2f0] sm:$0xff] }
 0x128   : > { %v8350_v53 = vcombine.high %v606_v46, %v610_v47  ;;  %v8349_v59 = vcombine.low %v606_v46, %v610_v47  ;;  %v666_v40 = vld [vmem:[%s12678_s1 + $0x4b0] sm:$0xff] }
 0x129   : > { %3427 = vmatpush1.bf16.msra.mxu0 %v8285_v55  ;;  %3646 = vmatpush1.bf16.msra.mxu1 %v8287_v56  ;;  %v618_v55 = vld [vmem:[%s12678_s1 + $0x330] sm:$0xff]  ;;  %v615_v56 = vld [vmem:[%s12678_s1 + $0x318] sm:$0xff]  ;;  %v8406_v46 = vcombine.high %v662_v39, %v666_v40 }
 0x12a   : > { %3428 = vmatprep.subr.bf16.mxu0 %v8294_v58  ;;  %3647 = vmatprep.subr.bf16.mxu1 %v8296_v62  ;;  %v619_v58 = vld [vmem:[%s12678_s1 + $0x338] sm:$0xff]  ;;  %v8358_v61 = vcombine.high %v614_v54, %v618_v55  ;;  %v622_v62 = vld [vmem:[%s12678_s1 + $0x350] sm:$0xff] }
 0x12b   : > { %v8359_v4 = vcombine.low %v615_v56, %v619_v58  ;;  %v8366_v5 = vcombine.high %v622_v62, %v626_v63  ;;  %v670_v47 = vld [vmem:[%s12678_s1 + $0x4d0] sm:$0xff] }
 0x12c   : > { %3181 = vmatmul.mubr.bf16.gmra.mrb[8].mxu0 %v9637_v57  ;;  %3400 = vmatmul.mubr.bf16.gmra.mrb[8].mxu1 %v9637_v57  ;;  %v8352_v57 = vcombine.high %v607_v48, %v611_v50  ;;  %v674_v48 = vld [vmem:[%s12678_s1 + $0x4f0] sm:$0xff] }
 0x12d   : > { %3429 = vmatpush1.bf16.msra.mxu0 %v8293_v0  ;;  %3648 = vmatpush1.bf16.msra.mxu1 %v8295_v2  ;;  %v623_v0 = vld [vmem:[%s12678_s1 + $0x358] sm:$0xff] }
 0x12e   : > { %3430 = vmatprep.subr.bf16.mxu0 %v8302_v3  ;;  %3649 = vmatprep.subr.bf16.mxu1 %v8304_v7  ;;  %v627_v2 = vld [vmem:[%s12678_s1 + $0x378] sm:$0xff]  ;;  %v8357_v3 = vcombine.low %v614_v54, %v618_v55  ;;  %v634_v7 = vld [vmem:[%s12678_s1 + $0x3b0] sm:$0xff]  ;;  %v8414_v55 = vcombine.high %v670_v47, %v674_v48 }
 0x12f   : > { %3190 = vmatprep.mubr.bf16.mxu0 %v9638_v1  ;;  %3409 = vmatprep.mubr.bf16.mxu1 %v9638_v1  ;;  %v8360_v1 = vcombine.high %v615_v56, %v619_v58  ;;  %v8374_v13 = vcombine.high %v630_v6, %v634_v7  ;;  %v682_v58 = vld [vmem:[%s12678_s1 + $0x530] sm:$0xff] }
 0x131   : > { %3431 = vmatpush1.bf16.msra.mxu0 %v8301_v9  ;;  %3650 = vmatpush1.bf16.msra.mxu1 %v8303_v10  ;;  %v8368_v9 = vcombine.high %v623_v0, %v627_v2  ;;  %v635_v10 = vld [vmem:[%s12678_s1 + $0x3b8] sm:$0xff] }
 0x132   : > { %3432 = vmatprep.subr.bf16.mxu0 %v8310_v12  ;;  %3651 = vmatprep.subr.bf16.mxu1 %v8312_v16  ;;  %v8367_v12 = vcombine.low %v623_v0, %v627_v2  ;;  %v639_v16 = vld [vmem:[%s12678_s1 + $0x3d8] sm:$0xff]  ;;  %v8376_v17 = vcombine.high %v631_v8, %v635_v10  ;;  %v690_v2 = vld [vmem:[%s12678_s1 + $0x570] sm:$0xff] }
 0x134   : > { %3191 = vmatmul.mubr.bf16.gmra.mrb[12].mxu0 %v9640_v11  ;;  %3410 = vmatmul.mubr.bf16.gmra.mrb[12].mxu1 %v9640_v11  ;;  %v8365_v11 = vcombine.low %v622_v62, %v626_v63  ;;  %v8413_v62 = vcombine.low %v670_v47, %v674_v48  ;;  %v727_v48 = vld [vmem:[%s12678_s1 + $0x698] sm:$0xff] }
 0x135   : > { %3433 = vmatpush1.bf16.msra.mxu0 %v8309_v18  ;;  %3652 = vmatpush1.bf16.msra.mxu1 %v8311_v19  ;;  %v643_v18 = vld [vmem:[%s12678_s1 + $0x3f8] sm:$0xff]  ;;  %v8373_v19 = vcombine.low %v630_v6, %v634_v7 }
 0x136   : > { %3434 = vmatprep.subr.bf16.mxu0 %v8318_v20  ;;  %3653 = vmatprep.subr.bf16.mxu1 %v8320_v24  ;;  %v8375_v20 = vcombine.low %v631_v8, %v635_v10  ;;  %v647_v24 = vld [vmem:[%s12678_s1 + $0x418] sm:$0xff]  ;;  %v8384_v25 = vcombine.high %v639_v16, %v643_v18 }
 0x137   : > { %3452 = vmatprep.mubr.bf16.mxu0 %v10289_v34  ;;  %3671 = vmatprep.mubr.bf16.mxu1 %v10289_v34  ;;  %v659_v34 = vld [vmem:[%s12678_s1 + $0x478] sm:$0xff] }
 0x138   : > { %v10293_v6 = vld [vmem:[%s10700_s23 + $0x64] ss:$24 sps:$4 sm:$0xff]  }
 0x139   : > { %3435 = vmatpush1.bf16.msra.mxu0 %v8317_v26  ;;  %3654 = vmatpush1.bf16.msra.mxu1 %v8319_v27  ;;  %v651_v26 = vld [vmem:[%s12678_s1 + $0x438] sm:$0xff]  ;;  %v8381_v27 = vcombine.low %v638_v14, %v642_v15 }
 0x13a   : > { %3436 = vmatprep.subr.bf16.mxu0 %v8326_v28  ;;  %3655 = vmatprep.subr.bf16.mxu1 %v8328_v32  ;;  %v8383_v28 = vcombine.low %v639_v16, %v643_v18  ;;  %v655_v32 = vld [vmem:[%s12678_s1 + $0x458] sm:$0xff]  ;;  %v8392_v33 = vcombine.high %v647_v24, %v651_v26 }
 0x13b   : > { %v8400_v38 = vcombine.high %v655_v32, %v659_v34  ;;  %v699_v14 = vld [vmem:[%s12678_s1 + $0x5b8] sm:$0xff] }
 0x13c   : > { %v10294_v15 = vld [vmem:[%s10700_s23 + $0x60] ss:$24 sps:$4 sm:$0xff]  }
 0x13d   : > { %3437 = vmatpush1.bf16.msra.mxu0 %v8325_v35  ;;  %3656 = vmatpush1.bf16.msra.mxu1 %v8327_v36  ;;  %v8389_v35 = vcombine.low %v646_v22, %v650_v23  ;;  %v8391_v36 = vcombine.low %v647_v24, %v651_v26  ;;  %v10295_v22 = vld [vmem:[%s10700_s23 + $0x94] ss:$24 sps:$4 sm:$0xff]   ;;  %v703_v23 = vld [vmem:[%s12678_s1 + $0x5d8] sm:$0xff] }
 0x13e   : > { %3438 = vmatprep.subr.bf16.mxu0 %v8334_v37  ;;  %3657 = vmatprep.subr.bf16.mxu1 %v8336_v41  ;;  %v8398_v37 = vcombine.high %v654_v30, %v658_v31  ;;  %v10290_v41 = vld [vmem:[%s10700_s23] ss:$24 sps:$4 sm:$0xff]   ;;  %v710_v26 = vld [vmem:[%s12678_s1 + $0x610] sm:$0xff] }
 0x13f   : > { %v707_v24 = vld [vmem:[%s12678_s1 + $0x5f8] sm:$0xff] }
 0x141   : > { %3439 = vmatpush1.bf16.msra.mxu0 %v8333_v43  ;;  %3658 = vmatpush1.bf16.msra.mxu1 %v8335_v44  ;;  %v667_v43 = vld [vmem:[%s12678_s1 + $0x4b8] sm:$0xff]  ;;  %v8397_v44 = vcombine.low %v654_v30, %v658_v31 }
 0x142   : > { %3440 = vmatprep.subr.bf16.mxu0 %v8342_v45  ;;  %3659 = vmatprep.subr.bf16.mxu1 %v8344_v49  ;;  %v8399_v45 = vcombine.low %v655_v32, %v659_v34  ;;  %v671_v49 = vld [vmem:[%s12678_s1 + $0x4d8] sm:$0xff]  ;;  %v8408_v50 = vcombine.high %v663_v42, %v667_v43  ;;  %v8407_v54 = vcombine.low %v663_v42, %v667_v43  ;;  %v10297_v42 = vld [vmem:[%s10700_s23 + $0xc] ss:$24 sps:$4 sm:$0xff]  }
 0x143   : > { %v711_v30 = vld [vmem:[%s12678_s1 + $0x618] sm:$0xff]  ;;  %v8448_v32 = vcombine.high %v703_v23, %v707_v24 }
 0x144   : > { %v715_v31 = vld [vmem:[%s12678_s1 + $0x638] sm:$0xff] }
 0x145   : > { %3441 = vmatpush1.bf16.msra.mxu0 %v8341_v51  ;;  %3660 = vmatpush1.bf16.msra.mxu1 %v8343_v52  ;;  %v675_v51 = vld [vmem:[%s12678_s1 + $0x4f8] sm:$0xff]  ;;  %v10291_v52 = vld [vmem:[%s10700_s23 + $0x34] ss:$24 sps:$4 sm:$0xff]  }
 0x146   : > { %3442 = vmatprep.subr.bf16.mxu0 %v8350_v53  ;;  %3661 = vmatprep.subr.bf16.mxu1 %v8352_v57  ;;  %v8405_v53 = vcombine.low %v662_v39, %v666_v40  ;;  %v8416_v56 = vcombine.high %v671_v49, %v675_v51  ;;  %v678_v57 = vld [vmem:[%s12678_s1 + $0x510] sm:$0xff]  ;;  %v8415_v63 = vcombine.low %v671_v49, %v675_v51  ;;  %v719_v39 = vld [vmem:[%s12678_s1 + $0x658] sm:$0xff] }
 0x147   : > { %v8422_v0 = vcombine.high %v678_v57, %v682_v58  ;;  %v8421_v7 = vcombine.low %v678_v57, %v682_v58  ;;  %v723_v40 = vld [vmem:[%s12678_s1 + $0x678] sm:$0xff] }
 0x148   : > { %v731_v49 = vld [vmem:[%s12678_s1 + $0x6b8] sm:$0xff] }
 0x149   : > { %3443 = vmatpush1.bf16.msra.mxu0 %v8349_v59  ;;  %3662 = vmatpush1.bf16.msra.mxu1 %v8351_v60  ;;  %v679_v59 = vld [vmem:[%s12678_s1 + $0x518] sm:$0xff] }
 0x14a   : > { %3444 = vmatprep.subr.bf16.mxu0 %v8358_v61  ;;  %3663 = vmatprep.subr.bf16.mxu1 %v8360_v1  ;;  %v683_v60 = vld [vmem:[%s12678_s1 + $0x538] sm:$0xff]  ;;  %v10292_v61 = vld [vmem:[%s10700_s23 + $0x30] ss:$24 sps:$4 sm:$0xff]  }
 0x14b   : > { %v686_v1 = vld [vmem:[%s12678_s1 + $0x550] sm:$0xff]  ;;  %v8423_v8 = vcombine.low %v679_v59, %v683_v60  ;;  %v735_v57 = vld [vmem:[%s12678_s1 + $0x6d8] sm:$0xff] }
 0x14c   : > { %v8429_v16 = vcombine.low %v686_v1, %v690_v2  ;;  %v739_v58 = vld [vmem:[%s12678_s1 + $0x6f8] sm:$0xff] }
 0x14d   : > { %3445 = vmatpush1.bf16.msra.mxu0 %v8357_v3  ;;  %3664 = vmatpush1.bf16.msra.mxu1 %v8359_v4  ;;  %v687_v3 = vld [vmem:[%s12678_s1 + $0x558] sm:$0xff]  ;;  %v8424_v4 = vcombine.high %v679_v59, %v683_v60  ;;  %v8471_v60 = vcombine.low %v727_v48, %v731_v49 }
 0x14e   : > { %3446 = vmatprep.subr.bf16.mxu0 %v8366_v5  ;;  %3665 = vmatprep.subr.bf16.mxu1 %v8368_v9  ;;  %v691_v5 = vld [vmem:[%s12678_s1 + $0x578] sm:$0xff]  ;;  %v8430_v9 = vcombine.high %v686_v1, %v690_v2 }
 0x14f   : > { %v8432_v10 = vcombine.high %v687_v3, %v691_v5  ;;  %v743_v1 = vld [vmem:[%s12678_s1 + $0x718] sm:$0xff] }
 0x150   : > { %v747_v2 = vld [vmem:[%s12678_s1 + $0x738] sm:$0xff] }
 0x151   : > { %3447 = vmatpush1.bf16.msra.mxu0 %v8365_v11  ;;  %3666 = vmatpush1.bf16.msra.mxu1 %v8367_v12  ;;  %v694_v11 = vld [vmem:[%s12678_s1 + $0x590] sm:$0xff] }
 0x152   : > { %3448 = vmatprep.subr.bf16.mxu0 %v8374_v13  ;;  %3667 = vmatprep.subr.bf16.mxu1 %v8376_v17  ;;  %v698_v12 = vld [vmem:[%s12678_s1 + $0x5b0] sm:$0xff]  ;;  %v695_v13 = vld [vmem:[%s12678_s1 + $0x598] sm:$0xff]  ;;  %v8431_v17 = vcombine.low %v687_v3, %v691_v5 }
 0x153   : > { %v8438_v18 = vcombine.high %v694_v11, %v698_v12 }
 0x155   : > { %3449 = vmatpush1.bf16.msra.mxu0 %v8373_v19  ;;  %3668 = vmatpush1.bf16.msra.mxu1 %v8375_v20  ;;  %v8440_v19 = vcombine.high %v695_v13, %v699_v14  ;;  %v702_v20 = vld [vmem:[%s12678_s1 + $0x5d0] sm:$0xff] }
 0x156   : > { %3450 = vmatprep.subr.bf16.mxu0 %v8382_v21  ;;  %3669 = vmatprep.subr.bf16.mxu1 %v8384_v25  ;;  %v706_v21 = vld [vmem:[%s12678_s1 + $0x5f0] sm:$0xff]  ;;  %v8437_v25 = vcombine.low %v694_v11, %v698_v12  ;;  %v8487_v12 = vcombine.low %v743_v1, %v747_v2 }
 0x157   : > { %v8445_v34 = vcombine.low %v702_v20, %v706_v21 }
 0x159   : > { %3451 = vmatpush1.bf16.msra.mxu0 %v8381_v27  ;;  %3670 = vmatpush1.bf16.msra.mxu1 %v8383_v28  ;;  %v714_v27 = vld [vmem:[%s12678_s1 + $0x630] sm:$0xff]  ;;  %v8439_v28 = vcombine.low %v695_v13, %v699_v14 }
 0x15a   : > { %3493 = vmatprep.subr.bf16.mxu0 %v8390_v29  ;;  %3712 = vmatprep.subr.bf16.mxu1 %v8392_v33  ;;  %v8446_v29 = vcombine.high %v702_v20, %v706_v21  ;;  %v10296_v33 = vld [vmem:[%s10700_s23 + $0x90] ss:$24 sps:$4 sm:$0xff]   ;;  %v8453_v43 = vcombine.low %v710_v26, %v714_v27 }
 0x15c   : > { %3453 = vmatmul.mubr.bf16.vlgmr.msra.gmra.mrb[16].mxu0 %v10290_v41  ;;  %3672 = vmatmul.mubr.bf16.vlgmr.msra.gmra.mrb[16].mxu1 %v10290_v41  ;;  %v8456_v41 = vcombine.high %v711_v30, %v715_v31 }
 0x15d   : > { %3494 = vmatpush1.bf16.msra.mxu0 %v8389_v35  ;;  %3713 = vmatpush1.bf16.msra.mxu1 %v8391_v36  ;;  %v718_v35 = vld [vmem:[%s12678_s1 + $0x650] sm:$0xff] }
 0x15e   : > { %3495 = vmatprep.subr.bf16.mxu0 %v8398_v37  ;;  %3714 = vmatprep.subr.bf16.mxu1 %v8400_v38  ;;  %v722_v36 = vld [vmem:[%s12678_s1 + $0x670] sm:$0xff]  ;;  %v8447_v37 = vcombine.low %v703_v23, %v707_v24  ;;  %v8454_v38 = vcombine.high %v710_v26, %v714_v27  ;;  %v771_v26 = vld [vmem:[%s12678_s1 + $0x7f8] sm:$0xff] }
 0x15f   : > { %3462 = vmatprep.mubr.bf16.mxu0 %v10291_v52  ;;  %3681 = vmatprep.mubr.bf16.mxu1 %v10291_v52  ;;  %v8462_v47 = vcombine.high %v718_v35, %v722_v36  ;;  %v8461_v51 = vcombine.low %v718_v35, %v722_v36  ;;  %v8463_v52 = vcombine.low %v719_v39, %v723_v40  ;;  %v766_v23 = vld [vmem:[%s12678_s1 + $0x7d0] sm:$0xff] }
 0x160   : > { %v770_v24 = vld [vmem:[%s12678_s1 + $0x7f0] sm:$0xff] }
 0x161   : > { %3496 = vmatpush1.bf16.msra.mxu0 %v8397_v44  ;;  %3715 = vmatpush1.bf16.msra.mxu1 %v8399_v45  ;;  %v726_v44 = vld [vmem:[%s12678_s1 + $0x690] sm:$0xff]  ;;  %v8509_v35 = vcombine.low %v766_v23, %v770_v24 }
 0x162   : > { %3497 = vmatprep.subr.bf16.mxu0 %v8406_v46  ;;  %3716 = vmatprep.subr.bf16.mxu1 %v8408_v50  ;;  %v730_v45 = vld [vmem:[%s12678_s1 + $0x6b0] sm:$0xff]  ;;  %v8455_v46 = vcombine.low %v711_v30, %v715_v31  ;;  %v8464_v50 = vcombine.high %v719_v39, %v723_v40  ;;  %v783_v40 = vld [vmem:[%s12678_s1 + $0x858] sm:$0xff] }
 0x163   : > { %v8469_v59 = vcombine.low %v726_v44, %v730_v45  ;;  %v774_v31 = vld [vmem:[%s12678_s1 + $0x810] sm:$0xff] }
 0x164   : > { %3463 = vmatmul.mubr.bf16.gmra.mrb[20].mxu0 %v10292_v61  ;;  %3682 = vmatmul.mubr.bf16.gmra.mrb[20].mxu1 %v10292_v61  ;;  %v786_v39 = vld [vmem:[%s12678_s1 + $0x870] sm:$0xff] }
 0x165   : > { %3498 = vmatpush1.bf16.msra.mxu0 %v8405_v53  ;;  %3717 = vmatpush1.bf16.msra.mxu1 %v8407_v54  ;;  %v8470_v53 = vcombine.high %v726_v44, %v730_v45  ;;  %v8472_v54 = vcombine.high %v727_v48, %v731_v49  ;;  %v794_v48 = vld [vmem:[%s12678_s1 + $0x8b0] sm:$0xff]  ;;  %v10298_v49 = vld [vmem:[%s10700_s23 + $0x8] ss:$24 sps:$4 sm:$0xff]  }
 0x166   : > { %3499 = vmatprep.subr.bf16.mxu0 %v8414_v55  ;;  %3718 = vmatprep.subr.bf16.mxu1 %v8416_v56  ;;  %v734_v55 = vld [vmem:[%s12678_s1 + $0x6d0] sm:$0xff] }
 0x167   : > { %3472 = vmatprep.mubr.bf16.mxu0 %v10293_v6  ;;  %3691 = vmatprep.mubr.bf16.mxu1 %v10293_v6  ;;  %v738_v56 = vld [vmem:[%s12678_s1 + $0x6f0] sm:$0xff]  ;;  %v8488_v6 = vcombine.high %v743_v1, %v747_v2 }
 0x168   : > { %v8478_v61 = vcombine.high %v734_v55, %v738_v56  ;;  %v8477_v3 = vcombine.low %v734_v55, %v738_v56  ;;  %v798_v56 = vld [vmem:[%s12678_s1 + $0x8d0] sm:$0xff] }
 0x169   : > { %3500 = vmatpush1.bf16.msra.mxu0 %v8413_v62  ;;  %3719 = vmatpush1.bf16.msra.mxu1 %v8415_v63  ;;  %v8480_v62 = vcombine.high %v735_v57, %v739_v58  ;;  %v742_v63 = vld [vmem:[%s12678_s1 + $0x710] sm:$0xff] }
 0x16a   : > { %3501 = vmatprep.subr.bf16.mxu0 %v8422_v0  ;;  %3720 = vmatprep.subr.bf16.mxu1 %v8424_v4  ;;  %v746_v0 = vld [vmem:[%s12678_s1 + $0x730] sm:$0xff]  ;;  %v8479_v4 = vcombine.low %v735_v57, %v739_v58 }
 0x16b   : > { %v8486_v5 = vcombine.high %v742_v63, %v746_v0  ;;  %v8485_v11 = vcombine.low %v742_v63, %v746_v0  ;;  %v802_v57 = vld [vmem:[%s12678_s1 + $0x8f0] sm:$0xff] }
 0x16c   : > { %3473 = vmatmul.mubr.bf16.gmra.mrb[24].mxu0 %v10294_v15  ;;  %3692 = vmatmul.mubr.bf16.gmra.mrb[24].mxu1 %v10294_v15  ;;  %v758_v15 = vld [vmem:[%s12678_s1 + $0x790] sm:$0xff]  ;;  %v8542_v63 = vcombine.high %v798_v56, %v802_v57 }
 0x16d   : > { %3502 = vmatpush1.bf16.msra.mxu0 %v8421_v7  ;;  %3721 = vmatpush1.bf16.msra.mxu1 %v8423_v8  ;;  %v750_v7 = vld [vmem:[%s12678_s1 + $0x750] sm:$0xff] }
 0x16e   : > { %3503 = vmatprep.subr.bf16.mxu0 %v8430_v9  ;;  %3722 = vmatprep.subr.bf16.mxu1 %v8432_v10  ;;  %v754_v8 = vld [vmem:[%s12678_s1 + $0x770] sm:$0xff]  ;;  %v751_v9 = vld [vmem:[%s12678_s1 + $0x758] sm:$0xff] }
 0x16f   : > { %3482 = vmatprep.mubr.bf16.mxu0 %v10295_v22  ;;  %3701 = vmatprep.mubr.bf16.mxu1 %v10295_v22  ;;  %v755_v10 = vld [vmem:[%s12678_s1 + $0x778] sm:$0xff]  ;;  %v8494_v13 = vcombine.high %v750_v7, %v754_v8  ;;  %v806_v1 = vld [vmem:[%s12678_s1 + $0x910] sm:$0xff] }
 0x170   : > { %v8496_v14 = vcombine.high %v751_v9, %v755_v10  ;;  %v8495_v20 = vcombine.low %v751_v9, %v755_v10  ;;  %v10299_v58 = vld [vmem:[%s10700_s23 + $0x3c] ss:$24 sps:$4 sm:$0xff]  }
 0x171   : > { %3504 = vmatpush1.bf16.msra.mxu0 %v8429_v16  ;;  %3723 = vmatpush1.bf16.msra.mxu1 %v8431_v17  ;;  %v762_v16 = vld [vmem:[%s12678_s1 + $0x7b0] sm:$0xff]  ;;  %v759_v17 = vld [vmem:[%s12678_s1 + $0x798] sm:$0xff] }
 0x172   : > { %3505 = vmatprep.subr.bf16.mxu0 %v8438_v18  ;;  %3724 = vmatprep.subr.bf16.mxu1 %v8440_v19  ;;  %v763_v18 = vld [vmem:[%s12678_s1 + $0x7b8] sm:$0xff]  ;;  %v8493_v19 = vcombine.low %v750_v7, %v754_v8  ;;  %v8502_v21 = vcombine.high %v758_v15, %v762_v16  ;;  %v8501_v27 = vcombine.low %v758_v15, %v762_v16  ;;  %v810_v2 = vld [vmem:[%s12678_s1 + $0x930] sm:$0xff] }
 0x173   : > { %v8504_v22 = vcombine.high %v759_v17, %v763_v18  ;;  %v8550_v8 = vcombine.high %v806_v1, %v810_v2  ;;  %v814_v10 = vld [vmem:[%s12678_s1 + $0x950] sm:$0xff]  ;;  %v8549_v15 = vcombine.low %v806_v1, %v810_v2  ;;  %v863_v1 = vld [vmem:[%s12678_s1 + $0xad8] sm:$0xff] }
 0x174   : > { %3483 = vmatmul.mubr.bf16.gmra.mrb[28].mxu0 %v10296_v33  ;;  %3702 = vmatmul.mubr.bf16.gmra.mrb[28].mxu1 %v10296_v33  ;;  %v775_v33 = vld [vmem:[%s12678_s1 + $0x818] sm:$0xff] }
 0x175   : > { %3506 = vmatpush1.bf16.msra.mxu0 %v8437_v25  ;;  %3725 = vmatpush1.bf16.msra.mxu1 %v8439_v28  ;;  %v767_v25 = vld [vmem:[%s12678_s1 + $0x7d8] sm:$0xff]  ;;  %v8503_v28 = vcombine.low %v759_v17, %v763_v18 }
 0x176   : > { %3507 = vmatprep.subr.bf16.mxu0 %v8446_v29  ;;  %3726 = vmatprep.subr.bf16.mxu1 %v8448_v32  ;;  %v8510_v29 = vcombine.high %v766_v23, %v770_v24  ;;  %v8512_v30 = vcombine.high %v767_v25, %v771_v26  ;;  %v778_v32 = vld [vmem:[%s12678_s1 + $0x830] sm:$0xff]  ;;  %v8511_v36 = vcombine.low %v767_v25, %v771_v26  ;;  %v10302_v23 = vld [vmem:[%s10700_s23 + $0x68] ss:$24 sps:$4 sm:$0xff]   ;;  %v867_v2 = vld [vmem:[%s12678_s1 + $0xaf8] sm:$0xff] }
 0x177   : > { %3525 = vmatprep.mubr.bf16.mxu0 %v10297_v42  ;;  %3744 = vmatprep.mubr.bf16.mxu1 %v10297_v42  ;;  %v787_v42 = vld [vmem:[%s12678_s1 + $0x878] sm:$0xff] }
 0x179   : > { %3508 = vmatpush1.bf16.msra.mxu0 %v8445_v34  ;;  %3727 = vmatpush1.bf16.msra.mxu1 %v8447_v37  ;;  %v779_v34 = vld [vmem:[%s12678_s1 + $0x838] sm:$0xff]  ;;  %v8518_v37 = vcombine.high %v774_v31, %v778_v32 }
 0x17a   : > { %3509 = vmatprep.subr.bf16.mxu0 %v8454_v38  ;;  %3728 = vmatprep.subr.bf16.mxu1 %v8456_v41  ;;  %v782_v38 = vld [vmem:[%s12678_s1 + $0x850] sm:$0xff]  ;;  %v8520_v41 = vcombine.high %v775_v33, %v779_v34  ;;  %v8519_v44 = vcombine.low %v775_v33, %v779_v34 }
 0x17b   : > { %v8526_v45 = vcombine.high %v782_v38, %v786_v39 }
 0x17d   : > { %3510 = vmatpush1.bf16.msra.mxu0 %v8453_v43  ;;  %3729 = vmatpush1.bf16.msra.mxu1 %v8455_v46  ;;  %v8517_v43 = vcombine.low %v774_v31, %v778_v32  ;;  %v8528_v46 = vcombine.high %v783_v40, %v787_v42  ;;  %v831_v31 = vld [vmem:[%s12678_s1 + $0x9d8] sm:$0xff] }
 0x17e   : > { %3511 = vmatprep.subr.bf16.mxu0 %v8462_v47  ;;  %3730 = vmatprep.subr.bf16.mxu1 %v8464_v50  ;;  %v790_v47 = vld [vmem:[%s12678_s1 + $0x890] sm:$0xff]  ;;  %v791_v50 = vld [vmem:[%s12678_s1 + $0x898] sm:$0xff] }
 0x17f   : > { %v835_v32 = vld [vmem:[%s12678_s1 + $0x9f8] sm:$0xff] }
 0x181   : > { %3512 = vmatpush1.bf16.msra.mxu0 %v8461_v51  ;;  %3731 = vmatpush1.bf16.msra.mxu1 %v8463_v52  ;;  %v795_v51 = vld [vmem:[%s12678_s1 + $0x8b8] sm:$0xff]  ;;  %v8525_v52 = vcombine.low %v782_v38, %v786_v39  ;;  %v842_v38 = vld [vmem:[%s12678_s1 + $0xa30] sm:$0xff] }
 0x182   : > { %3513 = vmatprep.subr.bf16.mxu0 %v8470_v53  ;;  %3732 = vmatprep.subr.bf16.mxu1 %v8472_v54  ;;  %v8527_v53 = vcombine.low %v783_v40, %v787_v42  ;;  %v8534_v54 = vcombine.high %v790_v47, %v794_v48  ;;  %v8536_v55 = vcombine.high %v791_v50, %v795_v51  ;;  %v839_v39 = vld [vmem:[%s12678_s1 + $0xa18] sm:$0xff] }
 0x183   : > { %v843_v40 = vld [vmem:[%s12678_s1 + $0xa38] sm:$0xff] }
 0x185   : > { %3514 = vmatpush1.bf16.msra.mxu0 %v8469_v59  ;;  %3733 = vmatpush1.bf16.msra.mxu1 %v8471_v60  ;;  %v799_v59 = vld [vmem:[%s12678_s1 + $0x8d8] sm:$0xff] }
 0x186   : > { %3515 = vmatprep.subr.bf16.mxu0 %v8478_v61  ;;  %3734 = vmatprep.subr.bf16.mxu1 %v8480_v62  ;;  %v803_v60 = vld [vmem:[%s12678_s1 + $0x8f8] sm:$0xff]  ;;  %v8533_v61 = vcombine.low %v790_v47, %v794_v48  ;;  %v8535_v62 = vcombine.low %v791_v50, %v795_v51  ;;  %v850_v47 = vld [vmem:[%s12678_s1 + $0xa70] sm:$0xff] }
 0x187   : > { %v8544_v0 = vcombine.high %v799_v59, %v803_v60  ;;  %v8543_v7 = vcombine.low %v799_v59, %v803_v60  ;;  %v10305_v48 = vld [vmem:[%s10700_s23 + $0x14] ss:$24 sps:$4 sm:$0xff]   ;;  %v851_v50 = vld [vmem:[%s12678_s1 + $0xa78] sm:$0xff] }
 0x189   : > { %3516 = vmatpush1.bf16.msra.mxu0 %v8477_v3  ;;  %3735 = vmatpush1.bf16.msra.mxu1 %v8479_v4  ;;  %v807_v3 = vld [vmem:[%s12678_s1 + $0x918] sm:$0xff] }
 0x18a   : > { %3517 = vmatprep.subr.bf16.mxu0 %v8486_v5  ;;  %3736 = vmatprep.subr.bf16.mxu1 %v8488_v6  ;;  %v811_v4 = vld [vmem:[%s12678_s1 + $0x938] sm:$0xff]  ;;  %v8541_v6 = vcombine.low %v798_v56, %v802_v57  ;;  %v858_v56 = vld [vmem:[%s12678_s1 + $0xab0] sm:$0xff] }
 0x18b   : > { %v10300_v5 = vld [vmem:[%s10700_s23 + $0x38] ss:$24 sps:$4 sm:$0xff]   ;;  %v8552_v9 = vcombine.high %v807_v3, %v811_v4  ;;  %v8551_v16 = vcombine.low %v807_v3, %v811_v4 }
 0x18c   : > { %v855_v57 = vld [vmem:[%s12678_s1 + $0xa98] sm:$0xff] }
 0x18d   : > { %3518 = vmatpush1.bf16.msra.mxu0 %v8485_v11  ;;  %3737 = vmatpush1.bf16.msra.mxu1 %v8487_v12  ;;  %v818_v11 = vld [vmem:[%s12678_s1 + $0x970] sm:$0xff]  ;;  %v10301_v12 = vld [vmem:[%s10700_s23 + $0x6c] ss:$24 sps:$4 sm:$0xff]  }
 0x18e   : > { %3519 = vmatprep.subr.bf16.mxu0 %v8494_v13  ;;  %3738 = vmatprep.subr.bf16.mxu1 %v8496_v14  ;;  %v815_v13 = vld [vmem:[%s12678_s1 + $0x958] sm:$0xff]  ;;  %v8558_v17 = vcombine.high %v814_v10, %v818_v11  ;;  %v8557_v24 = vcombine.low %v814_v10, %v818_v11 }
 0x18f   : > { %v819_v14 = vld [vmem:[%s12678_s1 + $0x978] sm:$0xff] }
 0x190   : > { %v8560_v18 = vcombine.high %v815_v13, %v819_v14  ;;  %v8559_v25 = vcombine.low %v815_v13, %v819_v14  ;;  %v875_v10 = vld [vmem:[%s12678_s1 + $0xb38] sm:$0xff] }
 0x191   : > { %3520 = vmatpush1.bf16.msra.mxu0 %v8493_v19  ;;  %3739 = vmatpush1.bf16.msra.mxu1 %v8495_v20  ;;  %v822_v19 = vld [vmem:[%s12678_s1 + $0x990] sm:$0xff] }
 0x192   : > { %3521 = vmatprep.subr.bf16.mxu0 %v8502_v21  ;;  %3740 = vmatprep.subr.bf16.mxu1 %v8504_v22  ;;  %v826_v20 = vld [vmem:[%s12678_s1 + $0x9b0] sm:$0xff]  ;;  %v823_v21 = vld [vmem:[%s12678_s1 + $0x998] sm:$0xff] }
 0x193   : > { %v827_v22 = vld [vmem:[%s12678_s1 + $0x9b8] sm:$0xff]  ;;  %v8566_v26 = vcombine.high %v822_v19, %v826_v20  ;;  %v8565_v33 = vcombine.low %v822_v19, %v826_v20 }
 0x194   : > { %v8567_v34 = vcombine.low %v823_v21, %v827_v22 }
 0x195   : > { %3522 = vmatpush1.bf16.msra.mxu0 %v8501_v27  ;;  %3741 = vmatpush1.bf16.msra.mxu1 %v8503_v28  ;;  %v8568_v27 = vcombine.high %v823_v21, %v827_v22  ;;  %v830_v28 = vld [vmem:[%s12678_s1 + $0x9d0] sm:$0xff] }
 0x196   : > { %3523 = vmatprep.subr.bf16.mxu0 %v8510_v29  ;;  %3742 = vmatprep.subr.bf16.mxu1 %v8512_v30  ;;  %v834_v29 = vld [vmem:[%s12678_s1 + $0x9f0] sm:$0xff] }
 0x197   : > { %v10303_v30 = vld [vmem:[%s10700_s23 + $0x9c] ss:$24 sps:$4 sm:$0xff]   ;;  %v8573_v42 = vcombine.low %v830_v28, %v834_v29 }
 0x199   : > { %3524 = vmatpush1.bf16.msra.mxu0 %v8509_v35  ;;  %3743 = vmatpush1.bf16.msra.mxu1 %v8511_v36  ;;  %v8574_v35 = vcombine.high %v830_v28, %v834_v29  ;;  %v8576_v36 = vcombine.high %v831_v31, %v835_v32 }
 0x19a   : > { %3566 = vmatprep.subr.bf16.mxu0 %v8518_v37  ;;  %3785 = vmatprep.subr.bf16.mxu1 %v8520_v41  ;;  %v838_v37 = vld [vmem:[%s12678_s1 + $0xa10] sm:$0xff] }
 0x19b   : > { %v10304_v41 = vld [vmem:[%s10700_s23 + $0x98] ss:$24 sps:$4 sm:$0xff]   ;;  %v8581_v51 = vcombine.low %v838_v37, %v842_v38 }
 0x19c   : > { %3526 = vmatmul.mubr.bf16.vlgmr.msra.gmra.mrb[16].mxu0 %v10298_v49  ;;  %3745 = vmatmul.mubr.bf16.vlgmr.msra.gmra.mrb[16].mxu1 %v10298_v49  ;;  %v847_v49 = vld [vmem:[%s12678_s1 + $0xa58] sm:$0xff] }
 0x19d   : > { %3567 = vmatpush1.bf16.msra.mxu0 %v8517_v43  ;;  %3786 = vmatpush1.bf16.msra.mxu1 %v8519_v44  ;;  %v8575_v43 = vcombine.low %v831_v31, %v835_v32  ;;  %v8582_v44 = vcombine.high %v838_v37, %v842_v38  ;;  %v8591_v60 = vcombine.low %v847_v49, %v851_v50  ;;  %v894_v31 = vld [vmem:[%s12678_s1 + $0xbd0] sm:$0xff] }
 0x19e   : > { %3568 = vmatprep.subr.bf16.mxu0 %v8526_v45  ;;  %3787 = vmatprep.subr.bf16.mxu1 %v8528_v46  ;;  %v8584_v45 = vcombine.high %v839_v39, %v843_v40  ;;  %v846_v46 = vld [vmem:[%s12678_s1 + $0xa50] sm:$0xff] }
 0x19f   : > { %3535 = vmatprep.mubr.bf16.mxu0 %v10299_v58  ;;  %3754 = vmatprep.mubr.bf16.mxu1 %v10299_v58  ;;  %v859_v58 = vld [vmem:[%s12678_s1 + $0xab8] sm:$0xff]  ;;  %v8589_v59 = vcombine.low %v846_v46, %v850_v47  ;;  %v898_v32 = vld [vmem:[%s12678_s1 + $0xbf0] sm:$0xff] }
 0x1a0   : > { %v8599_v4 = vcombine.low %v855_v57, %v859_v58  ;;  %v8638_v37 = vcombine.high %v894_v31, %v898_v32 }
 0x1a1   : > { %3569 = vmatpush1.bf16.msra.mxu0 %v8525_v52  ;;  %3788 = vmatpush1.bf16.msra.mxu1 %v8527_v53  ;;  %v8583_v52 = vcombine.low %v839_v39, %v843_v40  ;;  %v8590_v53 = vcombine.high %v846_v46, %v850_v47  ;;  %v8637_v39 = vcombine.low %v894_v31, %v898_v32  ;;  %v9652_v46 = vld [vmem:[#allocation2 + $0x2c] ss:$16 sps:$4 sm:$0xff]   ;;  %v10306_v47 = vld [vmem:[%s10700_s23 + $0x10] ss:$24 sps:$4 sm:$0xff]  }
 0x1a2   : > { %3570 = vmatprep.subr.bf16.mxu0 %v8534_v54  ;;  %3789 = vmatprep.subr.bf16.mxu1 %v8536_v55  ;;  %v8592_v54 = vcombine.high %v847_v49, %v851_v50  ;;  %v854_v55 = vld [vmem:[%s12678_s1 + $0xa90] sm:$0xff]  ;;  %v9650_v49 = vld [vmem:[#allocation2 + $0x28] ss:$16 sps:$4 sm:$0xff]  }
 0x1a3   : > { %v8597_v3 = vcombine.low %v854_v55, %v858_v56  ;;  %v9655_v50 = vld [vmem:[#allocation2 + $0x44] ss:$16 sps:$4 sm:$0xff]  }
 0x1a4   : > { %3536 = vmatmul.mubr.bf16.gmra.mrb[20].mxu0 %v10300_v5  ;;  %3755 = vmatmul.mubr.bf16.gmra.mrb[20].mxu1 %v10300_v5 }
 0x1a5   : > { %3571 = vmatpush1.bf16.msra.mxu0 %v8533_v61  ;;  %3790 = vmatpush1.bf16.msra.mxu1 %v8535_v62  ;;  %v8598_v61 = vcombine.high %v854_v55, %v858_v56  ;;  %v8600_v62 = vcombine.high %v855_v57, %v859_v58  ;;  %v9656_v55 = vld [vmem:[#allocation2 + $0x48] ss:$16 sps:$4 sm:$0xff]   ;;  %v9661_v56 = vld [vmem:[#allocation2 + $0x64] ss:$16 sps:$4 sm:$0xff]   ;;  %v9664_v57 = vld [vmem:[#allocation2 + $0x6c] ss:$16 sps:$4 sm:$0xff]  }
 0x1a6   : > { %3572 = vmatprep.subr.bf16.mxu0 %v8542_v63  ;;  %3791 = vmatprep.subr.bf16.mxu1 %v8544_v0  ;;  %v862_v63 = vld [vmem:[%s12678_s1 + $0xad0] sm:$0xff]  ;;  %v10308_v58 = vld [vmem:[%s10700_s23 + $0x40] ss:$24 sps:$4 sm:$0xff]  }
 0x1a7   : > { %3545 = vmatprep.mubr.bf16.mxu0 %v10301_v12  ;;  %3764 = vmatprep.mubr.bf16.mxu1 %v10301_v12  ;;  %v866_v0 = vld [vmem:[%s12678_s1 + $0xaf0] sm:$0xff]  ;;  %v8607_v12 = vcombine.low %v863_v1, %v867_v2 }
 0x1a8   : > { %v8606_v5 = vcombine.high %v862_v63, %v866_v0  ;;  %v8605_v11 = vcombine.low %v862_v63, %v866_v0  ;;  %v10309_v63 = vld [vmem:[%s10700_s23 + $0x74] ss:$24 sps:$4 sm:$0xff]  }
 0x1a9   : > { %3573 = vmatpush1.bf16.msra.mxu0 %v8541_v6  ;;  %3792 = vmatpush1.bf16.msra.mxu1 %v8543_v7  ;;  %v8608_v6 = vcombine.high %v863_v1, %v867_v2  ;;  %v870_v7 = vld [vmem:[%s12678_s1 + $0xb10] sm:$0xff]  ;;  %v9670_v0 = vld [vmem:[#allocation2 + $0x8c] ss:$16 sps:$4 sm:$0xff]  }
 0x1aa   : > { %3574 = vmatprep.subr.bf16.mxu0 %v8550_v8  ;;  %3793 = vmatprep.subr.bf16.mxu1 %v8552_v9  ;;  %v874_v8 = vld [vmem:[%s12678_s1 + $0xb30] sm:$0xff]  ;;  %v871_v9 = vld [vmem:[%s12678_s1 + $0xb18] sm:$0xff] }
 0x1ab   : > { %v8614_v13 = vcombine.high %v870_v7, %v874_v8  ;;  %v8616_v14 = vcombine.high %v871_v9, %v875_v10  ;;  %v8613_v19 = vcombine.low %v870_v7, %v874_v8  ;;  %v8615_v20 = vcombine.low %v871_v9, %v875_v10  ;;  %v9665_v2 = vld [vmem:[#allocation2 + $0x80] ss:$16 sps:$4 sm:$0xff]   ;;  %v9673_v7 = vld [vmem:[#allocation2 + $0xa4] ss:$16 sps:$4 sm:$0xff]   ;;  %v9676_v8 = vld [vmem:[#allocation2 + $0xac] ss:$16 sps:$4 sm:$0xff]  }
 0x1ac   : > { %3546 = vmatmul.mubr.bf16.gmra.mrb[24].mxu0 %v10302_v23  ;;  %3765 = vmatmul.mubr.bf16.gmra.mrb[24].mxu1 %v10302_v23  ;;  %v886_v23 = vld [vmem:[%s12678_s1 + $0xb90] sm:$0xff] }
 0x1ad   : > { %3575 = vmatpush1.bf16.msra.mxu0 %v8549_v15  ;;  %3794 = vmatpush1.bf16.msra.mxu1 %v8551_v16  ;;  %v878_v15 = vld [vmem:[%s12678_s1 + $0xb50] sm:$0xff] }
 0x1ae   : > { %3576 = vmatprep.subr.bf16.mxu0 %v8558_v17  ;;  %3795 = vmatprep.subr.bf16.mxu1 %v8560_v18  ;;  %v882_v16 = vld [vmem:[%s12678_s1 + $0xb70] sm:$0xff]  ;;  %v879_v17 = vld [vmem:[%s12678_s1 + $0xb58] sm:$0xff] }
 0x1af   : > { %3555 = vmatprep.mubr.bf16.mxu0 %v10303_v30  ;;  %3774 = vmatprep.mubr.bf16.mxu1 %v10303_v30  ;;  %v883_v18 = vld [vmem:[%s12678_s1 + $0xb78] sm:$0xff]  ;;  %v8622_v21 = vcombine.high %v878_v15, %v882_v16  ;;  %v10310_v9 = vld [vmem:[%s10700_s23 + $0x70] ss:$24 sps:$4 sm:$0xff]  }
 0x1b0   : > { %v8624_v22 = vcombine.high %v879_v17, %v883_v18  ;;  %v8623_v28 = vcombine.low %v879_v17, %v883_v18  ;;  %v10311_v18 = vld [vmem:[%s10700_s23 + $0xa4] ss:$24 sps:$4 sm:$0xff]  }
 0x1b1   : > { %3577 = vmatpush1.bf16.msra.mxu0 %v8557_v24  ;;  %3796 = vmatpush1.bf16.msra.mxu1 %v8559_v25  ;;  %v890_v24 = vld [vmem:[%s12678_s1 + $0xbb0] sm:$0xff]  ;;  %v887_v25 = vld [vmem:[%s12678_s1 + $0xb98] sm:$0xff] }
 0x1b2   : > { %3578 = vmatprep.subr.bf16.mxu0 %v8566_v26  ;;  %3797 = vmatprep.subr.bf16.mxu1 %v8568_v27  ;;  %v891_v26 = vld [vmem:[%s12678_s1 + $0xbb8] sm:$0xff]  ;;  %v8621_v27 = vcombine.low %v878_v15, %v882_v16  ;;  %v8630_v29 = vcombine.high %v886_v23, %v890_v24  ;;  %v9679_v16 = vld [vmem:[#allocation2 + $0xc4] ss:$16 sps:$4 sm:$0xff]  }
 0x1b3   : > { %v8632_v30 = vcombine.high %v887_v25, %v891_v26  ;;  %v9674_v15 = vld [vmem:[#allocation2 + $0xa8] ss:$16 sps:$4 sm:$0xff]  }
 0x1b4   : > { %3556 = vmatmul.mubr.bf16.gmra.mrb[28].mxu0 %v10304_v41  ;;  %3775 = vmatmul.mubr.bf16.gmra.mrb[28].mxu1 %v10304_v41  ;;  %v9643_v41 = vld [vmem:[#allocation2 + $0x4] ss:$16 sps:$4 sm:$0xff]  }
 0x1b5   : > { %3579 = vmatpush1.bf16.msra.mxu0 %v8565_v33  ;;  %3798 = vmatpush1.bf16.msra.mxu1 %v8567_v34  ;;  %v895_v33 = vld [vmem:[%s12678_s1 + $0xbd8] sm:$0xff] }
 0x1b6   : > { %3580 = vmatprep.subr.bf16.mxu0 %v8574_v35  ;;  %3799 = vmatprep.subr.bf16.mxu1 %v8576_v36  ;;  %v899_v34 = vld [vmem:[%s12678_s1 + $0xbf8] sm:$0xff]  ;;  %v8629_v35 = vcombine.low %v886_v23, %v890_v24  ;;  %v8631_v36 = vcombine.low %v887_v25, %v891_v26 }
 0x1b7   : > { %3598 = vmatprep.mubr.bf16.mxu0 %v10305_v48  ;;  %3817 = vmatprep.mubr.bf16.mxu1 %v10305_v48  ;;  %v8640_v38 = vcombine.high %v895_v33, %v899_v34  ;;  %v8639_v40 = vcombine.low %v895_v33, %v899_v34  ;;  %v9647_v48 = vld [vmem:[#allocation2 + $0x20] ss:$16 sps:$4 sm:$0xff]   ;;  %v9685_v34 = vld [vmem:[#allocation2 + $0xe4] ss:$16 sps:$4 sm:$0xff]  }
 0x1b9   : > { %3581 = vmatpush1.bf16.msra.mxu0 %v8573_v42  ;;  %3800 = vmatpush1.bf16.msra.mxu1 %v8575_v43  ;;  %v9646_v42 = vld [vmem:[#allocation2 + $0xc] ss:$16 sps:$4 sm:$0xff]   ;;  %v9641_v43 = vld [vmem:[#allocation2] ss:$16 sps:$4 sm:$0xff]  }
 0x1ba   : > { %3582 = vmatprep.subr.bf16.mxu0 %v8582_v44  ;;  %3801 = vmatprep.subr.bf16.mxu1 %v8584_v45  ;;  %v9644_v44 = vld [vmem:[#allocation2 + $0x8] ss:$16 sps:$4 sm:$0xff]   ;;  %v9649_v45 = vld [vmem:[#allocation2 + $0x24] ss:$16 sps:$4 sm:$0xff]  }
 0x1bd   : > { %3583 = vmatpush1.bf16.msra.mxu0 %v8581_v51  ;;  %3802 = vmatpush1.bf16.msra.mxu1 %v8583_v52  ;;  %v10307_v51 = vld [vmem:[%s10700_s23 + $0x44] ss:$24 sps:$4 sm:$0xff]  }
 0x1be   : > { %3584 = vmatprep.subr.bf16.mxu0 %v8590_v53  ;;  %3803 = vmatprep.subr.bf16.mxu1 %v8592_v54  ;;  %v9658_v52 = vld [vmem:[#allocation2 + $0x4c] ss:$16 sps:$4 sm:$0xff]   ;;  %v902_v53 = vlaneseq  ;;  %v9653_v54 = vld [vmem:[#allocation2 + $0x40] ss:$16 sps:$4 sm:$0xff]  }
 0x1c1   : > { %3585 = vmatpush1.bf16.msra.mxu0 %v8589_v59  ;;  %3804 = vmatpush1.bf16.msra.mxu1 %v8591_v60  ;;  %v11814_v59 = vshrl.u32 %v902_v53, 7  ;;  %v9659_v60 = vld [vmem:[#allocation2 + $0x60] ss:$16 sps:$4 sm:$0xff]  }
 0x1c2   : > { %3586 = vmatprep.subr.bf16.mxu0 %v8598_v61  ;;  %3805 = vmatprep.subr.bf16.mxu1 %v8600_v62  ;;  %v9662_v61 = vld [vmem:[#allocation2 + $0x68] ss:$16 sps:$4 sm:$0xff]   ;;  %v9667_v62 = vld [vmem:[#allocation2 + $0x84] ss:$16 sps:$4 sm:$0xff]  }
 0x1c3   : > { %v11818_v1 = vsub.s32 0, %v11814_v59 }
 0x1c5   : > { %3587 = vmatpush1.bf16.msra.mxu0 %v8597_v3  ;;  %3806 = vmatpush1.bf16.msra.mxu1 %v8599_v4  ;;  %v900_v3 = vld [vmem:[%s12679_s2] sm:$0xff]  ;;  %v11824_v4 = vsub.s32 2, %v11814_v59 }
 0x1c6   : > { %3588 = vmatprep.subr.bf16.mxu0 %v8606_v5  ;;  %3807 = vmatprep.subr.bf16.mxu1 %v8608_v6  ;;  %v9668_v5 = vld [vmem:[#allocation2 + $0x88] ss:$16 sps:$4 sm:$0xff]   ;;  %v11827_v6 = vsub.s32 1, %v11814_v59  ;;  %v11831_v10 = vrot.slane %v900_v3, %v11818_v1 }
 0x1c9   : > { %3589 = vmatpush1.bf16.msra.mxu0 %v8605_v11  ;;  %3808 = vmatpush1.bf16.msra.mxu1 %v8607_v12  ;;  %v11834_v11 = vsub.s32 3, %v11814_v59  ;;  %v11837_v12 = vrot.slane %v900_v3, %v11824_v4 }
 0x1ca   : > { %3590 = vmatprep.subr.bf16.mxu0 %v8614_v13  ;;  %3809 = vmatprep.subr.bf16.mxu1 %v8616_v14  ;;  %v9671_v13 = vld [vmem:[#allocation2 + $0xa0] ss:$16 sps:$4 sm:$0xff]   ;;  %v11840_v14 = vrot.slane %v900_v3, %v11827_v6 }
 0x1cb   : > { %v11845_v23 = vrot.slane %v900_v3, %v11834_v11 }
 0x1cd   : > { %3591 = vmatpush1.bf16.msra.mxu0 %v8613_v19  ;;  %3810 = vmatpush1.bf16.msra.mxu1 %v8615_v20  ;;  %v9682_v19 = vld [vmem:[#allocation2 + $0xcc] ss:$16 sps:$4 sm:$0xff]  }
 0x1ce   : > { %3592 = vmatprep.subr.bf16.mxu0 %v8622_v21  ;;  %3811 = vmatprep.subr.bf16.mxu1 %v8624_v22 }
 0x1d1   : > { %3593 = vmatpush1.bf16.msra.mxu0 %v8621_v27  ;;  %3812 = vmatpush1.bf16.msra.mxu1 %v8623_v28  ;;  %v9677_v27 = vld [vmem:[#allocation2 + $0xc0] ss:$16 sps:$4 sm:$0xff]   ;;  %v9680_v28 = vld [vmem:[#allocation2 + $0xc8] ss:$16 sps:$4 sm:$0xff]  }
 0x1d2   : > { %3594 = vmatprep.subr.bf16.mxu0 %v8630_v29  ;;  %3813 = vmatprep.subr.bf16.mxu1 %v8632_v30 }
 0x1d5   : > { %3595 = vmatpush1.bf16.msra.mxu0 %v8629_v35  ;;  %3814 = vmatpush1.bf16.msra.mxu1 %v8631_v36  ;;  %v9688_v35 = vld [vmem:[#allocation2 + $0xec] ss:$16 sps:$4 sm:$0xff]  }
 0x1d6   : > { %3596 = vmatprep.subr.bf16.mxu0 %v8638_v37  ;;  %3815 = vmatprep.subr.bf16.mxu1 %v8640_v38  ;;  %v10312_v38 = vld [vmem:[%s10700_s23 + $0xa0] ss:$24 sps:$4 sm:$0xff]  }
 0x1d9   : > { %3597 = vmatpush1.bf16.msra.mxu0 %v8637_v39  ;;  %3816 = vmatpush1.bf16.msra.mxu1 %v8639_v40  ;;  %v9683_v39 = vld [vmem:[#allocation2 + $0xe0] ss:$16 sps:$4 sm:$0xff]   ;;  %v9686_v40 = vld [vmem:[#allocation2 + $0xe8] ss:$16 sps:$4 sm:$0xff]  }
 0x1da   : > { %5640 = vmatprep.subr.bf16.mxu0 %v9643_v41  ;;  %5932 = vmatprep.subr.bf16.mxu1 %v9646_v42 }
 0x1dc   : > { %3599 = vmatmul.mubr.bf16.vlgmr.msra.gmra.mrb[16].mxu0 %v10306_v47  ;;  %3818 = vmatmul.mubr.bf16.vlgmr.msra.gmra.mrb[16].mxu1 %v10306_v47 }
 0x1dd   : > { %5641 = vmatpush1.bf16.msra.mxu0 %v9641_v43  ;;  %5933 = vmatpush1.bf16.msra.mxu1 %v9644_v44 }
 0x1de   : > { %5642 = vmatprep.subr.bf16.mxu0 %v9649_v45  ;;  %5934 = vmatprep.subr.bf16.mxu1 %v9652_v46  ;;  %v9691_v45 = vld [vmem:[#allocation2 + $0x104] ss:$16 sps:$4 sm:$0xff]  }
 0x1df   : > { %3608 = vmatprep.mubr.bf16.mxu0 %v10307_v51  ;;  %3827 = vmatprep.mubr.bf16.mxu1 %v10307_v51 }
 0x1e1   : > { %5643 = vmatpush1.bf16.msra.mxu0 %v9647_v48  ;;  %5935 = vmatpush1.bf16.msra.mxu1 %v9650_v49  ;;  %v9694_v48 = vld [vmem:[#allocation2 + $0x10c] ss:$16 sps:$4 sm:$0xff]  }
 0x1e2   : > { %5644 = vmatprep.subr.bf16.mxu0 %v9655_v50  ;;  %5936 = vmatprep.subr.bf16.mxu1 %v9658_v52 }
 0x1e4   : > { %3609 = vmatmul.mubr.bf16.gmra.mrb[20].mxu0 %v10308_v58  ;;  %3828 = vmatmul.mubr.bf16.gmra.mrb[20].mxu1 %v10308_v58 }
 0x1e5   : > { %5645 = vmatpush1.bf16.msra.mxu0 %v9653_v54  ;;  %5937 = vmatpush1.bf16.msra.mxu1 %v9656_v55 }
 0x1e6   : > { %5646 = vmatprep.subr.bf16.mxu0 %v9661_v56  ;;  %5938 = vmatprep.subr.bf16.mxu1 %v9664_v57 }
 0x1e7   : > { %3618 = vmatprep.mubr.bf16.mxu0 %v10309_v63  ;;  %3837 = vmatprep.mubr.bf16.mxu1 %v10309_v63  ;;  %v9689_v63 = vld [vmem:[#allocation2 + $0x100] ss:$16 sps:$4 sm:$0xff]  }
 0x1e9   : > { %5647 = vmatpush1.bf16.msra.mxu0 %v9659_v60  ;;  %5939 = vmatpush1.bf16.msra.mxu1 %v9662_v61 }
 0x1ea   : > { %5648 = vmatprep.subr.bf16.mxu0 %v9667_v62  ;;  %5940 = vmatprep.subr.bf16.mxu1 %v9670_v0 }
 0x1ec   : > { %3619 = vmatmul.mubr.bf16.gmra.mrb[24].mxu0 %v10310_v9  ;;  %3838 = vmatmul.mubr.bf16.gmra.mrb[24].mxu1 %v10310_v9  ;;  %v9697_v9 = vld [vmem:[#allocation2 + $0x124] ss:$16 sps:$4 sm:$0xff]  }
 0x1ed   : > { %5649 = vmatpush1.bf16.msra.mxu0 %v9665_v2  ;;  %5941 = vmatpush1.bf16.msra.mxu1 %v9668_v5 }
 0x1ee   : > { %5650 = vmatprep.subr.bf16.mxu0 %v9673_v7  ;;  %5942 = vmatprep.subr.bf16.mxu1 %v9676_v8  ;;  %v9692_v8 = vld [vmem:[#allocation2 + $0x108] ss:$16 sps:$4 sm:$0xff]  }
 0x1ef   : > { %v3162_v17 = vpop.f32.mrb[0].mxu0  ;;  %3628 = vmatprep.mubr.bf16.mxu0 %v10311_v18  ;;  %v3381_v21 = vpop.f32.mrb[0].mxu1  ;;  %3847 = vmatprep.mubr.bf16.mxu1 %v10311_v18 }
 0x1f0   : > { %v9209_v20 = vadd.f32 %v3162_v17, %v11831_v10  ;;  %v3164_v22 = vpop.f32.mrb[1].mxu0  ;;  %v9225_v24 = vadd.f32 %v3381_v21, %v11837_v12  ;;  %v3383_v25 = vpop.f32.mrb[1].mxu1  ;;  %v9700_v17 = vld [vmem:[#allocation2 + $0x12c] ss:$16 sps:$4 sm:$0xff]  }
 0x1f1   : > { %v3166_v26 = vpop.f32.mrb[2].mxu0  ;;  %5651 = vmatpush1.bf16.msra.mxu0 %v9671_v13  ;;  %v9210_v30 = vadd.f32 %v3164_v22, %v11840_v14  ;;  %v3385_v32 = vpop.f32.mrb[2].mxu1  ;;  %5943 = vmatpush1.bf16.msra.mxu1 %v9674_v15  ;;  %v9226_v36 = vadd.f32 %v3383_v25, %v11845_v23 }
 0x1f2   : > { %v3922_v29 = vmul.f32 0.01, %v9209_v20  ;;  %v9211_v31 = vadd.f32 %v3166_v26, %v11831_v10  ;;  %v3168_v33 = vpop.f32.mrb[3].mxu0  ;;  %5652 = vmatprep.subr.bf16.mxu0 %v9679_v16  ;;  %vm3858_vm0 = vcmp.ge.f32.partialorder %v9209_v20, 0.0  ;;  %5944 = vmatprep.subr.bf16.mxu1 %v9682_v19  ;;  %v3387_v37 = vpop.f32.mrb[3].mxu1  ;;  %v9227_v43 = vadd.f32 %v3385_v32, %v11837_v12 }
 0x1f3   : > { %v3924_v41 = vmul.f32 0.01, %v9225_v24  ;;  %v9212_v44 = vadd.f32 %v3168_v33, %v11840_v14  ;;  %vm3860_vm2 = vcmp.ge.f32.partialorder %v9225_v24, 0.0  ;;  %vm3859_vm3 = vcmp.ge.f32.partialorder %v9210_v30, 0.0  ;;  %v9695_v16 = vld [vmem:[#allocation2 + $0x120] ss:$16 sps:$4 sm:$0xff]  }
 0x1f4   : > { %vm3866_vm1 = vcmp.ge.f32.partialorder %v9211_v31, 0.0  ;;  %3629 = vmatmul.mubr.bf16.gmra.mrb[28].mxu0 %v10312_v38  ;;  %v3930_v42 = vmul.f32 0.01, %v9211_v31  ;;  %3848 = vmatmul.mubr.bf16.gmra.mrb[28].mxu1 %v10312_v38  ;;  %v3986_v46 = vsel %vm3858_vm0, %v9209_v20, %v3922_v29  ;;  %v3923_v47 = vmul.f32 0.01, %v9210_v30 }
 0x1f5   : > { %5653 = vmatpush1.bf16.msra.mxu0 %v9677_v27  ;;  %5945 = vmatpush1.bf16.msra.mxu1 %v9680_v28  ;;  %vm3868_vm4 = vcmp.ge.f32.partialorder %v9227_v43, 0.0  ;;  %v3932_v50 = vmul.f32 0.01, %v9227_v43  ;;  %vm3867_vm5 = vcmp.ge.f32.partialorder %v9212_v44, 0.0  ;;  %v3925_v52 = vmul.f32 0.01, %v9226_v36 }
 0x1f6   : > { %5654 = vmatprep.subr.bf16.mxu0 %v9685_v34  ;;  %v3994_v49 = vsel %vm3866_vm1, %v9211_v31, %v3930_v42  ;;  %5946 = vmatprep.subr.bf16.mxu1 %v9688_v35  ;;  %v3931_v54 = vmul.f32 0.01, %v9212_v44  ;;  %v11859_v55 = vadd.f32 %v3387_v37, %v11845_v23  ;;  %v3988_v57 = vsel %vm3860_vm2, %v9225_v24, %v3924_v41  ;;  %v9698_v20 = vld [vmem:[#allocation2 + $0x128] ss:$16 sps:$4 sm:$0xff]   ;;  %v9703_v31 = vld [vmem:[#allocation2 + $0x144] ss:$16 sps:$4 sm:$0xff]  }
 0x1f7   : > { %v3172_v51 = vpop.f32.mrb[4].mxu0  ;;  %v11856_v53 = vpack.c.bf16 %v3994_v49, %v3986_v46  ;;  %v3391_v56 = vpop.f32.mrb[4].mxu1  ;;  %vm3861_vm6 = vcmp.ge.f32.partialorder %v9226_v36, 0.0  ;;  %v3996_v58 = vsel %vm3868_vm4, %v9227_v43, %v3932_v50  ;;  %v3987_v15 = vsel %vm3859_vm3, %v9210_v30, %v3923_v47  ;;  %v9706_v32 = vld [vmem:[#allocation2 + $0x14c] ss:$16 sps:$4 sm:$0xff]  }
 0x1f8   : > { %v9213_v60 = vadd.f32 %v3172_v51, %v11831_v10  ;;  %v3174_v61 = vpop.f32.mrb[5].mxu0  ;;  %v3393_v62 = vpop.f32.mrb[5].mxu1  ;;  %v11863_v0 = vpack.c.bf16 %v3996_v58, %v3988_v57  ;;  %v3995_v7 = vsel %vm3867_vm5, %v9212_v44, %v3931_v54  ;;  %v11868_v13 = vadd.f32 %v3391_v56, %v11837_v12  ;;  %v9701_v37 = vld [vmem:[#allocation2 + $0x140] ss:$16 sps:$4 sm:$0xff]   ;;  %v9704_v41 = vld [vmem:[#allocation2 + $0x148] ss:$16 sps:$4 sm:$0xff]  }
 0x1f9   : > { %5655 = vmatpush1.bf16.msra.mxu0 %v9683_v39  ;;  %v9214_v2 = vadd.f32 %v3174_v61, %v11840_v14  ;;  %v3176_v3 = vpop.f32.mrb[6].mxu0  ;;  %v3395_v5 = vpop.f32.mrb[6].mxu1  ;;  %5947 = vmatpush1.bf16.msra.mxu1 %v9686_v40  ;;  %vm3869_vm7 = vcmp.ge.f32.partialorder %v11859_v55, 0.0  ;;  %v3933_v18 = vmul.f32 0.01, %v11859_v55  ;;  %v11874_v19 = vadd.f32 %v3393_v62, %v11845_v23 }
 0x1fa   : > { %5656 = vmatprep.subr.bf16.mxu0 %v9691_v45  ;;  %5948 = vmatprep.subr.bf16.mxu1 %v9694_v48  ;;  %v11877_v21 = vsel %vm3861_vm6, %v9226_v36, %v3925_v52  ;;  %v3938_v22 = vmul.f32 0.01, %v9213_v60  ;;  %v9215_v25 = vadd.f32 %v3176_v3, %v11831_v10  ;;  %v3178_v26 = vpop.f32.mrb[7].mxu0  ;;  %v3397_v27 = vpop.f32.mrb[7].mxu1  ;;  %v4051_v28 = vpack.c.bf16 %v3995_v7, %v3987_v15  ;;  %v9709_v50 = vld [vmem:[#allocation2 + $0x164] ss:$16 sps:$4 sm:$0xff]  }
 0x1fb   : > { %v3939_v24 = vmul.f32 0.01, %v9214_v2  ;;  %vm3874_vm8 = vcmp.ge.f32.partialorder %v9213_v60, 0.0  ;;  %vm3875_vm9 = vcmp.ge.f32.partialorder %v9214_v2, 0.0  ;;  %v11881_v29 = vadd.f32 %v3395_v5, %v11837_v12  ;;  %v9707_v58 = vld [vmem:[#allocation2 + $0x160] ss:$16 sps:$4 sm:$0xff]  }
 0x1fc   : > { %v9216_v30 = vadd.f32 %v3178_v26, %v11840_v14  ;;  %vm3876_vm10 = vcmp.ge.f32.partialorder %v11868_v13, 0.0  ;;  %v3940_v33 = vmul.f32 0.01, %v11868_v13  ;;  %vm3882_vm11 = vcmp.ge.f32.partialorder %v9215_v25, 0.0  ;;  %5672 = vmatprep.mubr.bf16.mxu0 %v4051_v28  ;;  %5964 = vmatprep.mubr.bf16.mxu1 %v4051_v28  ;;  %v9710_v3 = vld [vmem:[#allocation2 + $0x168] ss:$16 sps:$4 sm:$0xff]  }
 0x1fd   : > { %5657 = vmatpush1.bf16.msra.mxu0 %v9689_v63  ;;  %5949 = vmatpush1.bf16.msra.mxu1 %v9692_v8  ;;  %v3946_v34 = vmul.f32 0.01, %v9215_v25  ;;  %vm3877_vm12 = vcmp.ge.f32.partialorder %v11874_v19, 0.0  ;;  %v11888_v36 = vadd.f32 %v3397_v27, %v11845_v23  ;;  %v3941_v38 = vmul.f32 0.01, %v11874_v19 }
 0x1fe   : > { %5658 = vmatprep.subr.bf16.mxu0 %v9697_v9  ;;  %vm3883_vm13 = vcmp.ge.f32.partialorder %v9216_v30, 0.0  ;;  %v3947_v35 = vmul.f32 0.01, %v9216_v30  ;;  %5950 = vmatprep.subr.bf16.mxu1 %v9700_v17  ;;  %v4003_v42 = vsel %vm3875_vm9, %v9214_v2, %v3939_v24  ;;  %v4002_v43 = vsel %vm3874_vm8, %v9213_v60, %v3938_v22  ;;  %v9712_v60 = vld [vmem:[#allocation2 + $0x16c] ss:$16 sps:$4 sm:$0xff]  }
 0x1ff   : > { %v3182_v39 = vpop.f32.mrb[8].mxu0  ;;  %v3401_v40 = vpop.f32.mrb[8].mxu1  ;;  %v4010_v44 = vsel %vm3882_vm11, %v9215_v25, %v3946_v34  ;;  %v11895_v45 = vmul.f32 0.01, %v11881_v29  ;;  %vm3885_vm14 = vcmp.ge.f32.partialorder %v11888_v36, 0.0  ;;  %v3997_v5 = vsel %vm3869_vm7, %v11859_v55, %v3933_v18 }
 0x200   : > { %v9217_v46 = vadd.f32 %v3182_v39, %v11831_v10  ;;  %v11899_v47 = vadd.f32 %v3401_v40, %v11837_v12  ;;  %v3184_v48 = vpop.f32.mrb[9].mxu0  ;;  %v3403_v49 = vpop.f32.mrb[9].mxu1  ;;  %v4011_v51 = vsel %vm3883_vm13, %v9216_v30, %v3947_v35  ;;  %v11908_v62 = vpack.c.bf16 %v4010_v44, %v4002_v43  ;;  %v9715_v8 = vld [vmem:[#allocation2 + $0x184] ss:$16 sps:$4 sm:$0xff]   ;;  %v9718_v18 = vld [vmem:[#allocation2 + $0x18c] ss:$16 sps:$4 sm:$0xff]  }
 0x201   : > { %5659 = vmatpush1.bf16.msra.mxu0 %v9695_v16  ;;  %5951 = vmatpush1.bf16.msra.mxu1 %v9698_v20  ;;  %v9218_v52 = vadd.f32 %v3184_v48, %v11840_v14  ;;  %v11904_v54 = vadd.f32 %v3403_v49, %v11845_v23  ;;  %v3186_v56 = vpop.f32.mrb[10].mxu0  ;;  %v3405_v57 = vpop.f32.mrb[10].mxu1  ;;  %v11906_v61 = vpack.c.bf16 %v4011_v51, %v4003_v42  ;;  %v3949_v63 = vmul.f32 0.01, %v11888_v36  ;;  %v9713_v27 = vld [vmem:[#allocation2 + $0x180] ss:$16 sps:$4 sm:$0xff]  }
 0x202   : > { %5660 = vmatprep.subr.bf16.mxu0 %v9703_v31  ;;  %5952 = vmatprep.subr.bf16.mxu1 %v9706_v32  ;;  %v3954_v2 = vmul.f32 0.01, %v9217_v46  ;;  %vm3890_vm15 = vcmp.ge.f32.partialorder %v9217_v46, 0.0  ;;  %v11918_v9 = vsel %vm3877_vm12, %v11874_v19, %v3941_v38  ;;  %v11921_v15 = vmul.f32 0.01, %v11899_v47  ;;  %v3188_v20 = vpop.f32.mrb[11].mxu0 }
 0x203   : > { %vm3891_vm0 = vcmp.ge.f32.partialorder %v9218_v52, 0.0  ;;  %v3955_v7 = vmul.f32 0.01, %v9218_v52  ;;  %v9219_v16 = vadd.f32 %v3186_v56, %v11831_v10  ;;  %v11925_v17 = vadd.f32 %v3405_v57, %v11837_v12  ;;  %v3407_v55 = vpop.f32.mrb[11].mxu1  ;;  %v9716_v30 = vld [vmem:[#allocation2 + $0x188] ss:$16 sps:$4 sm:$0xff]  }
 0x204   : > { %v11930_v22 = vsel %vm3876_vm10, %v11868_v13, %v3940_v33  ;;  %vm3884_vm1 = vcmp.ge.f32.partialorder %v11881_v29, 0.0  ;;  %v11934_v19 = vmul.f32 0.01, %v11904_v54  ;;  %v9220_v24 = vadd.f32 %v3188_v20, %v11840_v14  ;;  %v9721_v39 = vld [vmem:[#allocation2 + $0x1a4] ss:$16 sps:$4 sm:$0xff]  }
 0x205   : > { %5661 = vmatpush1.bf16.msra.mxu0 %v9701_v37  ;;  %5953 = vmatpush1.bf16.msra.mxu1 %v9704_v41  ;;  %v11938_v25 = vadd.f32 %v3407_v55, %v11845_v23  ;;  %v11941_v28 = vpack.c.bf16 %v3997_v5, %v11877_v21  ;;  %vm3893_vm2 = vcmp.ge.f32.partialorder %v11904_v54, 0.0  ;;  %vm3898_vm3 = vcmp.ge.f32.partialorder %v9219_v16, 0.0  ;;  %v9719_v48 = vld [vmem:[#allocation2 + $0x1a0] ss:$16 sps:$4 sm:$0xff]   ;;  %v9724_v49 = vld [vmem:[#allocation2 + $0x1ac] ss:$16 sps:$4 sm:$0xff]  }
 0x206   : > { %5662 = vmatprep.subr.bf16.mxu0 %v9709_v50  ;;  %5954 = vmatprep.subr.bf16.mxu1 %v9712_v60  ;;  %v3962_v13 = vmul.f32 0.01, %v9219_v16  ;;  %v4019_v31 = vsel %vm3891_vm0, %v9218_v52, %v3955_v7  ;;  %v4018_v32 = vsel %vm3890_vm15, %v9217_v46, %v3954_v2  ;;  %vm3892_vm4 = vcmp.ge.f32.partialorder %v11899_v47, 0.0  ;;  %v9722_v60 = vld [vmem:[#allocation2 + $0x1a8] ss:$16 sps:$4 sm:$0xff]  }
 0x207   : > { %v3192_v26 = vpop.f32.mrb[12].mxu0  ;;  %vm3900_vm5 = vcmp.ge.f32.partialorder %v11925_v17, 0.0  ;;  %v11949_v33 = vmul.f32 0.01, %v11925_v17  ;;  %vm3899_vm6 = vcmp.ge.f32.partialorder %v9220_v24, 0.0  ;;  %vm3901_vm7 = vcmp.ge.f32.partialorder %v11938_v25, 0.0 }
 0x208   : > { %v3963_v34 = vmul.f32 0.01, %v9220_v24  ;;  %v11953_v21 = vmul.f32 0.01, %v11938_v25  ;;  %v9221_v35 = vadd.f32 %v3192_v26, %v11831_v10  ;;  %v3411_v37 = vpop.f32.mrb[12].mxu1  ;;  %v3194_v38 = vpop.f32.mrb[13].mxu0  ;;  %v4026_v40 = vsel %vm3898_vm3, %v9219_v16, %v3962_v13 }
 0x209   : > { %5663 = vmatpush1.bf16.msra.mxu0 %v9707_v58  ;;  %5955 = vmatpush1.bf16.msra.mxu1 %v9710_v3  ;;  %v4013_v41 = vsel %vm3885_vm14, %v11888_v36, %v3949_v63  ;;  %v11961_v42 = vadd.f32 %v3411_v37, %v11837_v12  ;;  %v9222_v43 = vadd.f32 %v3194_v38, %v11840_v14  ;;  %v3413_v44 = vpop.f32.mrb[13].mxu1  ;;  %v3196_v46 = vpop.f32.mrb[14].mxu0  ;;  %v9727_v63 = vld [vmem:[#allocation2 + $0x1c4] ss:$16 sps:$4 sm:$0xff]   ;;  %v9730_v20 = vld [vmem:[#allocation2 + $0x1cc] ss:$16 sps:$4 sm:$0xff]  }
 0x20a   : > { %5664 = vmatprep.subr.bf16.mxu0 %v9715_v8  ;;  %5956 = vmatprep.subr.bf16.mxu1 %v9718_v18  ;;  %v4027_v50 = vsel %vm3899_vm6, %v9220_v24, %v3963_v34  ;;  %v11965_v51 = vpack.c.bf16 %v4026_v40, %v4018_v32  ;;  %vm3906_vm8 = vcmp.ge.f32.partialorder %v9221_v35, 0.0  ;;  %v3970_v52 = vmul.f32 0.01, %v9221_v35  ;;  %v3415_v57 = vpop.f32.mrb[14].mxu1  ;;  %v3198_v58 = vpop.f32.mrb[15].mxu0 }
 0x20b   : > { %v9238_v56 = vadd.f32 %v3413_v44, %v11845_v23  ;;  %v9223_v36 = vadd.f32 %v3196_v46, %v11831_v10  ;;  %vm3908_vm9 = vcmp.ge.f32.partialorder %v11961_v42, 0.0  ;;  %v3972_v2 = vmul.f32 0.01, %v11961_v42  ;;  %v3417_v16 = vpop.f32.mrb[15].mxu1  ;;  %v9725_v26 = vld [vmem:[#allocation2 + $0x1c0] ss:$16 sps:$4 sm:$0xff]  }
 0x20c   : > { %vm3907_vm10 = vcmp.ge.f32.partialorder %v9222_v43, 0.0  ;;  %v3971_v3 = vmul.f32 0.01, %v9222_v43  ;;  %v9239_v8 = vadd.f32 %v3415_v57, %v11837_v12  ;;  %v9224_v10 = vadd.f32 %v3198_v58, %v11840_v14  ;;  %v9739_v44 = vld [vmem:[#allocation2 + $0x204] ss:$16 sps:$4 sm:$0xff]  }
 0x20d   : > { %5665 = vmatpush1.bf16.msra.mxu0 %v9713_v27  ;;  %vm3909_vm11 = vcmp.ge.f32.partialorder %v9238_v56, 0.0  ;;  %v3973_v5 = vmul.f32 0.01, %v9238_v56  ;;  %vm3914_vm12 = vcmp.ge.f32.partialorder %v9223_v36, 0.0  ;;  %v3978_v7 = vmul.f32 0.01, %v9223_v36  ;;  %5957 = vmatpush1.bf16.msra.mxu1 %v9716_v30 }
 0x20e   : > { %5666 = vmatprep.subr.bf16.mxu0 %v9721_v39  ;;  %5958 = vmatprep.subr.bf16.mxu1 %v9724_v49  ;;  %v11973_v55 = vpack.c.bf16 %v4027_v50, %v4019_v31  ;;  %v4035_v18 = vsel %vm3907_vm10, %v9222_v43, %v3971_v3  ;;  %v9240_v24 = vadd.f32 %v3417_v16, %v11845_v23  ;;  %v9728_v27 = vld [vmem:[#allocation2 + $0x1c8] ss:$16 sps:$4 sm:$0xff]   ;;  %vm3916_vm13 = vcmp.ge.f32.partialorder %v9239_v8, 0.0  ;;  %v9733_v31 = vld [vmem:[#allocation2 + $0x1e4] ss:$16 sps:$4 sm:$0xff]  }
 0x20f   : > { %v4034_v13 = vsel %vm3906_vm8, %v9221_v35, %v3970_v52  ;;  %v4042_v32 = vsel %vm3914_vm12, %v9223_v36, %v3978_v7  ;;  %v11978_v30 = vpack.c.bf16 %v4013_v41, %v11918_v9  ;;  %v3980_v12 = vmul.f32 0.01, %v9239_v8  ;;  %v9736_v9 = vld [vmem:[#allocation2 + $0x1ec] ss:$16 sps:$4 sm:$0xff]   ;;  %v9740_v49 = vld [vmem:[#allocation2 + $0x208] ss:$16 sps:$4 sm:$0xff]  }
 0x210   : > { %vm3915_vm14 = vcmp.ge.f32.partialorder %v9224_v10, 0.0  ;;  %v3979_v14 = vmul.f32 0.01, %v9224_v10  ;;  %vm3917_vm15 = vcmp.ge.f32.partialorder %v9240_v24, 0.0  ;;  %v3981_v34 = vmul.f32 0.01, %v9240_v24 }
 0x211   : > { %5667 = vmatpush1.bf16.msra.mxu0 %v9719_v48  ;;  %5959 = vmatpush1.bf16.msra.mxu1 %v9722_v60  ;;  %v11980_v37 = vpack.c.bf16 %v4042_v32, %v4034_v13  ;;  %v4012_v23 = vsel %vm3884_vm1, %v11881_v29, %v11895_v45  ;;  %v4021_v39 = vsel %vm3893_vm2, %v11904_v54, %v11934_v19  ;;  %v9731_v54 = vld [vmem:[#allocation2 + $0x1e0] ss:$16 sps:$4 sm:$0xff]   ;;  %v9745_v50 = vld [vmem:[#allocation2 + $0x224] ss:$16 sps:$4 sm:$0xff]   ;;  %v9748_v52 = vld [vmem:[#allocation2 + $0x22c] ss:$16 sps:$4 sm:$0xff]  }
 0x212   : > { %5668 = vmatprep.subr.bf16.mxu0 %v9727_v63  ;;  %5960 = vmatprep.subr.bf16.mxu1 %v9730_v20  ;;  %v4043_v35 = vsel %vm3915_vm14, %v9224_v10, %v3979_v14  ;;  %v11987_v38 = vpack.c.bf16 %v4012_v23, %v11930_v22  ;;  %v4029_v40 = vsel %vm3901_vm7, %v11938_v25, %v11953_v21  ;;  %v9734_v21 = vld [vmem:[#allocation2 + $0x1e8] ss:$16 sps:$4 sm:$0xff]   ;;  %v9737_v48 = vld [vmem:[#allocation2 + $0x200] ss:$16 sps:$4 sm:$0xff]   ;;  %v9751_v36 = vld [vmem:[#allocation2 + $0x244] ss:$16 sps:$4 sm:$0xff]  }
 0x213   : > { %v11997_v41 = vpack.c.bf16 %v4043_v35, %v4035_v18  ;;  %v11999_v43 = vpack.c.bf16 %v4029_v40, %v4021_v39  ;;  %v4020_v29 = vsel %vm3892_vm4, %v11899_v47, %v11921_v15  ;;  %v4028_v45 = vsel %vm3900_vm5, %v11925_v17, %v11949_v33  ;;  %v9742_v17 = vld [vmem:[#allocation2 + $0x20c] ss:$16 sps:$4 sm:$0xff]   ;;  %v9749_v58 = vld [vmem:[#allocation2 + $0x240] ss:$16 sps:$4 sm:$0xff]   ;;  %v9752_v60 = vld [vmem:[#allocation2 + $0x248] ss:$16 sps:$4 sm:$0xff]  }
 0x214   : > { %v12009_v22 = vpack.c.bf16 %v4028_v45, %v4020_v29  ;;  %v4037_v19 = vsel %vm3909_vm11, %v9238_v56, %v3973_v5  ;;  %v4045_v25 = vsel %vm3917_vm15, %v9240_v24, %v3981_v34  ;;  %v4036_v47 = vsel %vm3908_vm9, %v11961_v42, %v3972_v2  ;;  %v9743_v42 = vld [vmem:[#allocation2 + $0x220] ss:$16 sps:$4 sm:$0xff]   ;;  %v9746_v56 = vld [vmem:[#allocation2 + $0x228] ss:$16 sps:$4 sm:$0xff]   ;;  %v9754_v57 = vld [vmem:[#allocation2 + $0x24c] ss:$16 sps:$4 sm:$0xff]  }
 0x215   : > { %5669 = vmatpush1.bf16.msra.mxu0 %v9725_v26  ;;  %5961 = vmatpush1.bf16.msra.mxu1 %v9728_v27  ;;  %v12013_v46 = vpack.c.bf16 %v4045_v25, %v4037_v19  ;;  %v4044_v15 = vsel %vm3916_vm13, %v9239_v8, %v3980_v12  ;;  %v9757_v63 = vld [vmem:[#allocation2 + $0x264] ss:$16 sps:$4 sm:$0xff]   ;;  %v9758_v2 = vld [vmem:[#allocation2 + $0x268] ss:$16 sps:$4 sm:$0xff]   ;;  %v9766_v5 = vld [vmem:[#allocation2 + $0x28c] ss:$16 sps:$4 sm:$0xff]  }
 0x216   : > { %5670 = vmatprep.subr.bf16.mxu0 %v9733_v31  ;;  %5962 = vmatprep.subr.bf16.mxu1 %v9736_v9  ;;  %v12019_v33 = vpack.c.bf16 %v4044_v15, %v4036_v47  ;;  %v9763_v3 = vld [vmem:[#allocation2 + $0x284] ss:$16 sps:$4 sm:$0xff]   ;;  %v9761_v7 = vld [vmem:[#allocation2 + $0x280] ss:$16 sps:$4 sm:$0xff]   ;;  %v9764_v8 = vld [vmem:[#allocation2 + $0x288] ss:$16 sps:$4 sm:$0xff]  }
 0x217   : > { %v9769_v10 = vld [vmem:[#allocation2 + $0x2a4] ss:$16 sps:$4 sm:$0xff]   ;;  %v9767_v16 = vld [vmem:[#allocation2 + $0x2a0] ss:$16 sps:$4 sm:$0xff]   ;;  %v9770_v20 = vld [vmem:[#allocation2 + $0x2a8] ss:$16 sps:$4 sm:$0xff]  }
 0x218   : > { %v9778_v18 = vld [vmem:[#allocation2 + $0x2cc] ss:$16 sps:$4 sm:$0xff]   ;;  %v9773_v24 = vld [vmem:[#allocation2 + $0x2c0] ss:$16 sps:$4 sm:$0xff]   ;;  %v9776_v26 = vld [vmem:[#allocation2 + $0x2c8] ss:$16 sps:$4 sm:$0xff]  }
 0x219   : > { %5671 = vmatpush1.bf16.msra.mxu0 %v9731_v54  ;;  %5963 = vmatpush1.bf16.msra.mxu1 %v9734_v21  ;;  %v9781_v27 = vld [vmem:[#allocation2 + $0x2e4] ss:$16 sps:$4 sm:$0xff]   ;;  %v9779_v13 = vld [vmem:[#allocation2 + $0x2e0] ss:$16 sps:$4 sm:$0xff]   ;;  %v9782_v32 = vld [vmem:[#allocation2 + $0x2e8] ss:$16 sps:$4 sm:$0xff]  }
 0x21a   : > { %5713 = vmatprep.subr.bf16.mxu0 %v9739_v44  ;;  %6005 = vmatprep.subr.bf16.mxu1 %v9742_v17  ;;  %v9787_v12 = vld [vmem:[#allocation2 + $0x304] ss:$16 sps:$4 sm:$0xff]   ;;  %v9790_v14 = vld [vmem:[#allocation2 + $0x30c] ss:$16 sps:$4 sm:$0xff]   ;;  %v9785_v34 = vld [vmem:[#allocation2 + $0x300] ss:$16 sps:$4 sm:$0xff]  }
 0x21b   : > { %v9788_v31 = vld [vmem:[#allocation2 + $0x308] ss:$16 sps:$4 sm:$0xff]   ;;  %v9793_v23 = vld [vmem:[#allocation2 + $0x324] ss:$16 sps:$4 sm:$0xff]   ;;  %v9791_v9 = vld [vmem:[#allocation2 + $0x320] ss:$16 sps:$4 sm:$0xff]  }
 0x21c   : > { %5673 = vmatmul.mubr.bf16.vlgmr.msra.gmra.mrb[32].mxu0 %v11856_v53  ;;  %5965 = vmatmul.mubr.bf16.vlgmr.msra.gmra.mrb[32].mxu1 %v11856_v53  ;;  %v9760_v53 = vld [vmem:[#allocation2 + $0x26c] ss:$16 sps:$4 sm:$0xff]   ;;  %v9799_v35 = vld [vmem:[#allocation2 + $0x344] ss:$16 sps:$4 sm:$0xff]   ;;  %v9797_v40 = vld [vmem:[#allocation2 + $0x340] ss:$16 sps:$4 sm:$0xff]  }
 0x21d   : > { %5682 = vmatprep.mubr.bf16.mxu0 %v11906_v61  ;;  %5714 = vmatpush1.bf16.msra.mxu0 %v9737_v48  ;;  %v9802_v39 = vld [vmem:[#allocation2 + $0x34c] ss:$16 sps:$4 sm:$0xff]   ;;  %v9805_v29 = vld [vmem:[#allocation2 + $0x364] ss:$16 sps:$4 sm:$0xff]   ;;  %v9803_v54 = vld [vmem:[#allocation2 + $0x360] ss:$16 sps:$4 sm:$0xff]  }
 0x21e   : > { %5974 = vmatprep.mubr.bf16.mxu1 %v11906_v61  ;;  %6006 = vmatpush1.bf16.msra.mxu1 %v9740_v49  ;;  %v9755_v61 = vld [vmem:[#allocation2 + $0x260] ss:$16 sps:$4 sm:$0xff]   ;;  %v9808_v45 = vld [vmem:[#allocation2 + $0x36c] ss:$16 sps:$4 sm:$0xff]   ;;  %v9806_v19 = vld [vmem:[#allocation2 + $0x368] ss:$16 sps:$4 sm:$0xff]  }
 0x21f   : > { %5715 = vmatprep.subr.bf16.mxu0 %v9745_v50  ;;  %6007 = vmatprep.subr.bf16.mxu1 %v9748_v52  ;;  %v9811_v25 = vld [vmem:[#allocation2 + $0x384] ss:$16 sps:$4 sm:$0xff]   ;;  %v9814_v21 = vld [vmem:[#allocation2 + $0x38c] ss:$16 sps:$4 sm:$0xff]   ;;  %v9809_v44 = vld [vmem:[#allocation2 + $0x380] ss:$16 sps:$4 sm:$0xff]  }
 0x220   : > { %v9812_v47 = vld [vmem:[#allocation2 + $0x388] ss:$16 sps:$4 sm:$0xff]   ;;  %v9817_v15 = vld [vmem:[#allocation2 + $0x3a4] ss:$16 sps:$4 sm:$0xff]   ;;  %v9820_v17 = vld [vmem:[#allocation2 + $0x3ac] ss:$16 sps:$4 sm:$0xff]  }
 0x221   : > { %5716 = vmatpush1.bf16.msra.mxu0 %v9743_v42  ;;  %v9815_v48 = vld [vmem:[#allocation2 + $0x3a0] ss:$16 sps:$4 sm:$0xff]   ;;  %v9818_v49 = vld [vmem:[#allocation2 + $0x3a8] ss:$16 sps:$4 sm:$0xff]   ;;  %v9823_v50 = vld [vmem:[#allocation2 + $0x3c4] ss:$16 sps:$4 sm:$0xff]  }
 0x222   : > { %6008 = vmatpush1.bf16.msra.mxu1 %v9746_v56  ;;  %5717 = vmatprep.subr.bf16.mxu0 %v9751_v36  ;;  %v9826_v52 = vld [vmem:[#allocation2 + $0x3cc] ss:$16 sps:$4 sm:$0xff]   ;;  %v9821_v42 = vld [vmem:[#allocation2 + $0x3c0] ss:$16 sps:$4 sm:$0xff]   ;;  %v9824_v56 = vld [vmem:[#allocation2 + $0x3c8] ss:$16 sps:$4 sm:$0xff]  }
 0x223   : > { %6009 = vmatprep.subr.bf16.mxu1 %v9754_v57  ;;  %v9829_v36 = vld [vmem:[#allocation2 + $0x3e4] ss:$16 sps:$4 sm:$0xff]   ;;  %v9832_v57 = vld [vmem:[#allocation2 + $0x3ec] ss:$16 sps:$4 sm:$0xff]  }
 0x224   : > { %5683 = vmatmul.mubr.bf16.gmra.mrb[36].mxu0 %v11908_v62  ;;  %5975 = vmatmul.mubr.bf16.gmra.mrb[36].mxu1 %v11908_v62  ;;  %v9772_v62 = vld [vmem:[#allocation2 + $0x2ac] ss:$16 sps:$4 sm:$0xff]  }
 0x225   : > { %5692 = vmatprep.mubr.bf16.mxu0 %v11973_v55  ;;  %5718 = vmatpush1.bf16.msra.mxu0 %v9749_v58  ;;  %v9827_v58 = vld [vmem:[#allocation2 + $0x3e0] ss:$16 sps:$4 sm:$0xff]  }
 0x226   : > { %5984 = vmatprep.mubr.bf16.mxu1 %v11973_v55  ;;  %6010 = vmatpush1.bf16.msra.mxu1 %v9752_v60  ;;  %v9775_v55 = vld [vmem:[#allocation2 + $0x2c4] ss:$16 sps:$4 sm:$0xff]   ;;  %v9830_v60 = vld [vmem:[#allocation2 + $0x3e8] ss:$16 sps:$4 sm:$0xff]  }
 0x227   : > { %5719 = vmatprep.subr.bf16.mxu0 %v9757_v63  ;;  %6011 = vmatprep.subr.bf16.mxu1 %v9760_v53  ;;  %v9835_v63 = vld [vmem:[#allocation2 + $0x404] ss:$16 sps:$4 sm:$0xff]   ;;  %v9838_v53 = vld [vmem:[#allocation2 + $0x40c] ss:$16 sps:$4 sm:$0xff]  }
 0x229   : > { %5720 = vmatpush1.bf16.msra.mxu0 %v9755_v61  ;;  %v9833_v61 = vld [vmem:[#allocation2 + $0x400] ss:$16 sps:$4 sm:$0xff]  }
 0x22a   : > { %6012 = vmatpush1.bf16.msra.mxu1 %v9758_v2  ;;  %5721 = vmatprep.subr.bf16.mxu0 %v9763_v3  ;;  %v9836_v2 = vld [vmem:[#allocation2 + $0x408] ss:$16 sps:$4 sm:$0xff]   ;;  %v9841_v3 = vld [vmem:[#allocation2 + $0x424] ss:$16 sps:$4 sm:$0xff]  }
 0x22b   : > { %6013 = vmatprep.subr.bf16.mxu1 %v9766_v5  ;;  %v9844_v5 = vld [vmem:[#allocation2 + $0x42c] ss:$16 sps:$4 sm:$0xff]  }
 0x22c   : > { %5693 = vmatmul.mubr.bf16.gmra.mrb[40].mxu0 %v11965_v51  ;;  %5985 = vmatmul.mubr.bf16.gmra.mrb[40].mxu1 %v11965_v51  ;;  %v9784_v51 = vld [vmem:[#allocation2 + $0x2ec] ss:$16 sps:$4 sm:$0xff]  }
 0x22d   : > { %5702 = vmatprep.mubr.bf16.mxu0 %v11997_v41  ;;  %5722 = vmatpush1.bf16.msra.mxu0 %v9761_v7  ;;  %v9839_v7 = vld [vmem:[#allocation2 + $0x420] ss:$16 sps:$4 sm:$0xff]  }
 0x22e   : > { %5994 = vmatprep.mubr.bf16.mxu1 %v11997_v41  ;;  %6014 = vmatpush1.bf16.msra.mxu1 %v9764_v8  ;;  %v9800_v41 = vld [vmem:[#allocation2 + $0x348] ss:$16 sps:$4 sm:$0xff]  }
 0x22f   : > { %5723 = vmatprep.subr.bf16.mxu0 %v9769_v10  ;;  %6015 = vmatprep.subr.bf16.mxu1 %v9772_v62  ;;  %v9842_v8 = vld [vmem:[#allocation2 + $0x428] ss:$16 sps:$4 sm:$0xff]   ;;  %v9847_v10 = vld [vmem:[#allocation2 + $0x444] ss:$16 sps:$4 sm:$0xff]   ;;  %v9850_v62 = vld [vmem:[#allocation2 + $0x44c] ss:$16 sps:$4 sm:$0xff]  }
 0x231   : > { %5724 = vmatpush1.bf16.msra.mxu0 %v9767_v16  ;;  %v9845_v16 = vld [vmem:[#allocation2 + $0x440] ss:$16 sps:$4 sm:$0xff]  }
 0x232   : > { %6016 = vmatpush1.bf16.msra.mxu1 %v9770_v20  ;;  %5725 = vmatprep.subr.bf16.mxu0 %v9775_v55  ;;  %v9848_v20 = vld [vmem:[#allocation2 + $0x448] ss:$16 sps:$4 sm:$0xff]   ;;  %v9853_v55 = vld [vmem:[#allocation2 + $0x464] ss:$16 sps:$4 sm:$0xff]  }
 0x233   : > { %6017 = vmatprep.subr.bf16.mxu1 %v9778_v18  ;;  %v9854_v18 = vld [vmem:[#allocation2 + $0x468] ss:$16 sps:$4 sm:$0xff]  }
 0x234   : > { %5703 = vmatmul.mubr.bf16.gmra.mrb[44].mxu0 %v11980_v37  ;;  %5995 = vmatmul.mubr.bf16.gmra.mrb[44].mxu1 %v11980_v37  ;;  %v9796_v37 = vld [vmem:[#allocation2 + $0x32c] ss:$16 sps:$4 sm:$0xff]  }
 0x235   : > { %5745 = vmatprep.mubr.bf16.mxu0 %v11941_v28  ;;  %5726 = vmatpush1.bf16.msra.mxu0 %v9773_v24  ;;  %v9859_v24 = vld [vmem:[#allocation2 + $0x484] ss:$16 sps:$4 sm:$0xff]  }
 0x236   : > { %6037 = vmatprep.mubr.bf16.mxu1 %v11941_v28  ;;  %6018 = vmatpush1.bf16.msra.mxu1 %v9776_v26  ;;  %v9794_v28 = vld [vmem:[#allocation2 + $0x328] ss:$16 sps:$4 sm:$0xff]   ;;  %v9862_v26 = vld [vmem:[#allocation2 + $0x48c] ss:$16 sps:$4 sm:$0xff]  }
 0x237   : > { %5727 = vmatprep.subr.bf16.mxu0 %v9781_v27  ;;  %6019 = vmatprep.subr.bf16.mxu1 %v9784_v51  ;;  %v9857_v27 = vld [vmem:[#allocation2 + $0x480] ss:$16 sps:$4 sm:$0xff]   ;;  %v9860_v51 = vld [vmem:[#allocation2 + $0x488] ss:$16 sps:$4 sm:$0xff]  }
 0x239   : > { %5728 = vmatpush1.bf16.msra.mxu0 %v9779_v13  ;;  %v9865_v13 = vld [vmem:[#allocation2 + $0x4a4] ss:$16 sps:$4 sm:$0xff]  }
 0x23a   : > { %6020 = vmatpush1.bf16.msra.mxu1 %v9782_v32  ;;  %5729 = vmatprep.subr.bf16.mxu0 %v9787_v12  ;;  %v9866_v32 = vld [vmem:[#allocation2 + $0x4a8] ss:$16 sps:$4 sm:$0xff]   ;;  %v9871_v12 = vld [vmem:[#allocation2 + $0x4c4] ss:$16 sps:$4 sm:$0xff]  }
 0x23b   : > { %6021 = vmatprep.subr.bf16.mxu1 %v9790_v14  ;;  %v9874_v14 = vld [vmem:[#allocation2 + $0x4cc] ss:$16 sps:$4 sm:$0xff]  }
 0x23d   : > { %5730 = vmatpush1.bf16.msra.mxu0 %v9785_v34  ;;  %v9869_v34 = vld [vmem:[#allocation2 + $0x4c0] ss:$16 sps:$4 sm:$0xff]  }
 0x23e   : > { %6022 = vmatpush1.bf16.msra.mxu1 %v9788_v31  ;;  %5731 = vmatprep.subr.bf16.mxu0 %v9793_v23  ;;  %v9872_v31 = vld [vmem:[#allocation2 + $0x4c8] ss:$16 sps:$4 sm:$0xff]   ;;  %v9877_v23 = vld [vmem:[#allocation2 + $0x4e4] ss:$16 sps:$4 sm:$0xff]  }
 0x23f   : > { %6023 = vmatprep.subr.bf16.mxu1 %v9796_v37  ;;  %v9878_v37 = vld [vmem:[#allocation2 + $0x4e8] ss:$16 sps:$4 sm:$0xff]  }
 0x241   : > { %5732 = vmatpush1.bf16.msra.mxu0 %v9791_v9  ;;  %v9883_v9 = vld [vmem:[#allocation2 + $0x504] ss:$16 sps:$4 sm:$0xff]  }
 0x242   : > { %6024 = vmatpush1.bf16.msra.mxu1 %v9794_v28  ;;  %5733 = vmatprep.subr.bf16.mxu0 %v9799_v35  ;;  %v9886_v28 = vld [vmem:[#allocation2 + $0x50c] ss:$16 sps:$4 sm:$0xff]   ;;  %v9881_v35 = vld [vmem:[#allocation2 + $0x500] ss:$16 sps:$4 sm:$0xff]  }
 0x243   : > { %6025 = vmatprep.subr.bf16.mxu1 %v9802_v39  ;;  %v9884_v39 = vld [vmem:[#allocation2 + $0x508] ss:$16 sps:$4 sm:$0xff]  }
 0x245   : > { %5734 = vmatpush1.bf16.msra.mxu0 %v9797_v40  ;;  %v9889_v40 = vld [vmem:[#allocation2 + $0x524] ss:$16 sps:$4 sm:$0xff]  }
 0x246   : > { %6026 = vmatpush1.bf16.msra.mxu1 %v9800_v41  ;;  %5735 = vmatprep.subr.bf16.mxu0 %v9805_v29  ;;  %v9892_v41 = vld [vmem:[#allocation2 + $0x52c] ss:$16 sps:$4 sm:$0xff]   ;;  %v9887_v29 = vld [vmem:[#allocation2 + $0x520] ss:$16 sps:$4 sm:$0xff]  }
 0x247   : > { %6027 = vmatprep.subr.bf16.mxu1 %v9808_v45  ;;  %v9895_v45 = vld [vmem:[#allocation2 + $0x544] ss:$16 sps:$4 sm:$0xff]  }
 0x249   : > { %5736 = vmatpush1.bf16.msra.mxu0 %v9803_v54  ;;  %v9898_v54 = vld [vmem:[#allocation2 + $0x54c] ss:$16 sps:$4 sm:$0xff]  }
 0x24a   : > { %6028 = vmatpush1.bf16.msra.mxu1 %v9806_v19  ;;  %5737 = vmatprep.subr.bf16.mxu0 %v9811_v25  ;;  %v9893_v19 = vld [vmem:[#allocation2 + $0x540] ss:$16 sps:$4 sm:$0xff]   ;;  %v9896_v25 = vld [vmem:[#allocation2 + $0x548] ss:$16 sps:$4 sm:$0xff]  }
 0x24b   : > { %6029 = vmatprep.subr.bf16.mxu1 %v9814_v21  ;;  %v9901_v21 = vld [vmem:[#allocation2 + $0x564] ss:$16 sps:$4 sm:$0xff]  }
 0x24d   : > { %5738 = vmatpush1.bf16.msra.mxu0 %v9809_v44  ;;  %v9904_v44 = vld [vmem:[#allocation2 + $0x56c] ss:$16 sps:$4 sm:$0xff]  }
 0x24e   : > { %6030 = vmatpush1.bf16.msra.mxu1 %v9812_v47  ;;  %5739 = vmatprep.subr.bf16.mxu0 %v9817_v15  ;;  %v9899_v47 = vld [vmem:[#allocation2 + $0x560] ss:$16 sps:$4 sm:$0xff]   ;;  %v9902_v15 = vld [vmem:[#allocation2 + $0x568] ss:$16 sps:$4 sm:$0xff]  }
 0x24f   : > { %6031 = vmatprep.subr.bf16.mxu1 %v9820_v17  ;;  %v9907_v17 = vld [vmem:[#allocation2 + $0x584] ss:$16 sps:$4 sm:$0xff]  }
 0x251   : > { %5740 = vmatpush1.bf16.msra.mxu0 %v9815_v48  ;;  %v9910_v48 = vld [vmem:[#allocation2 + $0x58c] ss:$16 sps:$4 sm:$0xff]  }
 0x252   : > { %6032 = vmatpush1.bf16.msra.mxu1 %v9818_v49  ;;  %5741 = vmatprep.subr.bf16.mxu0 %v9823_v50  ;;  %v9905_v49 = vld [vmem:[#allocation2 + $0x580] ss:$16 sps:$4 sm:$0xff]   ;;  %v9908_v50 = vld [vmem:[#allocation2 + $0x588] ss:$16 sps:$4 sm:$0xff]  }
 0x253   : > { %6033 = vmatprep.subr.bf16.mxu1 %v9826_v52  ;;  %v9913_v52 = vld [vmem:[#allocation2 + $0x5a4] ss:$16 sps:$4 sm:$0xff]  }
 0x255   : > { %5742 = vmatpush1.bf16.msra.mxu0 %v9821_v42  ;;  %v9916_v42 = vld [vmem:[#allocation2 + $0x5ac] ss:$16 sps:$4 sm:$0xff]  }
 0x256   : > { %6034 = vmatpush1.bf16.msra.mxu1 %v9824_v56  ;;  %5743 = vmatprep.subr.bf16.mxu0 %v9829_v36  ;;  %v9911_v56 = vld [vmem:[#allocation2 + $0x5a0] ss:$16 sps:$4 sm:$0xff]   ;;  %v9914_v36 = vld [vmem:[#allocation2 + $0x5a8] ss:$16 sps:$4 sm:$0xff]  }
 0x257   : > { %6035 = vmatprep.subr.bf16.mxu1 %v9832_v57  ;;  %v9919_v57 = vld [vmem:[#allocation2 + $0x5c4] ss:$16 sps:$4 sm:$0xff]  }
 0x259   : > { %5744 = vmatpush1.bf16.msra.mxu0 %v9827_v58  ;;  %v9922_v58 = vld [vmem:[#allocation2 + $0x5cc] ss:$16 sps:$4 sm:$0xff]  }
 0x25a   : > { %6036 = vmatpush1.bf16.msra.mxu1 %v9830_v60  ;;  %5786 = vmatprep.subr.bf16.mxu0 %v9835_v63  ;;  %v9917_v60 = vld [vmem:[#allocation2 + $0x5c0] ss:$16 sps:$4 sm:$0xff]   ;;  %v9920_v63 = vld [vmem:[#allocation2 + $0x5c8] ss:$16 sps:$4 sm:$0xff]  }
 0x25b   : > { %6078 = vmatprep.subr.bf16.mxu1 %v9838_v53  ;;  %v9925_v53 = vld [vmem:[#allocation2 + $0x5e4] ss:$16 sps:$4 sm:$0xff]  }
 0x25c   : > { %5746 = vmatmul.mubr.bf16.vlgmr.msra.gmra.mrb[32].mxu0 %v11863_v0 }
 0x25d   : > { %6038 = vmatmul.mubr.bf16.vlgmr.msra.gmra.mrb[32].mxu1 %v11863_v0  ;;  %5755 = vmatprep.mubr.bf16.mxu0 %v11978_v30  ;;  %v9856_v0 = vld [vmem:[#allocation2 + $0x46c] ss:$16 sps:$4 sm:$0xff]  }
 0x25e   : > { %6047 = vmatprep.mubr.bf16.mxu1 %v11978_v30  ;;  %5787 = vmatpush1.bf16.msra.mxu0 %v9833_v61  ;;  %v9851_v30 = vld [vmem:[#allocation2 + $0x460] ss:$16 sps:$4 sm:$0xff]   ;;  %v9928_v61 = vld [vmem:[#allocation2 + $0x5ec] ss:$16 sps:$4 sm:$0xff]  }
 0x25f   : > { %6079 = vmatpush1.bf16.msra.mxu1 %v9836_v2  ;;  %5788 = vmatprep.subr.bf16.mxu0 %v9841_v3  ;;  %v9923_v2 = vld [vmem:[#allocation2 + $0x5e0] ss:$16 sps:$4 sm:$0xff]   ;;  %v9926_v3 = vld [vmem:[#allocation2 + $0x5e8] ss:$16 sps:$4 sm:$0xff]  }
 0x260   : > { %6080 = vmatprep.subr.bf16.mxu1 %v9844_v5  ;;  %v9931_v5 = vld [vmem:[#allocation2 + $0x604] ss:$16 sps:$4 sm:$0xff]  }
 0x262   : > { %5789 = vmatpush1.bf16.msra.mxu0 %v9839_v7  ;;  %v9934_v7 = vld [vmem:[#allocation2 + $0x60c] ss:$16 sps:$4 sm:$0xff]  }
 0x263   : > { %6081 = vmatpush1.bf16.msra.mxu1 %v9842_v8  ;;  %5790 = vmatprep.subr.bf16.mxu0 %v9847_v10  ;;  %v920_v8 = vsub.s32 4, %v11814_v59  ;;  %v928_v10 = vsub.s32 6, %v11814_v59 }
 0x264   : > { %5756 = vmatmul.mubr.bf16.gmra.mrb[36].mxu0 %v11987_v38  ;;  %6082 = vmatprep.subr.bf16.mxu1 %v9850_v62  ;;  %v10313_v62 = vld [vmem:[%s12679_s2] sm:$0xff] }
 0x265   : > { %6048 = vmatmul.mubr.bf16.gmra.mrb[36].mxu1 %v11987_v38  ;;  %5765 = vmatprep.mubr.bf16.mxu0 %v11999_v43  ;;  %v9868_v38 = vld [vmem:[#allocation2 + $0x4ac] ss:$16 sps:$4 sm:$0xff]  }
 0x266   : > { %6057 = vmatprep.mubr.bf16.mxu1 %v11999_v43  ;;  %5791 = vmatpush1.bf16.msra.mxu0 %v9845_v16  ;;  %v9863_v43 = vld [vmem:[#allocation2 + $0x4a0] ss:$16 sps:$4 sm:$0xff]   ;;  %v12056_v16 = vrot.slane %v10313_v62, %v920_v8 }
 0x267   : > { %6083 = vmatpush1.bf16.msra.mxu1 %v9848_v20  ;;  %5792 = vmatprep.subr.bf16.mxu0 %v9853_v55  ;;  %v924_v20 = vsub.s32 5, %v11814_v59  ;;  %v12059_v55 = vrot.slane %v10313_v62, %v928_v10  ;;  %v9940_v10 = vld [vmem:[#allocation2 + $0x62c] ss:$16 sps:$4 sm:$0xff]  }
 0x268   : > { %6084 = vmatprep.subr.bf16.mxu1 %v9856_v0  ;;  %v932_v0 = vsub.s32 7, %v11814_v59 }
 0x26a   : > { %5793 = vmatpush1.bf16.msra.mxu0 %v9851_v30 }
 0x26b   : > { %6085 = vmatpush1.bf16.msra.mxu1 %v9854_v18  ;;  %5794 = vmatprep.subr.bf16.mxu0 %v9859_v24 }
 0x26c   : > { %5766 = vmatmul.mubr.bf16.gmra.mrb[40].mxu0 %v12009_v22  ;;  %6086 = vmatprep.subr.bf16.mxu1 %v9862_v26  ;;  %v12063_v26 = vrot.slane %v10313_v62, %v924_v20 }
 0x26d   : > { %6058 = vmatmul.mubr.bf16.gmra.mrb[40].mxu1 %v12009_v22  ;;  %5775 = vmatprep.mubr.bf16.mxu0 %v12013_v46  ;;  %v9880_v22 = vld [vmem:[#allocation2 + $0x4ec] ss:$16 sps:$4 sm:$0xff]  }
 0x26e   : > { %6067 = vmatprep.mubr.bf16.mxu1 %v12013_v46  ;;  %5795 = vmatpush1.bf16.msra.mxu0 %v9857_v27  ;;  %v9875_v46 = vld [vmem:[#allocation2 + $0x4e0] ss:$16 sps:$4 sm:$0xff]  }
 0x26f   : > { %6087 = vmatpush1.bf16.msra.mxu1 %v9860_v51  ;;  %5796 = vmatprep.subr.bf16.mxu0 %v9865_v13 }
 0x270   : > { %6088 = vmatprep.subr.bf16.mxu1 %v9868_v38 }
 0x272   : > { %5797 = vmatpush1.bf16.msra.mxu0 %v9863_v43 }
 0x273   : > { %6089 = vmatpush1.bf16.msra.mxu1 %v9866_v32  ;;  %5798 = vmatprep.subr.bf16.mxu0 %v9871_v12  ;;  %v12066_v32 = vrot.slane %v10313_v62, %v932_v0 }
 0x274   : > { %5776 = vmatmul.mubr.bf16.gmra.mrb[44].mxu0 %v12019_v33  ;;  %6090 = vmatprep.subr.bf16.mxu1 %v9874_v14 }
 0x275   : > { %6068 = vmatmul.mubr.bf16.gmra.mrb[44].mxu1 %v12019_v33  ;;  %v9890_v33 = vld [vmem:[#allocation2 + $0x528] ss:$16 sps:$4 sm:$0xff]  }
 0x276   : > { %5799 = vmatpush1.bf16.msra.mxu0 %v9869_v34 }
 0x277   : > { %6091 = vmatpush1.bf16.msra.mxu1 %v9872_v31  ;;  %5800 = vmatprep.subr.bf16.mxu0 %v9877_v23 }
 0x278   : > { %6092 = vmatprep.subr.bf16.mxu1 %v9880_v22 }
 0x27a   : > { %5801 = vmatpush1.bf16.msra.mxu0 %v9875_v46 }
 0x27b   : > { %6093 = vmatpush1.bf16.msra.mxu1 %v9878_v37  ;;  %5802 = vmatprep.subr.bf16.mxu0 %v9883_v9 }
 0x27c   : > { %6094 = vmatprep.subr.bf16.mxu1 %v9886_v28 }
 0x27e   : > { %5803 = vmatpush1.bf16.msra.mxu0 %v9881_v35 }
 0x27f   : > { %6095 = vmatpush1.bf16.msra.mxu1 %v9884_v39  ;;  %5804 = vmatprep.subr.bf16.mxu0 %v9889_v40 }
 0x280   : > { %6096 = vmatprep.subr.bf16.mxu1 %v9892_v41 }
 0x282   : > { %5805 = vmatpush1.bf16.msra.mxu0 %v9887_v29 }
 0x283   : > { %6097 = vmatpush1.bf16.msra.mxu1 %v9890_v33  ;;  %5806 = vmatprep.subr.bf16.mxu0 %v9895_v45 }
 0x284   : > { %6098 = vmatprep.subr.bf16.mxu1 %v9898_v54 }
 0x286   : > { %5807 = vmatpush1.bf16.msra.mxu0 %v9893_v19 }
 0x287   : > { %6099 = vmatpush1.bf16.msra.mxu1 %v9896_v25  ;;  %5808 = vmatprep.subr.bf16.mxu0 %v9901_v21 }
 0x288   : > { %6100 = vmatprep.subr.bf16.mxu1 %v9904_v44 }
 0x28a   : > { %5809 = vmatpush1.bf16.msra.mxu0 %v9899_v47 }
 0x28b   : > { %6101 = vmatpush1.bf16.msra.mxu1 %v9902_v15  ;;  %5810 = vmatprep.subr.bf16.mxu0 %v9907_v17 }
 0x28c   : > { %6102 = vmatprep.subr.bf16.mxu1 %v9910_v48 }
 0x28e   : > { %5811 = vmatpush1.bf16.msra.mxu0 %v9905_v49 }
 0x28f   : > { %6103 = vmatpush1.bf16.msra.mxu1 %v9908_v50  ;;  %5812 = vmatprep.subr.bf16.mxu0 %v9913_v52 }
 0x290   : > { %6104 = vmatprep.subr.bf16.mxu1 %v9916_v42 }
 0x292   : > { %5813 = vmatpush1.bf16.msra.mxu0 %v9911_v56 }
 0x293   : > { %6105 = vmatpush1.bf16.msra.mxu1 %v9914_v36  ;;  %5814 = vmatprep.subr.bf16.mxu0 %v9919_v57  ;;  %v9929_v57 = vld [vmem:[#allocation2 + $0x600] ss:$16 sps:$4 sm:$0xff]  }
 0x294   : > { %6106 = vmatprep.subr.bf16.mxu1 %v9922_v58  ;;  %v9932_v58 = vld [vmem:[#allocation2 + $0x608] ss:$16 sps:$4 sm:$0xff]  }
 0x296   : > { %5815 = vmatpush1.bf16.msra.mxu0 %v9917_v60 }
 0x297   : > { %6107 = vmatpush1.bf16.msra.mxu1 %v9920_v63  ;;  %5816 = vmatprep.subr.bf16.mxu0 %v9925_v53 }
 0x298   : > { %6108 = vmatprep.subr.bf16.mxu1 %v9928_v61 }
 0x29a   : > { %5817 = vmatpush1.bf16.msra.mxu0 %v9923_v2 }
 0x29b   : > { %6109 = vmatpush1.bf16.msra.mxu1 %v9926_v3  ;;  %5859 = vmatprep.subr.bf16.mxu0 %v9931_v5  ;;  %v9937_v5 = vld [vmem:[#allocation2 + $0x624] ss:$16 sps:$4 sm:$0xff]  }
 0x29c   : > { %6151 = vmatprep.subr.bf16.mxu1 %v9934_v7 }
 0x2af   : > { %v3600_v30 = vpop.f32.mrb[16].mxu0  ;;  %v3819_v24 = vpop.f32.mrb[16].mxu1 }
 0x2b0   : > { %v9241_v18 = vadd.f32 %v3600_v30, %v12056_v16  ;;  %v3602_v27 = vpop.f32.mrb[17].mxu0  ;;  %v9257_v51 = vadd.f32 %v3819_v24, %v12059_v55  ;;  %v3821_v13 = vpop.f32.mrb[17].mxu1 }
 0x2b1   : > { %v3604_v38 = vpop.f32.mrb[18].mxu0  ;;  %v3823_v14 = vpop.f32.mrb[18].mxu1  ;;  %v9242_v59 = vadd.f32 %v3602_v27, %v12063_v26  ;;  %v9258_v28 = vadd.f32 %v3821_v13, %v12066_v32  ;;  %v9935_v27 = vld [vmem:[#allocation2 + $0x620] ss:$16 sps:$4 sm:$0xff]   ;;  %v9938_v13 = vld [vmem:[#allocation2 + $0x628] ss:$16 sps:$4 sm:$0xff]  }
 0x2b2   : > { %v3926_v43 = vmul.f32 0.01, %v9241_v18  ;;  %v9243_v12 = vadd.f32 %v3604_v38, %v12056_v16  ;;  %v3606_v34 = vpop.f32.mrb[19].mxu0  ;;  %vm3862_vm0 = vcmp.ge.f32.partialorder %v9241_v18, 0.0  ;;  %v3825_v31 = vpop.f32.mrb[19].mxu1  ;;  %v9259_v46 = vadd.f32 %v3823_v14, %v12059_v55 }
 0x2b3   : > { %v3928_v23 = vmul.f32 0.01, %v9257_v51  ;;  %v9244_v37 = vadd.f32 %v3606_v34, %v12063_v26  ;;  %vm3864_vm2 = vcmp.ge.f32.partialorder %v9257_v51, 0.0  ;;  %v9260_v35 = vadd.f32 %v3825_v31, %v12066_v32 }
 0x2b4   : > { %vm3870_vm1 = vcmp.ge.f32.partialorder %v9243_v12, 0.0  ;;  %v3934_v22 = vmul.f32 0.01, %v9243_v12  ;;  %v3990_v9 = vsel %vm3862_vm0, %v9241_v18, %v3926_v43  ;;  %vm3872_vm3 = vcmp.ge.f32.partialorder %v9259_v46, 0.0 }
 0x2b5   : > { %v3936_v40 = vmul.f32 0.01, %v9259_v46  ;;  %vm3871_vm4 = vcmp.ge.f32.partialorder %v9244_v37, 0.0  ;;  %v3927_v29 = vmul.f32 0.01, %v9242_v59  ;;  %v3992_v19 = vsel %vm3864_vm2, %v9257_v51, %v3928_v23 }
 0x2b6   : > { %v3998_v39 = vsel %vm3870_vm1, %v9243_v12, %v3934_v22  ;;  %v3935_v45 = vmul.f32 0.01, %v9244_v37  ;;  %vm3863_vm5 = vcmp.ge.f32.partialorder %v9242_v59, 0.0  ;;  %v3937_v17 = vmul.f32 0.01, %v9260_v35 }
 0x2b7   : > { %v3610_v41 = vpop.f32.mrb[20].mxu0  ;;  %v4054_v33 = vpack.c.bf16 %v3998_v39, %v3990_v9  ;;  %v3829_v54 = vpop.f32.mrb[20].mxu1  ;;  %v4000_v25 = vsel %vm3872_vm3, %v9259_v46, %v3936_v40  ;;  %v3929_v42 = vmul.f32 0.01, %v9258_v28  ;;  %vm3873_vm6 = vcmp.ge.f32.partialorder %v9260_v35, 0.0 }
 0x2b8   : > { %v9245_v21 = vadd.f32 %v3610_v41, %v12056_v16  ;;  %v3612_v44 = vpop.f32.mrb[21].mxu0  ;;  %v3831_v47 = vpop.f32.mrb[21].mxu1  ;;  %v12075_v15 = vpack.c.bf16 %v4000_v25, %v3992_v19  ;;  %v3999_v52 = vsel %vm3871_vm4, %v9244_v37, %v3935_v45  ;;  %vm3865_vm7 = vcmp.ge.f32.partialorder %v9258_v28, 0.0  ;;  %v9943_v9 = vld [vmem:[#allocation2 + $0x644] ss:$16 sps:$4 sm:$0xff]  }
 0x2b9   : > { %v9246_v48 = vadd.f32 %v3612_v44, %v12063_v26  ;;  %v3614_v49 = vpop.f32.mrb[22].mxu0  ;;  %v3833_v50 = vpop.f32.mrb[22].mxu1  ;;  %v12080_v56 = vadd.f32 %v3829_v54, %v12059_v55  ;;  %v3991_v36 = vsel %vm3863_vm5, %v9242_v59, %v3927_v29  ;;  %v12083_v63 = vadd.f32 %v3831_v47, %v12066_v32  ;;  %v9941_v29 = vld [vmem:[#allocation2 + $0x640] ss:$16 sps:$4 sm:$0xff]   ;;  %v9946_v45 = vld [vmem:[#allocation2 + $0x64c] ss:$16 sps:$4 sm:$0xff]  }
 0x2ba   : > { %v3942_v60 = vmul.f32 0.01, %v9245_v21  ;;  %v9247_v53 = vadd.f32 %v3614_v49, %v12056_v16  ;;  %v3616_v61 = vpop.f32.mrb[23].mxu0  ;;  %v3835_v2 = vpop.f32.mrb[23].mxu1  ;;  %v4055_v3 = vpack.c.bf16 %v3999_v52, %v3991_v36  ;;  %vm3878_vm8 = vcmp.ge.f32.partialorder %v9245_v21, 0.0 }
 0x2bb   : > { %v3943_v7 = vmul.f32 0.01, %v9246_v48  ;;  %v9248_v8 = vadd.f32 %v3616_v61, %v12063_v26  ;;  %v4001_v62 = vsel %vm3873_vm6, %v9260_v35, %v3937_v17  ;;  %vm3879_vm9 = vcmp.ge.f32.partialorder %v9246_v48, 0.0 }
 0x2bc   : > { %vm3886_vm10 = vcmp.ge.f32.partialorder %v9247_v53, 0.0  ;;  %v3950_v20 = vmul.f32 0.01, %v9247_v53  ;;  %5818 = vmatprep.mubr.bf16.mxu0 %v4055_v3  ;;  %6110 = vmatprep.mubr.bf16.mxu1 %v4055_v3  ;;  %v3993_v0 = vsel %vm3865_vm7, %v9258_v28, %v3929_v42  ;;  %v12090_v30 = vadd.f32 %v3833_v50, %v12059_v55  ;;  %v9952_v42 = vld [vmem:[#allocation2 + $0x66c] ss:$16 sps:$4 sm:$0xff]  }
 0x2bd   : > { %vm3887_vm11 = vcmp.ge.f32.partialorder %v9248_v8, 0.0  ;;  %v3951_v18 = vmul.f32 0.01, %v9248_v8  ;;  %v12093_v24 = vadd.f32 %v3835_v2, %v12066_v32  ;;  %5819 = vmatmul.mubr.bf16.vlgmr.msra.gmra.mrb[32].mxu0 %v4054_v33  ;;  %6111 = vmatmul.mubr.bf16.vlgmr.msra.gmra.mrb[32].mxu1 %v4054_v33  ;;  %v12096_v51 = vmul.f32 0.01, %v12080_v56 }
 0x2be   : > { %5860 = vmatpush1.bf16.msra.mxu0 %v9929_v57  ;;  %6152 = vmatpush1.bf16.msra.mxu1 %v9932_v58  ;;  %v4006_v12 = vsel %vm3878_vm8, %v9245_v21, %v3942_v60  ;;  %v4014_v14 = vsel %vm3886_vm10, %v9247_v53, %v3950_v20  ;;  %v12100_v34 = vpack.c.bf16 %v4001_v62, %v3993_v0  ;;  %v3945_v59 = vmul.f32 0.01, %v12083_v63  ;;  %v9944_v33 = vld [vmem:[#allocation2 + $0x648] ss:$16 sps:$4 sm:$0xff]   ;;  %v9949_v21 = vld [vmem:[#allocation2 + $0x664] ss:$16 sps:$4 sm:$0xff]  }
 0x2bf   : > { %v3620_v38 = vpop.f32.mrb[24].mxu0  ;;  %v3839_v43 = vpop.f32.mrb[24].mxu1  ;;  %5861 = vmatprep.subr.bf16.mxu0 %v9937_v5  ;;  %6153 = vmatprep.subr.bf16.mxu1 %v9940_v10  ;;  %v4007_v46 = vsel %vm3879_vm9, %v9246_v48, %v3943_v7  ;;  %v4015_v37 = vsel %vm3887_vm11, %v9248_v8, %v3951_v18  ;;  %v4062_v54 = vpack.c.bf16 %v4014_v14, %v4006_v12  ;;  %vm3881_vm12 = vcmp.ge.f32.partialorder %v12083_v63, 0.0  ;;  %v9947_v60 = vld [vmem:[#allocation2 + $0x660] ss:$16 sps:$4 sm:$0xff]  }
 0x2c0   : > { %v9249_v31 = vadd.f32 %v3620_v38, %v12056_v16  ;;  %v3622_v23 = vpop.f32.mrb[25].mxu0  ;;  %v3841_v22 = vpop.f32.mrb[25].mxu1  ;;  %v12107_v28 = vadd.f32 %v3839_v43, %v12059_v55  ;;  %v4063_v41 = vpack.c.bf16 %v4015_v37, %v4007_v46  ;;  %v12112_v19 = vmul.f32 0.01, %v12090_v30  ;;  %v9950_v53 = vld [vmem:[#allocation2 + $0x668] ss:$16 sps:$4 sm:$0xff]  }
 0x2c1   : > { %v9250_v35 = vadd.f32 %v3622_v23, %v12063_v26  ;;  %v3624_v39 = vpop.f32.mrb[26].mxu0  ;;  %v3843_v40 = vpop.f32.mrb[26].mxu1  ;;  %vm3889_vm13 = vcmp.ge.f32.partialorder %v12093_v24, 0.0  ;;  %v12116_v25 = vadd.f32 %v3841_v22, %v12066_v32  ;;  %v3953_v44 = vmul.f32 0.01, %v12093_v24 }
 0x2c2   : > { %v3958_v47 = vmul.f32 0.01, %v9249_v31  ;;  %5862 = vmatpush1.bf16.msra.mxu0 %v9935_v27  ;;  %6154 = vmatpush1.bf16.msra.mxu1 %v9938_v13  ;;  %vm3894_vm14 = vcmp.ge.f32.partialorder %v9249_v31, 0.0  ;;  %v9251_v48 = vadd.f32 %v3624_v39, %v12056_v16  ;;  %v12121_v49 = vadd.f32 %v3843_v40, %v12059_v55  ;;  %v3626_v50 = vpop.f32.mrb[27].mxu0  ;;  %v3845_v52 = vpop.f32.mrb[27].mxu1 }
 0x2c3   : > { %v3959_v17 = vmul.f32 0.01, %v9250_v35  ;;  %vm3895_vm15 = vcmp.ge.f32.partialorder %v9250_v35, 0.0  ;;  %5828 = vmatprep.mubr.bf16.mxu0 %v4063_v41  ;;  %5863 = vmatprep.subr.bf16.mxu0 %v9943_v9  ;;  %vm3880_vm0 = vcmp.ge.f32.partialorder %v12080_v56, 0.0  ;;  %v12125_v36 = vmul.f32 0.01, %v12107_v28 }
 0x2c4   : > { %v9252_v57 = vadd.f32 %v3626_v50, %v12063_v26  ;;  %v12129_v58 = vadd.f32 %v3845_v52, %v12066_v32  ;;  %6120 = vmatprep.mubr.bf16.mxu1 %v4063_v41  ;;  %6155 = vmatprep.subr.bf16.mxu1 %v9946_v45  ;;  %v12134_v2 = vsel %vm3881_vm12, %v12083_v63, %v3945_v59  ;;  %vm3888_vm1 = vcmp.ge.f32.partialorder %v12090_v30, 0.0  ;;  %v9955_v7 = vld [vmem:[#allocation2 + $0x684] ss:$16 sps:$4 sm:$0xff]   ;;  %v9958_v63 = vld [vmem:[#allocation2 + $0x68c] ss:$16 sps:$4 sm:$0xff]  }
 0x2c5   : > { %vm3897_vm2 = vcmp.ge.f32.partialorder %v12116_v25, 0.0  ;;  %v12139_v3 = vmul.f32 0.01, %v12116_v25  ;;  %vm3902_vm3 = vcmp.ge.f32.partialorder %v9251_v48, 0.0  ;;  %v3966_v5 = vmul.f32 0.01, %v9251_v48  ;;  %5829 = vmatmul.mubr.bf16.gmra.mrb[36].mxu0 %v4062_v54  ;;  %6121 = vmatmul.mubr.bf16.gmra.mrb[36].mxu1 %v4062_v54 }
 0x2c6   : > { %vm3903_vm4 = vcmp.ge.f32.partialorder %v9252_v57, 0.0  ;;  %v3967_v8 = vmul.f32 0.01, %v9252_v57  ;;  %5864 = vmatpush1.bf16.msra.mxu0 %v9941_v29  ;;  %6156 = vmatpush1.bf16.msra.mxu1 %v9944_v33  ;;  %v4023_v10 = vsel %vm3895_vm15, %v9250_v35, %v3959_v17  ;;  %v4022_v62 = vsel %vm3894_vm14, %v9249_v31, %v3958_v47  ;;  %v9953_v54 = vld [vmem:[#allocation2 + $0x680] ss:$16 sps:$4 sm:$0xff]  }
 0x2c7   : > { %v3630_v61 = vpop.f32.mrb[28].mxu0  ;;  %vm3896_vm5 = vcmp.ge.f32.partialorder %v12107_v28, 0.0  ;;  %vm3904_vm6 = vcmp.ge.f32.partialorder %v12121_v49, 0.0  ;;  %v12146_v20 = vmul.f32 0.01, %v12121_v49  ;;  %vm3905_vm7 = vcmp.ge.f32.partialorder %v12129_v58, 0.0  ;;  %5865 = vmatprep.subr.bf16.mxu0 %v9949_v21  ;;  %6157 = vmatprep.subr.bf16.mxu1 %v9952_v42 }
 0x2c8   : > { %v9253_v0 = vadd.f32 %v3630_v61, %v12056_v16  ;;  %v3849_v18 = vpop.f32.mrb[28].mxu1  ;;  %v3632_v27 = vpop.f32.mrb[29].mxu0  ;;  %v4030_v13 = vsel %vm3902_vm3, %v9251_v48, %v3966_v5  ;;  %v12152_v38 = vmul.f32 0.01, %v12129_v58  ;;  %v4031_v9 = vsel %vm3903_vm4, %v9252_v57, %v3967_v8  ;;  %v9956_v21 = vld [vmem:[#allocation2 + $0x688] ss:$16 sps:$4 sm:$0xff]  }
 0x2c9   : > { %v12155_v43 = vadd.f32 %v3849_v18, %v12059_v55  ;;  %v9254_v12 = vadd.f32 %v3632_v27, %v12063_v26  ;;  %v3851_v14 = vpop.f32.mrb[29].mxu1  ;;  %v3634_v59 = vpop.f32.mrb[30].mxu0  ;;  %v4070_v31 = vpack.c.bf16 %v4030_v13, %v4022_v62  ;;  %v4017_v35 = vsel %vm3889_vm13, %v12093_v24, %v3953_v44  ;;  %v9961_v17 = vld [vmem:[#allocation2 + $0x6a4] ss:$16 sps:$4 sm:$0xff]   ;;  %v9964_v48 = vld [vmem:[#allocation2 + $0x6ac] ss:$16 sps:$4 sm:$0xff]  }
 0x2ca   : > { %v12159_v23 = vadd.f32 %v3851_v14, %v12066_v32  ;;  %v9255_v22 = vadd.f32 %v3634_v59, %v12056_v16  ;;  %v3853_v46 = vpop.f32.mrb[30].mxu1  ;;  %v3636_v37 = vpop.f32.mrb[31].mxu0  ;;  %vm3910_vm8 = vcmp.ge.f32.partialorder %v9253_v0, 0.0  ;;  %v3974_v39 = vmul.f32 0.01, %v9253_v0  ;;  %5866 = vmatpush1.bf16.msra.mxu0 %v9947_v60  ;;  %6158 = vmatpush1.bf16.msra.mxu1 %v9950_v53 }
 0x2cb   : > { %vm3912_vm9 = vcmp.ge.f32.partialorder %v12155_v43, 0.0  ;;  %v3975_v40 = vmul.f32 0.01, %v9254_v12  ;;  %v3976_v41 = vmul.f32 0.01, %v12155_v43  ;;  %vm3911_vm10 = vcmp.ge.f32.partialorder %v9254_v12, 0.0  ;;  %5867 = vmatprep.subr.bf16.mxu0 %v9955_v7  ;;  %6159 = vmatprep.subr.bf16.mxu1 %v9958_v63 }
 0x2cc   : > { %vm3918_vm11 = vcmp.ge.f32.partialorder %v9255_v22, 0.0  ;;  %v3982_v16 = vmul.f32 0.01, %v9255_v22  ;;  %vm3913_vm12 = vcmp.ge.f32.partialorder %v12159_v23, 0.0  ;;  %v9271_v29 = vadd.f32 %v3853_v46, %v12059_v55  ;;  %v3855_v33 = vpop.f32.mrb[31].mxu1 }
 0x2cd   : > { %v9256_v24 = vadd.f32 %v3636_v37, %v12063_v26  ;;  %v4071_v45 = vpack.c.bf16 %v4031_v9, %v4023_v10  ;;  %v3977_v44 = vmul.f32 0.01, %v12159_v23  ;;  %v9272_v47 = vadd.f32 %v3855_v33, %v12066_v32  ;;  %v9959_v61 = vld [vmem:[#allocation2 + $0x6a0] ss:$16 sps:$4 sm:$0xff]   ;;  %v9970_v10 = vld [vmem:[#allocation2 + $0x6cc] ss:$16 sps:$4 sm:$0xff]  }
 0x2ce   : > { %v4046_v50 = vsel %vm3918_vm11, %v9255_v22, %v3982_v16  ;;  %v12174_v52 = vpack.c.bf16 %v4017_v35, %v12134_v2  ;;  %v4039_v55 = vsel %vm3911_vm10, %v9254_v12, %v3975_v40  ;;  %v4038_v26 = vsel %vm3910_vm8, %v9253_v0, %v3974_v39  ;;  %5868 = vmatpush1.bf16.msra.mxu0 %v9953_v54  ;;  %v9962_v2 = vld [vmem:[#allocation2 + $0x6a8] ss:$16 sps:$4 sm:$0xff]   ;;  %v9965_v18 = vld [vmem:[#allocation2 + $0x6c0] ss:$16 sps:$4 sm:$0xff]   ;;  %v9973_v13 = vld [vmem:[#allocation2 + $0x6e4] ss:$16 sps:$4 sm:$0xff]  }
 0x2cf   : > { %vm3919_vm13 = vcmp.ge.f32.partialorder %v9256_v24, 0.0  ;;  %v3983_v42 = vmul.f32 0.01, %v9256_v24  ;;  %5838 = vmatprep.mubr.bf16.mxu0 %v4071_v45  ;;  %6130 = vmatprep.mubr.bf16.mxu1 %v4071_v45  ;;  %v3984_v57 = vmul.f32 0.01, %v9271_v29  ;;  %v4078_v53 = vpack.c.bf16 %v4046_v50, %v4038_v26 }
 0x2d0   : > { %v3985_v60 = vmul.f32 0.01, %v9272_v47  ;;  %5839 = vmatmul.mubr.bf16.gmra.mrb[40].mxu0 %v4070_v31  ;;  %6131 = vmatmul.mubr.bf16.gmra.mrb[40].mxu1 %v4070_v31  ;;  %v4008_v32 = vsel %vm3880_vm0, %v12080_v56, %v12096_v51  ;;  %vm3921_vm14 = vcmp.ge.f32.partialorder %v9272_v47, 0.0  ;;  %v4016_v7 = vsel %vm3888_vm1, %v12090_v30, %v12112_v19  ;;  %v9967_v51 = vld [vmem:[#allocation2 + $0x6c4] ss:$16 sps:$4 sm:$0xff]  }
 0x2d1   : > { %6160 = vmatpush1.bf16.msra.mxu1 %v9956_v21  ;;  %v4047_v5 = vsel %vm3919_vm13, %v9256_v24, %v3983_v42  ;;  %v4025_v8 = vsel %vm3897_vm2, %v12116_v25, %v12139_v3  ;;  %vm3920_vm15 = vcmp.ge.f32.partialorder %v9271_v29, 0.0  ;;  %5869 = vmatprep.subr.bf16.mxu0 %v9961_v17  ;;  %v12191_v63 = vpack.c.bf16 %v4016_v7, %v4008_v32  ;;  %v9968_v27 = vld [vmem:[#allocation2 + $0x6c8] ss:$16 sps:$4 sm:$0xff]   ;;  %v9971_v12 = vld [vmem:[#allocation2 + $0x6e0] ss:$16 sps:$4 sm:$0xff]  }
 0x2d2   : > { %6161 = vmatprep.subr.bf16.mxu1 %v9964_v48  ;;  %v4079_v56 = vpack.c.bf16 %v4047_v5, %v4039_v55  ;;  %v4033_v62 = vsel %vm3905_vm7, %v12129_v58, %v12152_v38  ;;  %v4024_v30 = vsel %vm3896_vm5, %v12107_v28, %v12125_v36  ;;  %v4032_v19 = vsel %vm3904_vm6, %v12121_v49, %v12146_v20  ;;  %v9976_v38 = vld [vmem:[#allocation2 + $0x6ec] ss:$16 sps:$4 sm:$0xff]   ;;  %v9974_v14 = vld [vmem:[#allocation2 + $0x6e8] ss:$16 sps:$4 sm:$0xff]   ;;  %v9979_v59 = vld [vmem:[#allocation2 + $0x704] ss:$16 sps:$4 sm:$0xff]  }
 0x2d3   : > { %v12197_v0 = vpack.c.bf16 %v4033_v62, %v4025_v8  ;;  %v12207_v25 = vpack.c.bf16 %v4032_v19, %v4024_v30  ;;  %v4041_v58 = vsel %vm3913_vm12, %v12159_v23, %v3977_v44  ;;  %v4049_v3 = vsel %vm3921_vm14, %v9272_v47, %v3985_v60  ;;  %5870 = vmatpush1.bf16.msra.mxu0 %v9959_v61  ;;  %v9977_v31 = vld [vmem:[#allocation2 + $0x700] ss:$16 sps:$4 sm:$0xff]   ;;  %v9980_v23 = vld [vmem:[#allocation2 + $0x708] ss:$16 sps:$4 sm:$0xff]   ;;  %v9985_v22 = vld [vmem:[#allocation2 + $0x724] ss:$16 sps:$4 sm:$0xff]  }
 0x2d4   : > { %5848 = vmatprep.mubr.bf16.mxu0 %v4079_v56  ;;  %6140 = vmatprep.mubr.bf16.mxu1 %v4079_v56  ;;  %v12213_v28 = vpack.c.bf16 %v4049_v3, %v4041_v58  ;;  %v4040_v49 = vsel %vm3912_vm9, %v12155_v43, %v3976_v41  ;;  %v4048_v36 = vsel %vm3920_vm15, %v9271_v29, %v3984_v57  ;;  %v9982_v43 = vld [vmem:[#allocation2 + $0x70c] ss:$16 sps:$4 sm:$0xff]   ;;  %v9983_v37 = vld [vmem:[#allocation2 + $0x720] ss:$16 sps:$4 sm:$0xff]   ;;  %v9986_v9 = vld [vmem:[#allocation2 + $0x728] ss:$16 sps:$4 sm:$0xff]  }
 0x2d5   : > { %6162 = vmatpush1.bf16.msra.mxu1 %v9962_v2  ;;  %5871 = vmatprep.subr.bf16.mxu0 %v9967_v51  ;;  %v12219_v20 = vpack.c.bf16 %v4048_v36, %v4040_v49  ;;  %v9988_v46 = vld [vmem:[#allocation2 + $0x72c] ss:$16 sps:$4 sm:$0xff]   ;;  %v9991_v35 = vld [vmem:[#allocation2 + $0x744] ss:$16 sps:$4 sm:$0xff]   ;;  %v9989_v39 = vld [vmem:[#allocation2 + $0x740] ss:$16 sps:$4 sm:$0xff]  }
 0x2d6   : > { %6163 = vmatprep.subr.bf16.mxu1 %v9970_v10  ;;  %v9992_v40 = vld [vmem:[#allocation2 + $0x748] ss:$16 sps:$4 sm:$0xff]   ;;  %v9997_v41 = vld [vmem:[#allocation2 + $0x764] ss:$16 sps:$4 sm:$0xff]   ;;  %v10000_v16 = vld [vmem:[#allocation2 + $0x76c] ss:$16 sps:$4 sm:$0xff]  }
 0x2d7   : > { %5872 = vmatpush1.bf16.msra.mxu0 %v9965_v18  ;;  %v9995_v29 = vld [vmem:[#allocation2 + $0x760] ss:$16 sps:$4 sm:$0xff]   ;;  %v9998_v24 = vld [vmem:[#allocation2 + $0x768] ss:$16 sps:$4 sm:$0xff]   ;;  %v10003_v33 = vld [vmem:[#allocation2 + $0x784] ss:$16 sps:$4 sm:$0xff]  }
 0x2d8   : > { %5849 = vmatmul.mubr.bf16.gmra.mrb[44].mxu0 %v4078_v53  ;;  %6141 = vmatmul.mubr.bf16.gmra.mrb[44].mxu1 %v4078_v53  ;;  %v10006_v45 = vld [vmem:[#allocation2 + $0x78c] ss:$16 sps:$4 sm:$0xff]   ;;  %v10001_v54 = vld [vmem:[#allocation2 + $0x780] ss:$16 sps:$4 sm:$0xff]   ;;  %v10004_v21 = vld [vmem:[#allocation2 + $0x788] ss:$16 sps:$4 sm:$0xff]  }
 0x2d9   : > { %6164 = vmatpush1.bf16.msra.mxu1 %v9968_v27  ;;  %5891 = vmatprep.mubr.bf16.mxu0 %v12100_v34  ;;  %v10009_v44 = vld [vmem:[#allocation2 + $0x7a4] ss:$16 sps:$4 sm:$0xff]   ;;  %v10012_v47 = vld [vmem:[#allocation2 + $0x7ac] ss:$16 sps:$4 sm:$0xff]   ;;  %v10007_v17 = vld [vmem:[#allocation2 + $0x7a0] ss:$16 sps:$4 sm:$0xff]  }
 0x2da   : > { %6183 = vmatprep.mubr.bf16.mxu1 %v12100_v34  ;;  %5873 = vmatprep.subr.bf16.mxu0 %v9973_v13  ;;  %v9994_v34 = vld [vmem:[#allocation2 + $0x74c] ss:$16 sps:$4 sm:$0xff]   ;;  %v10010_v48 = vld [vmem:[#allocation2 + $0x7a8] ss:$16 sps:$4 sm:$0xff]   ;;  %v10015_v50 = vld [vmem:[#allocation2 + $0x7c4] ss:$16 sps:$4 sm:$0xff]  }
 0x2db   : > { %6165 = vmatprep.subr.bf16.mxu1 %v9976_v38  ;;  %5874 = vmatpush1.bf16.msra.mxu0 %v9971_v12  ;;  %v10018_v42 = vld [vmem:[#allocation2 + $0x7cc] ss:$16 sps:$4 sm:$0xff]   ;;  %v10013_v55 = vld [vmem:[#allocation2 + $0x7c0] ss:$16 sps:$4 sm:$0xff]   ;;  %v10016_v26 = vld [vmem:[#allocation2 + $0x7c8] ss:$16 sps:$4 sm:$0xff]  }
 0x2dc   : > { %5875 = vmatprep.subr.bf16.mxu0 %v9979_v59  ;;  %v10021_v57 = vld [vmem:[#allocation2 + $0x7e4] ss:$16 sps:$4 sm:$0xff]   ;;  %v10024_v60 = vld [vmem:[#allocation2 + $0x7ec] ss:$16 sps:$4 sm:$0xff]   ;;  %v10019_v53 = vld [vmem:[#allocation2 + $0x7e0] ss:$16 sps:$4 sm:$0xff]  }
 0x2dd   : > { %6166 = vmatpush1.bf16.msra.mxu1 %v9974_v14  ;;  %v10022_v32 = vld [vmem:[#allocation2 + $0x7e8] ss:$16 sps:$4 sm:$0xff]   ;;  %v10027_v61 = vld [vmem:[%s12682_s5 + $0x4] ss:$8 sps:$4 sm:$0xff]   ;;  %v10030_v5 = vld [vmem:[%s12682_s5 + $0x14] ss:$8 sps:$4 sm:$0xff]  }
 0x2de   : > { %6167 = vmatprep.subr.bf16.mxu1 %v9982_v43  ;;  %v10025_v2 = vld [vmem:[%s12682_s5] ss:$8 sps:$4 sm:$0xff]   ;;  %v10028_v7 = vld [vmem:[%s12682_s5 + $0x10] ss:$8 sps:$4 sm:$0xff]   ;;  %v10033_v8 = vld [vmem:[%s12682_s5 + $0x24] ss:$8 sps:$4 sm:$0xff]  }
 0x2df   : > { %5876 = vmatpush1.bf16.msra.mxu0 %v9977_v31  ;;  %v10031_v56 = vld [vmem:[%s12682_s5 + $0x20] ss:$8 sps:$4 sm:$0xff]   ;;  %v10039_v51 = vld [vmem:[%s12682_s5 + $0x44] ss:$8 sps:$4 sm:$0xff]   ;;  %v10040_v62 = vld [vmem:[%s12682_s5 + $0x50] ss:$8 sps:$4 sm:$0xff]  }
 0x2e0   : > { %5877 = vmatprep.subr.bf16.mxu0 %v9985_v22  ;;  %v10037_v10 = vld [vmem:[%s12682_s5 + $0x40] ss:$8 sps:$4 sm:$0xff]   ;;  %v10048_v19 = vld [vmem:[%s12682_s5 + $0x74] ss:$8 sps:$4 sm:$0xff]   ;;  %v10051_v58 = vld [vmem:[%s12682_s5 + $0x84] ss:$8 sps:$4 sm:$0xff]  }
 0x2e1   : > { %6168 = vmatpush1.bf16.msra.mxu1 %v9980_v23  ;;  %v10043_v30 = vld [vmem:[%s12682_s5 + $0x60] ss:$8 sps:$4 sm:$0xff]   ;;  %v10054_v18 = vld [vmem:[%s12682_s5 + $0x94] ss:$8 sps:$4 sm:$0xff]   ;;  %v10052_v27 = vld [vmem:[%s12682_s5 + $0x90] ss:$8 sps:$4 sm:$0xff]  }
 0x2e2   : > { %6169 = vmatprep.subr.bf16.mxu1 %v9988_v46  ;;  %v10049_v3 = vld [vmem:[%s12682_s5 + $0x80] ss:$8 sps:$4 sm:$0xff]   ;;  %v10060_v36 = vld [vmem:[%s12682_s5 + $0xb4] ss:$8 sps:$4 sm:$0xff]   ;;  %v10063_v13 = vld [vmem:[%s12682_s5 + $0xc4] ss:$8 sps:$4 sm:$0xff]  }
 0x2e3   : > { %5878 = vmatpush1.bf16.msra.mxu0 %v9983_v37  ;;  %v10055_v49 = vld [vmem:[%s12682_s5 + $0xa0] ss:$8 sps:$4 sm:$0xff]   ;;  %v10066_v12 = vld [vmem:[%s12682_s5 + $0xd4] ss:$8 sps:$4 sm:$0xff]   ;;  %v10064_v14 = vld [vmem:[%s12682_s5 + $0xd0] ss:$8 sps:$4 sm:$0xff]  }
 0x2e4   : > { %5879 = vmatprep.subr.bf16.mxu0 %v9991_v35  ;;  %v10061_v38 = vld [vmem:[%s12682_s5 + $0xc0] ss:$8 sps:$4 sm:$0xff]   ;;  %v10069_v43 = vld [vmem:[%s12682_s5 + $0xe4] ss:$8 sps:$4 sm:$0xff]   ;;  %v10072_v31 = vld [vmem:[%s12682_s5 + $0xf4] ss:$8 sps:$4 sm:$0xff]  }
 0x2e5   : > { %6170 = vmatpush1.bf16.msra.mxu1 %v9986_v9  ;;  %v10067_v59 = vld [vmem:[%s12682_s5 + $0xe0] ss:$8 sps:$4 sm:$0xff]   ;;  %v10070_v23 = vld [vmem:[%s12682_s5 + $0xf0] ss:$8 sps:$4 sm:$0xff]   ;;  %v10075_v22 = vld [vmem:[%s12682_s5 + $0x104] ss:$8 sps:$4 sm:$0xff]  }
 0x2e6   : > { %6171 = vmatprep.subr.bf16.mxu1 %v9994_v34  ;;  %v10121_v46 = vld [vmem:[#allocation4] ss:$16 sps:$4 sm:$0xff]   ;;  %v10123_v37 = vld [vmem:[#allocation4 + $0x4] ss:$16 sps:$4 sm:$0xff]  }
 0x2e7   : > { %5880 = vmatpush1.bf16.msra.mxu0 %v9989_v39  ;;  %v10126_v9 = vld [vmem:[#allocation4 + $0x24] ss:$16 sps:$4 sm:$0xff]   ;;  %v10124_v35 = vld [vmem:[#allocation4 + $0x20] ss:$16 sps:$4 sm:$0xff]  }
 0x2e8   : > { %5881 = vmatprep.subr.bf16.mxu0 %v9997_v41  ;;  %v10129_v34 = vld [vmem:[#allocation4 + $0x44] ss:$16 sps:$4 sm:$0xff]   ;;  %v10127_v39 = vld [vmem:[#allocation4 + $0x40] ss:$16 sps:$4 sm:$0xff]  }
 0x2e9   : > { %6172 = vmatpush1.bf16.msra.mxu1 %v9992_v40  ;;  %v10132_v40 = vld [vmem:[#allocation4 + $0x64] ss:$16 sps:$4 sm:$0xff]   ;;  %v10130_v41 = vld [vmem:[#allocation4 + $0x60] ss:$16 sps:$4 sm:$0xff]  }
 0x2ea   : > { %6173 = vmatprep.subr.bf16.mxu1 %v10000_v16  ;;  %v10135_v16 = vld [vmem:[#allocation4 + $0x84] ss:$16 sps:$4 sm:$0xff]  }
 0x2eb   : > { %5882 = vmatpush1.bf16.msra.mxu0 %v9995_v29  ;;  %v10133_v29 = vld [vmem:[#allocation4 + $0x80] ss:$16 sps:$4 sm:$0xff]  }
 0x2ec   : > { %5883 = vmatprep.subr.bf16.mxu0 %v10003_v33  ;;  %v10138_v33 = vld [vmem:[#allocation4 + $0xa4] ss:$16 sps:$4 sm:$0xff]  }
 0x2ed   : > { %6174 = vmatpush1.bf16.msra.mxu1 %v9998_v24  ;;  %v4338_v24 = vld [vmem:[%s12681_s4] sm:$0xf] }
 0x2ee   : > { %6175 = vmatprep.subr.bf16.mxu1 %v10006_v45  ;;  %v12340_v45 = vrot.slane %v4338_v24, %v11818_v1 }
 0x2ef   : > { %5884 = vmatpush1.bf16.msra.mxu0 %v10001_v54  ;;  %v12343_v54 = vrot.slane %v4338_v24, %v11824_v4 }
 0x2f0   : > { %5885 = vmatprep.subr.bf16.mxu0 %v10009_v44  ;;  %v12346_v44 = vrot.slane %v4338_v24, %v11827_v6 }
 0x2f1   : > { %6176 = vmatpush1.bf16.msra.mxu1 %v10004_v21  ;;  %v10136_v21 = vld [vmem:[#allocation4 + $0xa0] ss:$16 sps:$4 sm:$0xff]  }
 0x2f2   : > { %6177 = vmatprep.subr.bf16.mxu1 %v10012_v47  ;;  %v12349_v47 = vrot.slane %v4338_v24, %v11834_v11 }
 0x2f3   : > { %5886 = vmatpush1.bf16.msra.mxu0 %v10007_v17  ;;  %v10141_v17 = vld [vmem:[#allocation4 + $0xc4] ss:$16 sps:$4 sm:$0xff]  }
 0x2f4   : > { %5887 = vmatprep.subr.bf16.mxu0 %v10015_v50 }
 0x2f5   : > { %6178 = vmatpush1.bf16.msra.mxu1 %v10010_v48 }
 0x2f6   : > { %6179 = vmatprep.subr.bf16.mxu1 %v10018_v42 }
 0x2f7   : > { %5888 = vmatpush1.bf16.msra.mxu0 %v10013_v55 }
 0x2f8   : > { %5889 = vmatprep.subr.bf16.mxu0 %v10021_v57 }
 0x2f9   : > { %6180 = vmatpush1.bf16.msra.mxu1 %v10016_v26 }
 0x2fa   : > { %6181 = vmatprep.subr.bf16.mxu1 %v10024_v60  ;;  %v10139_v60 = vld [vmem:[#allocation4 + $0xc0] ss:$16 sps:$4 sm:$0xff]  }
 0x2fb   : > { %5890 = vmatpush1.bf16.msra.mxu0 %v10019_v53 }
 0x2fc   : > { %6732 = vmatprep.subr.bf16.mxu0 %v10027_v61 }
 0x2fd   : > { %6182 = vmatpush1.bf16.msra.mxu1 %v10022_v32 }
 0x2fe   : > { %5892 = vmatmul.mubr.bf16.vlgmr.msra.gmra.mrb[32].mxu0 %v12075_v15  ;;  %7340 = vmatprep.subr.bf16.mxu1 %v10123_v37 }
 0x2ff   : > { %5901 = vmatprep.mubr.bf16.mxu0 %v12174_v52  ;;  %6733 = vmatpush1.bf16.msra.mxu0 %v10025_v2 }
 0x300   : > { %6184 = vmatmul.mubr.bf16.vlgmr.msra.gmra.mrb[32].mxu1 %v12075_v15  ;;  %6734 = vmatprep.subr.bf16.mxu0 %v10030_v5  ;;  %v10036_v15 = vld [vmem:[%s12682_s5 + $0x34] ss:$8 sps:$4 sm:$0xff]  }
 0x301   : > { %6193 = vmatprep.mubr.bf16.mxu1 %v12174_v52  ;;  %v10034_v52 = vld [vmem:[%s12682_s5 + $0x30] ss:$8 sps:$4 sm:$0xff]   ;;  %7341 = vmatpush1.bf16.msra.mxu1 %v10121_v46  ;;  %v10144_v5 = vld [vmem:[#allocation4 + $0xe4] ss:$16 sps:$4 sm:$0xff]  }
 0x302   : > { %7342 = vmatprep.subr.bf16.mxu1 %v10126_v9  ;;  %v10150_v46 = vld [vmem:[#allocation4 + $0x124] ss:$16 sps:$4 sm:$0xff]  }
 0x303   : > { %6735 = vmatpush1.bf16.msra.mxu0 %v10028_v7 }
 0x304   : > { %6736 = vmatprep.subr.bf16.mxu0 %v10033_v8 }
 0x305   : > { %7343 = vmatpush1.bf16.msra.mxu1 %v10124_v35 }
 0x306   : > { %5902 = vmatmul.mubr.bf16.gmra.mrb[36].mxu0 %v12191_v63  ;;  %7344 = vmatprep.subr.bf16.mxu1 %v10129_v34 }
 0x307   : > { %5911 = vmatprep.mubr.bf16.mxu0 %v12197_v0  ;;  %6737 = vmatpush1.bf16.msra.mxu0 %v10031_v56  ;;  %v10142_v56 = vld [vmem:[#allocation4 + $0xe0] ss:$16 sps:$4 sm:$0xff]  }
 0x308   : > { %6194 = vmatmul.mubr.bf16.gmra.mrb[36].mxu1 %v12191_v63  ;;  %6738 = vmatprep.subr.bf16.mxu0 %v10036_v15  ;;  %v10042_v63 = vld [vmem:[%s12682_s5 + $0x54] ss:$8 sps:$4 sm:$0xff]  }
 0x309   : > { %6203 = vmatprep.mubr.bf16.mxu1 %v12197_v0  ;;  %v10045_v0 = vld [vmem:[%s12682_s5 + $0x64] ss:$8 sps:$4 sm:$0xff]   ;;  %7345 = vmatpush1.bf16.msra.mxu1 %v10127_v39 }
 0x30a   : > { %7346 = vmatprep.subr.bf16.mxu1 %v10132_v40 }
 0x30b   : > { %6739 = vmatpush1.bf16.msra.mxu0 %v10034_v52 }
 0x30c   : > { %6740 = vmatprep.subr.bf16.mxu0 %v10039_v51 }
 0x30d   : > { %7347 = vmatpush1.bf16.msra.mxu1 %v10130_v41 }
 0x30e   : > { %5912 = vmatmul.mubr.bf16.gmra.mrb[40].mxu0 %v12207_v25  ;;  %7348 = vmatprep.subr.bf16.mxu1 %v10135_v16 }
 0x30f   : > { %5921 = vmatprep.mubr.bf16.mxu0 %v12213_v28  ;;  %6741 = vmatpush1.bf16.msra.mxu0 %v10037_v10 }
 0x310   : > { %6204 = vmatmul.mubr.bf16.gmra.mrb[40].mxu1 %v12207_v25  ;;  %6742 = vmatprep.subr.bf16.mxu0 %v10042_v63  ;;  %v10046_v25 = vld [vmem:[%s12682_s5 + $0x70] ss:$8 sps:$4 sm:$0xff]  }
 0x311   : > { %6213 = vmatprep.mubr.bf16.mxu1 %v12213_v28  ;;  %v10057_v28 = vld [vmem:[%s12682_s5 + $0xa4] ss:$8 sps:$4 sm:$0xff]   ;;  %7349 = vmatpush1.bf16.msra.mxu1 %v10133_v29  ;;  %v10148_v29 = vld [vmem:[#allocation4 + $0x120] ss:$16 sps:$4 sm:$0xff]  }
 0x312   : > { %7350 = vmatprep.subr.bf16.mxu1 %v10138_v33 }
 0x313   : > { %6743 = vmatpush1.bf16.msra.mxu0 %v10040_v62 }
 0x314   : > { %6744 = vmatprep.subr.bf16.mxu0 %v10045_v0 }
 0x315   : > { %7351 = vmatpush1.bf16.msra.mxu1 %v10136_v21 }
 0x316   : > { %5922 = vmatmul.mubr.bf16.gmra.mrb[44].mxu0 %v12219_v20  ;;  %7352 = vmatprep.subr.bf16.mxu1 %v10141_v17 }
 0x317   : > { %6745 = vmatpush1.bf16.msra.mxu0 %v10043_v30 }
 0x318   : > { %6214 = vmatmul.mubr.bf16.gmra.mrb[44].mxu1 %v12219_v20  ;;  %6746 = vmatprep.subr.bf16.mxu0 %v10048_v19  ;;  %v10058_v20 = vld [vmem:[%s12682_s5 + $0xb0] ss:$8 sps:$4 sm:$0xff]  }
 0x319   : > { %7353 = vmatpush1.bf16.msra.mxu1 %v10139_v60 }
 0x31a   : > { %7354 = vmatprep.subr.bf16.mxu1 %v10144_v5  ;;  %v10153_v5 = vld [vmem:[#allocation4 + $0x144] ss:$16 sps:$4 sm:$0xff]  }
 0x31b   : > { %6747 = vmatpush1.bf16.msra.mxu0 %v10046_v25  ;;  %v10147_v25 = vld [vmem:[#allocation4 + $0x104] ss:$16 sps:$4 sm:$0xff]  }
 0x31c   : > { %6748 = vmatprep.subr.bf16.mxu0 %v10051_v58 }
 0x31d   : > { %7355 = vmatpush1.bf16.msra.mxu1 %v10142_v56 }
 0x31e   : > { %7356 = vmatprep.subr.bf16.mxu1 %v10147_v25 }
 0x31f   : > { %6749 = vmatpush1.bf16.msra.mxu0 %v10049_v3 }
 0x320   : > { %6750 = vmatprep.subr.bf16.mxu0 %v10054_v18 }
 0x323   : > { %6751 = vmatpush1.bf16.msra.mxu0 %v10052_v27 }
 0x324   : > { %6752 = vmatprep.subr.bf16.mxu0 %v10057_v28 }
 0x327   : > { %6753 = vmatpush1.bf16.msra.mxu0 %v10055_v49 }
 0x328   : > { %6754 = vmatprep.subr.bf16.mxu0 %v10060_v36 }
 0x32b   : > { %6755 = vmatpush1.bf16.msra.mxu0 %v10058_v20 }
 0x32c   : > { %6756 = vmatprep.subr.bf16.mxu0 %v10063_v13 }
 0x32f   : > { %6757 = vmatpush1.bf16.msra.mxu0 %v10061_v38 }
 0x330   : > { %6758 = vmatprep.subr.bf16.mxu0 %v10066_v12  ;;  %v10145_v12 = vld [vmem:[#allocation4 + $0x100] ss:$16 sps:$4 sm:$0xff]  }
 0x331   : > { %7357 = vmatpush1.bf16.msra.mxu1 %v10145_v12 }
 0x332   : > { %7358 = vmatprep.subr.bf16.mxu1 %v10150_v46  ;;  %v10159_v46 = vld [vmem:[#allocation4 + $0x184] ss:$16 sps:$4 sm:$0xff]  }
 0x333   : > { %6759 = vmatpush1.bf16.msra.mxu0 %v10064_v14 }
 0x334   : > { %6760 = vmatprep.subr.bf16.mxu0 %v10069_v43 }
 0x335   : > { %7359 = vmatpush1.bf16.msra.mxu1 %v10148_v29 }
 0x336   : > { %7360 = vmatprep.subr.bf16.mxu1 %v10153_v5 }
 0x337   : > { %6761 = vmatpush1.bf16.msra.mxu0 %v10067_v59 }
 0x338   : > { %6762 = vmatprep.subr.bf16.mxu0 %v10072_v31 }
 0x33b   : > { %6763 = vmatpush1.bf16.msra.mxu0 %v10070_v23 }
 0x33c   : > { %6805 = vmatprep.subr.bf16.mxu0 %v10075_v22 }
 0x3d1   : > { %v5893_v48 = vpop.f32.mrb[32].mxu0 }
 0x3d2   : > { %v9273_v42 = vadd.f32 %v5893_v48, %v12340_v45  ;;  %v5895_v26 = vpop.f32.mrb[33].mxu0 }
 0x3d3   : > { %v6185_v50 = vpop.f32.mrb[32].mxu1  ;;  %v9274_v53 = vadd.f32 %v5895_v26, %v12346_v44  ;;  %v5897_v61 = vpop.f32.mrb[34].mxu0  ;;  %v10073_v26 = vld [vmem:[%s12682_s5 + $0x100] ss:$8 sps:$4 sm:$0xff]  }
 0x3d4   : > { %v9289_v55 = vadd.f32 %v6185_v50, %v12343_v54  ;;  %v6187_v57 = vpop.f32.mrb[33].mxu1  ;;  %vm6224_vm0 = vcmp.ge.f32.partialorder %v9273_v42, 0.0  ;;  %v6256_v7 = vmul.f32 0.01, %v9273_v42  ;;  %v9275_v52 = vadd.f32 %v5897_v61, %v12340_v45  ;;  %v5899_v10 = vpop.f32.mrb[35].mxu0 }
 0x3d5   : > { %v9290_v32 = vadd.f32 %v6187_v57, %v12349_v47  ;;  %v6189_v2 = vpop.f32.mrb[34].mxu1  ;;  %vm6225_vm2 = vcmp.ge.f32.partialorder %v9274_v53, 0.0  ;;  %v6257_v15 = vmul.f32 0.01, %v9274_v53  ;;  %v9276_v30 = vadd.f32 %v5899_v10, %v12346_v44 }
 0x3d6   : > { %vm6226_vm1 = vcmp.ge.f32.partialorder %v9289_v55, 0.0  ;;  %v6258_v8 = vmul.f32 0.01, %v9289_v55  ;;  %v9291_v51 = vadd.f32 %v6189_v2, %v12343_v54  ;;  %v6191_v63 = vpop.f32.mrb[35].mxu1  ;;  %v12357_v62 = vsel %vm6224_vm0, %v9273_v42, %v6256_v7  ;;  %v10151_v2 = vld [vmem:[#allocation4 + $0x140] ss:$16 sps:$4 sm:$0xff]  }
 0x3d7   : > { %vm6227_vm3 = vcmp.ge.f32.partialorder %v9290_v32, 0.0  ;;  %v6259_v0 = vmul.f32 0.01, %v9290_v32  ;;  %v9292_v19 = vadd.f32 %v6191_v63, %v12349_v47  ;;  %vm6228_vm4 = vcmp.ge.f32.partialorder %v9275_v52, 0.0  ;;  %7361 = vmatpush1.bf16.msra.mxu1 %v10151_v2  ;;  %v10162_v2 = vld [vmem:[#allocation4 + $0x1a4] ss:$16 sps:$4 sm:$0xff]  }
 0x3d8   : > { %v6260_v58 = vmul.f32 0.01, %v9275_v52  ;;  %vm6230_vm5 = vcmp.ge.f32.partialorder %v9291_v51, 0.0  ;;  %v6262_v3 = vmul.f32 0.01, %v9291_v51  ;;  %v12362_v18 = vsel %vm6226_vm1, %v9289_v55, %v6258_v8 }
 0x3d9   : > { %vm6229_vm6 = vcmp.ge.f32.partialorder %v9276_v30, 0.0  ;;  %v6261_v27 = vmul.f32 0.01, %v9276_v30  ;;  %v6263_v28 = vmul.f32 0.01, %v9292_v19  ;;  %vm6231_vm7 = vcmp.ge.f32.partialorder %v9292_v19, 0.0 }
 0x3da   : > { %v6292_v49 = vsel %vm6228_vm4, %v9275_v52, %v6260_v58  ;;  %v12364_v36 = vsel %vm6230_vm5, %v9291_v51, %v6262_v3  ;;  %v5903_v20 = vpop.f32.mrb[36].mxu0  ;;  %v6289_v38 = vsel %vm6225_vm2, %v9274_v53, %v6257_v15  ;;  %v12376_v40 = vsel %vm6227_vm3, %v9290_v32, %v6259_v0  ;;  %v10078_v53 = vld [vmem:[%s12682_s5 + $0x114] ss:$8 sps:$4 sm:$0xff]   ;;  %v10076_v51 = vld [vmem:[%s12682_s5 + $0x110] ss:$8 sps:$4 sm:$0xff]  }
 0x3db   : > { %v6195_v13 = vpop.f32.mrb[36].mxu1  ;;  %v6320_v14 = vpack.c.bf16 %v6292_v49, %v12357_v62  ;;  %v6322_v59 = vpack.c.bf16 %v12364_v36, %v12362_v18  ;;  %v9277_v43 = vadd.f32 %v5903_v20, %v12340_v45  ;;  %v5905_v23 = vpop.f32.mrb[37].mxu0  ;;  %v6293_v39 = vsel %vm6229_vm6, %v9276_v30, %v6261_v27  ;;  %v10154_v20 = vld [vmem:[#allocation4 + $0x160] ss:$16 sps:$4 sm:$0xff]   ;;  %v10171_v18 = vld [vmem:[#allocation4 + $0xc] ss:$16 sps:$4 sm:$0xff]  }
 0x3dc   : > { %v9293_v31 = vadd.f32 %v6195_v13, %v12343_v54  ;;  %v6197_v22 = vpop.f32.mrb[37].mxu1  ;;  %v9278_v37 = vadd.f32 %v5905_v23, %v12346_v44  ;;  %v5907_v35 = vpop.f32.mrb[38].mxu0  ;;  %v12379_v16 = vsel %vm6231_vm7, %v9292_v19, %v6263_v28  ;;  %v6321_v55 = vpack.c.bf16 %v6293_v39, %v6289_v38  ;;  %v10081_v28 = vld [vmem:[%s12682_s5 + $0x124] ss:$8 sps:$4 sm:$0xff]  }
 0x3dd   : > { %v9294_v9 = vadd.f32 %v6197_v22, %v12349_v47  ;;  %v6199_v34 = vpop.f32.mrb[38].mxu1  ;;  %vm6232_vm8 = vcmp.ge.f32.partialorder %v9277_v43, 0.0  ;;  %v6264_v41 = vmul.f32 0.01, %v9277_v43  ;;  %v9279_v17 = vadd.f32 %v5907_v35, %v12340_v45  ;;  %v5909_v50 = vpop.f32.mrb[39].mxu0  ;;  %v10217_v36 = vld [vmem:[#allocation6 + $0x40] sm:$0xff]  }
 0x3de   : > { %vm6234_vm9 = vcmp.ge.f32.partialorder %v9293_v31, 0.0  ;;  %v6266_v24 = vmul.f32 0.01, %v9293_v31  ;;  %vm6233_vm10 = vcmp.ge.f32.partialorder %v9278_v37, 0.0  ;;  %v6265_v33 = vmul.f32 0.01, %v9278_v37  ;;  %6764 = vmatprep.mubr.bf16.mxu0 %v6321_v55 }
 0x3df   : > { %vm6235_vm11 = vcmp.ge.f32.partialorder %v9294_v9, 0.0  ;;  %v6267_v21 = vmul.f32 0.01, %v9294_v9  ;;  %v9295_v48 = vadd.f32 %v6199_v34, %v12343_v54  ;;  %v6201_v42 = vpop.f32.mrb[39].mxu1  ;;  %v9280_v57 = vadd.f32 %v5909_v50, %v12346_v44  ;;  %6765 = vmatmul.mubr.bf16.vlgmr.msra.gmra.mrb[48].mxu0 %v6320_v14  ;;  %v10156_v22 = vld [vmem:[#allocation4 + $0x164] ss:$16 sps:$4 sm:$0xff]  }
 0x3e0   : > { %v9296_v60 = vadd.f32 %v6201_v42, %v12349_v47  ;;  %v12392_v32 = vsel %vm6232_vm8, %v9277_v43, %v6264_v41  ;;  %v6323_v61 = vpack.c.bf16 %v12379_v16, %v12376_v40  ;;  %vm6236_vm12 = vcmp.ge.f32.partialorder %v9279_v17, 0.0  ;;  %6806 = vmatpush1.bf16.msra.mxu0 %v10073_v26  ;;  %v10082_v55 = vld [vmem:[%s12682_s5 + $0x130] ss:$8 sps:$4 sm:$0xff]   ;;  %7362 = vmatprep.subr.bf16.mxu1 %v10156_v22  ;;  %v10102_v40 = vld [vmem:[%s12682_s5 + $0x194] ss:$8 sps:$4 sm:$0xff]  }
 0x3e1   : > { %v6268_v7 = vmul.f32 0.01, %v9279_v17  ;;  %v6270_v8 = vmul.f32 0.01, %v9295_v48  ;;  %v6297_v56 = vsel %vm6233_vm10, %v9278_v37, %v6265_v33  ;;  %vm6237_vm13 = vcmp.ge.f32.partialorder %v9280_v57, 0.0  ;;  %v5913_v10 = vpop.f32.mrb[40].mxu0  ;;  %6807 = vmatprep.subr.bf16.mxu0 %v10078_v53  ;;  %7363 = vmatpush1.bf16.msra.mxu1 %v10154_v20 }
 0x3e2   : > { %v6269_v15 = vmul.f32 0.01, %v9280_v57  ;;  %vm6239_vm14 = vcmp.ge.f32.partialorder %v9296_v60, 0.0  ;;  %v6271_v52 = vmul.f32 0.01, %v9296_v60  ;;  %vm6238_vm15 = vcmp.ge.f32.partialorder %v9295_v48, 0.0  ;;  %7364 = vmatprep.subr.bf16.mxu1 %v10159_v46 }
 0x3e3   : > { %v6205_v63 = vpop.f32.mrb[40].mxu1  ;;  %v6300_v62 = vsel %vm6236_vm12, %v9279_v17, %v6268_v7  ;;  %v12402_v0 = vsel %vm6235_vm11, %v9294_v9, %v6267_v21  ;;  %v12405_v30 = vsel %vm6234_vm9, %v9293_v31, %v6266_v24  ;;  %v9281_v19 = vadd.f32 %v5913_v10, %v12340_v45  ;;  %v5915_v58 = vpop.f32.mrb[41].mxu0  ;;  %v10079_v31 = vld [vmem:[%s12682_s5 + $0x120] ss:$8 sps:$4 sm:$0xff]   ;;  %v10084_v21 = vld [vmem:[%s12682_s5 + $0x134] ss:$8 sps:$4 sm:$0xff]  }
 0x3e4   : > { %v12409_v25 = vadd.f32 %v6205_v63, %v12343_v54  ;;  %v6207_v3 = vpop.f32.mrb[41].mxu1  ;;  %v6301_v27 = vsel %vm6237_vm13, %v9280_v57, %v6269_v15  ;;  %v6324_v49 = vpack.c.bf16 %v6300_v62, %v12392_v32  ;;  %v9282_v13 = vadd.f32 %v5915_v58, %v12346_v44  ;;  %v5917_v12 = vpop.f32.mrb[42].mxu0  ;;  %6808 = vmatpush1.bf16.msra.mxu0 %v10076_v51  ;;  %v10157_v32 = vld [vmem:[#allocation4 + $0x180] ss:$16 sps:$4 sm:$0xff]   ;;  %v10087_v63 = vld [vmem:[%s12682_s5 + $0x144] ss:$8 sps:$4 sm:$0xff]  }
 0x3e5   : > { %v9298_v38 = vadd.f32 %v6207_v3, %v12349_v47  ;;  %v6209_v14 = vpop.f32.mrb[42].mxu1  ;;  %v6325_v43 = vpack.c.bf16 %v6301_v27, %v6297_v56  ;;  %v12422_v23 = vsel %vm6239_vm14, %v9296_v60, %v6271_v52  ;;  %vm6240_vm0 = vcmp.ge.f32.partialorder %v9281_v19, 0.0  ;;  %v5919_v24 = vpop.f32.mrb[43].mxu0  ;;  %6809 = vmatprep.subr.bf16.mxu0 %v10081_v28  ;;  %7365 = vmatpush1.bf16.msra.mxu1 %v10157_v32  ;;  %v10100_v16 = vld [vmem:[%s12682_s5 + $0x190] ss:$8 sps:$4 sm:$0xff]  }
 0x3e6   : > { %v6272_v37 = vmul.f32 0.01, %v9281_v19  ;;  %v12425_v9 = vmul.f32 0.01, %v12409_v25  ;;  %v12428_v35 = vsel %vm6238_vm15, %v9295_v48, %v6270_v8  ;;  %vm6241_vm1 = vcmp.ge.f32.partialorder %v9282_v13, 0.0  ;;  %v6211_v33 = vpop.f32.mrb[43].mxu1  ;;  %7366 = vmatprep.subr.bf16.mxu1 %v10162_v2 }
 0x3e7   : > { %v6273_v34 = vmul.f32 0.01, %v9282_v13  ;;  %vm6243_vm2 = vcmp.ge.f32.partialorder %v9298_v38, 0.0  ;;  %v6275_v39 = vmul.f32 0.01, %v9298_v38  ;;  %6774 = vmatprep.mubr.bf16.mxu0 %v6325_v43  ;;  %v9283_v41 = vadd.f32 %v5917_v12, %v12340_v45 }
 0x3e8   : > { %v12432_v29 = vadd.f32 %v6209_v14, %v12343_v54  ;;  %v12438_v17 = vsel %vm6240_vm0, %v9281_v19, %v6272_v37  ;;  %v6327_v48 = vpack.c.bf16 %v12422_v23, %v12402_v0  ;;  %vm6242_vm3 = vcmp.ge.f32.partialorder %v12409_v25, 0.0  ;;  %6775 = vmatmul.mubr.bf16.gmra.mrb[52].mxu0 %v6324_v49  ;;  %v10093_v2 = vld [vmem:[%s12682_s5 + $0x164] ss:$8 sps:$4 sm:$0xff]   ;;  %v10221_v23 = vld [vmem:[#allocation6 + $0x50] sm:$0xff]  }
 0x3e9   : > { %v9284_v50 = vadd.f32 %v5919_v24, %v12346_v44  ;;  %v9300_v42 = vadd.f32 %v6211_v33, %v12349_v47  ;;  %v5923_v26 = vpop.f32.mrb[44].mxu0  ;;  %v6305_v60 = vsel %vm6241_vm1, %v9282_v13, %v6273_v34  ;;  %v6326_v53 = vpack.c.bf16 %v12428_v35, %v12405_v30  ;;  %6810 = vmatpush1.bf16.msra.mxu0 %v10079_v31  ;;  %v10160_v13 = vld [vmem:[#allocation4 + $0x1a0] ss:$16 sps:$4 sm:$0xff]   ;;  %v10219_v0 = vld [vmem:[#allocation6 + $0x48] sm:$0xff]  }
 0x3ea   : > { %vm6244_vm4 = vcmp.ge.f32.partialorder %v9283_v41, 0.0  ;;  %v6276_v5 = vmul.f32 0.01, %v9283_v41  ;;  %vm6246_vm5 = vcmp.ge.f32.partialorder %v12432_v29, 0.0  ;;  %v12453_v7 = vmul.f32 0.01, %v12432_v29  ;;  %6811 = vmatprep.subr.bf16.mxu0 %v10084_v21  ;;  %7367 = vmatpush1.bf16.msra.mxu1 %v10160_v13 }
 0x3eb   : > { %v6215_v57 = vpop.f32.mrb[44].mxu1  ;;  %vm6245_vm6 = vcmp.ge.f32.partialorder %v9284_v50, 0.0  ;;  %v6277_v8 = vmul.f32 0.01, %v9284_v50  ;;  %vm6247_vm7 = vcmp.ge.f32.partialorder %v9300_v42, 0.0  ;;  %v9285_v15 = vadd.f32 %v5923_v26, %v12340_v45  ;;  %v5925_v51 = vpop.f32.mrb[45].mxu0 }
 0x3ec   : > { %v6279_v56 = vmul.f32 0.01, %v9300_v42  ;;  %v12457_v52 = vadd.f32 %v6215_v57, %v12343_v54  ;;  %v6217_v10 = vpop.f32.mrb[45].mxu1  ;;  %v6308_v62 = vsel %vm6244_vm4, %v9283_v41, %v6276_v5  ;;  %v12464_v19 = vsel %vm6243_vm2, %v9298_v38, %v6275_v39  ;;  %v5927_v27 = vpop.f32.mrb[46].mxu0  ;;  %v10085_v39 = vld [vmem:[%s12682_s5 + $0x140] ss:$8 sps:$4 sm:$0xff]  }
 0x3ed   : > { %v9286_v58 = vadd.f32 %v5925_v51, %v12346_v44  ;;  %v9302_v3 = vadd.f32 %v6217_v10, %v12349_v47  ;;  %v6219_v28 = vpop.f32.mrb[46].mxu1  ;;  %v6309_v49 = vsel %vm6245_vm6, %v9284_v50, %v6277_v8  ;;  %v6328_v20 = vpack.c.bf16 %v6308_v62, %v12438_v17  ;;  %6812 = vmatpush1.bf16.msra.mxu0 %v10082_v55  ;;  %v5929_v46 = vpop.f32.mrb[47].mxu0  ;;  %v10091_v10 = vld [vmem:[%s12682_s5 + $0x160] ss:$8 sps:$4 sm:$0xff]   ;;  %v10099_v62 = vld [vmem:[%s12682_s5 + $0x184] ss:$8 sps:$4 sm:$0xff]  }
 0x3ee   : > { %vm6248_vm8 = vcmp.ge.f32.partialorder %v9285_v15, 0.0  ;;  %v6280_v12 = vmul.f32 0.01, %v9285_v15  ;;  %vm6250_vm9 = vcmp.ge.f32.partialorder %v12457_v52, 0.0  ;;  %v6282_v14 = vmul.f32 0.01, %v12457_v52  ;;  %6813 = vmatprep.subr.bf16.mxu0 %v10087_v63 }
 0x3ef   : > { %vm6249_vm10 = vcmp.ge.f32.partialorder %v9286_v58, 0.0  ;;  %v6281_v38 = vmul.f32 0.01, %v9286_v58  ;;  %vm6251_vm11 = vcmp.ge.f32.partialorder %v9302_v3, 0.0  ;;  %v6283_v43 = vmul.f32 0.01, %v9302_v3 }
 0x3f0   : > { %v9287_v31 = vadd.f32 %v5927_v27, %v12340_v45  ;;  %v9303_v22 = vadd.f32 %v6219_v28, %v12343_v54  ;;  %v6221_v37 = vpop.f32.mrb[47].mxu1  ;;  %v6329_v34 = vpack.c.bf16 %v6309_v49, %v6305_v60  ;;  %v6312_v41 = vsel %vm6248_vm8, %v9285_v15, %v6280_v12  ;;  %v10090_v45 = vld [vmem:[%s12682_s5 + $0x154] ss:$8 sps:$4 sm:$0xff]   ;;  %v10106_v27 = vld [vmem:[%s12682_s5 + $0x1b0] ss:$8 sps:$4 sm:$0xff]   ;;  %v10220_v30 = vld [vmem:[#allocation6 + $0x8] sm:$0xff]  }
 0x3f1   : > { %v9288_v24 = vadd.f32 %v5929_v46, %v12346_v44  ;;  %v9304_v33 = vadd.f32 %v6221_v37, %v12349_v47  ;;  %v6313_v54 = vsel %vm6249_vm10, %v9286_v58, %v6281_v38  ;;  %v12485_v21 = vsel %vm6247_vm7, %v9300_v42, %v6279_v56  ;;  %6814 = vmatpush1.bf16.msra.mxu0 %v10085_v39  ;;  %v10088_v47 = vld [vmem:[%s12682_s5 + $0x150] ss:$8 sps:$4 sm:$0xff]   ;;  %v10096_v63 = vld [vmem:[%s12682_s5 + $0x174] ss:$8 sps:$4 sm:$0xff]   ;;  %v10103_v58 = vld [vmem:[%s12682_s5 + $0x1a0] ss:$8 sps:$4 sm:$0xff]  }
 0x3f2   : > { %vm6252_vm12 = vcmp.ge.f32.partialorder %v9287_v31, 0.0  ;;  %v6284_v17 = vmul.f32 0.01, %v9287_v31  ;;  %vm6254_vm13 = vcmp.ge.f32.partialorder %v9303_v22, 0.0  ;;  %v6286_v50 = vmul.f32 0.01, %v9303_v22  ;;  %6784 = vmatprep.mubr.bf16.mxu0 %v6329_v34  ;;  %6815 = vmatprep.subr.bf16.mxu0 %v10090_v45 }
 0x3f3   : > { %vm6253_vm14 = vcmp.ge.f32.partialorder %v9288_v24, 0.0  ;;  %v6285_v55 = vmul.f32 0.01, %v9288_v24  ;;  %vm6255_vm15 = vcmp.ge.f32.partialorder %v9304_v33, 0.0  ;;  %v6287_v44 = vmul.f32 0.01, %v9304_v33  ;;  %6785 = vmatmul.mubr.bf16.gmra.mrb[56].mxu0 %v6328_v20 }
 0x3f4   : > { %v6316_v26 = vsel %vm6252_vm12, %v9287_v31, %v6284_v17  ;;  %v6331_v42 = vpack.c.bf16 %v12485_v21, %v12464_v19  ;;  %v6306_v57 = vsel %vm6242_vm3, %v12409_v25, %v12425_v9  ;;  %v6310_v60 = vsel %vm6246_vm5, %v12432_v29, %v12453_v7  ;;  %v10097_v19 = vld [vmem:[%s12682_s5 + $0x180] ss:$8 sps:$4 sm:$0xff]   ;;  %v10111_v28 = vld [vmem:[%s12682_s5 + $0x1c4] ss:$8 sps:$4 sm:$0xff]   ;;  %v10114_v20 = vld [vmem:[%s12682_s5 + $0x1d4] ss:$8 sps:$4 sm:$0xff]  }
 0x3f5   : > { %v6317_v32 = vsel %vm6253_vm14, %v9288_v24, %v6285_v55  ;;  %v6332_v5 = vpack.c.bf16 %v6316_v26, %v6312_v41  ;;  %v6330_v8 = vpack.c.bf16 %v6310_v60, %v6306_v57  ;;  %v6315_v56 = vsel %vm6251_vm11, %v9302_v3, %v6283_v43  ;;  %6816 = vmatpush1.bf16.msra.mxu0 %v10088_v47  ;;  %v10108_v3 = vld [vmem:[%s12682_s5 + $0x1b4] ss:$8 sps:$4 sm:$0xff]   ;;  %v10109_v49 = vld [vmem:[%s12682_s5 + $0x1c0] ss:$8 sps:$4 sm:$0xff]   ;;  %v10112_v13 = vld [vmem:[%s12682_s5 + $0x1d0] ss:$8 sps:$4 sm:$0xff]  }
 0x3f6   : > { %v6333_v15 = vpack.c.bf16 %v6317_v32, %v6313_v54  ;;  %v6319_v51 = vsel %vm6255_vm15, %v9304_v33, %v6287_v44  ;;  %v6314_v25 = vsel %vm6250_vm9, %v12457_v52, %v6282_v14  ;;  %v6318_v9 = vsel %vm6254_vm13, %v9303_v22, %v6286_v50  ;;  %6817 = vmatprep.subr.bf16.mxu0 %v10093_v2  ;;  %v10094_v52 = vld [vmem:[%s12682_s5 + $0x170] ss:$8 sps:$4 sm:$0xff]   ;;  %v10117_v12 = vld [vmem:[%s12682_s5 + $0x1e4] ss:$8 sps:$4 sm:$0xff]   ;;  %v10115_v14 = vld [vmem:[%s12682_s5 + $0x1e0] ss:$8 sps:$4 sm:$0xff]  }
 0x3f7   : > { %v6335_v29 = vpack.c.bf16 %v6319_v51, %v6315_v56  ;;  %v6334_v7 = vpack.c.bf16 %v6318_v9, %v6314_v25  ;;  %v10120_v38 = vld [vmem:[%s12682_s5 + $0x1f4] ss:$8 sps:$4 sm:$0xff]   ;;  %v10118_v43 = vld [vmem:[%s12682_s5 + $0x1f0] ss:$8 sps:$4 sm:$0xff]   ;;  %v10225_v34 = vld [vmem:[#allocation6 + $0x60] sm:$0xff]  }
 0x3f8   : > { %6794 = vmatprep.mubr.bf16.mxu0 %v6333_v15  ;;  %v10163_v31 = vld [vmem:[#allocation4 + $0x1c0] ss:$16 sps:$4 sm:$0xff]   ;;  %v10165_v22 = vld [vmem:[#allocation4 + $0x1c4] ss:$16 sps:$4 sm:$0xff]   ;;  %v10227_v41 = vld [vmem:[#allocation6 + $0x68] sm:$0xff]  }
 0x3f9   : > { %6818 = vmatpush1.bf16.msra.mxu0 %v10091_v10  ;;  %v10168_v46 = vld [vmem:[#allocation4 + $0x1e4] ss:$16 sps:$4 sm:$0xff]   ;;  %7368 = vmatprep.subr.bf16.mxu1 %v10165_v22  ;;  %v10166_v37 = vld [vmem:[#allocation4 + $0x1e0] ss:$16 sps:$4 sm:$0xff]  }
 0x3fa   : > { %6819 = vmatprep.subr.bf16.mxu0 %v10096_v63  ;;  %7369 = vmatpush1.bf16.msra.mxu1 %v10163_v31  ;;  %v10222_v35 = vld [vmem:[#allocation6 + $0x10] sm:$0xff]   ;;  %v10226_v39 = vld [vmem:[#allocation6 + $0x20] sm:$0xff]  }
 0x3fb   : > { %6795 = vmatmul.mubr.bf16.gmra.mrb[60].mxu0 %v6332_v5  ;;  %7370 = vmatprep.subr.bf16.mxu1 %v10168_v46  ;;  %v6400_v24 = vld [vmem:[%s12683_s6] sm:$0x3]  ;;  %v10175_v46 = vld [vmem:[#allocation4 + $0x48] ss:$16 sps:$4 sm:$0xff]  }
 0x3fc   : > { %6837 = vmatprep.mubr.bf16.mxu0 %v6323_v61  ;;  %v10105_v61 = vld [vmem:[%s12682_s5 + $0x1a4] ss:$8 sps:$4 sm:$0xff]   ;;  %v12582_v33 = vrot.slane %v6400_v24, %v11818_v1  ;;  %v12585_v45 = vrot.slane %v6400_v24, %v11827_v6 }
 0x3fd   : > { %6820 = vmatpush1.bf16.msra.mxu0 %v10094_v52  ;;  %v10174_v52 = vld [vmem:[#allocation4 + $0x2c] ss:$16 sps:$4 sm:$0xff]  }
 0x3fe   : > { %6821 = vmatprep.subr.bf16.mxu0 %v10099_v62  ;;  %7371 = vmatpush1.bf16.msra.mxu1 %v10166_v37 }
 0x3ff   : > { %7413 = vmatprep.subr.bf16.mxu1 %v10171_v18 }
 0x401   : > { %6822 = vmatpush1.bf16.msra.mxu0 %v10097_v19 }
 0x402   : > { %6823 = vmatprep.subr.bf16.mxu0 %v10102_v40 }
 0x405   : > { %6824 = vmatpush1.bf16.msra.mxu0 %v10100_v16 }
 0x406   : > { %6825 = vmatprep.subr.bf16.mxu0 %v10105_v61 }
 0x409   : > { %6826 = vmatpush1.bf16.msra.mxu0 %v10103_v58 }
 0x40a   : > { %6827 = vmatprep.subr.bf16.mxu0 %v10108_v3  ;;  %v10172_v3 = vld [vmem:[#allocation4 + $0x28] ss:$16 sps:$4 sm:$0xff]  }
 0x40d   : > { %6828 = vmatpush1.bf16.msra.mxu0 %v10106_v27 }
 0x40e   : > { %6829 = vmatprep.subr.bf16.mxu0 %v10111_v28  ;;  %v10177_v28 = vld [vmem:[#allocation4 + $0x4c] ss:$16 sps:$4 sm:$0xff]  }
 0x411   : > { %6830 = vmatpush1.bf16.msra.mxu0 %v10109_v49 }
 0x412   : > { %6831 = vmatprep.subr.bf16.mxu0 %v10114_v20 }
 0x415   : > { %6832 = vmatpush1.bf16.msra.mxu0 %v10112_v13 }
 0x416   : > { %6833 = vmatprep.subr.bf16.mxu0 %v10117_v12 }
 0x419   : > { %6834 = vmatpush1.bf16.msra.mxu0 %v10115_v14 }
 0x41a   : > { %6835 = vmatprep.subr.bf16.mxu0 %v10120_v38 }
 0x41d   : > { %6836 = vmatpush1.bf16.msra.mxu0 %v10118_v43 }
 0x41e   : > { %9077 = vmatprep.subr.bf16.mxu0 %v10217_v36  ;;  %v10180_v36 = vld [vmem:[#allocation4 + $0x6c] ss:$16 sps:$4 sm:$0xff]  }
 0x420   : > { %6838 = vmatmul.mubr.bf16.vlgmr.msra.gmra.mrb[48].mxu0 %v6322_v59  ;;  %v10218_v59 = vld [vmem:[#allocation6] sm:$0xff]  }
 0x421   : > { %6847 = vmatprep.mubr.bf16.mxu0 %v6327_v48  ;;  %9078 = vmatpush3.bf16.msra.mxu0 %v10218_v59  ;;  %v10223_v48 = vld [vmem:[#allocation6 + $0x58] sm:$0xff]  }
 0x422   : > { %9079 = vmatprep.subr.bf16.mxu0 %v10219_v0 }
 0x425   : > { %9080 = vmatpush3.bf16.msra.mxu0 %v10220_v30 }
 0x426   : > { %9081 = vmatprep.subr.bf16.mxu0 %v10221_v23 }
 0x428   : > { %6848 = vmatmul.mubr.bf16.gmra.mrb[52].mxu0 %v6326_v53  ;;  %v10224_v53 = vld [vmem:[#allocation6 + $0x18] sm:$0xff]  }
 0x429   : > { %6857 = vmatprep.mubr.bf16.mxu0 %v6331_v42  ;;  %9082 = vmatpush3.bf16.msra.mxu0 %v10222_v35 }
 0x42a   : > { %9083 = vmatprep.subr.bf16.mxu0 %v10223_v48 }
 0x42d   : > { %9084 = vmatpush3.bf16.msra.mxu0 %v10224_v53  ;;  %v10178_v53 = vld [vmem:[#allocation4 + $0x68] ss:$16 sps:$4 sm:$0xff]  }
 0x42e   : > { %9085 = vmatprep.subr.bf16.mxu0 %v10225_v34 }
 0x430   : > { %6858 = vmatmul.mubr.bf16.gmra.mrb[56].mxu0 %v6330_v8 }
 0x431   : > { %6867 = vmatprep.mubr.bf16.mxu0 %v6335_v29  ;;  %9086 = vmatpush3.bf16.msra.mxu0 %v10226_v39  ;;  %v10183_v39 = vld [vmem:[#allocation4 + $0x8c] ss:$16 sps:$4 sm:$0xff]  }
 0x432   : > { %9087 = vmatprep.subr.bf16.mxu0 %v10227_v41 }
 0x438   : > { %6868 = vmatmul.mubr.bf16.gmra.mrb[60].mxu0 %v6334_v7  ;;  %v10169_v7 = vld [vmem:[#allocation4 + $0x8] ss:$16 sps:$4 sm:$0xff]  }
 0x4f3   : > { %v6839_v54 = vpop.f32.mrb[48].mxu0 }
 0x4f4   : > { %v9305_v21 = vadd.f32 %v6839_v54, %v12582_v33  ;;  %v6841_v17 = vpop.f32.mrb[49].mxu0 }
 0x4f5   : > { %v9306_v50 = vadd.f32 %v6841_v17, %v12585_v45  ;;  %v6843_v55 = vpop.f32.mrb[50].mxu0 }
 0x4f6   : > { %v6894_v44 = vmul.f32 0.01, %v9305_v21  ;;  %v9307_v47 = vadd.f32 %v6843_v55, %v12582_v33  ;;  %v6845_v26 = vpop.f32.mrb[51].mxu0  ;;  %vm6878_vm0 = vcmp.ge.f32.partialorder %v9305_v21, 0.0 }
 0x4f7   : > { %v6895_v42 = vmul.f32 0.01, %v9306_v50  ;;  %v9308_v57 = vadd.f32 %v6845_v26, %v12585_v45  ;;  %vm6879_vm1 = vcmp.ge.f32.partialorder %v9306_v50, 0.0  ;;  %v10181_v26 = vld [vmem:[#allocation4 + $0x88] ss:$16 sps:$4 sm:$0xff]  }
 0x4f8   : > { %vm6880_vm2 = vcmp.ge.f32.partialorder %v9307_v47, 0.0  ;;  %v6896_v60 = vmul.f32 0.01, %v9307_v47  ;;  %v6910_v2 = vsel %vm6878_vm0, %v9305_v21, %v6894_v44 }
 0x4f9   : > { %vm6881_vm3 = vcmp.ge.f32.partialorder %v9308_v57, 0.0  ;;  %v6897_v32 = vmul.f32 0.01, %v9308_v57  ;;  %v6911_v15 = vsel %vm6879_vm1, %v9306_v50, %v6895_v42 }
 0x4fa   : > { %v6912_v5 = vsel %vm6880_vm2, %v9307_v47, %v6896_v60  ;;  %v10186_v60 = vld [vmem:[#allocation4 + $0xac] ss:$16 sps:$4 sm:$0xff]  }
 0x4fb   : > { %v12591_v8 = vpack.c.bf16 %v6912_v5, %v6910_v2  ;;  %v6849_v56 = vpop.f32.mrb[52].mxu0  ;;  %v6913_v51 = vsel %vm6881_vm3, %v9308_v57, %v6897_v32 }
 0x4fc   : > { %v9309_v25 = vadd.f32 %v6849_v56, %v12582_v33  ;;  %v6851_v9 = vpop.f32.mrb[53].mxu0  ;;  %v12594_v29 = vpack.c.bf16 %v6913_v51, %v6911_v15 }
 0x4fd   : > { %v9310_v10 = vadd.f32 %v6851_v9, %v12585_v45  ;;  %v6853_v63 = vpop.f32.mrb[54].mxu0 }
 0x4fe   : > { %v6898_v62 = vmul.f32 0.01, %v9309_v25  ;;  %v9311_v19 = vadd.f32 %v6853_v63, %v12582_v33  ;;  %v6855_v40 = vpop.f32.mrb[55].mxu0  ;;  %7372 = vmatprep.mubr.bf16.mxu1 %v12594_v29  ;;  %vm6882_vm4 = vcmp.ge.f32.partialorder %v9309_v25, 0.0 }
 0x4ff   : > { %v6899_v16 = vmul.f32 0.01, %v9310_v10  ;;  %v9312_v61 = vadd.f32 %v6855_v40, %v12585_v45  ;;  %7373 = vmatmul.mubr.bf16.vlgmr.msra.gmra.mrb[48].mxu1 %v12591_v8  ;;  %vm6883_vm5 = vcmp.ge.f32.partialorder %v9310_v10, 0.0  ;;  %v10187_v40 = vld [vmem:[#allocation4 + $0xc8] ss:$16 sps:$4 sm:$0xff]  }
 0x500   : > { %vm6884_vm6 = vcmp.ge.f32.partialorder %v9311_v19, 0.0  ;;  %v6900_v58 = vmul.f32 0.01, %v9311_v19  ;;  %7414 = vmatpush1.bf16.msra.mxu1 %v10169_v7  ;;  %v6914_v49 = vsel %vm6882_vm4, %v9309_v25, %v6898_v62  ;;  %v10184_v25 = vld [vmem:[#allocation4 + $0xa8] ss:$16 sps:$4 sm:$0xff]  }
 0x501   : > { %vm6885_vm7 = vcmp.ge.f32.partialorder %v9312_v61, 0.0  ;;  %v6901_v27 = vmul.f32 0.01, %v9312_v61  ;;  %7415 = vmatprep.subr.bf16.mxu1 %v10174_v52  ;;  %v6915_v12 = vsel %vm6883_vm5, %v9310_v10, %v6899_v16  ;;  %v10189_v7 = vld [vmem:[#allocation4 + $0xcc] ss:$16 sps:$4 sm:$0xff]  }
 0x502   : > { %v6916_v20 = vsel %vm6884_vm6, %v9311_v19, %v6900_v58  ;;  %v10190_v16 = vld [vmem:[#allocation4 + $0xe8] ss:$16 sps:$4 sm:$0xff]  }
 0x503   : > { %v6859_v13 = vpop.f32.mrb[56].mxu0  ;;  %v6917_v14 = vsel %vm6885_vm7, %v9312_v61, %v6901_v27  ;;  %v12601_v38 = vpack.c.bf16 %v6916_v20, %v6914_v49  ;;  %v10195_v61 = vld [vmem:[#allocation4 + $0x10c] ss:$16 sps:$4 sm:$0xff]   ;;  %v10193_v58 = vld [vmem:[#allocation4 + $0x108] ss:$16 sps:$4 sm:$0xff]  }
 0x504   : > { %v9313_v43 = vadd.f32 %v6859_v13, %v12582_v33  ;;  %7416 = vmatpush1.bf16.msra.mxu1 %v10172_v3  ;;  %v6861_v31 = vpop.f32.mrb[57].mxu0  ;;  %v12604_v22 = vpack.c.bf16 %v6917_v14, %v6915_v12  ;;  %v10198_v3 = vld [vmem:[#allocation4 + $0x12c] ss:$16 sps:$4 sm:$0xff]   ;;  %v10196_v27 = vld [vmem:[#allocation4 + $0x128] ss:$16 sps:$4 sm:$0xff]  }
 0x505   : > { %v9314_v37 = vadd.f32 %v6861_v31, %v12585_v45  ;;  %v6863_v18 = vpop.f32.mrb[58].mxu0  ;;  %7417 = vmatprep.subr.bf16.mxu1 %v10177_v28  ;;  %v10201_v28 = vld [vmem:[#allocation4 + $0x14c] ss:$16 sps:$4 sm:$0xff]   ;;  %v10199_v49 = vld [vmem:[#allocation4 + $0x148] ss:$16 sps:$4 sm:$0xff]  }
 0x506   : > { %v6902_v59 = vmul.f32 0.01, %v9313_v43  ;;  %v9315_v0 = vadd.f32 %v6863_v18, %v12582_v33  ;;  %v6865_v30 = vpop.f32.mrb[59].mxu0  ;;  %7382 = vmatprep.mubr.bf16.mxu1 %v12604_v22  ;;  %vm6886_vm8 = vcmp.ge.f32.partialorder %v9313_v43, 0.0  ;;  %v10204_v20 = vld [vmem:[#allocation4 + $0x16c] ss:$16 sps:$4 sm:$0xff]  }
 0x507   : > { %v6903_v23 = vmul.f32 0.01, %v9314_v37  ;;  %v9316_v35 = vadd.f32 %v6865_v30, %v12585_v45  ;;  %7383 = vmatmul.mubr.bf16.gmra.mrb[52].mxu1 %v12601_v38  ;;  %vm6887_vm9 = vcmp.ge.f32.partialorder %v9314_v37, 0.0  ;;  %v10202_v13 = vld [vmem:[#allocation4 + $0x168] ss:$16 sps:$4 sm:$0xff]  }
 0x508   : > { %vm6888_vm10 = vcmp.ge.f32.partialorder %v9315_v0, 0.0  ;;  %v6904_v48 = vmul.f32 0.01, %v9315_v0  ;;  %7418 = vmatpush1.bf16.msra.mxu1 %v10175_v46  ;;  %v6918_v41 = vsel %vm6886_vm8, %v9313_v43, %v6902_v59  ;;  %v10207_v12 = vld [vmem:[#allocation4 + $0x18c] ss:$16 sps:$4 sm:$0xff]   ;;  %v10229_v59 = vld [vmem:[#allocation6 + $0x70] sm:$0xff]  }
 0x509   : > { %vm6889_vm11 = vcmp.ge.f32.partialorder %v9316_v35, 0.0  ;;  %v6905_v34 = vmul.f32 0.01, %v9316_v35  ;;  %7419 = vmatprep.subr.bf16.mxu1 %v10180_v36  ;;  %v6919_v21 = vsel %vm6887_vm9, %v9314_v37, %v6903_v23  ;;  %v10210_v14 = vld [vmem:[#allocation4 + $0x1ac] ss:$16 sps:$4 sm:$0xff]  }
 0x50a   : > { %v6920_v24 = vsel %vm6888_vm10, %v9315_v0, %v6904_v48  ;;  %v10208_v43 = vld [vmem:[#allocation4 + $0x1a8] ss:$16 sps:$4 sm:$0xff]   ;;  %v10213_v31 = vld [vmem:[#allocation4 + $0x1cc] ss:$16 sps:$4 sm:$0xff]   ;;  %v10230_v0 = vld [vmem:[#allocation6 + $0x30] sm:$0xff]  }
 0x50b   : > { %v6869_v54 = vpop.f32.mrb[60].mxu0  ;;  %v6921_v17 = vsel %vm6889_vm11, %v9316_v35, %v6905_v34  ;;  %v12611_v50 = vpack.c.bf16 %v6920_v24, %v6918_v41  ;;  %v10211_v46 = vld [vmem:[#allocation4 + $0x1c8] ss:$16 sps:$4 sm:$0xff]   ;;  %v10216_v37 = vld [vmem:[#allocation4 + $0x1ec] ss:$16 sps:$4 sm:$0xff]   ;;  %v10237_v48 = vld [vmem:[#allocation6 + $0xd0] sm:$0xff]  }
 0x50c   : > { %v9317_v55 = vadd.f32 %v6869_v54, %v12582_v33  ;;  %7420 = vmatpush1.bf16.msra.mxu1 %v10178_v53  ;;  %v6871_v44 = vpop.f32.mrb[61].mxu0  ;;  %v12614_v47 = vpack.c.bf16 %v6921_v17, %v6919_v21  ;;  %v10214_v18 = vld [vmem:[#allocation4 + $0x1e8] ss:$16 sps:$4 sm:$0xff]   ;;  %v10238_v53 = vld [vmem:[#allocation6 + $0x90] sm:$0xff]   ;;  %v10241_v41 = vld [vmem:[#allocation6 + $0xe0] sm:$0xff]  }
 0x50d   : > { %v9318_v42 = vadd.f32 %v6871_v44, %v12585_v45  ;;  %v6873_v57 = vpop.f32.mrb[62].mxu0  ;;  %7421 = vmatprep.subr.bf16.mxu1 %v10183_v39  ;;  %v10228_v36 = vld [vmem:[#allocation6 + $0x28] sm:$0xff]   ;;  %v10231_v30 = vld [vmem:[#allocation6 + $0x78] sm:$0xff]   ;;  %v10242_v24 = vld [vmem:[#allocation6 + $0xa0] sm:$0xff]  }
 0x50e   : > { %v6906_v32 = vmul.f32 0.01, %v9317_v55  ;;  %v9319_v2 = vadd.f32 %v6873_v57, %v12582_v33  ;;  %v6875_v5 = vpop.f32.mrb[63].mxu0  ;;  %7392 = vmatprep.mubr.bf16.mxu1 %v12614_v47  ;;  %vm6890_vm12 = vcmp.ge.f32.partialorder %v9317_v55, 0.0  ;;  %9088 = vmatpush3.bf16.msra.mxu0 %v10228_v36  ;;  %v10232_v23 = vld [vmem:[#allocation6 + $0x38] sm:$0xff]   ;;  %v10235_v35 = vld [vmem:[#allocation6 + $0xc8] sm:$0xff]  }
 0x50f   : > { %v6907_v56 = vmul.f32 0.01, %v9318_v42  ;;  %v9320_v15 = vadd.f32 %v6875_v5, %v12585_v45  ;;  %7393 = vmatmul.mubr.bf16.gmra.mrb[56].mxu1 %v12611_v50  ;;  %vm6891_vm13 = vcmp.ge.f32.partialorder %v9318_v42, 0.0  ;;  %v10192_v45 = vld [vmem:[#allocation4 + $0xec] ss:$16 sps:$4 sm:$0xff]   ;;  %9089 = vmatprep.subr.bf16.mxu0 %v10229_v59  ;;  %v10245_v17 = vld [vmem:[#allocation6 + $0xf0] sm:$0xff]  }
 0x510   : > { %vm6892_vm14 = vcmp.ge.f32.partialorder %v9319_v2, 0.0  ;;  %v6908_v51 = vmul.f32 0.01, %v9319_v2  ;;  %7422 = vmatpush1.bf16.msra.mxu1 %v10181_v26  ;;  %v6922_v10 = vsel %vm6890_vm12, %v9317_v55, %v6906_v32  ;;  %v10239_v34 = vld [vmem:[#allocation6 + $0xd8] sm:$0xff]   ;;  %v10243_v54 = vld [vmem:[#allocation6 + $0xe8] sm:$0xff]  }
 0x511   : > { %vm6893_vm15 = vcmp.ge.f32.partialorder %v9320_v15, 0.0  ;;  %v6909_v9 = vmul.f32 0.01, %v9320_v15  ;;  %7423 = vmatprep.subr.bf16.mxu1 %v10186_v60  ;;  %v6923_v63 = vsel %vm6891_vm13, %v9318_v42, %v6907_v56  ;;  %v10240_v39 = vld [vmem:[#allocation6 + $0x98] sm:$0xff]   ;;  %v10244_v21 = vld [vmem:[#allocation6 + $0xa8] sm:$0xff]  }
 0x512   : > { %v6924_v33 = vsel %vm6892_vm14, %v9319_v2, %v6908_v51  ;;  %9090 = vmatpush3.bf16.msra.mxu0 %v10230_v0  ;;  %v10247_v55 = vld [vmem:[#allocation6 + $0xf8] sm:$0xff]  }
 0x513   : > { %v6925_v52 = vsel %vm6893_vm15, %v9320_v15, %v6909_v9  ;;  %v6932_v62 = vpack.c.bf16 %v6924_v33, %v6922_v10  ;;  %9091 = vmatprep.subr.bf16.mxu0 %v10231_v30  ;;  %v10248_v44 = vld [vmem:[#allocation6 + $0xb8] sm:$0xff]  }
 0x514   : > { %7424 = vmatpush1.bf16.msra.mxu1 %v10184_v25  ;;  %v6933_v19 = vpack.c.bf16 %v6925_v52, %v6923_v63 }
 0x515   : > { %7425 = vmatprep.subr.bf16.mxu1 %v10189_v7 }
 0x516   : > { %7402 = vmatprep.mubr.bf16.mxu1 %v6933_v19  ;;  %9092 = vmatpush3.bf16.msra.mxu0 %v10232_v23 }
 0x517   : > { %7403 = vmatmul.mubr.bf16.gmra.mrb[60].mxu1 %v6932_v62 }
 0x518   : > { %7426 = vmatpush1.bf16.msra.mxu1 %v10187_v40  ;;  %7445 = vmatprep.mubr.bf16.mxu1 %v12594_v29  ;;  %v10205_v29 = vld [vmem:[#allocation4 + $0x188] ss:$16 sps:$4 sm:$0xff]  }
 0x519   : > { %7427 = vmatprep.subr.bf16.mxu1 %v10192_v45 }
 0x51c   : > { %7428 = vmatpush1.bf16.msra.mxu1 %v10190_v16 }
 0x51d   : > { %7429 = vmatprep.subr.bf16.mxu1 %v10195_v61 }
 0x520   : > { %7430 = vmatpush1.bf16.msra.mxu1 %v10193_v58 }
 0x521   : > { %7431 = vmatprep.subr.bf16.mxu1 %v10198_v3 }
 0x524   : > { %7432 = vmatpush1.bf16.msra.mxu1 %v10196_v27 }
 0x525   : > { %7433 = vmatprep.subr.bf16.mxu1 %v10201_v28 }
 0x528   : > { %7434 = vmatpush1.bf16.msra.mxu1 %v10199_v49 }
 0x529   : > { %7435 = vmatprep.subr.bf16.mxu1 %v10204_v20 }
 0x52c   : > { %7436 = vmatpush1.bf16.msra.mxu1 %v10202_v13 }
 0x52d   : > { %7437 = vmatprep.subr.bf16.mxu1 %v10207_v12 }
 0x530   : > { %7438 = vmatpush1.bf16.msra.mxu1 %v10205_v29 }
 0x531   : > { %7439 = vmatprep.subr.bf16.mxu1 %v10210_v14 }
 0x534   : > { %7440 = vmatpush1.bf16.msra.mxu1 %v10208_v43 }
 0x535   : > { %7441 = vmatprep.subr.bf16.mxu1 %v10213_v31 }
 0x538   : > { %7442 = vmatpush1.bf16.msra.mxu1 %v10211_v46 }
 0x539   : > { %7443 = vmatprep.subr.bf16.mxu1 %v10216_v37 }
 0x53c   : > { %7444 = vmatpush1.bf16.msra.mxu1 %v10214_v18 }
 0x53f   : > { %7446 = vmatmul.mubr.bf16.vlgmr.msra.gmra.mrb[64].mxu1 %v12591_v8  ;;  %v10233_v8 = vld [vmem:[#allocation6 + $0xc0] sm:$0xff]  }
 0x540   : > { %7455 = vmatprep.mubr.bf16.mxu1 %v12604_v22  ;;  %v10234_v22 = vld [vmem:[#allocation6 + $0x80] sm:$0xff]   ;;  %9117 = vmatprep.subr.bf16.mxu1 %v10233_v8 }
 0x541   : > { %9118 = vmatpush3.bf16.msra.mxu1 %v10234_v22 }
 0x542   : > { %9119 = vmatprep.subr.bf16.mxu1 %v10235_v35 }
 0x547   : > { %7456 = vmatmul.mubr.bf16.gmra.mrb[68].mxu1 %v12601_v38  ;;  %v10236_v38 = vld [vmem:[#allocation6 + $0x88] sm:$0xff]  }
 0x548   : > { %7465 = vmatprep.mubr.bf16.mxu1 %v12614_v47  ;;  %9120 = vmatpush3.bf16.msra.mxu1 %v10236_v38  ;;  %v12630_v47 = vld [vmem:[%s12685_s8] sm:$0xf] }
 0x549   : > { %9121 = vmatprep.subr.bf16.mxu1 %v10237_v48  ;;  %v7003_v26 = vrot.slane %v12630_v47, %v11818_v1  ;;  %v7007_v42 = vrot.slane %v12630_v47, %v11827_v6 }
 0x54c   : > { %9122 = vmatpush3.bf16.msra.mxu1 %v10238_v53 }
 0x54d   : > { %9123 = vmatprep.subr.bf16.mxu1 %v10239_v34 }
 0x54f   : > { %7466 = vmatmul.mubr.bf16.gmra.mrb[72].mxu1 %v12611_v50  ;;  %v10246_v50 = vld [vmem:[#allocation6 + $0xb0] sm:$0xff]  }
 0x550   : > { %7475 = vmatprep.mubr.bf16.mxu1 %v6933_v19  ;;  %9124 = vmatpush3.bf16.msra.mxu1 %v10240_v39 }
 0x551   : > { %9125 = vmatprep.subr.bf16.mxu1 %v10241_v41 }
 0x554   : > { %9126 = vmatpush3.bf16.msra.mxu1 %v10242_v24 }
 0x555   : > { %9127 = vmatprep.subr.bf16.mxu1 %v10243_v54 }
 0x557   : > { %7476 = vmatmul.mubr.bf16.gmra.mrb[76].mxu1 %v6932_v62 }
 0x558   : > { %9128 = vmatpush3.bf16.msra.mxu1 %v10244_v21 }
 0x559   : > { %9129 = vmatprep.subr.bf16.mxu1 %v10245_v17 }
 0x55c   : > { %9130 = vmatpush3.bf16.msra.mxu1 %v10246_v50  ;;  %v7011_v50 = vrot.slane %v12630_v47, %v11824_v4 }
 0x55d   : > { %9131 = vmatprep.subr.bf16.mxu1 %v10247_v55  ;;  %v7015_v55 = vrot.slane %v12630_v47, %v11834_v11 }
 0x560   : > { %9132 = vmatpush3.bf16.msra.mxu1 %v10248_v44 }
 0x5d2   : > { %v7374_v57 = vpop.f32.mrb[48].mxu1 }
 0x5d3   : > { %v7375_v60 = vadd.f32 %v7374_v57, %v7003_v26  ;;  %v7376_v32 = vpop.f32.mrb[49].mxu1 }
 0x5d4   : > { %v7377_v2 = vadd.f32 %v7376_v32, %v7007_v42  ;;  %v7378_v5 = vpop.f32.mrb[50].mxu1 }
 0x5d5   : > { %v7379_v56 = vadd.f32 %v7378_v5, %v7003_v26  ;;  %v7380_v15 = vpop.f32.mrb[51].mxu1  ;;  %v7486_v25 = vmax.f32 %v7375_v60, 0.0 }
 0x5d6   : > { %v7381_v51 = vadd.f32 %v7380_v15, %v7007_v42  ;;  %v7487_v7 = vmax.f32 %v7377_v2, 0.0 }
 0x5d7   : > { %v7490_v9 = vmax.f32 %v7379_v56, 0.0 }
 0x5d8   : > { %v7491_v10 = vmax.f32 %v7381_v51, 0.0 }
 0x5d9   : > { %v7518_v33 = vpack.c.bf16 %v7490_v9, %v7486_v25 }
 0x5da   : > { %v7519_v63 = vpack.c.bf16 %v7491_v10, %v7487_v7  ;;  %v7384_v52 = vpop.f32.mrb[52].mxu1 }
 0x5db   : > { %v7385_v62 = vadd.f32 %v7384_v52, %v7003_v26  ;;  %v7386_v1 = vpop.f32.mrb[53].mxu1 }
 0x5dc   : > { %v7387_v19 = vadd.f32 %v7386_v1, %v7007_v42  ;;  %v7388_v40 = vpop.f32.mrb[54].mxu1  ;;  %7829 = vmatprep.mubr.bf16.mxu0 %v7519_v63 }
 0x5dd   : > { %v7389_v6 = vadd.f32 %v7388_v40, %v7003_v26  ;;  %v7390_v45 = vpop.f32.mrb[55].mxu1  ;;  %7830 = vmatmul.mubr.bf16.vlgmr.msra.gmra.mrb[64].mxu0 %v7518_v33  ;;  %v7494_v61 = vmax.f32 %v7385_v62, 0.0 }
 0x5de   : > { %v7391_v16 = vadd.f32 %v7390_v45, %v7007_v42  ;;  %v7495_v3 = vmax.f32 %v7387_v19, 0.0 }
 0x5df   : > { %v7498_v58 = vmax.f32 %v7389_v6, 0.0 }
 0x5e0   : > { %v7499_v27 = vmax.f32 %v7391_v16, 0.0 }
 0x5e1   : > { %v7522_v28 = vpack.c.bf16 %v7498_v58, %v7494_v61 }
 0x5e2   : > { %v7523_v49 = vpack.c.bf16 %v7499_v27, %v7495_v3  ;;  %v7394_v20 = vpop.f32.mrb[56].mxu1 }
 0x5e3   : > { %v7395_v13 = vadd.f32 %v7394_v20, %v7003_v26  ;;  %v7396_v12 = vpop.f32.mrb[57].mxu1 }
 0x5e4   : > { %v7397_v29 = vadd.f32 %v7396_v12, %v7007_v42  ;;  %v7398_v14 = vpop.f32.mrb[58].mxu1  ;;  %7837 = vmatprep.mubr.bf16.mxu0 %v7523_v49 }
 0x5e5   : > { %v7399_v43 = vadd.f32 %v7398_v14, %v7003_v26  ;;  %v7400_v31 = vpop.f32.mrb[59].mxu1  ;;  %7838 = vmatmul.mubr.bf16.gmra.mrb[68].mxu0 %v7522_v28  ;;  %v7502_v37 = vmax.f32 %v7395_v13, 0.0 }
 0x5e6   : > { %v7401_v46 = vadd.f32 %v7400_v31, %v7007_v42  ;;  %v7503_v36 = vmax.f32 %v7397_v29, 0.0 }
 0x5e7   : > { %v7506_v18 = vmax.f32 %v7399_v43, 0.0 }
 0x5e8   : > { %v7507_v59 = vmax.f32 %v7401_v46, 0.0 }
 0x5e9   : > { %v7526_v0 = vpack.c.bf16 %v7506_v18, %v7502_v37 }
 0x5ea   : > { %v7527_v30 = vpack.c.bf16 %v7507_v59, %v7503_v36  ;;  %v7404_v23 = vpop.f32.mrb[60].mxu1 }
 0x5eb   : > { %v7405_v8 = vadd.f32 %v7404_v23, %v7003_v26  ;;  %v7406_v22 = vpop.f32.mrb[61].mxu1 }
 0x5ec   : > { %v7407_v35 = vadd.f32 %v7406_v22, %v7007_v42  ;;  %v7408_v38 = vpop.f32.mrb[62].mxu1  ;;  %7845 = vmatprep.mubr.bf16.mxu0 %v7527_v30 }
 0x5ed   : > { %v7409_v48 = vadd.f32 %v7408_v38, %v7003_v26  ;;  %v7410_v53 = vpop.f32.mrb[63].mxu1  ;;  %7846 = vmatmul.mubr.bf16.gmra.mrb[72].mxu0 %v7526_v0  ;;  %v7510_v39 = vmax.f32 %v7405_v8, 0.0 }
 0x5ee   : > { %v7411_v34 = vadd.f32 %v7410_v53, %v7007_v42  ;;  %v7511_v24 = vmax.f32 %v7407_v35, 0.0 }
 0x5ef   : > { %v7514_v41 = vmax.f32 %v7409_v48, 0.0 }
 0x5f0   : > { %v7515_v54 = vmax.f32 %v7411_v34, 0.0 }
 0x5f1   : > { %v7530_v21 = vpack.c.bf16 %v7514_v41, %v7510_v39  ;;  %v10249_v39 = vld [vmem:[%s12688_s11] sm:$0xff]   ;;  %v10250_v41 = vld [vmem:[%s12688_s11 + $0x8] sm:$0xff]  }
 0x5f2   : > { %v7531_v17 = vpack.c.bf16 %v7515_v54, %v7511_v24  ;;  %9169 = vmatprep.subr.bf16.mxu0 %v10249_v39  ;;  %9193 = vmatprep.subr.bf16.mxu1 %v10249_v39  ;;  %v10251_v24 = vld [vmem:[%s12688_s11 + $0x10] sm:$0xff]   ;;  %v10252_v54 = vld [vmem:[%s12688_s11 + $0x18] sm:$0xff]  }
 0x5f3   : > { %9170 = vmatpush3.bf16.msra.mxu0 %v10249_v39 }
 0x5f4   : > { %7853 = vmatprep.mubr.bf16.mxu0 %v7531_v17  ;;  %9171 = vmatprep.subr.bf16.mxu0 %v10250_v41  ;;  %v10254_v17 = vld [vmem:[%s12688_s11 + $0x28] sm:$0xff]  }
 0x5f5   : > { %7854 = vmatmul.mubr.bf16.gmra.mrb[76].mxu0 %v7530_v21  ;;  %v10253_v21 = vld [vmem:[%s12688_s11 + $0x20] sm:$0xff]  }
 0x5f7   : > { %9172 = vmatpush3.bf16.msra.mxu0 %v10250_v41 }
 0x5f8   : > { %9173 = vmatprep.subr.bf16.mxu0 %v10251_v24 }
 0x5fb   : > { %9174 = vmatpush3.bf16.msra.mxu0 %v10251_v24 }
 0x5fc   : > { %9175 = vmatprep.subr.bf16.mxu0 %v10252_v54 }
 0x5ff   : > { %9176 = vmatpush3.bf16.msra.mxu0 %v10252_v54 }
 0x600   : > { %9177 = vmatprep.subr.bf16.mxu0 %v10253_v21 }
 0x603   : > { %9178 = vmatpush3.bf16.msra.mxu0 %v10253_v21 }
 0x604   : > { %9179 = vmatprep.subr.bf16.mxu0 %v10254_v17 }
 0x607   : > { %9180 = vmatpush3.bf16.msra.mxu0 %v10254_v17 }
 0x612   : > { %v7447_v44 = vpop.f32.mrb[64].mxu1 }
 0x613   : > { %v7448_v57 = vadd.f32 %v7447_v44, %v7011_v50  ;;  %v7449_v26 = vpop.f32.mrb[65].mxu1 }
 0x614   : > { %v7450_v60 = vadd.f32 %v7449_v26, %v7015_v55  ;;  %v7451_v32 = vpop.f32.mrb[66].mxu1 }
 0x615   : > { %v7452_v42 = vadd.f32 %v7451_v32, %v7011_v50  ;;  %v7453_v2 = vpop.f32.mrb[67].mxu1  ;;  %v7488_v56 = vmax.f32 %v7448_v57, 0.0 }
 0x616   : > { %v7454_v5 = vadd.f32 %v7453_v2, %v7015_v55  ;;  %v7489_v51 = vmax.f32 %v7450_v60, 0.0 }
 0x617   : > { %v7492_v15 = vmax.f32 %v7452_v42, 0.0 }
 0x618   : > { %v7493_v25 = vmax.f32 %v7454_v5, 0.0 }
 0x619   : > { %v7520_v9 = vpack.c.bf16 %v7492_v15, %v7488_v56 }
 0x61a   : > { %v7521_v7 = vpack.c.bf16 %v7493_v25, %v7489_v51  ;;  %v7457_v10 = vpop.f32.mrb[68].mxu1 }
 0x61b   : > { %v7458_v33 = vadd.f32 %v7457_v10, %v7011_v50  ;;  %v7459_v4 = vpop.f32.mrb[69].mxu1 }
 0x61c   : > { %v7460_v63 = vadd.f32 %v7459_v4, %v7015_v55  ;;  %v7461_v52 = vpop.f32.mrb[70].mxu1  ;;  %7894 = vmatprep.mubr.bf16.mxu1 %v7521_v7 }
 0x61d   : > { %v7462_v11 = vadd.f32 %v7461_v52, %v7011_v50  ;;  %v7463_v47 = vpop.f32.mrb[71].mxu1  ;;  %7895 = vmatmul.mubr.bf16.vlgmr.msra.gmra.mrb[80].mxu1 %v7520_v9  ;;  %v7496_v1 = vmax.f32 %v7458_v33, 0.0 }
 0x61e   : > { %v7464_v62 = vadd.f32 %v7463_v47, %v7015_v55  ;;  %v7497_v40 = vmax.f32 %v7460_v63, 0.0  ;;  %9201 = vmatpush3.bf16.msra.mxu1 %v10249_v39 }
 0x61f   : > { %v7500_v19 = vmax.f32 %v7462_v11, 0.0  ;;  %9194 = vmatprep.subr.bf16.mxu1 %v10250_v41 }
 0x620   : > { %v7501_v6 = vmax.f32 %v7464_v62, 0.0 }
 0x621   : > { %v7524_v45 = vpack.c.bf16 %v7500_v19, %v7496_v1 }
 0x622   : > { %v7525_v16 = vpack.c.bf16 %v7501_v6, %v7497_v40  ;;  %v7467_v61 = vpop.f32.mrb[72].mxu1  ;;  %9202 = vmatpush3.bf16.msra.mxu1 %v10250_v41  ;;  %v9025_v40 = vld [vmem:[%s12687_s10] ss:$0 sm:$0xff] }
 0x623   : > { %v7468_v58 = vadd.f32 %v7467_v61, %v7011_v50  ;;  %v7469_v3 = vpop.f32.mrb[73].mxu1  ;;  %9195 = vmatprep.subr.bf16.mxu1 %v10251_v24 }
 0x624   : > { %v7470_v27 = vadd.f32 %v7469_v3, %v7015_v55  ;;  %v7471_v28 = vpop.f32.mrb[74].mxu1  ;;  %7902 = vmatprep.mubr.bf16.mxu1 %v7525_v16 }
 0x625   : > { %v7472_v49 = vadd.f32 %v7471_v28, %v7011_v50  ;;  %v7473_v20 = vpop.f32.mrb[75].mxu1  ;;  %7903 = vmatmul.mubr.bf16.gmra.mrb[84].mxu1 %v7524_v45  ;;  %v7504_v12 = vmax.f32 %v7468_v58, 0.0 }
 0x626   : > { %v7474_v13 = vadd.f32 %v7473_v20, %v7015_v55  ;;  %v7505_v14 = vmax.f32 %v7470_v27, 0.0  ;;  %9203 = vmatpush3.bf16.msra.mxu1 %v10251_v24 }
 0x627   : > { %v7508_v29 = vmax.f32 %v7472_v49, 0.0  ;;  %9196 = vmatprep.subr.bf16.mxu1 %v10252_v54 }
 0x628   : > { %v7509_v43 = vmax.f32 %v7474_v13, 0.0 }
 0x629   : > { %v7528_v31 = vpack.c.bf16 %v7508_v29, %v7504_v12 }
 0x62a   : > { %v7529_v46 = vpack.c.bf16 %v7509_v43, %v7505_v14  ;;  %v7477_v37 = vpop.f32.mrb[76].mxu1  ;;  %9204 = vmatpush3.bf16.msra.mxu1 %v10252_v54 }
 0x62b   : > { %v7478_v18 = vadd.f32 %v7477_v37, %v7011_v50  ;;  %v7479_v36 = vpop.f32.mrb[77].mxu1  ;;  %9197 = vmatprep.subr.bf16.mxu1 %v10253_v21 }
 0x62c   : > { %v7480_v59 = vadd.f32 %v7479_v36, %v7015_v55  ;;  %v7481_v0 = vpop.f32.mrb[78].mxu1  ;;  %7910 = vmatprep.mubr.bf16.mxu1 %v7529_v46 }
 0x62d   : > { %v7482_v30 = vadd.f32 %v7481_v0, %v7011_v50  ;;  %v7483_v23 = vpop.f32.mrb[79].mxu1  ;;  %7911 = vmatmul.mubr.bf16.gmra.mrb[88].mxu1 %v7528_v31  ;;  %v7512_v22 = vmax.f32 %v7478_v18, 0.0  ;;  %v10255_v50 = vld [vmem:[%s12688_s11 + $0x30] sm:$0xff]  }
 0x62e   : > { %v7484_v8 = vadd.f32 %v7483_v23, %v7015_v55  ;;  %v7513_v38 = vmax.f32 %v7480_v59, 0.0  ;;  %9205 = vmatpush3.bf16.msra.mxu1 %v10253_v21  ;;  %9181 = vmatprep.subr.bf16.mxu0 %v10255_v50  ;;  %v10256_v55 = vld [vmem:[%s12688_s11 + $0x38] sm:$0xff]  }
 0x62f   : > { %v7516_v35 = vmax.f32 %v7482_v30, 0.0  ;;  %9198 = vmatprep.subr.bf16.mxu1 %v10254_v17  ;;  %9182 = vmatpush3.bf16.msra.mxu0 %v10255_v50 }
 0x630   : > { %v7517_v48 = vmax.f32 %v7484_v8, 0.0  ;;  %9183 = vmatprep.subr.bf16.mxu0 %v10256_v55 }
 0x631   : > { %v7532_v53 = vpack.c.bf16 %v7516_v35, %v7512_v22 }
 0x632   : > { %v7533_v34 = vpack.c.bf16 %v7517_v48, %v7513_v38  ;;  %9206 = vmatpush3.bf16.msra.mxu1 %v10254_v17 }
 0x633   : > { %9199 = vmatprep.subr.bf16.mxu1 %v10255_v50  ;;  %9184 = vmatpush3.bf16.msra.mxu0 %v10256_v55 }
 0x634   : > { %7918 = vmatprep.mubr.bf16.mxu1 %v7533_v34 }
 0x635   : > { %7919 = vmatmul.mubr.bf16.gmra.mrb[92].mxu1 %v7532_v53 }
 0x636   : > { %9207 = vmatpush3.bf16.msra.mxu1 %v10255_v50 }
 0x637   : > { %9200 = vmatprep.subr.bf16.mxu1 %v10256_v55 }
 0x63a   : > { %9208 = vmatpush3.bf16.msra.mxu1 %v10256_v55 }
 0x6b0   : > { %v9093_v44 = vpop.f32.mrb[64].mxu0 }
 0x6b1   : > { %v9094_v57 = vpop.f32.mrb[65].mxu0 }
 0x6b2   : > { %v9095_v26 = vadd.f32 %v9094_v57, %v9093_v44  ;;  %v9096_v60 = vpop.f32.mrb[66].mxu0 }
 0x6b3   : > { %v9097_v32 = vpop.f32.mrb[67].mxu0 }
 0x6b4   : > { %v9098_v42 = vadd.f32 %v9097_v32, %v9096_v60  ;;  %v7832_v16 = vadd.f32 %v9095_v26, %v9025_v40 }
 0x6b6   : > { %v7835_v27 = vadd.f32 %v9098_v42, %v9025_v40 }
 0x6b8   : > { %v9099_v2 = vpop.f32.mrb[68].mxu0 }
 0x6b9   : > { %v9100_v5 = vpop.f32.mrb[69].mxu0 }
 0x6ba   : > { %v9101_v56 = vadd.f32 %v9100_v5, %v9099_v2  ;;  %v9102_v15 = vpop.f32.mrb[70].mxu0 }
 0x6bb   : > { %v9103_v51 = vpop.f32.mrb[71].mxu0 }
 0x6bc   : > { %v9104_v25 = vadd.f32 %v9103_v51, %v9102_v15  ;;  %v7840_v43 = vadd.f32 %v9101_v56, %v9025_v40 }
 0x6be   : > { %v7843_v36 = vadd.f32 %v9104_v25, %v9025_v40 }
 0x6c0   : > { %v9105_v9 = vpop.f32.mrb[72].mxu0 }
 0x6c1   : > { %v9106_v7 = vpop.f32.mrb[73].mxu0 }
 0x6c2   : > { %v9107_v10 = vadd.f32 %v9106_v7, %v9105_v9  ;;  %v9108_v33 = vpop.f32.mrb[74].mxu0  ;;  %v9058_v7 = vld [vmem:[%s12699_s28] ss:$0 sm:$0xff] }
 0x6c3   : > { %v9109_v4 = vpop.f32.mrb[75].mxu0 }
 0x6c4   : > { %v9110_v63 = vadd.f32 %v9109_v4, %v9108_v33  ;;  %v7848_v38 = vadd.f32 %v9107_v10, %v9025_v40 }
 0x6c6   : > { %v7851_v41 = vadd.f32 %v9110_v63, %v9025_v40 }
 0x6c8   : > { %v9111_v52 = vpop.f32.mrb[76].mxu0 }
 0x6c9   : > { %v9112_v11 = vpop.f32.mrb[77].mxu0 }
 0x6ca   : > { %v9113_v47 = vadd.f32 %v9112_v11, %v9111_v52  ;;  %v9114_v62 = vpop.f32.mrb[78].mxu0 }
 0x6cb   : > { %v9115_v1 = vpop.f32.mrb[79].mxu0 }
 0x6cc   : > { %v9116_v19 = vadd.f32 %v9115_v1, %v9114_v62  ;;  %v7856_v57 = vadd.f32 %v9113_v47, %v9025_v40 }
 0x6ce   : > { %v7859_v2 = vadd.f32 %v9116_v19, %v9025_v40 }
 0x6f0   : > { %v9133_v6 = vpop.f32.mrb[80].mxu1 }
 0x6f1   : > { %v9134_v45 = vpop.f32.mrb[81].mxu1 }
 0x6f2   : > { %v9135_v61 = vadd.f32 %v9134_v45, %v9133_v6  ;;  %v9136_v58 = vpop.f32.mrb[82].mxu1 }
 0x6f3   : > { %v9137_v3 = vpop.f32.mrb[83].mxu1 }
 0x6f4   : > { %v7897_v28 = vadd.f32 %v9135_v61, %v7832_v16  ;;  %v9138_v49 = vadd.f32 %v9137_v3, %v9136_v58 }
 0x6f6   : > { %v7900_v20 = vadd.f32 %v9138_v49, %v7835_v27  ;;  %v7927_v13 = vmax.f32 %v7897_v28, 0.0 }
 0x6f8   : > { %v7928_v12 = vmax.f32 %v7900_v20, 0.0  ;;  %v9139_v29 = vpop.f32.mrb[84].mxu1 }
 0x6f9   : > { %v9140_v14 = vpop.f32.mrb[85].mxu1 }
 0x6fa   : > { %v9141_v31 = vadd.f32 %v9140_v14, %v9139_v29  ;;  %v9142_v46 = vpop.f32.mrb[86].mxu1  ;;  %v7935_v37 = vpack.c.bf16 %v7928_v12, %v7927_v13 }
 0x6fb   : > { %v9143_v18 = vpop.f32.mrb[87].mxu1 }
 0x6fc   : > { %v7905_v59 = vadd.f32 %v9141_v31, %v7840_v43  ;;  %v9144_v0 = vadd.f32 %v9143_v18, %v9142_v46  ;;  %9185 = vmatprep.mubr.bf16.mxu0 %v7935_v37 }
 0x6fe   : > { %v7908_v30 = vadd.f32 %v9144_v0, %v7843_v36  ;;  %v7929_v23 = vmax.f32 %v7905_v59, 0.0 }
 0x700   : > { %v7930_v8 = vmax.f32 %v7908_v30, 0.0  ;;  %v9145_v22 = vpop.f32.mrb[88].mxu1 }
 0x701   : > { %v9146_v35 = vpop.f32.mrb[89].mxu1 }
 0x702   : > { %v7936_v48 = vpack.c.bf16 %v7930_v8, %v7929_v23  ;;  %v9147_v53 = vadd.f32 %v9146_v35, %v9145_v22  ;;  %v9148_v34 = vpop.f32.mrb[90].mxu1 }
 0x703   : > { %v9149_v39 = vpop.f32.mrb[91].mxu1 }
 0x704   : > { %v7913_v24 = vadd.f32 %v9147_v53, %v7848_v38  ;;  %v9150_v54 = vadd.f32 %v9149_v39, %v9148_v34  ;;  %9186 = vmatmul.mubr.bf16.vlgmr.msra.gmra.mrb[80].mxu0 %v7936_v48 }
 0x706   : > { %v7916_v21 = vadd.f32 %v9150_v54, %v7851_v41  ;;  %v7931_v17 = vmax.f32 %v7913_v24, 0.0 }
 0x708   : > { %v7932_v50 = vmax.f32 %v7916_v21, 0.0  ;;  %v9151_v55 = vpop.f32.mrb[92].mxu1 }
 0x709   : > { %v9152_v44 = vpop.f32.mrb[93].mxu1 }
 0x70a   : > { %v9153_v26 = vadd.f32 %v9152_v44, %v9151_v55  ;;  %v9154_v60 = vpop.f32.mrb[94].mxu1  ;;  %v7937_v32 = vpack.c.bf16 %v7932_v50, %v7931_v17 }
 0x70b   : > { %v9155_v42 = vpop.f32.mrb[95].mxu1 }
 0x70c   : > { %v7921_v5 = vadd.f32 %v9153_v26, %v7856_v57  ;;  %v9156_v56 = vadd.f32 %v9155_v42, %v9154_v60  ;;  %9189 = vmatprep.mubr.bf16.mxu1 %v7937_v32 }
 0x70e   : > { %v7924_v15 = vadd.f32 %v9156_v56, %v7859_v2  ;;  %v7933_v51 = vmax.f32 %v7921_v5, 0.0 }
 0x710   : > { %v7934_v25 = vmax.f32 %v7924_v15, 0.0 }
 0x712   : > { %v7938_v9 = vpack.c.bf16 %v7934_v25, %v7933_v51 }
 0x714   : > { %9190 = vmatmul.mubr.bf16.vlgmr.msra.gmra.mrb[96].mxu1 %v7938_v9 }
 0x7d7   : > { %v9187_v10 = vpop.f32.mrb[80].mxu0 }
 0x7d8   : > { %v8053_v33 = vadd.f32 %v9187_v10, %v9058_v7  ;;  %v8044_v4 = vpop.f32.mrb[81].mxu0 }
 0x7d9   : > { %v8045_v63 = vadd.f32 %v9058_v7, %v8044_v4  ;;  %v9188_v52 = vpop.f32.mrb[82].mxu0 }
 0x7da   : > { %v9069_v11 = vmul.f32 -1.442695, %v8053_v33  ;;  %v8056_v47 = vadd.f32 %v9188_v52, %v9058_v7  ;;  %v8047_v62 = vpop.f32.mrb[83].mxu0 }
 0x7db   : > { %v9067_v1 = vmul.f32 -1.442695, %v8045_v63  ;;  %v8048_v19 = vadd.f32 %v9058_v7, %v8047_v62 }
 0x7dc   : > { %10257 = vpow2.f32 %v9069_v11  ;;  %v9070_v40 = vmul.f32 -1.442695, %v8056_v47 }
 0x7dd   : > { %10259 = vpow2.f32 %v9067_v1  ;;  %v9068_v6 = vmul.f32 -1.442695, %v8048_v19 }
 0x7de   : > { %10261 = vpow2.f32 %v9070_v40 }
 0x7df   : > { %10263 = vpow2.f32 %v9068_v6 }
 0x7e6   : > { %v10258_v45 = vpop.eup %10257 }
 0x7e7   : > { %v10260_v16 = vpop.eup %10259  ;;  %v8101_v61 = vadd.f32 1.0, %v10258_v45  ;;  %v9191_v58 = vpop.f32.mrb[96].mxu1 }
 0x7e8   : > { %v10262_v3 = vpop.eup %10261  ;;  %v8099_v27 = vadd.f32 1.0, %v10260_v16  ;;  %v8069_v28 = vadd.f32 %v9191_v58, %v9058_v7  ;;  %v8060_v49 = vpop.f32.mrb[97].mxu1 }
 0x7e9   : > { %v10264_v20 = vpop.eup %10263  ;;  %10265 = vrcp.f32 %v8101_v61  ;;  %v8102_v13 = vadd.f32 1.0, %v10262_v3  ;;  %v8061_v12 = vadd.f32 %v9058_v7, %v8060_v49  ;;  %v9192_v29 = vpop.f32.mrb[98].mxu1 }
 0x7ea   : > { %10267 = vrcp.f32 %v8099_v27  ;;  %v8100_v14 = vadd.f32 1.0, %v10264_v20  ;;  %v9073_v43 = vmul.f32 -1.442695, %v8069_v28  ;;  %v8072_v31 = vadd.f32 %v9192_v29, %v9058_v7  ;;  %v8063_v46 = vpop.f32.mrb[99].mxu1 }
 0x7eb   : > { %10269 = vrcp.f32 %v8102_v13  ;;  %v9071_v37 = vmul.f32 -1.442695, %v8061_v12  ;;  %v8064_v18 = vadd.f32 %v9058_v7, %v8063_v46 }
 0x7ec   : > { %10271 = vrcp.f32 %v8100_v14  ;;  %v9074_v36 = vmul.f32 -1.442695, %v8072_v31 }
 0x7ed   : > { %10273 = vpow2.f32 %v9073_v43  ;;  %v9072_v59 = vmul.f32 -1.442695, %v8064_v18 }
 0x7ee   : > { %10275 = vpow2.f32 %v9071_v37 }
 0x7ef   : > { %10277 = vpow2.f32 %v9074_v36 }
 0x7f0   : > { %10279 = vpow2.f32 %v9072_v59 }
 0x7f3   : > { %v10266_v0 = vpop.eup %10265 }
 0x7f4   : > { %v10268_v30 = vpop.eup %10267  ;;  %8125 = vst [vmem:[%s489_s14 + $0x10] sm:$0xff] %v10266_v0 }
 0x7f5   : > { %v10270_v23 = vpop.eup %10269  ;;  %8123 = vst [vmem:[%s489_s14] sm:$0xff] %v10268_v30 }
 0x7f6   : > { %v10272_v8 = vpop.eup %10271  ;;  %8126 = vst [vmem:[%s489_s14 + $0x18] sm:$0xff] %v10270_v23 }
 0x7f7   : > { %v10274_v22 = vpop.eup %10273  ;;  %8124 = vst [vmem:[%s489_s14 + $0x8] sm:$0xff] %v10272_v8 }
 0x7f8   : > { %v10276_v35 = vpop.eup %10275  ;;  %v8105_v38 = vadd.f32 1.0, %v10274_v22 }
 0x7f9   : > { %v10278_v48 = vpop.eup %10277  ;;  %v8103_v53 = vadd.f32 1.0, %v10276_v35 }
 0x7fa   : > { %v10280_v34 = vpop.eup %10279  ;;  %10281 = vrcp.f32 %v8105_v38  ;;  %v8106_v39 = vadd.f32 1.0, %v10278_v48 }
 0x7fb   : > { %10283 = vrcp.f32 %v8103_v53  ;;  %v8104_v41 = vadd.f32 1.0, %v10280_v34 }
 0x7fc   : > { %10285 = vrcp.f32 %v8106_v39 }
 0x7fd   : > { %10287 = vrcp.f32 %v8104_v41 }
 0x804   : > { %v10282_v24 = vpop.eup %10281 }
 0x805   : > { %v10284_v54 = vpop.eup %10283  ;;  %8129 = vst [vmem:[%s489_s14 + $0x30] sm:$0xff] %v10282_v24 }
 0x806   : > { %v10286_v21 = vpop.eup %10285  ;;  %8127 = vst [vmem:[%s489_s14 + $0x20] sm:$0xff] %v10284_v54 }
 0x807   : > { %v10288_v17 = vpop.eup %10287  ;;  %8130 = vst [vmem:[%s489_s14 + $0x38] sm:$0xff] %v10286_v21 }
 0x808   : > { %8128 = vst [vmem:[%s489_s14 + $0x28] sm:$0xff] %v10288_v17 }
 0x809 PF: > { %s25_s25 = sadd.s32 1, %s10412_s25  }
 0x80a   : > { %p22_p3 = scmp.ge.s32.totalorder %s25_s25, 4  }
 0x80c   :  { %24 = sbr.rel (!%p22_p3) target bundleno = 5 (0x5), region = 115 }
 0x813   :  { %8153 = vsyncpa [#allocation3], 1 }
 0x814   :  { %8155 = vsyncpa [#allocation3 + $0x1], 1 }
 0x815   :  { %8156 = vsyncpa [#allocation5], 1 }

</bundles_post_ra>
